<compile_context>
chip_gen: v7x
topology: tpu7x:2x2x1
jax: 0.10.0
libtpu: 0.0.40
codegen_flags: <defaults>
</compile_context>

<pallas_src>
import functools

import numpy as np
import jax
import jax.numpy as jnp
from jax.experimental import pallas as pl
from jax.experimental.pallas import tpu as pltpu


def _round_up(x, m):
    return ((x + m - 1) // m) * m


# --------------------------------------------------------------------------- #
# Kernel 1: dense, target-independent part of the sigmoid focal loss (gamma=2).
#   loss0(x) = (1 - alpha) * softplus(x) * sigmoid(x)^2      (the t == 0 branch)
# Row-tiled; each grid step writes its partial sum broadcast into a lane-dense
# (8, 128) output block ("parallel" semantics -> both TensorCores on v7x).
# --------------------------------------------------------------------------- #
def _focal_base_kernel(x_ref, out_ref, *, alpha, n_rows, n_cols, tile_rows,
                       mask_rows, mask_cols):
    x = x_ref[...].astype(jnp.float32)                       # (tile_rows, c_pad)
    p = jax.nn.sigmoid(x)
    softplus = jnp.maximum(x, 0.0) + jnp.log1p(jnp.exp(-jnp.abs(x)))
    loss = (1.0 - alpha) * softplus * p * p
    if mask_cols:                                            # static python bool
        col = jax.lax.broadcasted_iota(jnp.int32, x.shape, 1)
        loss = jnp.where(col < n_cols, loss, 0.0)
    if mask_rows:                                            # static python bool
        row = (jax.lax.broadcasted_iota(jnp.int32, x.shape, 0)
               + pl.program_id(0) * tile_rows)
        loss = jnp.where(row < n_rows, loss, 0.0)
    out_ref[...] = jnp.broadcast_to(jnp.sum(loss), out_ref.shape)


def focal_base_sum(logits_2d, alpha):
    """Sum of the t=0 focal term over all real elements of logits_2d (R, C)."""
    R, C = logits_2d.shape
    itemsize = logits_2d.dtype.itemsize
    c_pad = _round_up(C, 128)                                # lane-dense tiles
    # keep each buffered input tile <= ~4 MiB (v5e friendly); rows multiple of 8
    max_rows = max(8, (((4 << 20) // (c_pad * itemsize)) // 8) * 8)
    tile_rows = min(512, _round_up(R, 8), max_rows)
    r_pad = _round_up(R, tile_rows)
    grid = r_pad // tile_rows

    x = logits_2d
    if (r_pad, c_pad) != (R, C):                             # no-op when already aligned
        x = jnp.pad(x, ((0, r_pad - R), (0, c_pad - C)))

    tile_bytes = tile_rows * c_pad * itemsize
    vmem_limit = int(min(64 << 20, max(32 << 20, 4 * tile_bytes + (2 << 20))))

    kernel = functools.partial(
        _focal_base_kernel, alpha=float(alpha), n_rows=R, n_cols=C,
        tile_rows=tile_rows, mask_rows=(r_pad != R), mask_cols=(c_pad != C))

    partials = pl.pallas_call(
        kernel,
        out_shape=jax.ShapeDtypeStruct((grid * 8, 128), jnp.float32),
        grid=(grid,),
        in_specs=[pl.BlockSpec((tile_rows, c_pad), lambda i: (i, 0))],
        out_specs=pl.BlockSpec((8, 128), lambda i: (i, 0)),
        compiler_params=pltpu.CompilerParams(
            dimension_semantics=("parallel",),
            vmem_limit_bytes=vmem_limit),
    )(x)
    return jnp.sum(partials.reshape(grid, 8 * 128)[:, 0])


# --------------------------------------------------------------------------- #
# Kernel 2: everything indexed by the matching, fused in one tiny launch.
#   boxes laid out (4, Npad): coords on sublanes, boxes on lanes.
#   outputs (1,5) SMEM: [sum|d|, sum(1-giou), sum|d_xy|, sum|d_wh|, focal_corr]
# --------------------------------------------------------------------------- #
def _matched_kernel(src_ref, tgt_ref, mlog_ref, cmask_ref, out_ref, *, alpha, eps):
    src = src_ref[...].astype(jnp.float32)                   # (4, Npad) cx,cy,w,h
    tgt = tgt_ref[...].astype(jnp.float32)

    l1 = jnp.abs(src - tgt)                                  # padded lanes -> 0 exactly
    l1_xy = jnp.sum(l1[0:2, :])
    l1_hw = jnp.sum(l1[2:4, :])
    out_ref[0, 0] = l1_xy + l1_hw
    out_ref[0, 2] = l1_xy
    out_ref[0, 3] = l1_hw

    def xyxy(b):
        x0 = b[0:1, :] - 0.5 * b[2:3, :]
        y0 = b[1:2, :] - 0.5 * b[3:4, :]
        x1 = b[0:1, :] + 0.5 * b[2:3, :]
        y1 = b[1:2, :] + 0.5 * b[3:4, :]
        return x0, y0, x1, y1

    sx0, sy0, sx1, sy1 = xyxy(src)
    tx0, ty0, tx1, ty1 = xyxy(tgt)
    area_s = (sx1 - sx0) * (sy1 - sy0)
    area_t = (tx1 - tx0) * (ty1 - ty0)
    iw = jnp.maximum(jnp.minimum(sx1, tx1) - jnp.maximum(sx0, tx0), 0.0)
    ih = jnp.maximum(jnp.minimum(sy1, ty1) - jnp.maximum(sy0, ty0), 0.0)
    inter = iw * ih
    union = area_s + area_t - inter
    iou = inter / jnp.maximum(union, eps)                    # eps only guards 0/0
    ew = jnp.maximum(sx1, tx1) - jnp.minimum(sx0, tx0)
    eh = jnp.maximum(sy1, ty1) - jnp.minimum(sy0, ty0)
    enc = ew * eh
    giou = iou - (enc - union) / jnp.maximum(enc, eps)
    out_ref[0, 1] = jnp.sum(1.0 - giou)                      # padded lanes -> 0 exactly

    # focal correction at the N matched (row, class) logits:
    #   loss1 - loss0 = alpha*softplus(-x)*(1-p)^2 - (1-alpha)*softplus(x)*p^2
    x = mlog_ref[...].astype(jnp.float32)                    # (1, Npad)
    m = cmask_ref[...].astype(jnp.float32)                   # (1, Npad) valid-lane mask
    p = jax.nn.sigmoid(x)
    sp_pos = jnp.maximum(x, 0.0) + jnp.log1p(jnp.exp(-jnp.abs(x)))   # softplus(x)
    sp_neg = sp_pos - x                                              # softplus(-x)
    delta = alpha * sp_neg * (1.0 - p) * (1.0 - p) - (1.0 - alpha) * sp_pos * p * p
    out_ref[0, 4] = jnp.sum(delta * m)


def matched_losses(src_boxes, tgt_boxes, matched_logits, corr_mask, alpha):
    N = int(src_boxes.shape[0])
    n_pad = _round_up(max(N, 1), 128)
    unit = jnp.array([0.5, 0.5, 1.0, 1.0], jnp.float32).reshape(4, 1)

    def prep_boxes(b):
        bt = jnp.transpose(b.astype(jnp.float32))            # (4, N)
        if n_pad > N:
            pad = jnp.broadcast_to(unit, (4, n_pad - N))      # identical pad boxes ->
            bt = jnp.concatenate([bt, pad], axis=1)           #   zero L1, zero (1-giou)
        return bt

    def prep_row(v):
        v = v.astype(jnp.float32).reshape(1, N)
        if n_pad > N:
            v = jnp.pad(v, ((0, 0), (0, n_pad - N)))
        return v

    return pl.pallas_call(
        functools.partial(_matched_kernel, alpha=float(alpha), eps=1e-12),
        out_shape=jax.ShapeDtypeStruct((1, 5), jnp.float32),
        in_specs=[pl.BlockSpec(memory_space=pltpu.MemorySpace.VMEM)] * 4,
        out_specs=pl.BlockSpec(memory_space=pltpu.MemorySpace.SMEM),
    )(prep_boxes(src_boxes), prep_boxes(tgt_boxes),
      prep_row(matched_logits), prep_row(corr_mask))


# ------------------------------- matcher / glue ----------------------------- #

def greedy_matcher(outputs, targets):
    """Deterministic per-batch greedy min-L1 assignment, fully on device (no host sync).
    # TODO(synk): the reference Hungarian matcher (scipy linear_sum_assignment) has no
    # JAX/Pallas equivalent; greedy L1 matching is used instead (the matcher is an
    # injected dependency of the original module anyway)."""
    pred_boxes = outputs['pred_boxes']                        # (B, Q, 4)
    Q = pred_boxes.shape[1]
    indices = []
    for b, t in enumerate(targets):
        tb = t['boxes']                                       # (n, 4)
        n = int(tb.shape[0])
        if n == 0:
            indices.append((jnp.zeros((0,), jnp.int32), jnp.zeros((0,), jnp.int32)))
            continue
        cost = jnp.sum(jnp.abs(pred_boxes[b][:, None, :] - tb[None, :, :]), axis=-1)  # (Q, n)
        used = jnp.zeros((Q,), dtype=jnp.bool_)
        src = []
        for j in range(n):                                    # n is tiny & static -> unrolled
            c = jnp.where(used, jnp.inf, cost[:, j])
            q = jnp.argmin(c).astype(jnp.int32)
            used = used.at[q].set(True)
            src.append(q)
        indices.append((jnp.stack(src), jnp.arange(n, dtype=jnp.int32)))
    return indices


def set_criterion_forward(outputs, targets, num_boxes, *,
                          num_classes, focal_alpha, topk, matcher):
    """JAX/Pallas port of SetCriterion.forward with losses = ['labels', 'boxes']."""
    pred_logits = outputs['pred_logits']      # (B, Q, C)
    pred_boxes = outputs['pred_boxes']        # (B, Q, 4)
    B, Q, C = pred_logits.shape

    indices = matcher(outputs, targets)       # list of (src, tgt) device int32 arrays

    # shape-only plumbing is static numpy; value-dependent parts stay on device
    sizes = [int(t['boxes'].shape[0]) for t in targets]
    batch_idx = jnp.asarray(
        np.concatenate([np.full(n, b, np.int32) for b, n in enumerate(sizes)])
        if sum(sizes) else np.zeros((0,), np.int32))
    src_idx = jnp.concatenate([s for s, _ in indices]).astype(jnp.int32)
    # literal reference semantics: global tgt_ids (value = batch_index % Topk), indexed
    # with each batch's *local* target permutation indices.
    tgt_ids = jnp.asarray(
        np.concatenate([np.full(n, b % topk, np.int32) for b, n in enumerate(sizes)])
        if sum(sizes) else np.zeros((0,), np.int32))
    target_classes_o = jnp.concatenate([tgt_ids[t] for _, t in indices]).astype(jnp.int32)

    # ----- loss_labels: dense target-independent term + N matched corrections ----- #
    base_sum = focal_base_sum(pred_logits.reshape(B * Q, C), focal_alpha)
    matched_logits = pred_logits[batch_idx, src_idx, target_classes_o]
    # classes >= num_classes land in the dropped "no-object" one-hot column -> no correction
    corr_mask = (target_classes_o < num_classes).astype(jnp.float32)

    # ----- loss_boxes: matched L1 + GIoU (fused with the focal correction) ----- #
    src_boxes = pred_boxes[batch_idx, src_idx]                          # (N, 4)
    tgt_bbox = jnp.concatenate([t['boxes'] for t in targets], axis=0)
    target_boxes = jnp.concatenate([tgt_bbox[t] for _, t in indices], axis=0)

    sums = matched_losses(src_boxes, target_boxes, matched_logits, corr_mask, focal_alpha)

    fsum = base_sum + sums[0, 4]
    loss_ce = (fsum / Q) / num_boxes * Q      # == loss.mean(1).sum()/num_boxes * Q

    return {
        'loss_ce':   loss_ce,
        'loss_bbox': sums[0, 0] / num_boxes,
        'loss_giou': sums[0, 1] / num_boxes,
        'loss_xy':   sums[0, 2] / num_boxes,
        'loss_hw':   sums[0, 3] / num_boxes,
    }


# --------------------------- pure-JAX reference (check) --------------------- #

def _reference_losses(outputs, targets, indices, num_boxes, *,
                      num_classes, focal_alpha, topk):
    pred_logits = outputs['pred_logits']
    pred_boxes = outputs['pred_boxes']
    B, Q, C = pred_logits.shape
    sizes = [int(t['boxes'].shape[0]) for t in targets]
    batch_idx = jnp.asarray(np.concatenate([np.full(n, b, np.int32)
                                            for b, n in enumerate(sizes)]))
    src_idx = jnp.concatenate([s for s, _ in indices]).astype(jnp.int32)
    tgt_ids = jnp.asarray(np.concatenate([np.full(n, b % topk, np.int32)
                                          for b, n in enumerate(sizes)]))
    target_classes_o = jnp.concatenate([tgt_ids[t] for _, t in indices]).astype(jnp.int32)
    target_classes = jnp.full((B, Q), num_classes, jnp.int32).at[
        batch_idx, src_idx].set(target_classes_o)
    onehot = jax.nn.one_hot(target_classes, num_classes + 1, dtype=jnp.float32)[..., :-1]
    x = pred_logits.astype(jnp.float32)
    p = jax.nn.sigmoid(x)
    ce = jnp.maximum(x, 0.0) - x * onehot + jnp.log1p(jnp.exp(-jnp.abs(x)))
    p_t = p * onehot + (1 - p) * (1 - onehot)
    loss = ce * (1 - p_t) ** 2 * (focal_alpha * onehot + (1 - focal_alpha) * (1 - onehot))
    loss_ce = (jnp.sum(loss) / Q) / num_boxes * Q

    src_b = pred_boxes[batch_idx, src_idx]
    tgt_bbox = jnp.concatenate([t['boxes'] for t in targets], 0)
    tgt_b = jnp.concatenate([tgt_bbox[t] for _, t in indices], 0)
    l1 = jnp.abs(src_b - tgt_b)

    def to_xyxy(b):
        cx, cy, w, h = b[:, 0], b[:, 1], b[:, 2], b[:, 3]
        return cx - 0.5 * w, cy - 0.5 * h, cx + 0.5 * w, cy + 0.5 * h

    sx0, sy0, sx1, sy1 = to_xyxy(src_b)
    tx0, ty0, tx1, ty1 = to_xyxy(tgt_b)
    inter = (jnp.maximum(jnp.minimum(sx1, tx1) - jnp.maximum(sx0, tx0), 0.0) *
             jnp.maximum(jnp.minimum(sy1, ty1) - jnp.maximum(sy0, ty0), 0.0))
    union = (sx1 - sx0) * (sy1 - sy0) + (tx1 - tx0) * (ty1 - ty0) - inter
    enc = ((jnp.maximum(sx1, tx1) - jnp.minimum(sx0, tx0)) *
           (jnp.maximum(sy1, ty1) - jnp.minimum(sy0, ty0)))
    giou = inter / union - (enc - union) / enc
    return {'loss_ce': loss_ce,
            'loss_bbox': jnp.sum(l1) / num_boxes,
            'loss_giou': jnp.sum(1.0 - giou) / num_boxes,
            'loss_xy': jnp.sum(l1[:, :2]) / num_boxes,
            'loss_hw': jnp.sum(l1[:, 2:]) / num_boxes}


# ----------------------------------- main ----------------------------------- #

if __name__ == "__main__":
    key = jax.random.PRNGKey(0)
    B, Q, C = 2, 16, 32          # batch, num_queries, num_classes
    n_gt = 3                     # gt boxes per image
    topk = 4                     # args.train_topk
    focal_alpha = 0.25

    k1, k2, k3 = jax.random.split(key, 3)
    pred_logits = jax.random.normal(k1, (B, Q, C), dtype=jnp.float32)
    pred_boxes = jax.nn.sigmoid(jax.random.normal(k2, (B, Q, 4), dtype=jnp.float32))

    targets = []
    for b in range(B):
        kk = jax.random.fold_in(k3, b)
        ka, kb = jax.random.split(kk)
        cxy = 0.2 + 0.6 * jax.random.uniform(ka, (n_gt, 2), dtype=jnp.float32)
        wh = 0.1 + 0.2 * jax.random.uniform(kb, (n_gt, 2), dtype=jnp.float32)
        targets.append({'boxes': jnp.concatenate([cxy, wh], axis=-1)})

    num_boxes = float(B * n_gt)
    outputs = {'pred_logits': pred_logits, 'pred_boxes': pred_boxes}

    # --- standalone check of the tiled focal kernel at a multi-block, padded size ---
    xchk = jax.random.normal(jax.random.PRNGKey(7), (1200, 200), dtype=jnp.float32)
    got = focal_base_sum(xchk, focal_alpha)
    pchk = jax.nn.sigmoid(xchk)
    spchk = jnp.maximum(xchk, 0.0) + jnp.log1p(jnp.exp(-jnp.abs(xchk)))
    want = jnp.sum((1.0 - focal_alpha) * spchk * pchk * pchk)
    np.testing.assert_allclose(np.asarray(jax.device_get(got)),
                               np.asarray(jax.device_get(want)), rtol=1e-3)

    # --- full criterion, checked against a plain-JAX transliteration of the module ---
    indices = greedy_matcher(outputs, targets)
    fixed_matcher = lambda o, t: indices                      # same indices for both paths

    losses = set_criterion_forward(outputs, targets, num_boxes,
                                   num_classes=C, focal_alpha=focal_alpha,
                                   topk=topk, matcher=fixed_matcher)
    losses = {k: jax.block_until_ready(v) for k, v in losses.items()}

    ref = _reference_losses(outputs, targets, indices, num_boxes,
                            num_classes=C, focal_alpha=focal_alpha, topk=topk)

    for k, v in losses.items():
        v_np = float(jax.device_get(v))
        r_np = float(jax.device_get(ref[k]))
        assert np.isfinite(v_np), f"non-finite loss {k}"
        np.testing.assert_allclose(v_np, r_np, rtol=2e-3, atol=1e-5, err_msg=k)

    print("KERNEL_OK")
</pallas_src>

<mosaic_0001>
module attributes {stable_mosaic.version = 11 : i64} {
  func.func @_focal_base_kernel(%arg0: i32, %arg1: memref<512x256xf32, #tpu.memory_space<vmem>>, %arg2: memref<8x128xf32, #tpu.memory_space<vmem>>) attributes {dimension_semantics = [#tpu.dimension_semantics<parallel>], iteration_bounds = array<i64: 3>, scalar_prefetch = 0 : i64, scratch_operands = 0 : i64, tpu.core_type = #tpu.core_type<tc>, window_params = [{transform_indices = @transform_0, window_bounds = array<i64: 512, 256>}, {transform_indices = @transform_1, window_bounds = array<i64: 8, 128>}]} {
    %c0 = arith.constant 0 : index
    %c0_0 = arith.constant 0 : index
    %0 = vector.load %arg1[%c0, %c0_0] : memref<512x256xf32, #tpu.memory_space<vmem>>, vector<512x256xf32>
    %1 = arith.negf %0 : vector<512x256xf32>
    %2 = math.exp %1 : vector<512x256xf32>
    %cst = arith.constant 1.000000e+00 : f32
    %3 = vector.broadcast %cst : f32 to vector<512x256xf32>
    %4 = arith.addf %3, %2 : vector<512x256xf32>
    %5 = arith.divf %3, %4 : vector<512x256xf32>
    %cst_1 = arith.constant 0.000000e+00 : f32
    %6 = vector.broadcast %cst_1 : f32 to vector<512x256xf32>
    %7 = arith.maximumf %0, %6 : vector<512x256xf32>
    %8 = math.absf %0 : vector<512x256xf32>
    %cst_2 = arith.constant 0.000000e+00 : f32
    %9 = vector.broadcast %cst_2 : f32 to vector<512x256xf32>
    %10 = arith.subf %9, %8 : vector<512x256xf32>
    %11 = math.exp %10 : vector<512x256xf32>
    %12 = math.log1p %11 : vector<512x256xf32>
    %13 = arith.addf %7, %12 : vector<512x256xf32>
    %cst_3 = arith.constant 7.500000e-01 : f32
    %14 = vector.broadcast %cst_3 : f32 to vector<512x256xf32>
    %15 = arith.mulf %14, %13 : vector<512x256xf32>
    %16 = arith.mulf %15, %5 : vector<512x256xf32>
    %17 = arith.mulf %16, %5 : vector<512x256xf32>
    %18 = tpu.iota {dimensions = array<i32: 1>} : vector<512x256xi32>
    %c200_i32 = arith.constant 200 : i32
    %19 = vector.broadcast %c200_i32 : i32 to vector<512x256xi32>
    %20 = arith.cmpi slt, %18, %19 : vector<512x256xi32>
    %cst_4 = arith.constant 0.000000e+00 : f32
    %21 = vector.broadcast %cst_4 : f32 to vector<512x256xf32>
    %22 = arith.select %20, %17, %21 : vector<512x256xi1>, vector<512x256xf32>
    %23 = tpu.iota {dimensions = array<i32: 0>} : vector<512x256xi32>
    %c512_i32 = arith.constant 512 : i32
    %24 = arith.muli %arg0, %c512_i32 : i32
    %25 = vector.broadcast %24 : i32 to vector<512x256xi32>
    %26 = arith.addi %23, %25 : vector<512x256xi32>
    %c1200_i32 = arith.constant 1200 : i32
    %27 = vector.broadcast %c1200_i32 : i32 to vector<512x256xi32>
    %28 = arith.cmpi slt, %26, %27 : vector<512x256xi32>
    %cst_5 = arith.constant 0.000000e+00 : f32
    %29 = vector.broadcast %cst_5 : f32 to vector<512x256xf32>
    %30 = arith.select %28, %22, %29 : vector<512x256xi1>, vector<512x256xf32>
    %31 = vector.shape_cast %30 : vector<512x256xf32> to vector<1x512x256xf32>
    %cst_6 = arith.constant dense<0.000000e+00> : vector<1xf32>
    %32 = vector.multi_reduction <add>, %31, %cst_6 [1, 2] : vector<1x512x256xf32> to vector<1xf32>
    %33 = vector.shape_cast %32 : vector<1xf32> to vector<1x1x1xf32>
    %34 = vector.extract %33[0, 0, 0] : f32 from vector<1x1x1xf32>
    %35 = vector.broadcast %34 : f32 to vector<8x128xf32>
    %c0_7 = arith.constant 0 : index
    %c0_8 = arith.constant 0 : index
    %36 = vector.load %arg2[%c0_7, %c0_8] : memref<8x128xf32, #tpu.memory_space<vmem>>, vector<8x128xf32>
    tpu.vector_store %arg2[%c0_7, %c0_8], %35 {strides = array<i32>} : memref<8x128xf32, #tpu.memory_space<vmem>>, vector<8x128xf32>,
    return
  }
  func.func @transform_0(%arg0: i32) -> (i32, i32) {
    %c0_i32 = arith.constant 0 : i32
    %c0_i32_0 = arith.constant 0 : i32
    return %arg0, %c0_i32 : i32, i32
  }
  func.func @transform_1(%arg0: i32) -> (i32, i32) {
    %c0_i32 = arith.constant 0 : i32
    %c0_i32_0 = arith.constant 0 : i32
    return %arg0, %c0_i32 : i32, i32
  }
}

</mosaic_0001>

<bundles_post_ra>
// kernel: tpu_custom_call.1
= control target key start
LH: loop header
LB: loop body
LE: loop exit
PB: predicated region body
PF: predicated region fallthrough
CT: control target
= control target key end

     0   :  { %6 = vsyncpa [#allocation3], 0  ;;  %s12972_s0 = inlined_call_operand.hbm [shape: f32[1536,256], index: 0, kind: input, shape index: {}]   ;;  %s12973_s1 = inlined_call_operand.hbm [shape: f32[24,128], index: 1, kind: output, shape index: {}]  }
   0x1   :  { %8 = vsyncpa [#allocation3 + $0x1], 0 }
   0x2   :  { %9 = vsyncpa [#allocation4], 0 }
   0x3   :  { %11 = vsyncpa [#allocation4 + $0x1], 0  ;;  %s5478_s6 = smov 0   ;;  %s5480_s7 = smov 0  }
   0x4   :  { %s5482_s8 = smov 0   ;;  %s5484_s9 = smov 0  }
   0x5 LB: > { %s5499_s10 = sadd.s32 4294967295, %s5462_s9   ;;  %s4015_s11 = sadd.s32 4294967294, %s5462_s9   ;;  %s5462_s9 = sphi %s5484_s9, %s17086_s9   ;;  %s5458_s8 = sphi %s5482_s8, %s17085_s8   ;;  %s5454_s7 = sphi %s5480_s7, %s17084_s7   ;;  %s5450_s6 = sphi %s5478_s6, %s17083_s6  }
   0x6   : > { %s5503_s12 = sadd.s32 1, %s5462_s9   ;;  %s24_s13 = sadd.s32 1, %s5458_s8 }
   0x7   : > { %s21_s14 = ssub.s32 %s5462_s9, %s5503_s12  ;;  %p31_p0 = scmp.ne.s32.totalorder %s5458_s8, %s5454_s7 }
   0x8   : > { %p22_p1 = scmp.eq.s32.totalorder %s21_s14, 0  ;;  %p32_p2 = scmp.eq.s32.totalorder %s5462_s9, 0 }
   0x9   : > { %p37_p3 = scmp.ne.s32.totalorder %s5454_s7, %s5450_s6  ;;  %p38_p4 = scmp.eq.s32.totalorder %s5499_s10, 0 }
   0xa   : > { %s5515_s15 = scalar_select %p22_p1, %s5458_s8, %s24_s13  }
   0xb   : > { %p5517_p5 = por %p32_p2, %p31_p0  ;;  %p5521_p6 = por %p38_p4, %p37_p3 }
   0xc   : > { %p61_p7 = scmp.eq.s32.totalorder %s5499_s10, 2  ;;  %p67_p8 = scmp.eq.s32.totalorder %s4015_s11, 2 }
   0xd   : > { %p4174_p9 = scmp.lt.s32.totalorder %s5462_s9, 3  ;;  %s87_s20 = sand.u32 1, %s5458_s8  }
   0xe   : > { %p5527_p10 = por %p61_p7, %p31_p0  ;;  %p5531_p11 = por %p67_p8, %p37_p3 }
   0xf   : > { %s4159_s21 = sshll.u32 %s5462_s9, 14  ;;  %s4018_s22 = sshll.u32 %s87_s20, 10 }
  0x10   : > { %s13918_s18 = scalar_select %p5527_p10, 1, 0 }
  0x11   : > { %s13919_s19 = scalar_select %p5531_p11, 1, 0 }
  0x12   : > { %s5540_s25 = scalar_lea.hbm %s12972_s0, %s4159_s21  ;;  %s91_s26 = scalar_lea.vmem [#allocation2], %s4018_s22 }
  0x13   : > { %s99_s27 = sshll.u32 %s91_s26, 4  ;;  %p5544_p12 = pnand %p4174_p9, %p5517_p5  ;;  %s5548_s27 = int_to_ptr.vmem [resolvable:$true] %s99_s27 }
  0x14   : > { %s5550_s29 = scalar_lea.sflag [#allocation3], %s87_s20  ;;  %s5366_s30 = scalar_lea.hbm %s5540_s25, 16384 }
  0x15   : > { %p5367_p13 = scmp.ne.s32.totalorder %s5540_s25, %s5366_s30  ;;  %p5368_p0 = pneg %p5544_p12 }
  0x16   : > { %s5371_s4 = scalar_lea.hbm %s12972_s0, 49152  ;;  %p5372_p3 = scmp.lt.u32.totalorder %s5540_s25, %s12972_s0 }
  0x17   : > { %p5369_p1 = pnand %p5368_p0, %p5367_p13  ;;  %p5373_p4 = scmp.lt.u32.totalorder %s5371_s4, %s5366_s30 }
  0x18   : > { %p5375_p7 = scmp.lt.u32.totalorder %s5366_s30, %s5540_s25 }
  0x19   : > { %p5370_p2 = pneg %p5369_p1  ;;  %p5374_p5 = por %p5373_p4, %p5372_p3 }
  0x1b   : > { %p5376_p8 = por %p5375_p7, %p5374_p5 }
  0x1d   : > { %p5377_p9 = pnand %p5376_p8, %p5370_p2 }
  0x1f   : > { %5380 = shalt.err (!%p5377_p9)
}
  0x20   : > { %s5381_s13 = scalar_lea.vmem %s5548_s27, 16384  ;;  %s5464_s14 = smov [#allocation2]  }
  0x21   : > { %p5382_p13 = scmp.ne.s32.totalorder %s5548_s27, %s5381_s13  ;;  %s5386_s16 = sshll.u32 %s5464_s14, 4  ;;  %s5387_s16 = int_to_ptr.vmem [resolvable:$false] %s5386_s16 }
  0x22   : > { %s5388_s20 = scalar_lea.vmem %s5387_s16, 32768  ;;  %p5389_p10 = scmp.lt.s32.totalorder %s5548_s27, %s5387_s16 }
  0x23   : > { %p5384_p1 = pnand %p5382_p13, %p5368_p0  ;;  %p5390_p3 = scmp.lt.s32.totalorder %s5388_s20, %s5381_s13 }
  0x25   : > { %p5385_p11 = pneg %p5384_p1  ;;  %p5391_p4 = por %p5390_p3, %p5389_p10 }
  0x27   : > { %p5392_p5 = pnand %p5391_p4, %p5385_p11 }
  0x29   : > { %5395 = shalt.err (!%p5392_p5)
}
  0x2a   : > { %s5465_s21 = smov 256   ;;  %s5466_s22 = smov 16  }
  0x2b   : > { %4169 = dma.hbm_to_vmem [thread:$0]  (!%p5544_p12), %s5540_s25, 16384, %s5548_s27, %s5550_s29, %s5465_s21, %s5465_s21, %s5466_s22  }
  0x2c   : > { %p4022_p0 = scmp.ge.s32.totalorder %s5462_s9, 1  ;;  %p107_p2 = scmp.lt.s32.totalorder %s5462_s9, 4 }
  0x2e   : > { %p108_p7 = pnand %p4022_p0, %p107_p2 }
  0x30   : > { %111 = sbr.rel (%p108_p7) target bundleno = 1488 (0x5d0), region = 24 }
  0x37   : > { %s5581_s23 = sand.u32 1, %s5454_s7  }
  0x38   : > { %s4023_s24 = sshll.u32 %s5581_s23, 10  ;;  %s114_s26 = scalar_lea.sflag [#allocation3], %s5581_s23 }
  0x39   : > { %s5585_s30 = scalar_lea.vmem [#allocation2], %s4023_s24 }
  0x3a   : > { %5441 = dma.done.wait (%p5521_p6), %s114_s26, 16384  }
  0x3b   : > { %5443 = vsyncadd (%p5521_p6), %s114_s26, 4294950912  ;;  %v5592_v0 = vld [vmem:[%s5585_s30] sm:$0xff]  ;;  %v5595_v1 = vld [vmem:[%s5585_s30 + $0x8] sm:$0xff]  ;;  %s4153_s17 = sshll.u32 %s5499_s10, 9  ;;  %s4024_s25 = sshll.u32 %s5581_s23, 3 }
  0x3c   : > { %13921 = vst [vmem:[#allocation8_spill] sm:$0xff] %v5592_v0  ;;  %13922 = vst [vmem:[#allocation9_spill] sm:$0xff] %v5595_v1  ;;  %v4025_v2 = vmul.f32 -1.442695, %v5592_v0  ;;  %v5599_v3 = vld [vmem:[%s5585_s30 + $0x10] sm:$0xff]  ;;  %v5603_v5 = vld [vmem:[%s5585_s30 + $0x18] sm:$0xff] }
  0x3d   : > { %13923 = vst [vmem:[#allocation10_spill] sm:$0xff] %v5599_v3  ;;  %v4026_v4 = vmul.f32 -1.442695, %v5595_v1  ;;  %13924 = vst [vmem:[#allocation11_spill] sm:$0xff] %v5603_v5  ;;  %v4027_v6 = vmul.f32 -1.442695, %v5599_v3 }
  0x3e   : > { %v141_v7 = vld [vmem:[%s5585_s30 + $0x20] sm:$0xff]  ;;  %v4028_v8 = vmul.f32 -1.442695, %v5603_v5  ;;  %v142_v9 = vld [vmem:[%s5585_s30 + $0x28] sm:$0xff]  ;;  %4210 = vpow2.f32 %v4025_v2  ;;  %v143_v11 = vld [vmem:[%s5585_s30 + $0x30] sm:$0xff]  ;;  %s4155_s27 = sshll.u32 %s5499_s10, 7 }
  0x3f   : > { %v4029_v10 = vmul.f32 -1.442695, %v141_v7  ;;  %4212 = vpow2.f32 %v4026_v4  ;;  %v4030_v12 = vmul.f32 -1.442695, %v142_v9  ;;  %v144_v13 = vld [vmem:[%s5585_s30 + $0x38] sm:$0xff]  ;;  %v145_v15 = vld [vmem:[%s5585_s30 + $0x40] sm:$0xff]  ;;  %s12929_s4 = scalar_lea.hbm %s12973_s1, %s4155_s27 }
  0x40   : > { %4214 = vpow2.f32 %v4027_v6  ;;  %v4031_v14 = vmul.f32 -1.442695, %v143_v11  ;;  %v4032_v16 = vmul.f32 -1.442695, %v144_v13  ;;  %v146_v17 = vld [vmem:[%s5585_s30 + $0x48] sm:$0xff]  ;;  %v147_v19 = vld [vmem:[%s5585_s30 + $0x50] sm:$0xff] }
  0x41   : > { %4216 = vpow2.f32 %v4028_v8  ;;  %v4033_v18 = vmul.f32 -1.442695, %v145_v15  ;;  %v4034_v20 = vmul.f32 -1.442695, %v146_v17  ;;  %v148_v21 = vld [vmem:[%s5585_s30 + $0x58] sm:$0xff]  ;;  %v149_v23 = vld [vmem:[%s5585_s30 + $0x60] sm:$0xff] }
  0x42   : > { %4218 = vpow2.f32 %v4029_v10  ;;  %v4035_v22 = vmul.f32 -1.442695, %v147_v19  ;;  %v4036_v24 = vmul.f32 -1.442695, %v148_v21  ;;  %v150_v25 = vld [vmem:[%s5585_s30 + $0x68] sm:$0xff]  ;;  %v151_v27 = vld [vmem:[%s5585_s30 + $0x70] sm:$0xff] }
  0x43   : > { %4220 = vpow2.f32 %v4030_v12  ;;  %v4037_v26 = vmul.f32 -1.442695, %v149_v23  ;;  %v4038_v28 = vmul.f32 -1.442695, %v150_v25  ;;  %v152_v30 = vld [vmem:[%s5585_s30 + $0x78] sm:$0xff]  ;;  %v153_v33 = vld [vmem:[%s5585_s30 + $0x80] sm:$0xff] }
  0x44   : > { %4222 = vpow2.f32 %v4031_v14  ;;  %v4039_v31 = vmul.f32 -1.442695, %v151_v27  ;;  %v4040_v34 = vmul.f32 -1.442695, %v152_v30  ;;  %v154_v36 = vld [vmem:[%s5585_s30 + $0x88] sm:$0xff]  ;;  %v155_v39 = vld [vmem:[%s5585_s30 + $0x90] sm:$0xff] }
  0x45   : > { %4224 = vpow2.f32 %v4032_v16  ;;  %v4041_v37 = vmul.f32 -1.442695, %v153_v33  ;;  %v4042_v40 = vmul.f32 -1.442695, %v154_v36  ;;  %v156_v42 = vld [vmem:[%s5585_s30 + $0x98] sm:$0xff]  ;;  %v157_v45 = vld [vmem:[%s5585_s30 + $0xa0] sm:$0xff] }
  0x46   : > { %4226 = vpow2.f32 %v4033_v18  ;;  %v4043_v43 = vmul.f32 -1.442695, %v155_v39  ;;  %v4044_v46 = vmul.f32 -1.442695, %v156_v42  ;;  %v158_v48 = vld [vmem:[%s5585_s30 + $0xa8] sm:$0xff]  ;;  %v159_v51 = vld [vmem:[%s5585_s30 + $0xb0] sm:$0xff] }
  0x47   : > { %4228 = vpow2.f32 %v4034_v20  ;;  %v4045_v49 = vmul.f32 -1.442695, %v157_v45  ;;  %v4046_v52 = vmul.f32 -1.442695, %v158_v48  ;;  %v160_v54 = vld [vmem:[%s5585_s30 + $0xb8] sm:$0xff]  ;;  %v161_v57 = vld [vmem:[%s5585_s30 + $0xc0] sm:$0xff] }
  0x48   : > { %v5618_v29 = vpop.eup %4210  ;;  %4230 = vpow2.f32 %v4035_v22  ;;  %v4047_v55 = vmul.f32 -1.442695, %v159_v51  ;;  %v4048_v58 = vmul.f32 -1.442695, %v160_v54  ;;  %v162_v60 = vld [vmem:[%s5585_s30 + $0xc8] sm:$0xff]  ;;  %v163_v63 = vld [vmem:[%s5585_s30 + $0xd0] sm:$0xff] }
  0x49   : > { %v5621_v32 = vpop.eup %4212  ;;  %4232 = vpow2.f32 %v4036_v24  ;;  %v4049_v61 = vmul.f32 -1.442695, %v161_v57  ;;  %v4050_v2 = vmul.f32 -1.442695, %v162_v60  ;;  %v164_v6 = vld [vmem:[%s5585_s30 + $0xd8] sm:$0xff]  ;;  %v165_v9 = vld [vmem:[%s5585_s30 + $0xe0] sm:$0xff] }
  0x4a   : > { %v5624_v35 = vpop.eup %4214  ;;  %4234 = vpow2.f32 %v4037_v26  ;;  %v4051_v7 = vmul.f32 -1.442695, %v163_v63  ;;  %v4052_v10 = vmul.f32 -1.442695, %v164_v6  ;;  %v166_v12 = vld [vmem:[%s5585_s30 + $0xe8] sm:$0xff]  ;;  %v167_v15 = vld [vmem:[%s5585_s30 + $0xf0] sm:$0xff] }
  0x4b   : > { %v5627_v38 = vpop.eup %4216  ;;  %4236 = vpow2.f32 %v4038_v28  ;;  %v4053_v13 = vmul.f32 -1.442695, %v165_v9  ;;  %v4054_v16 = vmul.f32 -1.442695, %v166_v12  ;;  %v168_v18 = vld [vmem:[%s5585_s30 + $0xf8] sm:$0xff]  ;;  %v169_v21 = vld [vmem:[%s5585_s30 + $0x100] sm:$0xff] }
  0x4c   : > { %v5630_v41 = vpop.eup %4218  ;;  %4238 = vpow2.f32 %v4039_v31  ;;  %v4055_v19 = vmul.f32 -1.442695, %v167_v15  ;;  %v4056_v22 = vmul.f32 -1.442695, %v168_v18  ;;  %v170_v24 = vld [vmem:[%s5585_s30 + $0x108] sm:$0xff]  ;;  %v171_v27 = vld [vmem:[%s5585_s30 + $0x110] sm:$0xff] }
  0x4d   : > { %v5633_v44 = vpop.eup %4220  ;;  %4240 = vpow2.f32 %v4040_v34  ;;  %v4057_v25 = vmul.f32 -1.442695, %v169_v21  ;;  %v4058_v28 = vmul.f32 -1.442695, %v170_v24  ;;  %v172_v31 = vld [vmem:[%s5585_s30 + $0x118] sm:$0xff]  ;;  %v173_v36 = vld [vmem:[%s5585_s30 + $0x120] sm:$0xff] }
  0x4e   : > { %v5636_v47 = vpop.eup %4222  ;;  %4242 = vpow2.f32 %v4041_v37  ;;  %v4059_v33 = vmul.f32 -1.442695, %v171_v27  ;;  %v4060_v37 = vmul.f32 -1.442695, %v172_v31  ;;  %v4061_v42 = vmul.f32 -1.442695, %v173_v36 }
  0x4f   : > { %v5639_v50 = vpop.eup %4224  ;;  %4244 = vpow2.f32 %v4042_v40  ;;  %v174_v40 = vld [vmem:[%s5585_s30 + $0x128] sm:$0xff]  ;;  %v175_v45 = vld [vmem:[%s5585_s30 + $0x130] sm:$0xff]  ;;  %v177_v54 = vld [vmem:[%s5585_s30 + $0x140] sm:$0xff]  ;;  %v5910_v3 = vadd.f32 1.0, %v5636_v47  ;;  %s135_s28 = scalar_lea.vmem [#allocation5], %s4024_s25  ;;  %s3932_s11 = scalar_lea.sflag [#allocation4], %s5581_s23 }
  0x50   : > { %v5642_v53 = vpop.eup %4226  ;;  %4246 = vpow2.f32 %v4043_v43  ;;  %v4063_v51 = vmul.f32 -1.442695, %v175_v45  ;;  %v4065_v60 = vmul.f32 -1.442695, %v177_v54  ;;  %v179_v63 = vld [vmem:[%s5585_s30 + $0x150] sm:$0xff]  ;;  %v181_v12 = vld [vmem:[%s5585_s30 + $0x160] sm:$0xff] }
  0x51   : > { %v5645_v56 = vpop.eup %4228  ;;  %4248 = vpow2.f32 %v4044_v46  ;;  %v4062_v46 = vmul.f32 -1.442695, %v174_v40  ;;  %v4067_v9 = vmul.f32 -1.442695, %v179_v63  ;;  %v4069_v18 = vmul.f32 -1.442695, %v181_v12 }
  0x52   : > { %v5648_v59 = vpop.eup %4230  ;;  %4250 = vpow2.f32 %v4045_v49  ;;  %v176_v49 = vld [vmem:[%s5585_s30 + $0x138] sm:$0xff]  ;;  %v5716_v21 = vld [vmem:[%s5585_s30 + $0x170] sm:$0xff]  ;;  %v5728_v31 = vld [vmem:[%s5585_s30 + $0x180] sm:$0xff]  ;;  %13969 = vst [vmem:[#allocation56_spill] sm:$0xff] %v5910_v3  ;;  %v5922_v0 = vadd.f32 1.0, %v5642_v53  ;;  %s3945_s29 = sshll.u32 %s135_s28, 4  ;;  %s12931_s29 = int_to_ptr.vmem [resolvable:$true] %s3945_s29 }
  0x53   : > { %v5651_v62 = vpop.eup %4232  ;;  %4252 = vpow2.f32 %v4046_v52  ;;  %13926 = vst [vmem:[#allocation13_spill] sm:$0xff] %v5716_v21  ;;  %v4071_v27 = vmul.f32 -1.442695, %v5716_v21  ;;  %13928 = vst [vmem:[#allocation15_spill] sm:$0xff] %v5728_v31  ;;  %v4073_v40 = vmul.f32 -1.442695, %v5728_v31 }
  0x54   : > { %v5654_v4 = vpop.eup %4234  ;;  %4254 = vpow2.f32 %v4047_v55  ;;  %v4064_v55 = vmul.f32 -1.442695, %v176_v49  ;;  %v5740_v45 = vld [vmem:[%s5585_s30 + $0x190] sm:$0xff]  ;;  %13972 = vst [vmem:[#allocation59_spill] sm:$0xff] %v5922_v0  ;;  %v5930_v47 = vld [vmem:[%s5585_s30 + $0x2e8] sm:$0xff]  ;;  %s5396_s13 = scalar_lea.vmem %s12931_s29, 128 }
  0x55   : > { %v5657_v8 = vpop.eup %4236  ;;  %4256 = vpow2.f32 %v4048_v58  ;;  %v178_v58 = vld [vmem:[%s5585_s30 + $0x148] sm:$0xff]  ;;  %13930 = vst [vmem:[#allocation17_spill] sm:$0xff] %v5740_v45  ;;  %v4075_v54 = vmul.f32 -1.442695, %v5740_v45  ;;  %v191_v12 = vld [vmem:[%s5585_s30 + $0x1b0] sm:$0xff]  ;;  %13974 = vst [vmem:[#allocation61_spill] sm:$0xff] %v5930_v47  ;;  %p5397_p6 = scmp.ne.s32.totalorder %s12931_s29, %s5396_s13 }
  0x56   : > { %v5660_v11 = vpop.eup %4238  ;;  %4258 = vpow2.f32 %v4049_v61  ;;  %v194_v45 = vld [vmem:[%s5585_s30 + $0x1c8] sm:$0xff]  ;;  %v5942_v53 = vld [vmem:[%s5585_s30 + $0x2f0] sm:$0xff]  ;;  %p17081_p10 = scmp.ne.s32.totalorder %s13918_s18, 0  ;;  %s5467_s10 = smov [#allocation5]  }
  0x57   : > { %v5663_v14 = vpop.eup %4240  ;;  %4260 = vpow2.f32 %v4050_v2  ;;  %v4066_v2 = vmul.f32 -1.442695, %v178_v58  ;;  %v5752_v58 = vld [vmem:[%s5585_s30 + $0x1a0] sm:$0xff]  ;;  %v4082_v31 = vmul.f32 -1.442695, %v194_v45  ;;  %v199_v45 = vld [vmem:[%s5585_s30 + $0x1f0] sm:$0xff] }
  0x58   : > { %v5666_v17 = vpop.eup %4242  ;;  %4262 = vpow2.f32 %v4051_v7  ;;  %v180_v7 = vld [vmem:[%s5585_s30 + $0x158] sm:$0xff]  ;;  %13932 = vst [vmem:[#allocation19_spill] sm:$0xff] %v5752_v58  ;;  %13977 = vst [vmem:[#allocation64_spill] sm:$0xff] %v5942_v53  ;;  %v6108_v3 = vld [vmem:[%s5585_s30 + $0x3c8] sm:$0xff]  ;;  %p5398_p11 = pnand %p5397_p6, %p17081_p10  ;;  %s5400_s14 = sshll.u32 %s5467_s10, 4  ;;  %s5401_s14 = int_to_ptr.vmem [resolvable:$false] %s5400_s14 }
  0x59   : > { %v5669_v20 = vpop.eup %4244  ;;  %4264 = vpow2.f32 %v4052_v10  ;;  %14026 = vst [vmem:[#allocation113_spill] sm:$0xff] %v6108_v3  ;;  %s5402_s16 = scalar_lea.vmem %s5401_s14, 256  ;;  %p5403_p8 = scmp.lt.s32.totalorder %s12931_s29, %s5401_s14 }
  0x5a   : > { %v5672_v23 = vpop.eup %4246  ;;  %4266 = vpow2.f32 %v4053_v13  ;;  %v4068_v13 = vmul.f32 -1.442695, %v180_v7  ;;  %v4077_v7 = vmul.f32 -1.442695, %v5752_v58  ;;  %p5399_p12 = pneg %p5398_p11  ;;  %p5404_p9 = scmp.lt.s32.totalorder %s5402_s16, %s5396_s13 }
  0x5b   : > { %v5675_v26 = vpop.eup %4248  ;;  %4268 = vpow2.f32 %v4054_v16  ;;  %v5711_v16 = vld [vmem:[%s5585_s30 + $0x168] sm:$0xff] }
  0x5c   : > { %v5678_v30 = vpop.eup %4250  ;;  %4270 = vpow2.f32 %v4055_v19  ;;  %13925 = vst [vmem:[#allocation12_spill] sm:$0xff] %v5711_v16  ;;  %p5405_p13 = por %p5404_p9, %p5403_p8 }
  0x5d   : > { %v5681_v34 = vpop.eup %4252  ;;  %4272 = vpow2.f32 %v4056_v22  ;;  %v4070_v22 = vmul.f32 -1.442695, %v5711_v16 }
  0x5e   : > { %v5684_v39 = vpop.eup %4254  ;;  %4274 = vpow2.f32 %v4057_v25  ;;  %v5722_v25 = vld [vmem:[%s5585_s30 + $0x178] sm:$0xff]  ;;  %p5406_p1 = pnand %p5405_p13, %p5399_p12 }
  0x5f   : > { %v5687_v43 = vpop.eup %4256  ;;  %4276 = vpow2.f32 %v4058_v28  ;;  %13927 = vst [vmem:[#allocation14_spill] sm:$0xff] %v5722_v25 }
  0x60   : > { %v5690_v48 = vpop.eup %4258  ;;  %4278 = vpow2.f32 %v4059_v33  ;;  %v4072_v33 = vmul.f32 -1.442695, %v5722_v25 }
  0x61   : > { %v5693_v52 = vpop.eup %4260  ;;  %4280 = vpow2.f32 %v4060_v37  ;;  %v5734_v37 = vld [vmem:[%s5585_s30 + $0x188] sm:$0xff] }
  0x62   : > { %v5696_v57 = vpop.eup %4262  ;;  %4282 = vpow2.f32 %v4061_v42  ;;  %13929 = vst [vmem:[#allocation16_spill] sm:$0xff] %v5734_v37 }
  0x63   : > { %v5699_v61 = vpop.eup %4264  ;;  %4284 = vpow2.f32 %v4062_v46  ;;  %v4074_v46 = vmul.f32 -1.442695, %v5734_v37 }
  0x64   : > { %v5702_v6 = vpop.eup %4266  ;;  %4286 = vpow2.f32 %v4063_v51  ;;  %v5746_v51 = vld [vmem:[%s5585_s30 + $0x198] sm:$0xff] }
  0x65   : > { %v5705_v10 = vpop.eup %4268  ;;  %4288 = vpow2.f32 %v4064_v55  ;;  %13931 = vst [vmem:[#allocation18_spill] sm:$0xff] %v5746_v51 }
  0x66   : > { %v5708_v15 = vpop.eup %4270  ;;  %4290 = vpow2.f32 %v4065_v60  ;;  %v4076_v60 = vmul.f32 -1.442695, %v5746_v51  ;;  %v193_v51 = vld [vmem:[%s5585_s30 + $0x1c0] sm:$0xff] }
  0x67   : > { %v5713_v19 = vpop.eup %4272  ;;  %4292 = vpow2.f32 %v4066_v2  ;;  %v5758_v2 = vld [vmem:[%s5585_s30 + $0x1a8] sm:$0xff] }
  0x68   : > { %v5719_v24 = vpop.eup %4274  ;;  %4294 = vpow2.f32 %v4067_v9  ;;  %13933 = vst [vmem:[#allocation20_spill] sm:$0xff] %v5758_v2 }
  0x69   : > { %v5725_v28 = vpop.eup %4276  ;;  %4296 = vpow2.f32 %v4068_v13  ;;  %v4078_v13 = vmul.f32 -1.442695, %v5758_v2  ;;  %v195_v2 = vld [vmem:[%s5585_s30 + $0x1d0] sm:$0xff] }
  0x6a   : > { %v5731_v36 = vpop.eup %4278  ;;  %4298 = vpow2.f32 %v4069_v18  ;;  %v4083_v25 = vmul.f32 -1.442695, %v195_v2  ;;  %v200_v2 = vld [vmem:[%s5585_s30 + $0x1f8] sm:$0xff] }
  0x6b   : > { %v5737_v42 = vpop.eup %4280  ;;  %4300 = vpow2.f32 %v4070_v22  ;;  %v192_v22 = vld [vmem:[%s5585_s30 + $0x1b8] sm:$0xff] }
  0x6c   : > { %v5743_v49 = vpop.eup %4282  ;;  %4302 = vpow2.f32 %v4071_v27  ;;  %v4079_v27 = vmul.f32 -1.442695, %v191_v12  ;;  %v196_v12 = vld [vmem:[%s5585_s30 + $0x1d8] sm:$0xff] }
  0x6d   : > { %v5749_v55 = vpop.eup %4284  ;;  %4304 = vpow2.f32 %v4072_v33  ;;  %v4084_v21 = vmul.f32 -1.442695, %v196_v12  ;;  %v201_v12 = vld [vmem:[%s5585_s30 + $0x200] sm:$0xff] }
  0x6e   : > { %v5755_v63 = vpop.eup %4286  ;;  %4306 = vpow2.f32 %v4073_v40  ;;  %v4080_v40 = vmul.f32 -1.442695, %v192_v22  ;;  %v197_v22 = vld [vmem:[%s5585_s30 + $0x1e0] sm:$0xff] }
  0x6f   : > { %v5761_v9 = vpop.eup %4288  ;;  %4308 = vpow2.f32 %v4074_v46  ;;  %v4081_v46 = vmul.f32 -1.442695, %v193_v51  ;;  %v198_v51 = vld [vmem:[%s5585_s30 + $0x1e8] sm:$0xff]  ;;  %v4085_v16 = vmul.f32 -1.442695, %v197_v22 }
  0x70   : > { %v5765_v18 = vpop.eup %4290  ;;  %4310 = vpow2.f32 %v4075_v54  ;;  %v202_v22 = vld [vmem:[%s5585_s30 + $0x208] sm:$0xff] }
  0x71   : > { %v5768_v33 = vpop.eup %4292  ;;  %4312 = vpow2.f32 %v4076_v60 }
  0x72   : > { %v5771_v58 = vpop.eup %4294  ;;  %4314 = vpow2.f32 %v4077_v7 }
  0x73   : > { %v5774_v37 = vpop.eup %4296  ;;  %4316 = vpow2.f32 %v4078_v13 }
  0x74   : > { %13934 = vst [vmem:[#allocation21_spill] sm:$0xff] %v5774_v37  ;;  %v5777_v54 = vpop.eup %4298  ;;  %4318 = vpow2.f32 %v4079_v27 }
  0x75   : > { %13935 = vst [vmem:[#allocation22_spill] sm:$0xff] %v5777_v54  ;;  %v5780_v60 = vpop.eup %4300  ;;  %4320 = vpow2.f32 %v4080_v40  ;;  %v4086_v54 = vmul.f32 -1.442695, %v198_v51  ;;  %v203_v51 = vld [vmem:[%s5585_s30 + $0x210] sm:$0xff] }
  0x76   : > { %13936 = vst [vmem:[#allocation23_spill] sm:$0xff] %v5780_v60  ;;  %v5783_v7 = vpop.eup %4302  ;;  %4322 = vpow2.f32 %v4081_v46  ;;  %v4087_v60 = vmul.f32 -1.442695, %v199_v45  ;;  %v204_v45 = vld [vmem:[%s5585_s30 + $0x218] sm:$0xff] }
  0x77   : > { %13937 = vst [vmem:[#allocation24_spill] sm:$0xff] %v5783_v7  ;;  %v5786_v13 = vpop.eup %4304  ;;  %4324 = vpow2.f32 %v4082_v31  ;;  %v4088_v7 = vmul.f32 -1.442695, %v200_v2  ;;  %v205_v2 = vld [vmem:[%s5585_s30 + $0x220] sm:$0xff] }
  0x78   : > { %13938 = vst [vmem:[#allocation25_spill] sm:$0xff] %v5786_v13  ;;  %v5789_v27 = vpop.eup %4306  ;;  %4326 = vpow2.f32 %v4083_v25  ;;  %v4089_v13 = vmul.f32 -1.442695, %v201_v12  ;;  %v206_v12 = vld [vmem:[%s5585_s30 + $0x228] sm:$0xff] }
  0x79   : > { %13939 = vst [vmem:[#allocation26_spill] sm:$0xff] %v5789_v27  ;;  %v5792_v40 = vpop.eup %4308  ;;  %4328 = vpow2.f32 %v4084_v21  ;;  %v4090_v27 = vmul.f32 -1.442695, %v202_v22  ;;  %v207_v22 = vld [vmem:[%s5585_s30 + $0x230] sm:$0xff] }
  0x7a   : > { %13940 = vst [vmem:[#allocation27_spill] sm:$0xff] %v5792_v40  ;;  %v5795_v46 = vpop.eup %4310  ;;  %4330 = vpow2.f32 %v4085_v16  ;;  %v4091_v40 = vmul.f32 -1.442695, %v203_v51  ;;  %v208_v51 = vld [vmem:[%s5585_s30 + $0x238] sm:$0xff] }
  0x7b   : > { %13941 = vst [vmem:[#allocation28_spill] sm:$0xff] %v5795_v46  ;;  %v5798_v31 = vpop.eup %4312  ;;  %4332 = vpow2.f32 %v4086_v54  ;;  %v4092_v46 = vmul.f32 -1.442695, %v204_v45  ;;  %v209_v45 = vld [vmem:[%s5585_s30 + $0x240] sm:$0xff] }
  0x7c   : > { %13942 = vst [vmem:[#allocation29_spill] sm:$0xff] %v5798_v31  ;;  %v5801_v25 = vpop.eup %4314  ;;  %4334 = vpow2.f32 %v4087_v60  ;;  %v4093_v31 = vmul.f32 -1.442695, %v205_v2  ;;  %v210_v2 = vld [vmem:[%s5585_s30 + $0x248] sm:$0xff] }
  0x7d   : > { %13943 = vst [vmem:[#allocation30_spill] sm:$0xff] %v5801_v25  ;;  %v5804_v21 = vpop.eup %4316  ;;  %4336 = vpow2.f32 %v4088_v7  ;;  %v4094_v25 = vmul.f32 -1.442695, %v206_v12  ;;  %v211_v12 = vld [vmem:[%s5585_s30 + $0x250] sm:$0xff] }
  0x7e   : > { %13944 = vst [vmem:[#allocation31_spill] sm:$0xff] %v5804_v21  ;;  %v5807_v16 = vpop.eup %4318  ;;  %4338 = vpow2.f32 %v4089_v13  ;;  %v4095_v21 = vmul.f32 -1.442695, %v207_v22  ;;  %v212_v22 = vld [vmem:[%s5585_s30 + $0x258] sm:$0xff] }
  0x7f   : > { %13945 = vst [vmem:[#allocation32_spill] sm:$0xff] %v5807_v16  ;;  %v5810_v54 = vpop.eup %4320  ;;  %4340 = vpow2.f32 %v4090_v27  ;;  %v4096_v16 = vmul.f32 -1.442695, %v208_v51  ;;  %v213_v51 = vld [vmem:[%s5585_s30 + $0x260] sm:$0xff] }
  0x80   : > { %13946 = vst [vmem:[#allocation33_spill] sm:$0xff] %v5810_v54  ;;  %v5813_v60 = vpop.eup %4322  ;;  %4342 = vpow2.f32 %v4091_v40  ;;  %v4097_v54 = vmul.f32 -1.442695, %v209_v45  ;;  %v214_v45 = vld [vmem:[%s5585_s30 + $0x268] sm:$0xff] }
  0x81   : > { %13947 = vst [vmem:[#allocation34_spill] sm:$0xff] %v5813_v60  ;;  %v5816_v7 = vpop.eup %4324  ;;  %4344 = vpow2.f32 %v4092_v46  ;;  %v4098_v60 = vmul.f32 -1.442695, %v210_v2  ;;  %v215_v2 = vld [vmem:[%s5585_s30 + $0x270] sm:$0xff] }
  0x82   : > { %13948 = vst [vmem:[#allocation35_spill] sm:$0xff] %v5816_v7  ;;  %v5819_v13 = vpop.eup %4326  ;;  %4346 = vpow2.f32 %v4093_v31  ;;  %v4099_v7 = vmul.f32 -1.442695, %v211_v12  ;;  %v216_v12 = vld [vmem:[%s5585_s30 + $0x278] sm:$0xff] }
  0x83   : > { %13949 = vst [vmem:[#allocation36_spill] sm:$0xff] %v5819_v13  ;;  %v5822_v27 = vpop.eup %4328  ;;  %4348 = vpow2.f32 %v4094_v25  ;;  %v4100_v13 = vmul.f32 -1.442695, %v212_v22  ;;  %v217_v22 = vld [vmem:[%s5585_s30 + $0x280] sm:$0xff] }
  0x84   : > { %13950 = vst [vmem:[#allocation37_spill] sm:$0xff] %v5822_v27  ;;  %v5825_v40 = vpop.eup %4330  ;;  %4350 = vpow2.f32 %v4095_v21  ;;  %v4101_v27 = vmul.f32 -1.442695, %v213_v51  ;;  %v218_v51 = vld [vmem:[%s5585_s30 + $0x288] sm:$0xff] }
  0x85   : > { %13951 = vst [vmem:[#allocation38_spill] sm:$0xff] %v5825_v40  ;;  %v5828_v46 = vpop.eup %4332  ;;  %4352 = vpow2.f32 %v4096_v16  ;;  %v4102_v40 = vmul.f32 -1.442695, %v214_v45  ;;  %v219_v45 = vld [vmem:[%s5585_s30 + $0x290] sm:$0xff] }
  0x86   : > { %13952 = vst [vmem:[#allocation39_spill] sm:$0xff] %v5828_v46  ;;  %v5831_v31 = vpop.eup %4334  ;;  %4354 = vpow2.f32 %v4097_v54  ;;  %v4103_v46 = vmul.f32 -1.442695, %v215_v2  ;;  %v220_v2 = vld [vmem:[%s5585_s30 + $0x298] sm:$0xff] }
  0x87   : > { %13953 = vst [vmem:[#allocation40_spill] sm:$0xff] %v5831_v31  ;;  %v5834_v25 = vpop.eup %4336  ;;  %4356 = vpow2.f32 %v4098_v60  ;;  %v4104_v31 = vmul.f32 -1.442695, %v216_v12  ;;  %v221_v12 = vld [vmem:[%s5585_s30 + $0x2a0] sm:$0xff] }
  0x88   : > { %13954 = vst [vmem:[#allocation41_spill] sm:$0xff] %v5834_v25  ;;  %v5837_v21 = vpop.eup %4338  ;;  %4358 = vpow2.f32 %v4099_v7  ;;  %v4105_v25 = vmul.f32 -1.442695, %v217_v22  ;;  %v4109_v22 = vmul.f32 -1.442695, %v221_v12 }
  0x89   : > { %13955 = vst [vmem:[#allocation42_spill] sm:$0xff] %v5837_v21  ;;  %v5840_v16 = vpop.eup %4340  ;;  %4360 = vpow2.f32 %v4100_v13  ;;  %v4106_v21 = vmul.f32 -1.442695, %v218_v51 }
  0x8a   : > { %13956 = vst [vmem:[#allocation43_spill] sm:$0xff] %v5840_v16  ;;  %v5843_v54 = vpop.eup %4342  ;;  %4362 = vpow2.f32 %v4101_v27  ;;  %v4107_v16 = vmul.f32 -1.442695, %v219_v45  ;;  %v222_v27 = vld [vmem:[%s5585_s30 + $0x2a8] sm:$0xff]  ;;  %v5877_v45 = vadd.f32 1.0, %v5621_v32 }
  0x8b   : > { %13957 = vst [vmem:[#allocation44_spill] sm:$0xff] %v5843_v54  ;;  %v5846_v60 = vpop.eup %4344  ;;  %4364 = vpow2.f32 %v4102_v40  ;;  %v4108_v54 = vmul.f32 -1.442695, %v220_v2  ;;  %v223_v40 = vld [vmem:[%s5585_s30 + $0x2b0] sm:$0xff]  ;;  %v4110_v51 = vmul.f32 -1.442695, %v222_v27 }
  0x8c   : > { %13958 = vst [vmem:[#allocation45_spill] sm:$0xff] %v5846_v60  ;;  %v5849_v7 = vpop.eup %4346  ;;  %4366 = vpow2.f32 %v4103_v46  ;;  %v4111_v2 = vmul.f32 -1.442695, %v223_v40  ;;  %v5874_v27 = vadd.f32 1.0, %v5618_v29  ;;  %v5882_v40 = vld [vmem:[%s5585_s30 + $0x2c8] sm:$0xff]  ;;  %v5894_v29 = vld [vmem:[%s5585_s30 + $0x2d0] sm:$0xff] }
  0x8d   : > { %v5852_v13 = vpop.eup %4348  ;;  %4368 = vpow2.f32 %v4104_v31  ;;  %v224_v31 = vld [vmem:[%s5585_s30 + $0x2b8] sm:$0xff]  ;;  %13963 = vst [vmem:[#allocation50_spill] sm:$0xff] %v5882_v40  ;;  %13965 = vst [vmem:[#allocation52_spill] sm:$0xff] %v5894_v29  ;;  %v4114_v32 = vmul.f32 -1.442695, %v5882_v40  ;;  %v5898_v46 = vadd.f32 1.0, %v5630_v41 }
  0x8e   : > { %13959 = vst [vmem:[#allocation46_spill] sm:$0xff] %v5852_v13  ;;  %v5855_v37 = vpop.eup %4350  ;;  %4370 = vpow2.f32 %v4105_v25  ;;  %v5918_v41 = vld [vmem:[%s5585_s30 + $0x2e0] sm:$0xff]  ;;  %v5934_v40 = vadd.f32 1.0, %v5648_v59 }
  0x8f   : > { %13960 = vst [vmem:[#allocation47_spill] sm:$0xff] %v5855_v37  ;;  %v5858_v60 = vpop.eup %4352  ;;  %4372 = vpow2.f32 %v4106_v21  ;;  %v4112_v21 = vmul.f32 -1.442695, %v224_v31  ;;  %v5886_v37 = vadd.f32 1.0, %v5624_v35  ;;  %13966 = vst [vmem:[#allocation53_spill] sm:$0xff] %v5898_v46  ;;  %v5906_v35 = vld [vmem:[%s5585_s30 + $0x2d8] sm:$0xff] }
  0x90   : > { %13961 = vst [vmem:[#allocation48_spill] sm:$0xff] %v5858_v60  ;;  %v5863_v13 = vpop.eup %4354  ;;  %4374 = vpow2.f32 %v4107_v16  ;;  %v5871_v60 = vld [vmem:[%s5585_s30 + $0x2c0] sm:$0xff]  ;;  %13968 = vst [vmem:[#allocation55_spill] sm:$0xff] %v5906_v35 }
  0x91   : > { %v5868_v12 = vpop.eup %4356  ;;  %13962 = vst [vmem:[#allocation49_spill] sm:$0xff] %v5871_v60  ;;  %4376 = vpow2.f32 %v4108_v54  ;;  %v4113_v25 = vmul.f32 -1.442695, %v5871_v60  ;;  %v5889_v54 = vadd.f32 1.0, %v5627_v38  ;;  %v4115_v38 = vmul.f32 -1.442695, %v5894_v29 }
  0x92   : > { %v5879_v16 = vpop.eup %4358  ;;  %4378 = vpow2.f32 %v4109_v22  ;;  %v5901_v22 = vadd.f32 1.0, %v5633_v44  ;;  %13971 = vst [vmem:[#allocation58_spill] sm:$0xff] %v5918_v41  ;;  %v4116_v44 = vmul.f32 -1.442695, %v5906_v35  ;;  %13975 = vst [vmem:[#allocation62_spill] sm:$0xff] %v5934_v40  ;;  %v5946_v60 = vadd.f32 1.0, %v5654_v4 }
  0x93   : > { %13964 = vst [vmem:[#allocation51_spill] sm:$0xff] %v5889_v54  ;;  %v5891_v31 = vpop.eup %4360  ;;  %4380 = vpow2.f32 %v4110_v51  ;;  %v5913_v51 = vadd.f32 1.0, %v5639_v50  ;;  %v4117_v50 = vmul.f32 -1.442695, %v5918_v41  ;;  %v5954_v41 = vld [vmem:[%s5585_s30 + $0x2f8] sm:$0xff]  ;;  %v6068_v40 = vld [vmem:[%s5585_s30 + $0x380] sm:$0xff] }
  0x94   : > { %13967 = vst [vmem:[#allocation54_spill] sm:$0xff] %v5901_v22  ;;  %v5903_v5 = vpop.eup %4362  ;;  %4382 = vpow2.f32 %v4111_v2  ;;  %v5925_v2 = vadd.f32 1.0, %v5645_v56  ;;  %v4118_v56 = vmul.f32 -1.442695, %v5930_v47  ;;  %13978 = vst [vmem:[#allocation65_spill] sm:$0xff] %v5946_v60  ;;  %v5966_v47 = vld [vmem:[%s5585_s30 + $0x300] sm:$0xff] }
  0x95   : > { %13970 = vst [vmem:[#allocation57_spill] sm:$0xff] %v5913_v51  ;;  %v5915_v1 = vpop.eup %4364  ;;  %4384 = vpow2.f32 %v4112_v21  ;;  %v5937_v21 = vadd.f32 1.0, %v5651_v62  ;;  %13980 = vst [vmem:[#allocation67_spill] sm:$0xff] %v5954_v41  ;;  %v4119_v62 = vmul.f32 -1.442695, %v5942_v53  ;;  %v5981_v53 = vld [vmem:[%s5585_s30 + $0x310] sm:$0xff] }
  0x96   : > { %13973 = vst [vmem:[#allocation60_spill] sm:$0xff] %v5925_v2  ;;  %v5927_v29 = vpop.eup %4366  ;;  %4386 = vpow2.f32 %v4113_v25  ;;  %v5949_v25 = vadd.f32 1.0, %v5657_v8  ;;  %13983 = vst [vmem:[#allocation70_spill] sm:$0xff] %v5966_v47  ;;  %v4120_v8 = vmul.f32 -1.442695, %v5954_v41  ;;  %v5985_v41 = vadd.f32 1.0, %v5672_v23 }
  0x97   : > { %13976 = vst [vmem:[#allocation63_spill] sm:$0xff] %v5937_v21  ;;  %v5939_v35 = vpop.eup %4368  ;;  %4388 = vpow2.f32 %v4114_v32  ;;  %v5958_v21 = vadd.f32 1.0, %v5660_v11  ;;  %v5961_v32 = vadd.f32 1.0, %v5663_v14  ;;  %v5978_v14 = vld [vmem:[%s5585_s30 + $0x308] sm:$0xff]  ;;  %13987 = vst [vmem:[#allocation74_spill] sm:$0xff] %v5981_v53  ;;  %v6003_v23 = vadd.f32 1.0, %v5681_v34 }
  0x98   : > { %13979 = vst [vmem:[#allocation66_spill] sm:$0xff] %v5949_v25  ;;  %v5951_v59 = vpop.eup %4370  ;;  %4390 = vpow2.f32 %v4115_v38  ;;  %v5970_v25 = vadd.f32 1.0, %v5666_v17  ;;  %v5973_v38 = vadd.f32 1.0, %v5669_v20  ;;  %13986 = vst [vmem:[#allocation73_spill] sm:$0xff] %v5978_v14  ;;  %v5988_v17 = vadd.f32 1.0, %v5675_v26  ;;  %v6050_v60 = vld [vmem:[%s5585_s30 + $0x368] sm:$0xff] }
  0x99   : > { %13981 = vst [vmem:[#allocation68_spill] sm:$0xff] %v5958_v21  ;;  %13982 = vst [vmem:[#allocation69_spill] sm:$0xff] %v5961_v32  ;;  %v5963_v4 = vpop.eup %4372  ;;  %4392 = vpow2.f32 %v4116_v44  ;;  %v4121_v44 = vmul.f32 -1.442695, %v5966_v47  ;;  %v6000_v47 = vadd.f32 1.0, %v5678_v30  ;;  %v6014_v32 = vld [vmem:[%s5585_s30 + $0x338] sm:$0xff] }
  0x9a   : > { %13984 = vst [vmem:[#allocation71_spill] sm:$0xff] %v5970_v25  ;;  %13985 = vst [vmem:[#allocation72_spill] sm:$0xff] %v5973_v38  ;;  %v5975_v11 = vpop.eup %4374  ;;  %4394 = vpow2.f32 %v4117_v50  ;;  %v5993_v38 = vld [vmem:[%s5585_s30 + $0x318] sm:$0xff]  ;;  %v5996_v25 = vld [vmem:[%s5585_s30 + $0x320] sm:$0xff]  ;;  %v4122_v50 = vmul.f32 -1.442695, %v5978_v14 }
  0x9b   : > { %13988 = vst [vmem:[#allocation75_spill] sm:$0xff] %v5985_v41  ;;  %13989 = vst [vmem:[#allocation76_spill] sm:$0xff] %v5988_v17  ;;  %v5990_v20 = vpop.eup %4376  ;;  %4396 = vpow2.f32 %v4118_v56  ;;  %v6008_v17 = vld [vmem:[%s5585_s30 + $0x328] sm:$0xff]  ;;  %v6011_v41 = vld [vmem:[%s5585_s30 + $0x330] sm:$0xff]  ;;  %v4123_v56 = vmul.f32 -1.442695, %v5981_v53 }
  0x9c   : > { %13990 = vst [vmem:[#allocation77_spill] sm:$0xff] %v5993_v38  ;;  %13991 = vst [vmem:[#allocation78_spill] sm:$0xff] %v5996_v25  ;;  %v6005_v26 = vpop.eup %4378  ;;  %4398 = vpow2.f32 %v4119_v62  ;;  %v6018_v30 = vadd.f32 1.0, %v5684_v39  ;;  %v6021_v34 = vadd.f32 1.0, %v5687_v43  ;;  %v6032_v21 = vld [vmem:[%s5585_s30 + $0x350] sm:$0xff]  ;;  %v6036_v39 = vadd.f32 1.0, %v5690_v48 }
  0x9d   : > { %13992 = vst [vmem:[#allocation79_spill] sm:$0xff] %v6000_v47  ;;  %13993 = vst [vmem:[#allocation80_spill] sm:$0xff] %v6003_v23  ;;  %v6023_v14 = vpop.eup %4380  ;;  %v6026_v23 = vld [vmem:[%s5585_s30 + $0x340] sm:$0xff]  ;;  %v6029_v47 = vld [vmem:[%s5585_s30 + $0x348] sm:$0xff]  ;;  %4400 = vpow2.f32 %v4120_v8  ;;  %v4124_v62 = vmul.f32 -1.442695, %v5993_v38 }
  0x9e   : > { %13994 = vst [vmem:[#allocation81_spill] sm:$0xff] %v6005_v26  ;;  %13995 = vst [vmem:[#allocation82_spill] sm:$0xff] %v6008_v17  ;;  %v6039_v43 = vadd.f32 1.0, %v5693_v52  ;;  %v6041_v53 = vpop.eup %4382  ;;  %4402 = vpow2.f32 %v4121_v44  ;;  %v4125_v8 = vmul.f32 -1.442695, %v5996_v25  ;;  %v6054_v48 = vadd.f32 1.0, %v5696_v57 }
  0x9f   : > { %13996 = vst [vmem:[#allocation83_spill] sm:$0xff] %v6011_v41  ;;  %13997 = vst [vmem:[#allocation84_spill] sm:$0xff] %v6014_v32  ;;  %v6057_v52 = vadd.f32 1.0, %v5699_v61  ;;  %v6059_v38 = vpop.eup %4384  ;;  %4404 = vpow2.f32 %v4122_v50  ;;  %v4126_v44 = vmul.f32 -1.442695, %v6008_v17  ;;  %v6082_v2 = vld [vmem:[%s5585_s30 + $0x398] sm:$0xff] }
  0xa0   : > { %13998 = vst [vmem:[#allocation85_spill] sm:$0xff] %v6018_v30  ;;  %13999 = vst [vmem:[#allocation86_spill] sm:$0xff] %v6021_v34  ;;  %v6044_v34 = vld [vmem:[%s5585_s30 + $0x358] sm:$0xff]  ;;  %v6047_v30 = vld [vmem:[%s5585_s30 + $0x360] sm:$0xff]  ;;  %v4127_v57 = vmul.f32 -1.442695, %v6011_v41  ;;  %v6073_v61 = vpop.eup %4386  ;;  %4406 = vpow2.f32 %v4123_v56 }
  0xa1   : > { %14000 = vst [vmem:[#allocation87_spill] sm:$0xff] %v6023_v14  ;;  %14001 = vst [vmem:[#allocation88_spill] sm:$0xff] %v6026_v23  ;;  %v4128_v25 = vmul.f32 -1.442695, %v6014_v32  ;;  %v4129_v50 = vmul.f32 -1.442695, %v6026_v23  ;;  %v6087_v0 = vpop.eup %4388  ;;  %4408 = vpow2.f32 %v4124_v62 }
  0xa2   : > { %14002 = vst [vmem:[#allocation89_spill] sm:$0xff] %v6029_v47  ;;  %14003 = vst [vmem:[#allocation90_spill] sm:$0xff] %v6032_v21  ;;  %v4130_v17 = vmul.f32 -1.442695, %v6029_v47  ;;  %v4131_v41 = vmul.f32 -1.442695, %v6032_v21  ;;  %4410 = vpow2.f32 %v4125_v8 }
  0xa3   : > { %14004 = vst [vmem:[#allocation91_spill] sm:$0xff] %v6036_v39  ;;  %14005 = vst [vmem:[#allocation92_spill] sm:$0xff] %v6039_v43  ;;  %v6062_v43 = vld [vmem:[%s5585_s30 + $0x370] sm:$0xff]  ;;  %v6065_v39 = vld [vmem:[%s5585_s30 + $0x378] sm:$0xff]  ;;  %v4132_v56 = vmul.f32 -1.442695, %v6044_v34  ;;  %4412 = vpow2.f32 %v4126_v44 }
  0xa4   : > { %14006 = vst [vmem:[#allocation93_spill] sm:$0xff] %v6041_v53  ;;  %14007 = vst [vmem:[#allocation94_spill] sm:$0xff] %v6044_v34  ;;  %v6090_v32 = vld [vmem:[%s5585_s30 + $0x3a0] sm:$0xff]  ;;  %v6096_v51 = vld [vmem:[%s5585_s30 + $0x3b0] sm:$0xff]  ;;  %v4133_v23 = vmul.f32 -1.442695, %v6047_v30  ;;  %4414 = vpow2.f32 %v4127_v57 }
  0xa5   : > { %14008 = vst [vmem:[#allocation95_spill] sm:$0xff] %v6047_v30  ;;  %14009 = vst [vmem:[#allocation96_spill] sm:$0xff] %v6050_v60  ;;  %v4134_v47 = vmul.f32 -1.442695, %v6050_v60  ;;  %v6104_v21 = vld [vmem:[%s5585_s30 + $0x3b8] sm:$0xff]  ;;  %v259_v60 = vld [vmem:[%s5585_s30 + $0x3d0] sm:$0xff]  ;;  %4416 = vpow2.f32 %v4128_v25 }
  0xa6   : > { %14010 = vst [vmem:[#allocation97_spill] sm:$0xff] %v6054_v48  ;;  %14011 = vst [vmem:[#allocation98_spill] sm:$0xff] %v6057_v52  ;;  %v6076_v52 = vld [vmem:[%s5585_s30 + $0x388] sm:$0xff]  ;;  %v6079_v48 = vld [vmem:[%s5585_s30 + $0x390] sm:$0xff]  ;;  %v4135_v53 = vmul.f32 -1.442695, %v6062_v43  ;;  %4418 = vpow2.f32 %v4129_v50 }
  0xa7   : > { %14012 = vst [vmem:[#allocation99_spill] sm:$0xff] %v6059_v38  ;;  %14013 = vst [vmem:[#allocation100_spill] sm:$0xff] %v6062_v43  ;;  %v6101_v38 = vpop.eup %4390  ;;  %v4136_v62 = vmul.f32 -1.442695, %v6065_v39  ;;  %v4137_v34 = vmul.f32 -1.442695, %v6068_v40  ;;  %4420 = vpow2.f32 %v4130_v17 }
  0xa8   : > { %14014 = vst [vmem:[#allocation101_spill] sm:$0xff] %v6065_v39  ;;  %14015 = vst [vmem:[#allocation102_spill] sm:$0xff] %v6068_v40  ;;  %v6113_v30 = vpop.eup %4392  ;;  %v6117_v22 = vld [vmem:[%s5585_s30 + $0x3d8] sm:$0xff]  ;;  %v4138_v14 = vmul.f32 -1.442695, %v6076_v52  ;;  %v6130_v39 = vld [vmem:[%s5585_s30 + $0x3e8] sm:$0xff]  ;;  %4422 = vpow2.f32 %v4131_v41 }
  0xa9   : > { %14016 = vst [vmem:[#allocation103_spill] sm:$0xff] %v6073_v61  ;;  %14017 = vst [vmem:[#allocation104_spill] sm:$0xff] %v6076_v52  ;;  %v6093_v61 = vld [vmem:[%s5585_s30 + $0x3a8] sm:$0xff]  ;;  %v6122_v46 = vmul.f32 -1.442695, %v6079_v48  ;;  %v6127_v43 = vpop.eup %4394  ;;  %v263_v40 = vld [vmem:[%s5585_s30 + $0x3f0] sm:$0xff]  ;;  %4424 = vpow2.f32 %v4132_v56 }
  0xaa   : > { %14018 = vst [vmem:[#allocation105_spill] sm:$0xff] %v6079_v48  ;;  %14019 = vst [vmem:[#allocation106_spill] sm:$0xff] %v6082_v2  ;;  %v6125_v8 = vmul.f32 -1.442695, %v6082_v2  ;;  %v6134_v26 = vld [vmem:[%s5585_s30 + $0x3f8] sm:$0xff]  ;;  %v6145_v52 = vpop.eup %4396  ;;  %v6183_v50 = vadd.f32 1.0, %v5708_v15  ;;  %4426 = vpow2.f32 %v4133_v23 }
  0xab   : > { %14020 = vst [vmem:[#allocation107_spill] sm:$0xff] %v6087_v0  ;;  %14021 = vst [vmem:[#allocation108_spill] sm:$0xff] %v6090_v32  ;;  %v257_v0 = vld [vmem:[%s5585_s30 + $0x3c0] sm:$0xff]  ;;  %v6140_v44 = vmul.f32 -1.442695, %v6093_v61  ;;  %v6155_v57 = vpop.eup %4398  ;;  %v6194_v41 = vadd.f32 1.0, %v5725_v28  ;;  %4428 = vpow2.f32 %v4134_v47 }
  0xac   : > { %14022 = vst [vmem:[#allocation109_spill] sm:$0xff] %v6093_v61  ;;  %14023 = vst [vmem:[#allocation110_spill] sm:$0xff] %v6096_v51  ;;  %v6143_v48 = vmul.f32 -1.442695, %v6096_v51  ;;  %v6148_v2 = vmul.f32 -1.442695, %v6104_v21  ;;  %4430 = vpow2.f32 %v4135_v53 }
  0xad   : > { %14024 = vst [vmem:[#allocation111_spill] sm:$0xff] %v6101_v38  ;;  %14025 = vst [vmem:[#allocation112_spill] sm:$0xff] %v6104_v21  ;;  %v261_v38 = vld [vmem:[%s5585_s30 + $0x3e0] sm:$0xff]  ;;  %v6153_v54 = vmul.f32 -1.442695, %v6108_v3  ;;  %v6202_v15 = vadd.f32 1.0, %v5737_v42 }
  0xae   : > { %14027 = vst [vmem:[#allocation114_spill] sm:$0xff] %v6113_v30  ;;  %14028 = vst [vmem:[#allocation115_spill] sm:$0xff] %v6117_v22  ;;  %v6137_v30 = vmul.f32 -1.442695, %v6090_v32  ;;  %v6157_v32 = vmul.f32 -1.442695, %v259_v60 }
  0xaf   : > { %14029 = vst [vmem:[#allocation116_spill] sm:$0xff] %v6127_v43  ;;  %14030 = vst [vmem:[#allocation117_spill] sm:$0xff] %v6130_v39  ;;  %v6150_v43 = vmul.f32 -1.442695, %v257_v0  ;;  %v6160_v61 = vmul.f32 -1.442695, %v6117_v22 }
  0xb0   : > { %14031 = vst [vmem:[#allocation118_spill] sm:$0xff] %v6134_v26  ;;  %14032 = vst [vmem:[#allocation119_spill] sm:$0xff] %v6145_v52  ;;  %v6162_v51 = vmul.f32 -1.442695, %v261_v38  ;;  %v6164_v52 = vpop.eup %4400  ;;  %v6167_v25 = vmul.f32 -1.442695, %v6130_v39  ;;  %4432 = vpow2.f32 %v4136_v62 }
  0xb1   : > { %v6169_v0 = vmul.f32 -1.442695, %v263_v40  ;;  %v6172_v3 = vmul.f32 -1.442695, %v6134_v26  ;;  %v6174_v21 = vpop.eup %4402  ;;  %v6177_v60 = vadd.f32 1.0, %v5702_v6  ;;  %v6180_v38 = vadd.f32 1.0, %v5705_v10 }
  0xb2   : > { %v6185_v17 = vpop.eup %4404  ;;  %v6188_v40 = vadd.f32 1.0, %v5713_v19  ;;  %v6191_v26 = vadd.f32 1.0, %v5719_v24  ;;  %v6199_v10 = vadd.f32 1.0, %v5731_v36  ;;  %14033 = vst [vmem:[#allocation120_spill] sm:$0xff] %v6202_v15  ;;  %v6205_v56 = vadd.f32 1.0, %v5743_v49 }
  0xb3   : > { %v6196_v6 = vpop.eup %4406  ;;  %v6210_v24 = vadd.f32 1.0, %v5749_v55  ;;  %v6213_v28 = vadd.f32 1.0, %v5755_v63  ;;  %v6216_v23 = vadd.f32 1.0, %v5761_v9  ;;  %v6221_v42 = vadd.f32 1.0, %v5765_v18  ;;  %v14041_v63 = vld [vmem:[#allocation21_spill] sm:$0xff]  ;;  %v14043_v9 = vld [vmem:[#allocation22_spill] sm:$0xff] }
  0xb4   : > { %14034 = vst [vmem:[#allocation121_spill] sm:$0xff] %v6205_v56  ;;  %v6207_v19 = vpop.eup %4408  ;;  %v6224_v49 = vadd.f32 1.0, %v5768_v33  ;;  %v6227_v47 = vadd.f32 1.0, %v5771_v58  ;;  %v6232_v39 = vadd.f32 1.0, %v14041_v63  ;;  %v6235_v22 = vadd.f32 1.0, %v14043_v9  ;;  %v14047_v33 = vld [vmem:[#allocation24_spill] sm:$0xff] }
  0xb5   : > { %14035 = vst [vmem:[#allocation122_spill] sm:$0xff] %v6210_v24  ;;  %14036 = vst [vmem:[#allocation123_spill] sm:$0xff] %v6213_v28  ;;  %v6218_v36 = vpop.eup %4410  ;;  %4434 = vpow2.f32 %v4137_v34  ;;  %v14049_v58 = vld [vmem:[#allocation25_spill] sm:$0xff]  ;;  %v14053_v9 = vld [vmem:[#allocation27_spill] sm:$0xff] }
  0xb6   : > { %14037 = vst [vmem:[#allocation124_spill] sm:$0xff] %v6216_v23  ;;  %14038 = vst [vmem:[#allocation125_spill] sm:$0xff] %v6221_v42  ;;  %v6229_v55 = vpop.eup %4412  ;;  %v14045_v23 = vld [vmem:[#allocation23_spill] sm:$0xff]  ;;  %v14051_v42 = vld [vmem:[#allocation26_spill] sm:$0xff]  ;;  %4436 = vpow2.f32 %v4138_v14 }
  0xb7   : > { %14039 = vst [vmem:[#allocation126_spill] sm:$0xff] %v6224_v49  ;;  %14040 = vst [vmem:[#allocation127_spill] sm:$0xff] %v6227_v47  ;;  %v6238_v53 = vadd.f32 1.0, %v14045_v23  ;;  %v6240_v18 = vpop.eup %4414  ;;  %v6243_v49 = vadd.f32 1.0, %v14047_v33  ;;  %v6246_v47 = vadd.f32 1.0, %v14049_v58  ;;  %v6249_v62 = vadd.f32 1.0, %v14051_v42 }
  0xb8   : > { %14042 = vst [vmem:[#allocation21_spill] sm:$0xff] %v6232_v39  ;;  %14044 = vst [vmem:[#allocation22_spill] sm:$0xff] %v6235_v22  ;;  %v6251_v63 = vpop.eup %4416  ;;  %v6254_v22 = vadd.f32 1.0, %v14053_v9  ;;  %v14055_v23 = vld [vmem:[#allocation28_spill] sm:$0xff]  ;;  %v14057_v39 = vld [vmem:[#allocation29_spill] sm:$0xff]  ;;  %4438 = vpow2.f32 %v6122_v46 }
  0xb9   : > { %14046 = vst [vmem:[#allocation23_spill] sm:$0xff] %v6238_v53  ;;  %14048 = vst [vmem:[#allocation24_spill] sm:$0xff] %v6243_v49  ;;  %v6257_v53 = vadd.f32 1.0, %v14055_v23  ;;  %v6260_v34 = vadd.f32 1.0, %v14057_v39  ;;  %v6262_v33 = vpop.eup %4418  ;;  %v14059_v58 = vld [vmem:[#allocation30_spill] sm:$0xff]  ;;  %v14061_v42 = vld [vmem:[#allocation31_spill] sm:$0xff]  ;;  %4440 = vpow2.f32 %v6125_v8 }
  0xba   : > { %14050 = vst [vmem:[#allocation25_spill] sm:$0xff] %v6246_v47  ;;  %14052 = vst [vmem:[#allocation26_spill] sm:$0xff] %v6249_v62  ;;  %v6266_v47 = vadd.f32 1.0, %v14059_v58  ;;  %v6269_v62 = vadd.f32 1.0, %v14061_v42  ;;  %v14063_v14 = vld [vmem:[#allocation32_spill] sm:$0xff]  ;;  %v6274_v9 = vpop.eup %4420  ;;  %v14065_v23 = vld [vmem:[#allocation33_spill] sm:$0xff]  ;;  %4442 = vpow2.f32 %v6137_v30 }
  0xbb   : > { %14054 = vst [vmem:[#allocation27_spill] sm:$0xff] %v6254_v22  ;;  %14056 = vst [vmem:[#allocation28_spill] sm:$0xff] %v6257_v53  ;;  %v6272_v49 = vadd.f32 1.0, %v14063_v14  ;;  %v6278_v39 = vadd.f32 1.0, %v14065_v23  ;;  %v14069_v46 = vld [vmem:[#allocation35_spill] sm:$0xff]  ;;  %v6286_v58 = vpop.eup %4422  ;;  %v14071_v42 = vld [vmem:[#allocation36_spill] sm:$0xff]  ;;  %4444 = vpow2.f32 %v6140_v44 }
  0xbc   : > { %14058 = vst [vmem:[#allocation29_spill] sm:$0xff] %v6260_v34  ;;  %14060 = vst [vmem:[#allocation30_spill] sm:$0xff] %v6266_v47  ;;  %v14067_v34 = vld [vmem:[#allocation34_spill] sm:$0xff]  ;;  %v6284_v22 = vadd.f32 1.0, %v14069_v46  ;;  %v6290_v14 = vadd.f32 1.0, %v14071_v42  ;;  %v6298_v23 = vpop.eup %4424  ;;  %v14081_v30 = vld [vmem:[#allocation41_spill] sm:$0xff]  ;;  %4446 = vpow2.f32 %v6143_v48 }
  0xbd   : > { %14062 = vst [vmem:[#allocation31_spill] sm:$0xff] %v6269_v62  ;;  %14064 = vst [vmem:[#allocation32_spill] sm:$0xff] %v6272_v49  ;;  %v6281_v53 = vadd.f32 1.0, %v14067_v34  ;;  %v14073_v49 = vld [vmem:[#allocation37_spill] sm:$0xff]  ;;  %v14075_v8 = vld [vmem:[#allocation38_spill] sm:$0xff]  ;;  %v6310_v42 = vpop.eup %4426  ;;  %4448 = vpow2.f32 %v6148_v2  ;;  %v6329_v48 = vadd.f32 1.0, %v5849_v7 }
  0xbe   : > { %14066 = vst [vmem:[#allocation33_spill] sm:$0xff] %v6278_v39  ;;  %14070 = vst [vmem:[#allocation35_spill] sm:$0xff] %v6284_v22  ;;  %v6293_v62 = vadd.f32 1.0, %v14073_v49  ;;  %v6296_v47 = vadd.f32 1.0, %v14075_v8  ;;  %v14077_v34 = vld [vmem:[#allocation39_spill] sm:$0xff]  ;;  %v14079_v22 = vld [vmem:[#allocation40_spill] sm:$0xff]  ;;  %4450 = vpow2.f32 %v6150_v43 }
  0xbf   : > { %14068 = vst [vmem:[#allocation34_spill] sm:$0xff] %v6281_v53  ;;  %14072 = vst [vmem:[#allocation36_spill] sm:$0xff] %v6290_v14  ;;  %v6302_v46 = vadd.f32 1.0, %v14077_v34  ;;  %v6305_v53 = vadd.f32 1.0, %v14079_v22  ;;  %v6308_v39 = vadd.f32 1.0, %v14081_v30  ;;  %v14083_v49 = vld [vmem:[#allocation42_spill] sm:$0xff]  ;;  %v6322_v22 = vpop.eup %4428  ;;  %4452 = vpow2.f32 %v6153_v54 }
  0xc0   : > { %14074 = vst [vmem:[#allocation37_spill] sm:$0xff] %v6293_v62  ;;  %14076 = vst [vmem:[#allocation38_spill] sm:$0xff] %v6296_v47  ;;  %v6314_v8 = vadd.f32 1.0, %v14083_v49  ;;  %v14085_v47 = vld [vmem:[#allocation43_spill] sm:$0xff]  ;;  %v14087_v44 = vld [vmem:[#allocation44_spill] sm:$0xff]  ;;  %4454 = vpow2.f32 %v6157_v32  ;;  %v6378_v32 = vadd.f32 1.0, %v5891_v31 }
  0xc1   : > { %14078 = vst [vmem:[#allocation39_spill] sm:$0xff] %v6302_v46  ;;  %14080 = vst [vmem:[#allocation40_spill] sm:$0xff] %v6305_v53  ;;  %v6317_v62 = vadd.f32 1.0, %v14085_v47  ;;  %v6320_v34 = vadd.f32 1.0, %v14087_v44  ;;  %v14089_v30 = vld [vmem:[#allocation45_spill] sm:$0xff]  ;;  %v14092_v49 = vld [vmem:[#allocation46_spill] sm:$0xff]  ;;  %v6334_v47 = vpop.eup %4430  ;;  %4456 = vpow2.f32 %v6160_v61 }
  0xc2   : > { %14082 = vst [vmem:[#allocation41_spill] sm:$0xff] %v6308_v39  ;;  %14084 = vst [vmem:[#allocation42_spill] sm:$0xff] %v6314_v8  ;;  %v6326_v39 = vadd.f32 1.0, %v14089_v30  ;;  %v6332_v8 = vadd.f32 1.0, %v14092_v49  ;;  %v14094_v44 = vld [vmem:[#allocation47_spill] sm:$0xff]  ;;  %v6344_v30 = vadd.f32 1.0, %v5863_v13  ;;  %v6346_v7 = vpop.eup %4432  ;;  %4458 = vpow2.f32 %v6162_v51 }
  0xc3   : > { %14086 = vst [vmem:[#allocation43_spill] sm:$0xff] %v6317_v62  ;;  %14088 = vst [vmem:[#allocation44_spill] sm:$0xff] %v6320_v34  ;;  %v6338_v34 = vadd.f32 1.0, %v14094_v44  ;;  %v14096_v62 = vld [vmem:[#allocation48_spill] sm:$0xff]  ;;  %v6350_v49 = vadd.f32 1.0, %v5868_v12  ;;  %v6357_v44 = vld [vmem:[%s5585_s30 + $0x28] sm:$0xff]  ;;  %4460 = vpow2.f32 %v6167_v25 }
  0xc4   : > { %14090 = vst [vmem:[#allocation45_spill] sm:$0xff] %v6326_v39  ;;  %14091 = vst [vmem:[#allocation128_spill] sm:$0xff] %v6329_v48  ;;  %v6341_v2 = vadd.f32 1.0, %v14096_v62  ;;  %v6364_v13 = vadd.f32 1.0, %v5879_v16  ;;  %v6367_v54 = vld [vmem:[%s5585_s30 + $0x30] sm:$0xff]  ;;  %v6381_v62 = vld [vmem:[%s5585_s30 + $0x40] sm:$0xff]  ;;  %4462 = vpow2.f32 %v6169_v0 }
  0xc5   : > { %14093 = vst [vmem:[#allocation46_spill] sm:$0xff] %v6332_v8  ;;  %14095 = vst [vmem:[#allocation47_spill] sm:$0xff] %v6338_v34  ;;  %v6353_v8 = vld [vmem:[%s5585_s30 + $0x20] sm:$0xff]  ;;  %v6392_v61 = vadd.f32 1.0, %v5903_v5  ;;  %v6395_v43 = vld [vmem:[%s5585_s30 + $0x50] sm:$0xff]  ;;  %v6406_v51 = vadd.f32 1.0, %v5915_v1  ;;  %4464 = vpow2.f32 %v6172_v3 }
  0xc6   : > { %14097 = vst [vmem:[#allocation48_spill] sm:$0xff] %v6341_v2  ;;  %14098 = vst [vmem:[#allocation129_spill] sm:$0xff] %v6344_v30  ;;  %v6360_v2 = vpop.eup %4434  ;;  %v6409_v12 = vld [vmem:[%s5585_s30 + $0x60] sm:$0xff]  ;;  %v6420_v25 = vadd.f32 1.0, %v5927_v29  ;;  %v6423_v16 = vld [vmem:[%s5585_s30 + $0x70] sm:$0xff]  ;;  %v6434_v0 = vadd.f32 1.0, %v5939_v35  ;;  %4466 = vrcp.f32 %v5874_v27 }
  0xc7   : > { %14099 = vst [vmem:[#allocation130_spill] sm:$0xff] %v6350_v49  ;;  %14100 = vst [vmem:[#allocation131_spill] sm:$0xff] %v6353_v8  ;;  %v6371_v49 = vld [vmem:[%s5585_s30 + $0x38] sm:$0xff]  ;;  %v6374_v30 = vpop.eup %4436  ;;  %v6437_v31 = vld [vmem:[%s5585_s30 + $0x80] sm:$0xff]  ;;  %v6447_v5 = vadd.f32 1.0, %v5951_v59  ;;  %v6461_v1 = vadd.f32 1.0, %v5963_v4  ;;  %4468 = vrcp.f32 %v5877_v45 }
  0xc8   : > { %14101 = vst [vmem:[#allocation132_spill] sm:$0xff] %v6357_v44  ;;  %14102 = vst [vmem:[#allocation133_spill] sm:$0xff] %v6364_v13  ;;  %v6385_v13 = vld [vmem:[%s5585_s30 + $0x48] sm:$0xff]  ;;  %v6388_v34 = vpop.eup %4438  ;;  %v6451_v3 = vld [vmem:[%s5585_s30 + $0x90] sm:$0xff]  ;;  %v6475_v29 = vadd.f32 1.0, %v5975_v11  ;;  %4470 = vrcp.f32 %v5886_v37  ;;  %v6489_v35 = vadd.f32 1.0, %v5990_v20 }
  0xc9   : > { %14103 = vst [vmem:[#allocation134_spill] sm:$0xff] %v6367_v54  ;;  %14104 = vst [vmem:[#allocation135_spill] sm:$0xff] %v6371_v49  ;;  %v6402_v48 = vpop.eup %4440  ;;  %v6465_v59 = vld [vmem:[%s5585_s30 + $0xa0] sm:$0xff]  ;;  %v6479_v4 = vld [vmem:[%s5585_s30 + $0xb0] sm:$0xff] }
  0xca   : > { %14105 = vst [vmem:[#allocation136_spill] sm:$0xff] %v6378_v32  ;;  %14106 = vst [vmem:[#allocation137_spill] sm:$0xff] %v6381_v62  ;;  %v6399_v32 = vld [vmem:[%s5585_s30 + $0x58] sm:$0xff]  ;;  %v6416_v39 = vpop.eup %4442  ;;  %v6493_v11 = vld [vmem:[%s5585_s30 + $0xc0] sm:$0xff] }
  0xcb   : > { %14107 = vst [vmem:[#allocation138_spill] sm:$0xff] %v6385_v13  ;;  %14108 = vst [vmem:[#allocation139_spill] sm:$0xff] %v6392_v61  ;;  %v6413_v61 = vld [vmem:[%s5585_s30 + $0x68] sm:$0xff]  ;;  %v6430_v53 = vpop.eup %4444  ;;  %v14141_v27 = vld [vmem:[#allocation81_spill] sm:$0xff] }
  0xcc   : > { %14109 = vst [vmem:[#allocation140_spill] sm:$0xff] %v6395_v43  ;;  %14110 = vst [vmem:[#allocation141_spill] sm:$0xff] %v6399_v32  ;;  %v6444_v46 = vpop.eup %4446  ;;  %v6503_v24 = vadd.f32 1.0, %v14141_v27  ;;  %v6507_v20 = vld [vmem:[%s5585_s30 + $0xd0] sm:$0xff]  ;;  %v14147_v45 = vld [vmem:[#allocation87_spill] sm:$0xff] }
  0xcd   : > { %14111 = vst [vmem:[#allocation142_spill] sm:$0xff] %v6402_v48  ;;  %14112 = vst [vmem:[#allocation143_spill] sm:$0xff] %v6406_v51  ;;  %v6427_v51 = vld [vmem:[%s5585_s30 + $0x78] sm:$0xff]  ;;  %v6458_v14 = vpop.eup %4448  ;;  %v6517_v56 = vadd.f32 1.0, %v14147_v45  ;;  %v6521_v27 = vld [vmem:[%s5585_s30 + $0xe0] sm:$0xff] }
  0xce   : > { %14113 = vst [vmem:[#allocation144_spill] sm:$0xff] %v6409_v12  ;;  %14114 = vst [vmem:[#allocation145_spill] sm:$0xff] %v6413_v61  ;;  %v6472_v28 = vpop.eup %4450  ;;  %v14153_v37 = vld [vmem:[#allocation93_spill] sm:$0xff]  ;;  %v6535_v45 = vld [vmem:[%s5585_s30 + $0xf0] sm:$0xff] }
  0xcf   : > { %14115 = vst [vmem:[#allocation146_spill] sm:$0xff] %v6416_v39  ;;  %14116 = vst [vmem:[#allocation147_spill] sm:$0xff] %v6420_v25  ;;  %v6441_v25 = vld [vmem:[%s5585_s30 + $0x88] sm:$0xff]  ;;  %v6531_v15 = vadd.f32 1.0, %v14153_v37  ;;  %v6549_v37 = vld [vmem:[%s5585_s30 + $0x100] sm:$0xff] }
  0xd0   : > { %14117 = vst [vmem:[#allocation148_spill] sm:$0xff] %v6423_v16  ;;  %14118 = vst [vmem:[#allocation149_spill] sm:$0xff] %v6427_v51  ;;  %v14189_v48 = vld [vmem:[#allocation116_spill] sm:$0xff]  ;;  %v14426_v12 = vld [vmem:[#allocation42_spill] sm:$0xff] }
  0xd1   : > { %14119 = vst [vmem:[#allocation150_spill] sm:$0xff] %v6430_v53  ;;  %14120 = vst [vmem:[#allocation151_spill] sm:$0xff] %v6434_v0  ;;  %v6455_v0 = vld [vmem:[%s5585_s30 + $0x98] sm:$0xff]  ;;  %v14356_v61 = vld [vmem:[#allocation28_spill] sm:$0xff] }
  0xd2   : > { %14121 = vst [vmem:[#allocation152_spill] sm:$0xff] %v6437_v31  ;;  %14122 = vst [vmem:[#allocation153_spill] sm:$0xff] %v6441_v25 }
  0xd3   : > { %14123 = vst [vmem:[#allocation154_spill] sm:$0xff] %v6444_v46  ;;  %14124 = vst [vmem:[#allocation155_spill] sm:$0xff] %v6447_v5  ;;  %v6469_v5 = vld [vmem:[%s5585_s30 + $0xa8] sm:$0xff] }
  0xd4   : > { %14125 = vst [vmem:[#allocation156_spill] sm:$0xff] %v6451_v3  ;;  %14126 = vst [vmem:[#allocation157_spill] sm:$0xff] %v6455_v0  ;;  %v14346_v0 = vld [vmem:[#allocation26_spill] sm:$0xff] }
  0xd5   : > { %14127 = vst [vmem:[#allocation158_spill] sm:$0xff] %v6458_v14  ;;  %14128 = vst [vmem:[#allocation159_spill] sm:$0xff] %v6461_v1  ;;  %v6483_v1 = vld [vmem:[%s5585_s30 + $0xb8] sm:$0xff]  ;;  %v6486_v14 = vpop.eup %4452 }
  0xd6   : > { %14129 = vst [vmem:[#allocation160_spill] sm:$0xff] %v6465_v59  ;;  %14130 = vst [vmem:[#allocation161_spill] sm:$0xff] %v6469_v5  ;;  %v6500_v46 = vpop.eup %4454  ;;  %v7006_v5 = vld [vmem:[%s5585_s30 + $0x2a0] sm:$0xff]  ;;  %v7010_v59 = vld [vmem:[%s5585_s30 + $0x2a8] sm:$0xff] }
  0xd7   : > { %14131 = vst [vmem:[#allocation162_spill] sm:$0xff] %v6472_v28  ;;  %14132 = vst [vmem:[#allocation163_spill] sm:$0xff] %v6475_v29  ;;  %v14137_v28 = vld [vmem:[#allocation51_spill] sm:$0xff]  ;;  %v6514_v53 = vpop.eup %4456 }
  0xd8   : > { %14133 = vst [vmem:[#allocation164_spill] sm:$0xff] %v6479_v4  ;;  %14134 = vst [vmem:[#allocation165_spill] sm:$0xff] %v6483_v1  ;;  %4472 = vrcp.f32 %v14137_v28  ;;  %v6497_v29 = vld [vmem:[%s5585_s30 + $0xc8] sm:$0xff]  ;;  %v6528_v39 = vpop.eup %4458 }
  0xd9   : > { %14135 = vst [vmem:[#allocation166_spill] sm:$0xff] %v6486_v14  ;;  %14136 = vst [vmem:[#allocation167_spill] sm:$0xff] %v6489_v35  ;;  %v14143_v14 = vld [vmem:[#allocation53_spill] sm:$0xff]  ;;  %v14159_v28 = vld [vmem:[#allocation99_spill] sm:$0xff] }
  0xda   : > { %14138 = vst [vmem:[#allocation51_spill] sm:$0xff] %v6493_v11  ;;  %14139 = vst [vmem:[#allocation168_spill] sm:$0xff] %v6497_v29  ;;  %4474 = vrcp.f32 %v14143_v14  ;;  %v6511_v35 = vld [vmem:[%s5585_s30 + $0xd8] sm:$0xff]  ;;  %v14165_v14 = vld [vmem:[#allocation103_spill] sm:$0xff] }
  0xdb   : > { %14140 = vst [vmem:[#allocation169_spill] sm:$0xff] %v6500_v46  ;;  %14142 = vst [vmem:[#allocation81_spill] sm:$0xff] %v6503_v24  ;;  %v14149_v46 = vld [vmem:[#allocation54_spill] sm:$0xff]  ;;  %v6525_v24 = vld [vmem:[%s5585_s30 + $0xe8] sm:$0xff] }
  0xdc   : > { %14144 = vst [vmem:[#allocation53_spill] sm:$0xff] %v6507_v20  ;;  %14145 = vst [vmem:[#allocation170_spill] sm:$0xff] %v6511_v35  ;;  %4476 = vrcp.f32 %v14149_v46  ;;  %v14171_v46 = vld [vmem:[#allocation107_spill] sm:$0xff]  ;;  %v6977_v29 = vld [vmem:[%s5585_s30 + $0x278] sm:$0xff] }
  0xdd   : > { %14146 = vst [vmem:[#allocation171_spill] sm:$0xff] %v6514_v53  ;;  %14148 = vst [vmem:[#allocation87_spill] sm:$0xff] %v6517_v56  ;;  %v14155_v53 = vld [vmem:[#allocation56_spill] sm:$0xff]  ;;  %v6539_v56 = vld [vmem:[%s5585_s30 + $0xf8] sm:$0xff] }
  0xde   : > { %14150 = vst [vmem:[#allocation54_spill] sm:$0xff] %v6521_v27  ;;  %14151 = vst [vmem:[#allocation172_spill] sm:$0xff] %v6525_v24  ;;  %4478 = vrcp.f32 %v14155_v53  ;;  %v6542_v27 = vpop.eup %4460  ;;  %v6545_v24 = vadd.f32 1.0, %v14159_v28  ;;  %v6563_v28 = vld [vmem:[%s5585_s30 + $0x110] sm:$0xff]  ;;  %v14177_v53 = vld [vmem:[#allocation111_spill] sm:$0xff] }
  0xdf   : > { %14152 = vst [vmem:[#allocation173_spill] sm:$0xff] %v6528_v39  ;;  %14154 = vst [vmem:[#allocation93_spill] sm:$0xff] %v6531_v15  ;;  %v14161_v39 = vld [vmem:[#allocation57_spill] sm:$0xff]  ;;  %v6553_v15 = vld [vmem:[%s5585_s30 + $0x108] sm:$0xff] }
  0xe0   : > { %14156 = vst [vmem:[#allocation56_spill] sm:$0xff] %v6535_v45  ;;  %14157 = vst [vmem:[#allocation174_spill] sm:$0xff] %v6539_v56  ;;  %4480 = vrcp.f32 %v14161_v39  ;;  %v6556_v45 = vpop.eup %4462  ;;  %v6559_v56 = vadd.f32 1.0, %v14165_v14  ;;  %v6577_v14 = vld [vmem:[%s5585_s30 + $0x120] sm:$0xff]  ;;  %v14335_v20 = vld [vmem:[#allocation24_spill] sm:$0xff] }
  0xe1   : > { %14158 = vst [vmem:[#allocation175_spill] sm:$0xff] %v6542_v27  ;;  %14160 = vst [vmem:[#allocation99_spill] sm:$0xff] %v6545_v24  ;;  %v14167_v27 = vld [vmem:[#allocation59_spill] sm:$0xff]  ;;  %v6567_v24 = vld [vmem:[%s5585_s30 + $0x118] sm:$0xff] }
  0xe2   : > { %14162 = vst [vmem:[#allocation57_spill] sm:$0xff] %v6549_v37  ;;  %14163 = vst [vmem:[#allocation176_spill] sm:$0xff] %v6553_v15  ;;  %4482 = vrcp.f32 %v14167_v27  ;;  %v6570_v37 = vpop.eup %4464  ;;  %v6573_v15 = vadd.f32 1.0, %v14171_v46  ;;  %v6591_v46 = vld [vmem:[%s5585_s30 + $0x130] sm:$0xff]  ;;  %v14183_v39 = vld [vmem:[#allocation114_spill] sm:$0xff]  ;;  %v6615_v27 = vadd.f32 1.0, %v14189_v48 }
  0xe3   : > { %14164 = vst [vmem:[#allocation177_spill] sm:$0xff] %v6556_v45  ;;  %14166 = vst [vmem:[#allocation103_spill] sm:$0xff] %v6559_v56  ;;  %v14173_v45 = vld [vmem:[#allocation60_spill] sm:$0xff]  ;;  %v6581_v56 = vld [vmem:[%s5585_s30 + $0x128] sm:$0xff] }
  0xe4   : > { %14168 = vst [vmem:[#allocation59_spill] sm:$0xff] %v6563_v28  ;;  %14169 = vst [vmem:[#allocation178_spill] sm:$0xff] %v6567_v24  ;;  %4484 = vrcp.f32 %v14173_v45  ;;  %v6584_v28 = vpop.eup %4466  ;;  %v6587_v24 = vadd.f32 1.0, %v14177_v53  ;;  %v6605_v53 = vld [vmem:[%s5585_s30 + $0x140] sm:$0xff]  ;;  %v14206_v48 = vld [vmem:[#allocation69_spill] sm:$0xff] }
  0xe5   : > { %14170 = vst [vmem:[#allocation179_spill] sm:$0xff] %v6570_v37  ;;  %14172 = vst [vmem:[#allocation107_spill] sm:$0xff] %v6573_v15  ;;  %v14179_v37 = vld [vmem:[#allocation62_spill] sm:$0xff]  ;;  %v6595_v15 = vld [vmem:[%s5585_s30 + $0x138] sm:$0xff] }
  0xe6   : > { %14174 = vst [vmem:[#allocation60_spill] sm:$0xff] %v6577_v14  ;;  %14175 = vst [vmem:[#allocation180_spill] sm:$0xff] %v6581_v56  ;;  %4486 = vrcp.f32 %v14179_v37  ;;  %v6598_v14 = vpop.eup %4468  ;;  %v6601_v56 = vadd.f32 1.0, %v14183_v39  ;;  %v6619_v39 = vld [vmem:[%s5585_s30 + $0x150] sm:$0xff]  ;;  %v14197_v45 = vld [vmem:[#allocation66_spill] sm:$0xff] }
  0xe7   : > { %14176 = vst [vmem:[#allocation181_spill] sm:$0xff] %v6584_v28  ;;  %14178 = vst [vmem:[#allocation111_spill] sm:$0xff] %v6587_v24  ;;  %v14185_v28 = vld [vmem:[#allocation63_spill] sm:$0xff]  ;;  %v6981_v11 = vld [vmem:[%s5585_s30 + $0x280] sm:$0xff] }
  0xe8   : > { %14180 = vst [vmem:[#allocation62_spill] sm:$0xff] %v6591_v46  ;;  %14181 = vst [vmem:[#allocation182_spill] sm:$0xff] %v6595_v15  ;;  %4488 = vrcp.f32 %v14185_v28  ;;  %v6609_v24 = vld [vmem:[%s5585_s30 + $0x148] sm:$0xff]  ;;  %v6612_v46 = vpop.eup %4470  ;;  %v6623_v28 = vld [vmem:[%s5585_s30 + $0x158] sm:$0xff]  ;;  %v6678_v15 = vadd.f32 1.0, %v6196_v6 }
  0xe9   : > { %14182 = vst [vmem:[#allocation183_spill] sm:$0xff] %v6598_v14  ;;  %14184 = vst [vmem:[#allocation114_spill] sm:$0xff] %v6601_v56  ;;  %v14191_v14 = vld [vmem:[#allocation65_spill] sm:$0xff]  ;;  %v6626_v37 = vpop.eup %4472  ;;  %v6640_v56 = vadd.f32 1.0, %v6155_v57  ;;  %v6668_v57 = vld [vmem:[%s5585_s30] sm:$0xff] }
  0xea   : > { %14186 = vst [vmem:[#allocation63_spill] sm:$0xff] %v6605_v53  ;;  %14187 = vst [vmem:[#allocation184_spill] sm:$0xff] %v6609_v24  ;;  %4490 = vrcp.f32 %v14191_v14  ;;  %v14195_v53 = vld [vmem:[#allocation119_spill] sm:$0xff]  ;;  %v6637_v24 = vpop.eup %4474  ;;  %v14229_v6 = vld [vmem:[#allocation80_spill] sm:$0xff] }
  0xeb   : > { %14188 = vst [vmem:[#allocation185_spill] sm:$0xff] %v6612_v46  ;;  %14190 = vst [vmem:[#allocation116_spill] sm:$0xff] %v6615_v27  ;;  %v6629_v35 = vadd.f32 1.0, %v14195_v53  ;;  %4492 = vrcp.f32 %v14197_v45  ;;  %v6633_v46 = vld [vmem:[%s5585_s30 + $0x160] sm:$0xff]  ;;  %v6645_v45 = vpop.eup %4476 }
  0xec   : > { %14192 = vst [vmem:[#allocation65_spill] sm:$0xff] %v6619_v39  ;;  %14193 = vst [vmem:[#allocation186_spill] sm:$0xff] %v6623_v28  ;;  %v14202_v39 = vld [vmem:[#allocation68_spill] sm:$0xff]  ;;  %v6648_v28 = vadd.f32 1.0, %v6164_v52  ;;  %v14218_v52 = vld [vmem:[#allocation75_spill] sm:$0xff] }
  0xed   : > { %14194 = vst [vmem:[#allocation187_spill] sm:$0xff] %v6626_v37  ;;  %14196 = vst [vmem:[#allocation119_spill] sm:$0xff] %v6629_v35  ;;  %4494 = vrcp.f32 %v14202_v39  ;;  %v6656_v39 = vadd.f32 1.0, %v6174_v21  ;;  %v14210_v37 = vld [vmem:[#allocation71_spill] sm:$0xff]  ;;  %v6682_v35 = vld [vmem:[%s5585_s30 + $0x10] sm:$0xff] }
  0xee   : > { %14198 = vst [vmem:[#allocation66_spill] sm:$0xff] %v6633_v46  ;;  %14200 = vst [vmem:[#allocation188_spill] sm:$0xff] %v6637_v24  ;;  %4496 = vrcp.f32 %v14206_v48  ;;  %v6664_v48 = vadd.f32 1.0, %v6185_v17  ;;  %v14215_v24 = vld [vmem:[#allocation72_spill] sm:$0xff]  ;;  %v6672_v21 = vld [vmem:[%s5585_s30 + $0x8] sm:$0xff] }
  0xef   : > { %14201 = vst [vmem:[#allocation189_spill] sm:$0xff] %v6640_v56  ;;  %14205 = vst [vmem:[#allocation68_spill] sm:$0xff] %v6645_v45  ;;  %v6653_v56 = vpop.eup %4478  ;;  %4498 = vrcp.f32 %v14210_v37  ;;  %v6692_v45 = vadd.f32 1.0, %v6207_v19  ;;  %v14225_v17 = vld [vmem:[#allocation79_spill] sm:$0xff]  ;;  %v14235_v14 = vld [vmem:[#allocation86_spill] sm:$0xff] }
  0xf0   : > { %14209 = vst [vmem:[#allocation69_spill] sm:$0xff] %v6653_v56  ;;  %v6661_v53 = vpop.eup %4480  ;;  %14214 = vst [vmem:[#allocation190_spill] sm:$0xff] %v6664_v48  ;;  %4500 = vrcp.f32 %v14215_v24  ;;  %v6686_v24 = vld [vmem:[%s5585_s30 + $0x18] sm:$0xff]  ;;  %v14221_v56 = vld [vmem:[#allocation76_spill] sm:$0xff]  ;;  %v6754_v48 = vadd.f32 1.0, %v6286_v58 }
  0xf1   : > { %14213 = vst [vmem:[#allocation71_spill] sm:$0xff] %v6661_v53  ;;  %v6675_v37 = vpop.eup %4482  ;;  %14217 = vst [vmem:[#allocation191_spill] sm:$0xff] %v6678_v15  ;;  %4502 = vrcp.f32 %v14218_v52  ;;  %v6700_v15 = vadd.f32 1.0, %v6218_v36  ;;  %v14232_v53 = vld [vmem:[#allocation85_spill] sm:$0xff]  ;;  %v6746_v36 = vadd.f32 1.0, %v6274_v9  ;;  %v6804_v58 = vld [vmem:[%s5585_s30 + $0x1d0] sm:$0xff] }
  0xf2   : > { %14216 = vst [vmem:[#allocation72_spill] sm:$0xff] %v6675_v37  ;;  %v6689_v27 = vpop.eup %4484  ;;  %14220 = vst [vmem:[#allocation192_spill] sm:$0xff] %v6692_v45  ;;  %4504 = vrcp.f32 %v14221_v56  ;;  %v6708_v56 = vadd.f32 1.0, %v6229_v55  ;;  %v14428_v3 = vld [vmem:[#allocation184_spill] sm:$0xff]  ;;  %v7164_v46 = vld [vmem:[%s5585_s30 + $0x1a0] sm:$0xff] }
  0xf3   : > { %14219 = vst [vmem:[#allocation75_spill] sm:$0xff] %v6689_v27  ;;  %v6697_v52 = vpop.eup %4486  ;;  %14224 = vst [vmem:[#allocation193_spill] sm:$0xff] %v6700_v15  ;;  %4506 = vrcp.f32 %v14225_v17  ;;  %v6716_v17 = vadd.f32 1.0, %v6240_v18  ;;  %v14239_v27 = vld [vmem:[#allocation91_spill] sm:$0xff]  ;;  %v14243_v18 = vld [vmem:[#allocation92_spill] sm:$0xff] }
  0xf4   : > { %14223 = vst [vmem:[#allocation76_spill] sm:$0xff] %v6697_v52  ;;  %v6705_v19 = vpop.eup %4488  ;;  %14228 = vst [vmem:[#allocation194_spill] sm:$0xff] %v6708_v56  ;;  %4508 = vrcp.f32 %v14229_v6  ;;  %v6724_v6 = vadd.f32 1.0, %v6251_v63  ;;  %v6739_v52 = vld [vmem:[%s5585_s30 + $0x1b8] sm:$0xff]  ;;  %v7017_v56 = vld [vmem:[%s5585_s30 + $0x2b0] sm:$0xff] }
  0xf5   : > { %14227 = vst [vmem:[#allocation79_spill] sm:$0xff] %v6705_v19  ;;  %v6713_v37 = vpop.eup %4490  ;;  %14231 = vst [vmem:[#allocation195_spill] sm:$0xff] %v6716_v17  ;;  %4510 = vrcp.f32 %v14232_v53  ;;  %v6728_v19 = vld [vmem:[%s5585_s30 + $0x1b0] sm:$0xff]  ;;  %v6735_v53 = vadd.f32 1.0, %v6262_v33  ;;  %v14246_v63 = vld [vmem:[#allocation97_spill] sm:$0xff]  ;;  %v6784_v33 = vadd.f32 1.0, %v6322_v22 }
  0xf6   : > { %14230 = vst [vmem:[#allocation80_spill] sm:$0xff] %v6713_v37  ;;  %v6721_v55 = vpop.eup %4492  ;;  %14234 = vst [vmem:[#allocation196_spill] sm:$0xff] %v6724_v6  ;;  %4512 = vrcp.f32 %v14235_v14  ;;  %v14422_v15 = vld [vmem:[#allocation180_spill] sm:$0xff] }
  0xf7   : > { %14233 = vst [vmem:[#allocation85_spill] sm:$0xff] %v6721_v55  ;;  %14236 = vst [vmem:[#allocation86_spill] sm:$0xff] %v6728_v19  ;;  %v6732_v37 = vpop.eup %4494  ;;  %4514 = vrcp.f32 %v14239_v27 }
  0xf8   : > { %14237 = vst [vmem:[#allocation197_spill] sm:$0xff] %v6732_v37  ;;  %14238 = vst [vmem:[#allocation198_spill] sm:$0xff] %v6735_v53  ;;  %v6743_v55 = vpop.eup %4496  ;;  %4516 = vrcp.f32 %v14243_v18  ;;  %v6762_v18 = vadd.f32 1.0, %v6298_v23  ;;  %v14249_v37 = vld [vmem:[#allocation98_spill] sm:$0xff] }
  0xf9   : > { %14240 = vst [vmem:[#allocation91_spill] sm:$0xff] %v6739_v52  ;;  %14241 = vst [vmem:[#allocation199_spill] sm:$0xff] %v6743_v55  ;;  %v6751_v27 = vpop.eup %4498  ;;  %4518 = vrcp.f32 %v14246_v63  ;;  %v6773_v63 = vadd.f32 1.0, %v6310_v42  ;;  %v6777_v55 = vld [vmem:[%s5585_s30 + $0x1c8] sm:$0xff]  ;;  %v6822_v42 = vadd.f32 1.0, %v6374_v30 }
  0xfa   : > { %14242 = vst [vmem:[#allocation200_spill] sm:$0xff] %v6746_v36  ;;  %14244 = vst [vmem:[#allocation92_spill] sm:$0xff] %v6751_v27  ;;  %v6759_v9 = vpop.eup %4500  ;;  %4520 = vrcp.f32 %v14249_v37  ;;  %v6766_v36 = vld [vmem:[%s5585_s30 + $0x1c0] sm:$0xff]  ;;  %v6815_v37 = vld [vmem:[%s5585_s30 + $0x1d8] sm:$0xff] }
  0xfb   : > { %14245 = vst [vmem:[#allocation201_spill] sm:$0xff] %v6754_v48  ;;  %14247 = vst [vmem:[#allocation97_spill] sm:$0xff] %v6759_v9  ;;  %v6770_v27 = vpop.eup %4502  ;;  %4522 = vrcp.f32 %v6177_v60  ;;  %v14278_v9 = vld [vmem:[#allocation121_spill] sm:$0xff] }
  0xfc   : > { %14248 = vst [vmem:[#allocation202_spill] sm:$0xff] %v6762_v18  ;;  %14250 = vst [vmem:[#allocation98_spill] sm:$0xff] %v6766_v36  ;;  %v6781_v14 = vpop.eup %4504  ;;  %4524 = vrcp.f32 %v6180_v38  ;;  %v6800_v38 = vadd.f32 1.0, %v6346_v7  ;;  %v14276_v7 = vld [vmem:[#allocation146_spill] sm:$0xff] }
  0xfd   : > { %14251 = vst [vmem:[#allocation203_spill] sm:$0xff] %v6770_v27  ;;  %14252 = vst [vmem:[#allocation204_spill] sm:$0xff] %v6773_v63  ;;  %v6789_v60 = vpop.eup %4506  ;;  %v6792_v27 = vadd.f32 1.0, %v6334_v47  ;;  %4526 = vrcp.f32 %v6183_v50  ;;  %v6811_v50 = vadd.f32 1.0, %v6360_v2  ;;  %v14272_v47 = vld [vmem:[#allocation120_spill] sm:$0xff]  ;;  %v6842_v2 = vld [vmem:[%s5585_s30 + $0x1e0] sm:$0xff] }
  0xfe   : > { %14253 = vst [vmem:[#allocation205_spill] sm:$0xff] %v6777_v55  ;;  %14254 = vst [vmem:[#allocation206_spill] sm:$0xff] %v6781_v14  ;;  %v6797_v22 = vpop.eup %4508  ;;  %4528 = vrcp.f32 %v6188_v40  ;;  %v14284_v14 = vld [vmem:[#allocation122_spill] sm:$0xff] }
  0xff   : > { %14255 = vst [vmem:[#allocation207_spill] sm:$0xff] %v6784_v33  ;;  %14256 = vst [vmem:[#allocation208_spill] sm:$0xff] %v6789_v60  ;;  %v6808_v60 = vpop.eup %4510  ;;  %4530 = vrcp.f32 %v6191_v26 }
 0x100   : > { %14257 = vst [vmem:[#allocation209_spill] sm:$0xff] %v6792_v27  ;;  %14258 = vst [vmem:[#allocation210_spill] sm:$0xff] %v6797_v22  ;;  %v6819_v23 = vpop.eup %4512  ;;  %4532 = vrcp.f32 %v6194_v41  ;;  %v14270_v41 = vld [vmem:[#allocation142_spill] sm:$0xff] }
 0x101   : > { %14259 = vst [vmem:[#allocation211_spill] sm:$0xff] %v6800_v38  ;;  %14260 = vst [vmem:[#allocation212_spill] sm:$0xff] %v6804_v58  ;;  %v6827_v26 = vpop.eup %4514  ;;  %4534 = vrcp.f32 %v6199_v10  ;;  %v6838_v22 = vadd.f32 1.0, %v14270_v41  ;;  %v6853_v41 = vld [vmem:[%s5585_s30 + $0x1e8] sm:$0xff] }
 0x102   : > { %14261 = vst [vmem:[#allocation213_spill] sm:$0xff] %v6808_v60  ;;  %14262 = vst [vmem:[#allocation214_spill] sm:$0xff] %v6811_v50  ;;  %v6830_v60 = vadd.f32 1.0, %v6388_v34  ;;  %v6835_v30 = vpop.eup %4516  ;;  %4536 = vrcp.f32 %v14272_v47  ;;  %v14282_v34 = vld [vmem:[#allocation150_spill] sm:$0xff]  ;;  %v6938_v47 = vld [vmem:[%s5585_s30 + $0x248] sm:$0xff] }
 0x103   : > { %14263 = vst [vmem:[#allocation215_spill] sm:$0xff] %v6815_v37  ;;  %14264 = vst [vmem:[#allocation216_spill] sm:$0xff] %v6819_v23  ;;  %v6846_v10 = vpop.eup %4518  ;;  %v6849_v23 = vadd.f32 1.0, %v14276_v7  ;;  %4538 = vrcp.f32 %v14278_v9  ;;  %v6868_v7 = vld [vmem:[%s5585_s30 + $0x1f8] sm:$0xff]  ;;  %v14300_v9 = vld [vmem:[#allocation162_spill] sm:$0xff] }
 0x104   : > { %14265 = vst [vmem:[#allocation217_spill] sm:$0xff] %v6822_v42  ;;  %14266 = vst [vmem:[#allocation218_spill] sm:$0xff] %v6827_v26  ;;  %v6860_v42 = vadd.f32 1.0, %v14282_v34  ;;  %4540 = vrcp.f32 %v14284_v14  ;;  %v6878_v34 = vld [vmem:[%s5585_s30 + $0x200] sm:$0xff]  ;;  %v6902_v63 = vadd.f32 1.0, %v14300_v9  ;;  %v6920_v9 = vld [vmem:[%s5585_s30 + $0x230] sm:$0xff] }
 0x105   : > { %14267 = vst [vmem:[#allocation219_spill] sm:$0xff] %v6830_v60  ;;  %14269 = vst [vmem:[#allocation220_spill] sm:$0xff] %v6835_v30  ;;  %v6857_v60 = vpop.eup %4520  ;;  %v14306_v14 = vld [vmem:[#allocation166_spill] sm:$0xff]  ;;  %v14320_v26 = vld [vmem:[#allocation21_spill] sm:$0xff] }
 0x106   : > { %14271 = vst [vmem:[#allocation142_spill] sm:$0xff] %v6838_v22  ;;  %14273 = vst [vmem:[#allocation120_spill] sm:$0xff] %v6842_v2  ;;  %v6871_v30 = vpop.eup %4522  ;;  %v14288_v22 = vld [vmem:[#allocation154_spill] sm:$0xff]  ;;  %v6916_v48 = vadd.f32 1.0, %v14306_v14  ;;  %v14314_v14 = vld [vmem:[#allocation127_spill] sm:$0xff] }
 0x107   : > { %14275 = vst [vmem:[#allocation221_spill] sm:$0xff] %v6846_v10  ;;  %14277 = vst [vmem:[#allocation146_spill] sm:$0xff] %v6849_v23  ;;  %v6864_v10 = vld [vmem:[%s5585_s30 + $0x1f0] sm:$0xff]  ;;  %v6874_v50 = vadd.f32 1.0, %v14288_v22  ;;  %v6885_v38 = vpop.eup %4524  ;;  %v14294_v23 = vld [vmem:[#allocation158_spill] sm:$0xff] }
 0x108   : > { %14279 = vst [vmem:[#allocation121_spill] sm:$0xff] %v6853_v41  ;;  %14281 = vst [vmem:[#allocation222_spill] sm:$0xff] %v6857_v60  ;;  %v14290_v60 = vld [vmem:[#allocation123_spill] sm:$0xff]  ;;  %v6888_v27 = vadd.f32 1.0, %v14294_v23  ;;  %v6892_v22 = vld [vmem:[%s5585_s30 + $0x210] sm:$0xff]  ;;  %v6899_v33 = vpop.eup %4526 }
 0x109   : > { %14283 = vst [vmem:[#allocation150_spill] sm:$0xff] %v6860_v42  ;;  %14285 = vst [vmem:[#allocation122_spill] sm:$0xff] %v6864_v10  ;;  %4542 = vrcp.f32 %v14290_v60  ;;  %v6882_v42 = vld [vmem:[%s5585_s30 + $0x208] sm:$0xff]  ;;  %v6906_v23 = vld [vmem:[%s5585_s30 + $0x220] sm:$0xff]  ;;  %v6913_v18 = vpop.eup %4528 }
 0x10a   : > { %14286 = vst [vmem:[#allocation223_spill] sm:$0xff] %v6868_v7  ;;  %14287 = vst [vmem:[#allocation224_spill] sm:$0xff] %v6871_v30  ;;  %v14296_v30 = vld [vmem:[#allocation124_spill] sm:$0xff]  ;;  %v6927_v53 = vpop.eup %4530  ;;  %v14312_v60 = vld [vmem:[#allocation169_spill] sm:$0xff] }
 0x10b   : > { %14289 = vst [vmem:[#allocation154_spill] sm:$0xff] %v6874_v50  ;;  %14291 = vst [vmem:[#allocation123_spill] sm:$0xff] %v6878_v34  ;;  %4544 = vrcp.f32 %v14296_v30  ;;  %v6896_v50 = vld [vmem:[%s5585_s30 + $0x218] sm:$0xff]  ;;  %v6941_v6 = vpop.eup %4532  ;;  %v14318_v30 = vld [vmem:[#allocation171_spill] sm:$0xff] }
 0x10c   : > { %14292 = vst [vmem:[#allocation225_spill] sm:$0xff] %v6882_v42  ;;  %14293 = vst [vmem:[#allocation226_spill] sm:$0xff] %v6885_v38  ;;  %v14302_v38 = vld [vmem:[#allocation125_spill] sm:$0xff]  ;;  %v6955_v40 = vpop.eup %4534 }
 0x10d   : > { %14295 = vst [vmem:[#allocation158_spill] sm:$0xff] %v6888_v27  ;;  %14297 = vst [vmem:[#allocation124_spill] sm:$0xff] %v6892_v22  ;;  %4546 = vrcp.f32 %v14302_v38  ;;  %v6910_v27 = vld [vmem:[%s5585_s30 + $0x228] sm:$0xff]  ;;  %v14324_v38 = vld [vmem:[#allocation22_spill] sm:$0xff] }
 0x10e   : > { %14298 = vst [vmem:[#allocation227_spill] sm:$0xff] %v6896_v50  ;;  %14299 = vst [vmem:[#allocation228_spill] sm:$0xff] %v6899_v33  ;;  %v14308_v33 = vld [vmem:[#allocation126_spill] sm:$0xff] }
 0x10f   : > { %14301 = vst [vmem:[#allocation162_spill] sm:$0xff] %v6902_v63  ;;  %14303 = vst [vmem:[#allocation125_spill] sm:$0xff] %v6906_v23  ;;  %4548 = vrcp.f32 %v14308_v33  ;;  %v6924_v63 = vld [vmem:[%s5585_s30 + $0x238] sm:$0xff]  ;;  %v6970_v33 = vpop.eup %4536 }
 0x110   : > { %14304 = vst [vmem:[#allocation229_spill] sm:$0xff] %v6910_v27  ;;  %14305 = vst [vmem:[#allocation230_spill] sm:$0xff] %v6913_v18  ;;  %v6930_v18 = vadd.f32 1.0, %v14312_v60  ;;  %4550 = vrcp.f32 %v14314_v14  ;;  %v6948_v60 = vld [vmem:[%s5585_s30 + $0x250] sm:$0xff]  ;;  %v6984_v1 = vpop.eup %4538 }
 0x111   : > { %14307 = vst [vmem:[#allocation166_spill] sm:$0xff] %v6916_v48  ;;  %14309 = vst [vmem:[#allocation126_spill] sm:$0xff] %v6920_v9  ;;  %v6934_v48 = vld [vmem:[%s5585_s30 + $0x240] sm:$0xff]  ;;  %4552 = vrcp.f32 %v14320_v26  ;;  %v6963_v26 = vld [vmem:[%s5585_s30 + $0x268] sm:$0xff]  ;;  %v6999_v4 = vpop.eup %4540 }
 0x112   : > { %14310 = vst [vmem:[#allocation231_spill] sm:$0xff] %v6924_v63  ;;  %14311 = vst [vmem:[#allocation232_spill] sm:$0xff] %v6927_v53  ;;  %v6944_v53 = vadd.f32 1.0, %v14318_v30  ;;  %4554 = vrcp.f32 %v14324_v38  ;;  %v6967_v14 = vld [vmem:[%s5585_s30 + $0x270] sm:$0xff]  ;;  %v14331_v38 = vld [vmem:[#allocation23_spill] sm:$0xff] }
 0x113   : > { %14313 = vst [vmem:[#allocation169_spill] sm:$0xff] %v6930_v18  ;;  %14315 = vst [vmem:[#allocation127_spill] sm:$0xff] %v6934_v48  ;;  %v6952_v18 = vld [vmem:[%s5585_s30 + $0x258] sm:$0xff]  ;;  %4556 = vrcp.f32 %v14331_v38  ;;  %v6992_v38 = vld [vmem:[%s5585_s30 + $0x290] sm:$0xff] }
 0x114   : > { %14316 = vst [vmem:[#allocation233_spill] sm:$0xff] %v6938_v47  ;;  %14317 = vst [vmem:[#allocation234_spill] sm:$0xff] %v6941_v6  ;;  %v6959_v6 = vld [vmem:[%s5585_s30 + $0x260] sm:$0xff]  ;;  %4558 = vrcp.f32 %v14335_v20  ;;  %v6996_v30 = vld [vmem:[%s5585_s30 + $0x298] sm:$0xff] }
 0x115   : > { %14319 = vst [vmem:[#allocation171_spill] sm:$0xff] %v6944_v53  ;;  %14321 = vst [vmem:[#allocation21_spill] sm:$0xff] %v6948_v60  ;;  %v14340_v53 = vld [vmem:[#allocation179_spill] sm:$0xff]  ;;  %v14342_v20 = vld [vmem:[#allocation25_spill] sm:$0xff] }
 0x116   : > { %14322 = vst [vmem:[#allocation235_spill] sm:$0xff] %v6952_v18  ;;  %14323 = vst [vmem:[#allocation236_spill] sm:$0xff] %v6955_v40  ;;  %v14329_v40 = vld [vmem:[#allocation175_spill] sm:$0xff]  ;;  %4560 = vrcp.f32 %v14342_v20 }
 0x117   : > { %14325 = vst [vmem:[#allocation22_spill] sm:$0xff] %v6959_v6  ;;  %14326 = vst [vmem:[#allocation237_spill] sm:$0xff] %v6963_v26  ;;  %v6973_v17 = vadd.f32 1.0, %v14329_v40  ;;  %4562 = vrcp.f32 %v14346_v0  ;;  %v14351_v40 = vld [vmem:[#allocation27_spill] sm:$0xff] }
 0x118   : > { %14327 = vst [vmem:[#allocation238_spill] sm:$0xff] %v6967_v14  ;;  %14328 = vst [vmem:[#allocation239_spill] sm:$0xff] %v6970_v33  ;;  %v6988_v33 = vld [vmem:[%s5585_s30 + $0x288] sm:$0xff]  ;;  %4564 = vrcp.f32 %v14351_v40 }
 0x119   : > { %14330 = vst [vmem:[#allocation175_spill] sm:$0xff] %v6973_v17  ;;  %14332 = vst [vmem:[#allocation23_spill] sm:$0xff] %v6977_v29  ;;  %v7013_v17 = vpop.eup %4542  ;;  %4566 = vrcp.f32 %v14356_v61  ;;  %v14427_v20 = vld [vmem:[#allocation63_spill] sm:$0xff] }
 0x11a   : > { %14333 = vst [vmem:[#allocation240_spill] sm:$0xff] %v6981_v11  ;;  %14334 = vst [vmem:[#allocation241_spill] sm:$0xff] %v6984_v1  ;;  %v7002_v1 = vadd.f32 1.0, %v14340_v53  ;;  %v7021_v53 = vld [vmem:[%s5585_s30 + $0x2b8] sm:$0xff]  ;;  %v7025_v25 = vpop.eup %4544 }
 0x11b   : > { %14336 = vst [vmem:[#allocation24_spill] sm:$0xff] %v6988_v33  ;;  %14337 = vst [vmem:[#allocation242_spill] sm:$0xff] %v6992_v38  ;;  %v7031_v16 = vpop.eup %4546 }
 0x11c   : > { %14338 = vst [vmem:[#allocation243_spill] sm:$0xff] %v6996_v30  ;;  %14339 = vst [vmem:[#allocation244_spill] sm:$0xff] %v6999_v4 }
 0x11d   : > { %14341 = vst [vmem:[#allocation179_spill] sm:$0xff] %v7002_v1  ;;  %14343 = vst [vmem:[#allocation25_spill] sm:$0xff] %v7006_v5  ;;  %v7037_v1 = vpop.eup %4548 }
 0x11e   : > { %14344 = vst [vmem:[#allocation245_spill] sm:$0xff] %v7010_v59  ;;  %14345 = vst [vmem:[#allocation246_spill] sm:$0xff] %v7013_v17  ;;  %v7043_v51 = vpop.eup %4550 }
 0x11f   : > { %14347 = vst [vmem:[#allocation26_spill] sm:$0xff] %v7017_v56  ;;  %14348 = vst [vmem:[#allocation247_spill] sm:$0xff] %v7021_v53  ;;  %v7049_v43 = vpop.eup %4552  ;;  %v14534_v53 = vld [vmem:[#allocation119_spill] sm:$0xff] }
 0x120   : > { %14350 = vst [vmem:[#allocation248_spill] sm:$0xff] %v7025_v25  ;;  %14355 = vst [vmem:[#allocation27_spill] sm:$0xff] %v7031_v16  ;;  %v14361_v25 = vld [vmem:[#allocation29_spill] sm:$0xff]  ;;  %v14366_v16 = vld [vmem:[#allocation30_spill] sm:$0xff]  ;;  %v7055_v31 = vpop.eup %4554 }
 0x121   : > { %14360 = vst [vmem:[#allocation28_spill] sm:$0xff] %v7037_v1  ;;  %4568 = vrcp.f32 %v14361_v25  ;;  %14365 = vst [vmem:[#allocation29_spill] sm:$0xff] %v7043_v51  ;;  %v14371_v1 = vld [vmem:[#allocation31_spill] sm:$0xff]  ;;  %v14376_v51 = vld [vmem:[#allocation32_spill] sm:$0xff]  ;;  %v7061_v32 = vpop.eup %4556 }
 0x122   : > { %4570 = vrcp.f32 %v14366_v16  ;;  %14370 = vst [vmem:[#allocation30_spill] sm:$0xff] %v7049_v43  ;;  %14375 = vst [vmem:[#allocation31_spill] sm:$0xff] %v7055_v31  ;;  %v14381_v43 = vld [vmem:[#allocation33_spill] sm:$0xff]  ;;  %v7067_v45 = vpop.eup %4558  ;;  %v14386_v31 = vld [vmem:[#allocation34_spill] sm:$0xff] }
 0x123   : > { %4572 = vrcp.f32 %v14371_v1  ;;  %14380 = vst [vmem:[#allocation32_spill] sm:$0xff] %v7061_v32  ;;  %14385 = vst [vmem:[#allocation33_spill] sm:$0xff] %v7067_v45  ;;  %v7073_v4 = vpop.eup %4560  ;;  %v14391_v32 = vld [vmem:[#allocation35_spill] sm:$0xff]  ;;  %v14396_v45 = vld [vmem:[#allocation36_spill] sm:$0xff] }
 0x124   : > { %4574 = vrcp.f32 %v14376_v51  ;;  %14390 = vst [vmem:[#allocation34_spill] sm:$0xff] %v7073_v4  ;;  %v7079_v40 = vpop.eup %4562  ;;  %v14401_v4 = vld [vmem:[#allocation37_spill] sm:$0xff]  ;;  %v14409_v51 = vld [vmem:[#allocation56_spill] sm:$0xff] }
 0x125   : > { %4576 = vrcp.f32 %v14381_v43  ;;  %14395 = vst [vmem:[#allocation35_spill] sm:$0xff] %v7079_v40  ;;  %v7085_v61 = vpop.eup %4564  ;;  %v14406_v40 = vld [vmem:[#allocation38_spill] sm:$0xff] }
 0x126   : > { %4578 = vrcp.f32 %v14386_v31  ;;  %14400 = vst [vmem:[#allocation36_spill] sm:$0xff] %v7085_v61  ;;  %v7091_v25 = vpop.eup %4566  ;;  %v14411_v61 = vld [vmem:[#allocation39_spill] sm:$0xff]  ;;  %v14424_v43 = vld [vmem:[#allocation182_spill] sm:$0xff]  ;;  %v14435_v31 = vld [vmem:[#allocation44_spill] sm:$0xff] }
 0x127   : > { %4580 = vrcp.f32 %v14391_v32  ;;  %14405 = vst [vmem:[#allocation37_spill] sm:$0xff] %v7091_v25  ;;  %v14413_v32 = vld [vmem:[#allocation57_spill] sm:$0xff]  ;;  %v14416_v25 = vld [vmem:[#allocation40_spill] sm:$0xff] }
 0x128   : > { %4582 = vrcp.f32 %v14396_v45 }
 0x129   : > { %4584 = vrcp.f32 %v14401_v4  ;;  %v14431_v4 = vld [vmem:[#allocation43_spill] sm:$0xff] }
 0x12a   : > { %4586 = vrcp.f32 %v14406_v40  ;;  %v7134_v40 = vld [vmem:[%s5585_s30 + $0x170] sm:$0xff] }
 0x12b   : > { %v7097_v16 = vpop.eup %4568  ;;  %4588 = vrcp.f32 %v14411_v61  ;;  %v14421_v61 = vld [vmem:[#allocation41_spill] sm:$0xff]  ;;  %14436 = vst [vmem:[#allocation44_spill] sm:$0xff] %v7134_v40 }
 0x12c   : > { %14410 = vst [vmem:[#allocation38_spill] sm:$0xff] %v7097_v16  ;;  %v7103_v1 = vpop.eup %4570  ;;  %4590 = vrcp.f32 %v14416_v25  ;;  %v7157_v40 = vld [vmem:[%s5585_s30 + $0x198] sm:$0xff] }
 0x12d   : > { %14415 = vst [vmem:[#allocation39_spill] sm:$0xff] %v7103_v1  ;;  %v7109_v16 = vpop.eup %4572  ;;  %4592 = vrcp.f32 %v14421_v61  ;;  %v7142_v1 = vld [vmem:[%s5585_s30 + $0x180] sm:$0xff]  ;;  %14443 = vst [vmem:[#allocation254_spill] sm:$0xff] %v7157_v40 }
 0x12e   : > { %14420 = vst [vmem:[#allocation40_spill] sm:$0xff] %v7109_v16  ;;  %v7115_v25 = vpop.eup %4574  ;;  %4594 = vrcp.f32 %v14426_v12  ;;  %14438 = vst [vmem:[#allocation251_spill] sm:$0xff] %v7142_v1  ;;  %v14440_v12 = vld [vmem:[#allocation45_spill] sm:$0xff]  ;;  %v14445_v16 = vld [vmem:[#allocation128_spill] sm:$0xff] }
 0x12f   : > { %14425 = vst [vmem:[#allocation41_spill] sm:$0xff] %v7115_v25  ;;  %v7121_v61 = vpop.eup %4576  ;;  %4596 = vrcp.f32 %v14431_v4  ;;  %v7127_v25 = vld [vmem:[%s5585_s30 + $0x168] sm:$0xff]  ;;  %v7138_v4 = vld [vmem:[%s5585_s30 + $0x178] sm:$0xff] }
 0x130   : > { %14430 = vst [vmem:[#allocation42_spill] sm:$0xff] %v7121_v61  ;;  %14433 = vst [vmem:[#allocation43_spill] sm:$0xff] %v7127_v25  ;;  %v7130_v45 = vpop.eup %4578  ;;  %4598 = vrcp.f32 %v14435_v31  ;;  %v7153_v25 = vld [vmem:[%s5585_s30 + $0x190] sm:$0xff]  ;;  %v14447_v61 = vld [vmem:[#allocation46_spill] sm:$0xff] }
 0x131   : > { %14434 = vst [vmem:[#allocation249_spill] sm:$0xff] %v7130_v45  ;;  %14437 = vst [vmem:[#allocation250_spill] sm:$0xff] %v7138_v4  ;;  %v7145_v0 = vpop.eup %4580  ;;  %4600 = vrcp.f32 %v14440_v12  ;;  %v7149_v45 = vld [vmem:[%s5585_s30 + $0x188] sm:$0xff] }
 0x132   : > { %14439 = vst [vmem:[#allocation252_spill] sm:$0xff] %v7145_v0  ;;  %14441 = vst [vmem:[#allocation45_spill] sm:$0xff] %v7149_v45  ;;  %v7160_v4 = vpop.eup %4582  ;;  %4602 = vrcp.f32 %v14445_v16  ;;  %v7168_v0 = vld [vmem:[%s5585_s30 + $0x1a8] sm:$0xff]  ;;  %v7242_v45 = vld [vmem:[%s5585_s30 + $0x2c0] sm:$0xff] }
 0x133   : > { %14442 = vst [vmem:[#allocation253_spill] sm:$0xff] %v7153_v25  ;;  %14444 = vst [vmem:[#allocation255_spill] sm:$0xff] %v7160_v4  ;;  %v7172_v1 = vpop.eup %4584  ;;  %4604 = vrcp.f32 %v14447_v61  ;;  %v14449_v25 = vld [vmem:[#allocation47_spill] sm:$0xff]  ;;  %v7250_v4 = vld [vmem:[%s5585_s30 + $0x2d0] sm:$0xff] }
 0x134   : > { %14446 = vst [vmem:[#allocation128_spill] sm:$0xff] %v7172_v1  ;;  %v7178_v40 = vpop.eup %4586  ;;  %4606 = vrcp.f32 %v14449_v25  ;;  %v14451_v1 = vld [vmem:[#allocation48_spill] sm:$0xff]  ;;  %v14469_v31 = vld [vmem:[#allocation155_spill] sm:$0xff]  ;;  %14472 = vst [vmem:[#allocation257_spill] sm:$0xff] %v7250_v4 }
 0x135   : > { %14448 = vst [vmem:[#allocation46_spill] sm:$0xff] %v7178_v40  ;;  %v7184_v19 = vpop.eup %4588  ;;  %4608 = vrcp.f32 %v14451_v1  ;;  %v14453_v40 = vld [vmem:[#allocation129_spill] sm:$0xff]  ;;  %14470 = vst [vmem:[#allocation155_spill] sm:$0xff] %v7242_v45  ;;  %v7291_v4 = vld [vmem:[%s5585_s30 + $0x310] sm:$0xff] }
 0x136   : > { %14450 = vst [vmem:[#allocation47_spill] sm:$0xff] %v7184_v19  ;;  %v7190_v17 = vpop.eup %4590  ;;  %4610 = vrcp.f32 %v14453_v40  ;;  %v14455_v19 = vld [vmem:[#allocation130_spill] sm:$0xff]  ;;  %14486 = vst [vmem:[#allocation265_spill] sm:$0xff] %v7291_v4  ;;  %v7415_v45 = vld [vmem:[%s5585_s30 + $0x3d8] sm:$0xff] }
 0x137   : > { %14452 = vst [vmem:[#allocation48_spill] sm:$0xff] %v7190_v17  ;;  %v7196_v12 = vpop.eup %4592  ;;  %4612 = vrcp.f32 %v14455_v19  ;;  %v14457_v17 = vld [vmem:[#allocation133_spill] sm:$0xff]  ;;  %14527 = vst [vmem:[#allocation290_spill] sm:$0xff] %v7415_v45 }
 0x138   : > { %14454 = vst [vmem:[#allocation129_spill] sm:$0xff] %v7196_v12  ;;  %v7202_v61 = vpop.eup %4594  ;;  %4614 = vrcp.f32 %v14457_v17  ;;  %v14459_v12 = vld [vmem:[#allocation136_spill] sm:$0xff]  ;;  %v7261_v17 = vld [vmem:[%s5585_s30 + $0x2e0] sm:$0xff] }
 0x139   : > { %14456 = vst [vmem:[#allocation130_spill] sm:$0xff] %v7202_v61  ;;  %v7208_v25 = vpop.eup %4596  ;;  %4616 = vrcp.f32 %v14459_v12  ;;  %v14461_v61 = vld [vmem:[#allocation139_spill] sm:$0xff]  ;;  %14476 = vst [vmem:[#allocation259_spill] sm:$0xff] %v7261_v17 }
 0x13a   : > { %14458 = vst [vmem:[#allocation133_spill] sm:$0xff] %v7208_v25  ;;  %v7214_v1 = vpop.eup %4598  ;;  %4618 = vrcp.f32 %v14461_v61  ;;  %v14463_v25 = vld [vmem:[#allocation143_spill] sm:$0xff] }
 0x13b   : > { %14460 = vst [vmem:[#allocation136_spill] sm:$0xff] %v7214_v1  ;;  %v7220_v40 = vpop.eup %4600  ;;  %4620 = vrcp.f32 %v14463_v25  ;;  %v14465_v61 = vld [vmem:[#allocation147_spill] sm:$0xff] }
 0x13c   : > { %14462 = vst [vmem:[#allocation139_spill] sm:$0xff] %v7220_v40  ;;  %v7226_v19 = vpop.eup %4602  ;;  %4622 = vrcp.f32 %v14465_v61  ;;  %v14467_v12 = vld [vmem:[#allocation151_spill] sm:$0xff]  ;;  %v7280_v40 = vld [vmem:[%s5585_s30 + $0x300] sm:$0xff] }
 0x13d   : > { %14464 = vst [vmem:[#allocation143_spill] sm:$0xff] %v7226_v19  ;;  %v7232_v25 = vpop.eup %4604  ;;  %4624 = vrcp.f32 %v14467_v12  ;;  %v7246_v1 = vld [vmem:[%s5585_s30 + $0x2c8] sm:$0xff]  ;;  %14482 = vst [vmem:[#allocation263_spill] sm:$0xff] %v7280_v40  ;;  %v7321_v40 = vld [vmem:[%s5585_s30 + $0x340] sm:$0xff] }
 0x13e   : > { %14466 = vst [vmem:[#allocation147_spill] sm:$0xff] %v7232_v25  ;;  %v7238_v61 = vpop.eup %4606  ;;  %4626 = vrcp.f32 %v14469_v31  ;;  %14471 = vst [vmem:[#allocation256_spill] sm:$0xff] %v7246_v1  ;;  %v7257_v31 = vld [vmem:[%s5585_s30 + $0x2d8] sm:$0xff]  ;;  %v7265_v12 = vld [vmem:[%s5585_s30 + $0x2e8] sm:$0xff] }
 0x13f   : > { %14468 = vst [vmem:[#allocation151_spill] sm:$0xff] %v7238_v61  ;;  %v7253_v19 = vpop.eup %4608  ;;  %v14474_v61 = vld [vmem:[#allocation159_spill] sm:$0xff]  ;;  %14477 = vst [vmem:[#allocation260_spill] sm:$0xff] %v7265_v12  ;;  %v7276_v25 = vld [vmem:[%s5585_s30 + $0x2f8] sm:$0xff] }
 0x140   : > { %14473 = vst [vmem:[#allocation258_spill] sm:$0xff] %v7253_v19  ;;  %4628 = vrcp.f32 %v14474_v61  ;;  %14475 = vst [vmem:[#allocation159_spill] sm:$0xff] %v7257_v31  ;;  %v7268_v16 = vpop.eup %4610  ;;  %v14479_v19 = vld [vmem:[#allocation163_spill] sm:$0xff]  ;;  %v7272_v61 = vld [vmem:[%s5585_s30 + $0x2f0] sm:$0xff] }
 0x141   : > { %14478 = vst [vmem:[#allocation261_spill] sm:$0xff] %v7268_v16  ;;  %4630 = vrcp.f32 %v14479_v19  ;;  %14480 = vst [vmem:[#allocation163_spill] sm:$0xff] %v7272_v61  ;;  %v7283_v1 = vpop.eup %4612  ;;  %v14484_v16 = vld [vmem:[#allocation167_spill] sm:$0xff]  ;;  %v7295_v31 = vld [vmem:[%s5585_s30 + $0x318] sm:$0xff] }
 0x142   : > { %14481 = vst [vmem:[#allocation262_spill] sm:$0xff] %v7276_v25  ;;  %14483 = vst [vmem:[#allocation264_spill] sm:$0xff] %v7283_v1  ;;  %4632 = vrcp.f32 %v14484_v16  ;;  %v7287_v19 = vld [vmem:[%s5585_s30 + $0x308] sm:$0xff]  ;;  %v7298_v17 = vpop.eup %4614  ;;  %v14489_v1 = vld [vmem:[#allocation81_spill] sm:$0xff] }
 0x143   : > { %14485 = vst [vmem:[#allocation167_spill] sm:$0xff] %v7287_v19  ;;  %14487 = vst [vmem:[#allocation266_spill] sm:$0xff] %v7295_v31  ;;  %4634 = vrcp.f32 %v14489_v1  ;;  %v7302_v16 = vld [vmem:[%s5585_s30 + $0x320] sm:$0xff]  ;;  %v7306_v12 = vld [vmem:[%s5585_s30 + $0x328] sm:$0xff]  ;;  %v7313_v25 = vpop.eup %4616 }
 0x144   : > { %14488 = vst [vmem:[#allocation267_spill] sm:$0xff] %v7298_v17  ;;  %14490 = vst [vmem:[#allocation81_spill] sm:$0xff] %v7302_v16  ;;  %v7310_v61 = vld [vmem:[%s5585_s30 + $0x330] sm:$0xff]  ;;  %v14494_v17 = vld [vmem:[#allocation87_spill] sm:$0xff]  ;;  %v7328_v4 = vpop.eup %4618 }
 0x145   : > { %14491 = vst [vmem:[#allocation268_spill] sm:$0xff] %v7306_v12  ;;  %14492 = vst [vmem:[#allocation269_spill] sm:$0xff] %v7310_v61  ;;  %4636 = vrcp.f32 %v14494_v17  ;;  %v7317_v1 = vld [vmem:[%s5585_s30 + $0x338] sm:$0xff]  ;;  %v7325_v19 = vld [vmem:[%s5585_s30 + $0x348] sm:$0xff]  ;;  %v7343_v12 = vpop.eup %4620 }
 0x146   : > { %14493 = vst [vmem:[#allocation270_spill] sm:$0xff] %v7313_v25  ;;  %14495 = vst [vmem:[#allocation87_spill] sm:$0xff] %v7317_v1  ;;  %v14499_v25 = vld [vmem:[#allocation93_spill] sm:$0xff]  ;;  %v7332_v17 = vld [vmem:[%s5585_s30 + $0x350] sm:$0xff] }
 0x147   : > { %14496 = vst [vmem:[#allocation271_spill] sm:$0xff] %v7321_v40  ;;  %14497 = vst [vmem:[#allocation272_spill] sm:$0xff] %v7325_v19  ;;  %4638 = vrcp.f32 %v14499_v25  ;;  %v7336_v31 = vld [vmem:[%s5585_s30 + $0x358] sm:$0xff]  ;;  %v7340_v16 = vld [vmem:[%s5585_s30 + $0x360] sm:$0xff]  ;;  %v7358_v40 = vpop.eup %4622 }
 0x148   : > { %14498 = vst [vmem:[#allocation273_spill] sm:$0xff] %v7328_v4  ;;  %14500 = vst [vmem:[#allocation93_spill] sm:$0xff] %v7332_v17  ;;  %v14504_v4 = vld [vmem:[#allocation99_spill] sm:$0xff]  ;;  %v7351_v61 = vld [vmem:[%s5585_s30 + $0x370] sm:$0xff] }
 0x149   : > { %14501 = vst [vmem:[#allocation274_spill] sm:$0xff] %v7336_v31  ;;  %14502 = vst [vmem:[#allocation275_spill] sm:$0xff] %v7340_v16  ;;  %4640 = vrcp.f32 %v14504_v4  ;;  %v7347_v25 = vld [vmem:[%s5585_s30 + $0x368] sm:$0xff]  ;;  %v7355_v1 = vld [vmem:[%s5585_s30 + $0x378] sm:$0xff]  ;;  %v7373_v31 = vpop.eup %4624 }
 0x14a   : > { %14503 = vst [vmem:[#allocation276_spill] sm:$0xff] %v7343_v12  ;;  %14505 = vst [vmem:[#allocation99_spill] sm:$0xff] %v7347_v25  ;;  %v14509_v12 = vld [vmem:[#allocation103_spill] sm:$0xff]  ;;  %v7362_v4 = vld [vmem:[%s5585_s30 + $0x380] sm:$0xff] }
 0x14b   : > { %14506 = vst [vmem:[#allocation277_spill] sm:$0xff] %v7351_v61  ;;  %14507 = vst [vmem:[#allocation278_spill] sm:$0xff] %v7355_v1  ;;  %4642 = vrcp.f32 %v14509_v12  ;;  %v7366_v19 = vld [vmem:[%s5585_s30 + $0x388] sm:$0xff]  ;;  %v7370_v17 = vld [vmem:[%s5585_s30 + $0x390] sm:$0xff]  ;;  %v7388_v61 = vpop.eup %4626 }
 0x14c   : > { %14508 = vst [vmem:[#allocation279_spill] sm:$0xff] %v7358_v40  ;;  %14510 = vst [vmem:[#allocation103_spill] sm:$0xff] %v7362_v4  ;;  %v14514_v40 = vld [vmem:[#allocation107_spill] sm:$0xff]  ;;  %v7377_v12 = vld [vmem:[%s5585_s30 + $0x398] sm:$0xff] }
 0x14d   : > { %14511 = vst [vmem:[#allocation280_spill] sm:$0xff] %v7366_v19  ;;  %14512 = vst [vmem:[#allocation281_spill] sm:$0xff] %v7370_v17  ;;  %4644 = vrcp.f32 %v14514_v40  ;;  %v7381_v16 = vld [vmem:[%s5585_s30 + $0x3a0] sm:$0xff]  ;;  %v7385_v25 = vld [vmem:[%s5585_s30 + $0x3a8] sm:$0xff]  ;;  %v7403_v19 = vpop.eup %4628 }
 0x14e   : > { %14513 = vst [vmem:[#allocation282_spill] sm:$0xff] %v7373_v31  ;;  %14515 = vst [vmem:[#allocation107_spill] sm:$0xff] %v7377_v12  ;;  %v14519_v31 = vld [vmem:[#allocation111_spill] sm:$0xff]  ;;  %v7392_v40 = vld [vmem:[%s5585_s30 + $0x3b0] sm:$0xff] }
 0x14f   : > { %14516 = vst [vmem:[#allocation283_spill] sm:$0xff] %v7381_v16  ;;  %14517 = vst [vmem:[#allocation284_spill] sm:$0xff] %v7385_v25  ;;  %4646 = vrcp.f32 %v14519_v31  ;;  %v7396_v1 = vld [vmem:[%s5585_s30 + $0x3b8] sm:$0xff]  ;;  %v7400_v4 = vld [vmem:[%s5585_s30 + $0x3c0] sm:$0xff] }
 0x150   : > { %14518 = vst [vmem:[#allocation285_spill] sm:$0xff] %v7388_v61  ;;  %14520 = vst [vmem:[#allocation111_spill] sm:$0xff] %v7392_v40  ;;  %v14524_v61 = vld [vmem:[#allocation114_spill] sm:$0xff]  ;;  %v7407_v31 = vld [vmem:[%s5585_s30 + $0x3c8] sm:$0xff]  ;;  %v14540_v40 = vand.u32 2147483647, %v6682_v35 }
 0x151   : > { %14521 = vst [vmem:[#allocation286_spill] sm:$0xff] %v7396_v1  ;;  %14522 = vst [vmem:[#allocation287_spill] sm:$0xff] %v7400_v4  ;;  %4648 = vrcp.f32 %v14524_v61  ;;  %v7411_v17 = vld [vmem:[%s5585_s30 + $0x3d0] sm:$0xff]  ;;  %v7418_v1 = vpop.eup %4630  ;;  %v7426_v4 = vld [vmem:[%s5585_s30 + $0x3e8] sm:$0xff]  ;;  %v14537_v61 = vand.u32 2147483647, %v6672_v21 }
 0x152   : > { %14523 = vst [vmem:[#allocation288_spill] sm:$0xff] %v7403_v19  ;;  %14525 = vst [vmem:[#allocation114_spill] sm:$0xff] %v7407_v31  ;;  %v14529_v16 = vld [vmem:[#allocation116_spill] sm:$0xff]  ;;  %v7422_v19 = vld [vmem:[%s5585_s30 + $0x3e0] sm:$0xff]  ;;  %v14544_v21 = vand.u32 2147483647, %v6357_v44 }
 0x153   : > { %14526 = vst [vmem:[#allocation289_spill] sm:$0xff] %v7411_v17  ;;  %14528 = vst [vmem:[#allocation291_spill] sm:$0xff] %v7418_v1  ;;  %4650 = vrcp.f32 %v14529_v16  ;;  %v7430_v31 = vld [vmem:[%s5585_s30 + $0x3f0] sm:$0xff]  ;;  %v7433_v17 = vpop.eup %4632  ;;  %v7437_v12 = vld [vmem:[%s5585_s30 + $0x3f8] sm:$0xff]  ;;  %v14536_v1 = vand.u32 2147483647, %v6668_v57 }
 0x154   : > { %14530 = vst [vmem:[#allocation116_spill] sm:$0xff] %v7422_v19  ;;  %14531 = vst [vmem:[#allocation292_spill] sm:$0xff] %v7426_v4  ;;  %4652 = vrcp.f32 %v14534_v53  ;;  %v7446_v19 = vsub.f32 0.0, %v14537_v61  ;;  %v7448_v25 = vpop.eup %4634  ;;  %v14539_v4 = vld [vmem:[#allocation189_spill] sm:$0xff]  ;;  %v14541_v53 = vand.u32 2147483647, %v6686_v24 }
 0x155   : > { %14532 = vst [vmem:[#allocation293_spill] sm:$0xff] %v7430_v31  ;;  %14533 = vst [vmem:[#allocation294_spill] sm:$0xff] %v7433_v17  ;;  %v7442_v45 = vsub.f32 0.0, %v14536_v1  ;;  %4654 = vrcp.f32 %v14539_v4  ;;  %v7453_v17 = vsub.f32 0.0, %v14540_v40  ;;  %v14542_v57 = vand.u32 2147483647, %v6353_v8  ;;  %v7463_v16 = vpop.eup %4636 }
 0x156   : > { %14535 = vst [vmem:[#allocation119_spill] sm:$0xff] %v7437_v12  ;;  %14538 = vst [vmem:[#allocation295_spill] sm:$0xff] %v7448_v25  ;;  %v7457_v31 = vsub.f32 0.0, %v14541_v53  ;;  %4656 = vrcp.f32 %v6648_v28  ;;  %v7468_v61 = vsub.f32 0.0, %v14544_v21  ;;  %v14545_v35 = vand.u32 2147483647, %v6367_v54  ;;  %v7478_v53 = vpop.eup %4638 }
 0x157   : > { %v7461_v1 = vsub.f32 0.0, %v14542_v57  ;;  %14543 = vst [vmem:[#allocation189_spill] sm:$0xff] %v7463_v16  ;;  %v14546_v24 = vand.u32 2147483647, %v6371_v49  ;;  %14547 = vst [vmem:[#allocation296_spill] sm:$0xff] %v7478_v53  ;;  %4658 = vrcp.f32 %v6656_v39  ;;  %v14551_v16 = vld [vmem:[#allocation140_spill] sm:$0xff]  ;;  %v7493_v44 = vpop.eup %4640 }
 0x158   : > { %v7472_v4 = vsub.f32 0.0, %v14545_v35  ;;  %v14548_v57 = vand.u32 2147483647, %v6381_v62  ;;  %v14549_v28 = vand.u32 2147483647, %v6385_v13  ;;  %14554 = vst [vmem:[#allocation299_spill] sm:$0xff] %v7493_v44 }
 0x159   : > { %v7476_v40 = vsub.f32 0.0, %v14546_v24  ;;  %v14552_v54 = vand.u32 2147483647, %v14551_v16  ;;  %v14555_v24 = vld [vmem:[#allocation190_spill] sm:$0xff]  ;;  %v14556_v49 = vld [vmem:[#allocation141_spill] sm:$0xff]  ;;  %v14559_v39 = vld [vmem:[#allocation144_spill] sm:$0xff] }
 0x15a   : > { %v7483_v25 = vsub.f32 0.0, %v14548_v57  ;;  %v7487_v21 = vsub.f32 0.0, %v14549_v28  ;;  %4660 = vrcp.f32 %v14555_v24  ;;  %v14557_v53 = vand.u32 2147483647, %v14556_v49  ;;  %v14562_v12 = vld [vmem:[#allocation145_spill] sm:$0xff]  ;;  %v14567_v16 = vld [vmem:[#allocation148_spill] sm:$0xff] }
 0x15b   : > { %v7491_v35 = vsub.f32 0.0, %v14552_v54  ;;  %v14560_v62 = vand.u32 2147483647, %v14559_v39  ;;  %v14563_v13 = vand.u32 2147483647, %v14562_v12  ;;  %v14566_v54 = vld [vmem:[#allocation191_spill] sm:$0xff] }
 0x15c   : > { %14550 = vst [vmem:[#allocation297_spill] sm:$0xff] %v7487_v21  ;;  %v7498_v8 = vsub.f32 0.0, %v14557_v53  ;;  %v7508_v21 = vpop.eup %4642  ;;  %4662 = vrcp.f32 %v14566_v54  ;;  %v14568_v44 = vand.u32 2147483647, %v14567_v16  ;;  %v14570_v24 = vld [vmem:[#allocation149_spill] sm:$0xff]  ;;  %v14581_v54 = vld [vmem:[#allocation156_spill] sm:$0xff] }
 0x15d   : > { %14553 = vst [vmem:[#allocation298_spill] sm:$0xff] %v7491_v35  ;;  %v7502_v57 = vsub.f32 0.0, %v14560_v62  ;;  %v7506_v28 = vsub.f32 0.0, %v14563_v13  ;;  %14565 = vst [vmem:[#allocation302_spill] sm:$0xff] %v7508_v21  ;;  %v14571_v49 = vand.u32 2147483647, %v14570_v24 }
 0x15e   : > { %14558 = vst [vmem:[#allocation190_spill] sm:$0xff] %v7498_v8  ;;  %v7513_v35 = vsub.f32 0.0, %v14568_v44  ;;  %v14573_v8 = vld [vmem:[#allocation152_spill] sm:$0xff]  ;;  %v14578_v12 = vld [vmem:[#allocation153_spill] sm:$0xff]  ;;  %v14582_v16 = vand.u32 2147483647, %v14581_v54 }
 0x15f   : > { %14561 = vst [vmem:[#allocation300_spill] sm:$0xff] %v7502_v57  ;;  %14564 = vst [vmem:[#allocation301_spill] sm:$0xff] %v7506_v28  ;;  %v7517_v53 = vsub.f32 0.0, %v14571_v49  ;;  %v14574_v39 = vand.u32 2147483647, %v14573_v8  ;;  %v7523_v57 = vpop.eup %4644  ;;  %v14577_v13 = vld [vmem:[#allocation192_spill] sm:$0xff] }
 0x160   : > { %14569 = vst [vmem:[#allocation191_spill] sm:$0xff] %v7513_v35  ;;  %14576 = vst [vmem:[#allocation305_spill] sm:$0xff] %v7523_v57  ;;  %4664 = vrcp.f32 %v14577_v13  ;;  %v14579_v21 = vand.u32 2147483647, %v14578_v12  ;;  %v7532_v44 = vsub.f32 0.0, %v14582_v16  ;;  %v14584_v35 = vld [vmem:[#allocation157_spill] sm:$0xff] }
 0x161   : > { %14572 = vst [vmem:[#allocation303_spill] sm:$0xff] %v7517_v53  ;;  %v7521_v62 = vsub.f32 0.0, %v14574_v39  ;;  %v14585_v24 = vand.u32 2147483647, %v14584_v35  ;;  %v7538_v53 = vpop.eup %4646  ;;  %v14588_v39 = vld [vmem:[#allocation193_spill] sm:$0xff]  ;;  %v14589_v8 = vld [vmem:[#allocation160_spill] sm:$0xff] }
 0x162   : > { %v7528_v28 = vsub.f32 0.0, %v14579_v21  ;;  %14583 = vst [vmem:[#allocation306_spill] sm:$0xff] %v7532_v44  ;;  %14587 = vst [vmem:[#allocation308_spill] sm:$0xff] %v7538_v53  ;;  %4666 = vrcp.f32 %v14588_v39  ;;  %v14590_v57 = vand.u32 2147483647, %v14589_v8  ;;  %v14592_v13 = vld [vmem:[#allocation161_spill] sm:$0xff]  ;;  %v7553_v44 = vpop.eup %4648 }
 0x163   : > { %14575 = vst [vmem:[#allocation304_spill] sm:$0xff] %v7521_v62  ;;  %v7536_v49 = vsub.f32 0.0, %v14585_v24  ;;  %v14593_v12 = vand.u32 2147483647, %v14592_v13  ;;  %14598 = vst [vmem:[#allocation311_spill] sm:$0xff] %v7553_v44  ;;  %v14599_v24 = vld [vmem:[#allocation194_spill] sm:$0xff] }
 0x164   : > { %14580 = vst [vmem:[#allocation192_spill] sm:$0xff] %v7528_v28  ;;  %v7543_v62 = vsub.f32 0.0, %v14590_v57  ;;  %v14595_v28 = vld [vmem:[#allocation164_spill] sm:$0xff]  ;;  %4668 = vrcp.f32 %v14599_v24  ;;  %v14600_v35 = vld [vmem:[#allocation165_spill] sm:$0xff]  ;;  %v14603_v39 = vld [vmem:[#allocation51_spill] sm:$0xff] }
 0x165   : > { %14586 = vst [vmem:[#allocation307_spill] sm:$0xff] %v7536_v49  ;;  %v7547_v21 = vsub.f32 0.0, %v14593_v12  ;;  %v14596_v54 = vand.u32 2147483647, %v14595_v28  ;;  %v14601_v53 = vand.u32 2147483647, %v14600_v35 }
 0x166   : > { %14591 = vst [vmem:[#allocation193_spill] sm:$0xff] %v7543_v62  ;;  %v14604_v8 = vand.u32 2147483647, %v14603_v39  ;;  %v14606_v62 = vld [vmem:[#allocation168_spill] sm:$0xff]  ;;  %v14611_v28 = vld [vmem:[#allocation53_spill] sm:$0xff]  ;;  %v14613_v24 = vld [vmem:[#allocation170_spill] sm:$0xff] }
 0x167   : > { %14594 = vst [vmem:[#allocation309_spill] sm:$0xff] %v7547_v21  ;;  %v7551_v16 = vsub.f32 0.0, %v14596_v54  ;;  %v7558_v49 = vsub.f32 0.0, %v14601_v53  ;;  %v14607_v13 = vand.u32 2147483647, %v14606_v62  ;;  %v7568_v21 = vpop.eup %4650  ;;  %v14610_v54 = vld [vmem:[#allocation195_spill] sm:$0xff] }
 0x168   : > { %v7562_v57 = vsub.f32 0.0, %v14604_v8  ;;  %14609 = vst [vmem:[#allocation314_spill] sm:$0xff] %v7568_v21  ;;  %4670 = vrcp.f32 %v14610_v54  ;;  %v14612_v44 = vand.u32 2147483647, %v14611_v28  ;;  %v14614_v35 = vand.u32 2147483647, %v14613_v24 }
 0x169   : > { %14597 = vst [vmem:[#allocation310_spill] sm:$0xff] %v7551_v16  ;;  %14602 = vst [vmem:[#allocation194_spill] sm:$0xff] %v7558_v49  ;;  %v7566_v12 = vsub.f32 0.0, %v14607_v13  ;;  %v14616_v49 = vld [vmem:[#allocation54_spill] sm:$0xff]  ;;  %v14619_v13 = vld [vmem:[#allocation196_spill] sm:$0xff] }
 0x16a   : > { %14605 = vst [vmem:[#allocation312_spill] sm:$0xff] %v7562_v57  ;;  %v7573_v16 = vsub.f32 0.0, %v14612_v44  ;;  %v7577_v53 = vsub.f32 0.0, %v14614_v35  ;;  %v14617_v39 = vand.u32 2147483647, %v14616_v49  ;;  %v7583_v57 = vpop.eup %4652  ;;  %4672 = vrcp.f32 %v14619_v13  ;;  %v14620_v62 = vld [vmem:[#allocation172_spill] sm:$0xff] }
 0x16b   : > { %14608 = vst [vmem:[#allocation313_spill] sm:$0xff] %v7566_v12  ;;  %14618 = vst [vmem:[#allocation315_spill] sm:$0xff] %v7583_v57  ;;  %v14621_v21 = vand.u32 2147483647, %v14620_v62  ;;  %v14623_v54 = vand.u32 2147483647, %v14409_v51 }
 0x16c   : > { %14615 = vst [vmem:[#allocation195_spill] sm:$0xff] %v7577_v53  ;;  %v7581_v8 = vsub.f32 0.0, %v14617_v39  ;;  %v14625_v28 = vld [vmem:[#allocation174_spill] sm:$0xff]  ;;  %v7598_v53 = vpop.eup %4654  ;;  %v14630_v49 = vand.u32 2147483647, %v14413_v32  ;;  %v14631_v13 = vld [vmem:[#allocation176_spill] sm:$0xff] }
 0x16d   : > { %v7588_v12 = vsub.f32 0.0, %v14621_v21  ;;  %v7592_v44 = vsub.f32 0.0, %v14623_v54  ;;  %v14626_v24 = vand.u32 2147483647, %v14625_v28  ;;  %14628 = vst [vmem:[#allocation318_spill] sm:$0xff] %v7598_v53  ;;  %v14629_v39 = vld [vmem:[#allocation198_spill] sm:$0xff] }
 0x16e   : > { %4674 = vrcp.f32 %v14629_v39  ;;  %v7603_v57 = vsub.f32 0.0, %v14630_v49  ;;  %v14632_v62 = vand.u32 2147483647, %v14631_v13  ;;  %v14639_v28 = vld [vmem:[#allocation178_spill] sm:$0xff]  ;;  %v14641_v39 = vld [vmem:[#allocation60_spill] sm:$0xff] }
 0x16f   : > { %14622 = vst [vmem:[#allocation196_spill] sm:$0xff] %v7588_v12  ;;  %14624 = vst [vmem:[#allocation316_spill] sm:$0xff] %v7592_v44  ;;  %v7596_v35 = vsub.f32 0.0, %v14626_v24  ;;  %v14634_v12 = vld [vmem:[#allocation59_spill] sm:$0xff]  ;;  %v7613_v44 = vpop.eup %4656  ;;  %v14638_v24 = vld [vmem:[#allocation200_spill] sm:$0xff] }
 0x170   : > { %v7607_v21 = vsub.f32 0.0, %v14632_v62  ;;  %v14635_v51 = vand.u32 2147483647, %v14634_v12  ;;  %14637 = vst [vmem:[#allocation320_spill] sm:$0xff] %v7613_v44  ;;  %4676 = vrcp.f32 %v14638_v24  ;;  %v14640_v53 = vand.u32 2147483647, %v14639_v28 }
 0x171   : > { %14627 = vst [vmem:[#allocation317_spill] sm:$0xff] %v7596_v35  ;;  %v14642_v32 = vand.u32 2147483647, %v14641_v39  ;;  %v14643_v13 = vand.u32 2147483647, %v14422_v15  ;;  %v14646_v12 = vld [vmem:[#allocation62_spill] sm:$0xff] }
 0x172   : > { %14633 = vst [vmem:[#allocation198_spill] sm:$0xff] %v7607_v21  ;;  %v7611_v54 = vsub.f32 0.0, %v14635_v51  ;;  %v7618_v35 = vsub.f32 0.0, %v14640_v53  ;;  %v7628_v21 = vpop.eup %4658  ;;  %v14645_v51 = vld [vmem:[#allocation201_spill] sm:$0xff]  ;;  %v14647_v44 = vand.u32 2147483647, %v14646_v12 }
 0x173   : > { %v7622_v49 = vsub.f32 0.0, %v14642_v32  ;;  %v7626_v62 = vsub.f32 0.0, %v14643_v13  ;;  %14644 = vst [vmem:[#allocation200_spill] sm:$0xff] %v7628_v21  ;;  %4678 = vrcp.f32 %v14645_v51  ;;  %v14649_v24 = vand.u32 2147483647, %v14424_v43  ;;  %v7643_v28 = vpop.eup %4660  ;;  %v14654_v13 = vld [vmem:[#allocation202_spill] sm:$0xff] }
 0x174   : > { %14636 = vst [vmem:[#allocation319_spill] sm:$0xff] %v7611_v54  ;;  %v7633_v54 = vsub.f32 0.0, %v14647_v44  ;;  %v14651_v39 = vand.u32 2147483647, %v14427_v20  ;;  %14653 = vst [vmem:[#allocation323_spill] sm:$0xff] %v7643_v28  ;;  %4680 = vrcp.f32 %v14654_v13  ;;  %v14657_v51 = vld [vmem:[#allocation65_spill] sm:$0xff] }
 0x175   : > { %v7637_v53 = vsub.f32 0.0, %v14649_v24  ;;  %v14655_v21 = vand.u32 2147483647, %v14428_v3  ;;  %v14658_v12 = vand.u32 2147483647, %v14657_v51  ;;  %v14665_v20 = vld [vmem:[#allocation66_spill] sm:$0xff] }
 0x176   : > { %14648 = vst [vmem:[#allocation201_spill] sm:$0xff] %v7633_v54  ;;  %v7641_v32 = vsub.f32 0.0, %v14651_v39  ;;  %v14660_v54 = vld [vmem:[#allocation186_spill] sm:$0xff]  ;;  %v14664_v39 = vld [vmem:[#allocation204_spill] sm:$0xff]  ;;  %v14666_v28 = vand.u32 2147483647, %v14665_v20 }
 0x177   : > { %14650 = vst [vmem:[#allocation321_spill] sm:$0xff] %v7637_v53  ;;  %v7648_v15 = vsub.f32 0.0, %v14655_v21  ;;  %v7652_v44 = vsub.f32 0.0, %v14658_v12  ;;  %v14661_v43 = vand.u32 2147483647, %v14660_v54  ;;  %v7658_v53 = vpop.eup %4662  ;;  %4682 = vrcp.f32 %v14664_v39  ;;  %v14668_v13 = vld [vmem:[#allocation43_spill] sm:$0xff] }
 0x178   : > { %14652 = vst [vmem:[#allocation322_spill] sm:$0xff] %v7641_v32  ;;  %14663 = vst [vmem:[#allocation326_spill] sm:$0xff] %v7658_v53  ;;  %v7663_v32 = vsub.f32 0.0, %v14666_v28  ;;  %v14669_v3 = vand.u32 2147483647, %v14668_v13  ;;  %v14676_v54 = vld [vmem:[#allocation250_spill] sm:$0xff] }
 0x179   : > { %14656 = vst [vmem:[#allocation202_spill] sm:$0xff] %v7648_v15  ;;  %14659 = vst [vmem:[#allocation324_spill] sm:$0xff] %v7652_v44  ;;  %v7656_v24 = vsub.f32 0.0, %v14661_v43  ;;  %v14671_v15 = vld [vmem:[#allocation44_spill] sm:$0xff]  ;;  %v7673_v44 = vpop.eup %4664  ;;  %v14675_v43 = vld [vmem:[#allocation207_spill] sm:$0xff] }
 0x17a   : > { %14667 = vst [vmem:[#allocation204_spill] sm:$0xff] %v7663_v32  ;;  %v7667_v21 = vsub.f32 0.0, %v14669_v3  ;;  %v14672_v51 = vand.u32 2147483647, %v14671_v15  ;;  %14674 = vst [vmem:[#allocation327_spill] sm:$0xff] %v7673_v44  ;;  %4684 = vrcp.f32 %v14675_v43  ;;  %v14678_v39 = vld [vmem:[#allocation251_spill] sm:$0xff] }
 0x17b   : > { %14662 = vst [vmem:[#allocation325_spill] sm:$0xff] %v7656_v24  ;;  %v14677_v53 = vand.u32 2147483647, %v14676_v54  ;;  %v14679_v20 = vand.u32 2147483647, %v14678_v39  ;;  %v14681_v32 = vld [vmem:[#allocation45_spill] sm:$0xff] }
 0x17c   : > { %14670 = vst [vmem:[#allocation43_spill] sm:$0xff] %v7667_v21  ;;  %v7671_v12 = vsub.f32 0.0, %v14672_v51  ;;  %v14682_v13 = vand.u32 2147483647, %v14681_v32  ;;  %v7688_v21 = vpop.eup %4666  ;;  %v14684_v15 = vld [vmem:[#allocation209_spill] sm:$0xff]  ;;  %v14687_v43 = vld [vmem:[#allocation254_spill] sm:$0xff] }
 0x17d   : > { %v7678_v24 = vsub.f32 0.0, %v14677_v53  ;;  %v7682_v28 = vsub.f32 0.0, %v14679_v20  ;;  %14683 = vst [vmem:[#allocation250_spill] sm:$0xff] %v7688_v21  ;;  %4686 = vrcp.f32 %v14684_v15  ;;  %v14685_v51 = vld [vmem:[#allocation253_spill] sm:$0xff]  ;;  %v14688_v54 = vand.u32 2147483647, %v14687_v43 }
 0x17e   : > { %14673 = vst [vmem:[#allocation44_spill] sm:$0xff] %v7671_v12  ;;  %v7686_v3 = vsub.f32 0.0, %v14682_v13  ;;  %v14686_v44 = vand.u32 2147483647, %v14685_v51  ;;  %v14690_v39 = vand.u32 2147483647, %v7164_v46 }
 0x17f   : > { %14680 = vst [vmem:[#allocation207_spill] sm:$0xff] %v7682_v28  ;;  %v7697_v53 = vsub.f32 0.0, %v14688_v54  ;;  %v7703_v28 = vpop.eup %4668  ;;  %v14692_v32 = vld [vmem:[#allocation211_spill] sm:$0xff]  ;;  %v14693_v13 = vand.u32 2147483647, %v7168_v0  ;;  %v14694_v15 = vld [vmem:[#allocation86_spill] sm:$0xff] }
 0x180   : > { %v7693_v12 = vsub.f32 0.0, %v14686_v44  ;;  %v7701_v20 = vsub.f32 0.0, %v14690_v39  ;;  %14691 = vst [vmem:[#allocation45_spill] sm:$0xff] %v7703_v28  ;;  %4688 = vrcp.f32 %v14692_v32  ;;  %v14695_v51 = vand.u32 2147483647, %v14694_v15  ;;  %v14698_v46 = vld [vmem:[#allocation214_spill] sm:$0xff] }
 0x181   : > { %14689 = vst [vmem:[#allocation251_spill] sm:$0xff] %v7697_v53  ;;  %v7708_v21 = vsub.f32 0.0, %v14693_v13  ;;  %v14696_v43 = vand.u32 2147483647, %v6739_v52  ;;  %v7718_v53 = vpop.eup %4670  ;;  %4690 = vrcp.f32 %v14698_v46  ;;  %v14699_v39 = vand.u32 2147483647, %v6766_v36 }
 0x182   : > { %v7712_v44 = vsub.f32 0.0, %v14695_v51  ;;  %14697 = vst [vmem:[#allocation209_spill] sm:$0xff] %v7718_v53  ;;  %v14700_v0 = vand.u32 2147483647, %v6777_v55  ;;  %v14701_v13 = vand.u32 2147483647, %v6804_v58  ;;  %v7733_v15 = vpop.eup %4672 }
 0x183   : > { %v7716_v54 = vsub.f32 0.0, %v14696_v43  ;;  %v7723_v28 = vsub.f32 0.0, %v14699_v39  ;;  %14702 = vst [vmem:[#allocation253_spill] sm:$0xff] %v7733_v15  ;;  %v14703_v43 = vld [vmem:[#allocation217_spill] sm:$0xff]  ;;  %v14704_v53 = vand.u32 2147483647, %v6815_v37  ;;  %v7748_v55 = vpop.eup %4674 }
 0x184   : > { %v7727_v32 = vsub.f32 0.0, %v14700_v0  ;;  %v7731_v51 = vsub.f32 0.0, %v14701_v13  ;;  %4692 = vrcp.f32 %v14703_v43  ;;  %v14705_v46 = vand.u32 2147483647, %v6842_v2  ;;  %14707 = vst [vmem:[#allocation254_spill] sm:$0xff] %v7748_v55  ;;  %v14708_v13 = vld [vmem:[#allocation219_spill] sm:$0xff]  ;;  %v7763_v37 = vpop.eup %4676 }
 0x185   : > { %v7738_v52 = vsub.f32 0.0, %v14704_v53  ;;  %v14706_v36 = vand.u32 2147483647, %v6853_v41  ;;  %4694 = vrcp.f32 %v14708_v13  ;;  %v14709_v58 = vand.u32 2147483647, %v6864_v10  ;;  %14712 = vst [vmem:[#allocation211_spill] sm:$0xff] %v7763_v37 }
 0x186   : > { %v7742_v39 = vsub.f32 0.0, %v14705_v46  ;;  %v14710_v43 = vand.u32 2147483647, %v6868_v7  ;;  %v14711_v2 = vand.u32 2147483647, %v6878_v34  ;;  %v7778_v7 = vpop.eup %4678 }
 0x187   : > { %v7746_v0 = vsub.f32 0.0, %v14706_v36  ;;  %v7753_v15 = vsub.f32 0.0, %v14709_v58  ;;  %v14713_v36 = vld [vmem:[#allocation142_spill] sm:$0xff]  ;;  %v14714_v55 = vand.u32 2147483647, %v6882_v42  ;;  %14717 = vst [vmem:[#allocation214_spill] sm:$0xff] %v7778_v7  ;;  %v7793_v42 = vpop.eup %4680 }
 0x188   : > { %v7757_v53 = vsub.f32 0.0, %v14710_v43  ;;  %v7761_v46 = vsub.f32 0.0, %v14711_v2  ;;  %4696 = vrcp.f32 %v14713_v36  ;;  %v14715_v13 = vand.u32 2147483647, %v6892_v22  ;;  %v14718_v2 = vld [vmem:[#allocation146_spill] sm:$0xff]  ;;  %14722 = vst [vmem:[#allocation217_spill] sm:$0xff] %v7793_v42 }
 0x189   : > { %v7768_v41 = vsub.f32 0.0, %v14714_v55  ;;  %v14716_v10 = vand.u32 2147483647, %v6896_v50  ;;  %4698 = vrcp.f32 %v14718_v2  ;;  %v14719_v34 = vand.u32 2147483647, %v6906_v23 }
 0x18a   : > { %v7772_v58 = vsub.f32 0.0, %v14715_v13  ;;  %v14720_v36 = vand.u32 2147483647, %v6910_v27  ;;  %v14721_v22 = vand.u32 2147483647, %v6920_v9  ;;  %v7808_v27 = vpop.eup %4682 }
 0x18b   : > { %v7776_v43 = vsub.f32 0.0, %v14716_v10  ;;  %v7783_v37 = vsub.f32 0.0, %v14719_v34  ;;  %v14723_v10 = vld [vmem:[#allocation150_spill] sm:$0xff]  ;;  %v14724_v7 = vand.u32 2147483647, %v6924_v63  ;;  %14727 = vst [vmem:[#allocation219_spill] sm:$0xff] %v7808_v27  ;;  %v7823_v63 = vpop.eup %4684 }
 0x18c   : > { %v7787_v55 = vsub.f32 0.0, %v14720_v36  ;;  %v7791_v13 = vsub.f32 0.0, %v14721_v22  ;;  %4700 = vrcp.f32 %v14723_v10  ;;  %v14725_v2 = vand.u32 2147483647, %v6934_v48  ;;  %v14728_v22 = vld [vmem:[#allocation158_spill] sm:$0xff]  ;;  %14732 = vst [vmem:[#allocation142_spill] sm:$0xff] %v7823_v63 }
 0x18d   : > { %v7798_v50 = vsub.f32 0.0, %v14724_v7  ;;  %v14726_v23 = vand.u32 2147483647, %v6938_v47  ;;  %4702 = vrcp.f32 %v14728_v22  ;;  %v14729_v9 = vand.u32 2147483647, %v6948_v60 }
 0x18e   : > { %v7802_v34 = vsub.f32 0.0, %v14725_v2  ;;  %v14730_v10 = vand.u32 2147483647, %v6952_v18  ;;  %v14731_v48 = vand.u32 2147483647, %v6959_v6  ;;  %v14737_v18 = vld [vmem:[#allocation171_spill] sm:$0xff] }
 0x18f   : > { %v7806_v36 = vsub.f32 0.0, %v14726_v23  ;;  %v7813_v42 = vsub.f32 0.0, %v14729_v9  ;;  %v14733_v23 = vld [vmem:[#allocation166_spill] sm:$0xff]  ;;  %v14734_v27 = vand.u32 2147483647, %v6963_v26 }
 0x190   : > { %v7817_v7 = vsub.f32 0.0, %v14730_v10  ;;  %v7821_v2 = vsub.f32 0.0, %v14731_v48  ;;  %4704 = vrcp.f32 %v14733_v23  ;;  %v14735_v22 = vand.u32 2147483647, %v6967_v14  ;;  %v7835_v10 = vpop.eup %4686 }
 0x191   : > { %v7828_v47 = vsub.f32 0.0, %v14734_v27  ;;  %v1417_v60 = vmul.f32 1.442695, %v7442_v45  ;;  %14736 = vst [vmem:[#allocation146_spill] sm:$0xff] %v7835_v10  ;;  %4706 = vrcp.f32 %v14737_v18  ;;  %v14738_v48 = vand.u32 2147483647, %v6977_v29  ;;  %v7847_v26 = vpop.eup %4688 }
 0x192   : > { %v7832_v9 = vsub.f32 0.0, %v14735_v22  ;;  %v14739_v23 = vand.u32 2147483647, %v6981_v11  ;;  %v1419_v27 = vmul.f32 1.442695, %v7446_v19  ;;  %14740 = vst [vmem:[#allocation150_spill] sm:$0xff] %v7847_v26  ;;  %v7859_v29 = vpop.eup %4690 }
 0x193   : > { %v7840_v6 = vsub.f32 0.0, %v14738_v48  ;;  %v14741_v22 = vld [vmem:[#allocation175_spill] sm:$0xff]  ;;  %v14742_v45 = vand.u32 2147483647, %v6988_v33  ;;  %v14743_v18 = vand.u32 2147483647, %v6992_v38  ;;  %v7871_v33 = vpop.eup %4692 }
 0x194   : > { %v7844_v63 = vsub.f32 0.0, %v14739_v23  ;;  %4708 = vrcp.f32 %v14741_v22  ;;  %v1421_v48 = vmul.f32 1.442695, %v7453_v17  ;;  %14744 = vst [vmem:[#allocation158_spill] sm:$0xff] %v7859_v29  ;;  %v14745_v23 = vld [vmem:[#allocation179_spill] sm:$0xff]  ;;  %14749 = vst [vmem:[#allocation171_spill] sm:$0xff] %v7871_v33 }
 0x195   : > { %v7852_v14 = vsub.f32 0.0, %v14742_v45  ;;  %v7856_v10 = vsub.f32 0.0, %v14743_v18  ;;  %4710 = vrcp.f32 %v14745_v23  ;;  %v14746_v19 = vand.u32 2147483647, %v6996_v30 }
 0x196   : > { %v14747_v22 = vand.u32 2147483647, %v7006_v5  ;;  %v1423_v45 = vmul.f32 1.442695, %v7457_v31  ;;  %v14750_v18 = vand.u32 2147483647, %v7010_v59  ;;  %4712 = vpow2.f32 %v1417_v60 }
 0x197   : > { %v7864_v11 = vsub.f32 0.0, %v14746_v19  ;;  %v14751_v17 = vand.u32 2147483647, %v7017_v56  ;;  %v1425_v23 = vmul.f32 1.442695, %v7461_v1  ;;  %v7882_v19 = vpop.eup %4694  ;;  %v14754_v5 = vld [vmem:[#allocation247_spill] sm:$0xff]  ;;  %4714 = vpow2.f32 %v1419_v27 }
 0x198   : > { %v7868_v26 = vsub.f32 0.0, %v14747_v22  ;;  %v7875_v38 = vsub.f32 0.0, %v14750_v18  ;;  %14753 = vst [vmem:[#allocation179_spill] sm:$0xff] %v7882_v19  ;;  %v14755_v22 = vand.u32 2147483647, %v14754_v5  ;;  %v14756_v31 = vld [vmem:[#allocation155_spill] sm:$0xff]  ;;  %v7893_v59 = vpop.eup %4696  ;;  %4716 = vpow2.f32 %v1421_v48 }
 0x199   : > { %v7879_v29 = vsub.f32 0.0, %v14751_v17  ;;  %v1427_v18 = vmul.f32 1.442695, %v7468_v61  ;;  %14759 = vst [vmem:[#allocation328_spill] sm:$0xff] %v7893_v59  ;;  %v14760_v17 = vld [vmem:[#allocation256_spill] sm:$0xff]  ;;  %v14763_v1 = vld [vmem:[#allocation257_spill] sm:$0xff]  ;;  %v7904_v5 = vpop.eup %4698  ;;  %4718 = vpow2.f32 %v1423_v45 }
 0x19a   : > { %14748 = vst [vmem:[#allocation166_spill] sm:$0xff] %v7868_v26  ;;  %v7886_v30 = vsub.f32 0.0, %v14755_v22  ;;  %v14757_v26 = vand.u32 2147483647, %v14756_v31  ;;  %v14761_v56 = vand.u32 2147483647, %v14760_v17  ;;  %v7915_v17 = vpop.eup %4700  ;;  %4720 = vpow2.f32 %v1425_v23 }
 0x19b   : > { %14752 = vst [vmem:[#allocation175_spill] sm:$0xff] %v7879_v29  ;;  %v14764_v29 = vand.u32 2147483647, %v14763_v1  ;;  %v1429_v22 = vmul.f32 1.442695, %v7472_v4  ;;  %14766 = vst [vmem:[#allocation329_spill] sm:$0xff] %v7904_v5  ;;  %4722 = vpow2.f32 %v1427_v18 }
 0x19c   : > { %v7890_v33 = vsub.f32 0.0, %v14757_v26  ;;  %v7897_v60 = vsub.f32 0.0, %v14761_v56  ;;  %v14767_v26 = vld [vmem:[#allocation159_spill] sm:$0xff]  ;;  %v1431_v56 = vmul.f32 1.442695, %v7476_v40  ;;  %14773 = vst [vmem:[#allocation330_spill] sm:$0xff] %v7915_v17 }
 0x19d   : > { %v7901_v19 = vsub.f32 0.0, %v14764_v29  ;;  %v14768_v31 = vand.u32 2147483647, %v14767_v26  ;;  %v14770_v61 = vld [vmem:[#allocation259_spill] sm:$0xff]  ;;  %v14774_v29 = vld [vmem:[#allocation260_spill] sm:$0xff]  ;;  %4724 = vpow2.f32 %v1429_v22 }
 0x19e   : > { %14758 = vst [vmem:[#allocation155_spill] sm:$0xff] %v7890_v33  ;;  %14762 = vst [vmem:[#allocation256_spill] sm:$0xff] %v7897_v60  ;;  %v14771_v33 = vand.u32 2147483647, %v14770_v61  ;;  %v14775_v1 = vand.u32 2147483647, %v14774_v29  ;;  %4726 = vpow2.f32 %v1431_v56 }
 0x19f   : > { %14765 = vst [vmem:[#allocation257_spill] sm:$0xff] %v7901_v19  ;;  %v7908_v27 = vsub.f32 0.0, %v14768_v31  ;;  %v14777_v4 = vld [vmem:[#allocation163_spill] sm:$0xff]  ;;  %v1433_v26 = vmul.f32 1.442695, %v7483_v25  ;;  %v7926_v31 = vpop.eup %4702  ;;  %v14787_v29 = vld [vmem:[#allocation297_spill] sm:$0xff] }
 0x1a0   : > { %v7912_v59 = vsub.f32 0.0, %v14771_v33  ;;  %v7919_v48 = vsub.f32 0.0, %v14775_v1  ;;  %v14778_v19 = vand.u32 2147483647, %v14777_v4  ;;  %14780 = vst [vmem:[#allocation331_spill] sm:$0xff] %v7926_v31  ;;  %v14781_v33 = vld [vmem:[#allocation262_spill] sm:$0xff] }
 0x1a1   : > { %14769 = vst [vmem:[#allocation159_spill] sm:$0xff] %v7908_v27  ;;  %v14782_v61 = vand.u32 2147483647, %v14781_v33  ;;  %v14784_v40 = vld [vmem:[#allocation263_spill] sm:$0xff]  ;;  %v1435_v1 = vmul.f32 1.442695, %v14787_v29  ;;  %4728 = vpow2.f32 %v1433_v26 }
 0x1a2   : > { %14772 = vst [vmem:[#allocation259_spill] sm:$0xff] %v7912_v59  ;;  %14776 = vst [vmem:[#allocation260_spill] sm:$0xff] %v7919_v48  ;;  %v7923_v5 = vsub.f32 0.0, %v14778_v19  ;;  %v14785_v59 = vand.u32 2147483647, %v14784_v40  ;;  %v7937_v48 = vpop.eup %4704  ;;  %v14789_v19 = vld [vmem:[#allocation167_spill] sm:$0xff] }
 0x1a3   : > { %v7930_v45 = vsub.f32 0.0, %v14782_v61  ;;  %14788 = vst [vmem:[#allocation297_spill] sm:$0xff] %v7937_v48  ;;  %v14790_v4 = vand.u32 2147483647, %v14789_v19  ;;  %v14792_v25 = vld [vmem:[#allocation265_spill] sm:$0xff]  ;;  %v14795_v33 = vld [vmem:[#allocation298_spill] sm:$0xff]  ;;  %4730 = vpow2.f32 %v1435_v1 }
 0x1a4   : > { %14779 = vst [vmem:[#allocation163_spill] sm:$0xff] %v7923_v5  ;;  %v7934_v17 = vsub.f32 0.0, %v14785_v59  ;;  %v14793_v5 = vand.u32 2147483647, %v14792_v25  ;;  %v1437_v61 = vmul.f32 1.442695, %v14795_v33 }
 0x1a5   : > { %14783 = vst [vmem:[#allocation262_spill] sm:$0xff] %v7930_v45  ;;  %v7941_v23 = vsub.f32 0.0, %v14790_v4  ;;  %v7948_v45 = vpop.eup %4706  ;;  %v14797_v59 = vld [vmem:[#allocation266_spill] sm:$0xff]  ;;  %v14800_v29 = vld [vmem:[#allocation81_spill] sm:$0xff] }
 0x1a6   : > { %14786 = vst [vmem:[#allocation263_spill] sm:$0xff] %v7934_v17  ;;  %v7945_v31 = vsub.f32 0.0, %v14793_v5  ;;  %14796 = vst [vmem:[#allocation298_spill] sm:$0xff] %v7948_v45  ;;  %v14798_v40 = vand.u32 2147483647, %v14797_v59  ;;  %v14803_v19 = vld [vmem:[#allocation190_spill] sm:$0xff]  ;;  %4732 = vpow2.f32 %v1437_v61 }
 0x1a7   : > { %14791 = vst [vmem:[#allocation167_spill] sm:$0xff] %v7941_v23  ;;  %v14801_v17 = vand.u32 2147483647, %v14800_v29  ;;  %v1439_v4 = vmul.f32 1.442695, %v14803_v19  ;;  %v7959_v23 = vpop.eup %4708  ;;  %v14805_v5 = vld [vmem:[#allocation268_spill] sm:$0xff] }
 0x1a8   : > { %14794 = vst [vmem:[#allocation265_spill] sm:$0xff] %v7945_v31  ;;  %v7952_v18 = vsub.f32 0.0, %v14798_v40  ;;  %14804 = vst [vmem:[#allocation190_spill] sm:$0xff] %v7959_v23  ;;  %v14806_v25 = vand.u32 2147483647, %v14805_v5  ;;  %v14808_v33 = vld [vmem:[#allocation269_spill] sm:$0xff] }
 0x1a9   : > { %v7956_v48 = vsub.f32 0.0, %v14801_v17  ;;  %v14809_v31 = vand.u32 2147483647, %v14808_v33  ;;  %v14811_v59 = vld [vmem:[#allocation300_spill] sm:$0xff]  ;;  %v14813_v17 = vld [vmem:[#allocation87_spill] sm:$0xff]  ;;  %v14819_v5 = vld [vmem:[#allocation301_spill] sm:$0xff]  ;;  %4734 = vpow2.f32 %v1439_v4 }
 0x1aa   : > { %14799 = vst [vmem:[#allocation266_spill] sm:$0xff] %v7952_v18  ;;  %v7963_v22 = vsub.f32 0.0, %v14806_v25  ;;  %v1441_v40 = vmul.f32 1.442695, %v14811_v59  ;;  %v7970_v18 = vpop.eup %4710  ;;  %v14814_v29 = vand.u32 2147483647, %v14813_v17 }
 0x1ab   : > { %14802 = vst [vmem:[#allocation81_spill] sm:$0xff] %v7956_v48  ;;  %v7967_v45 = vsub.f32 0.0, %v14809_v31  ;;  %14812 = vst [vmem:[#allocation300_spill] sm:$0xff] %v7970_v18  ;;  %v14816_v19 = vld [vmem:[#allocation271_spill] sm:$0xff]  ;;  %v1443_v25 = vmul.f32 1.442695, %v14819_v5 }
 0x1ac   : > { %14807 = vst [vmem:[#allocation268_spill] sm:$0xff] %v7963_v22  ;;  %v7974_v56 = vsub.f32 0.0, %v14814_v29  ;;  %v14817_v48 = vand.u32 2147483647, %v14816_v19  ;;  %v7981_v22 = vpop.eup %4712  ;;  %v14821_v31 = vld [vmem:[#allocation272_spill] sm:$0xff]  ;;  %v14824_v59 = vld [vmem:[#allocation93_spill] sm:$0xff]  ;;  %4736 = vpow2.f32 %v1441_v40 }
 0x1ad   : > { %14810 = vst [vmem:[#allocation269_spill] sm:$0xff] %v7967_v45  ;;  %14820 = vst [vmem:[#allocation301_spill] sm:$0xff] %v7981_v22  ;;  %v14822_v33 = vand.u32 2147483647, %v14821_v31  ;;  %v14825_v45 = vand.u32 2147483647, %v14824_v59  ;;  %4738 = vpow2.f32 %v1443_v25 }
 0x1ae   : > { %14815 = vst [vmem:[#allocation87_spill] sm:$0xff] %v7974_v56  ;;  %v7978_v23 = vsub.f32 0.0, %v14817_v48  ;;  %v14827_v17 = vld [vmem:[#allocation191_spill] sm:$0xff]  ;;  %v7992_v56 = vpop.eup %4714  ;;  %v14829_v48 = vld [vmem:[#allocation274_spill] sm:$0xff] }
 0x1af   : > { %v7985_v26 = vsub.f32 0.0, %v14822_v33  ;;  %v7989_v18 = vsub.f32 0.0, %v14825_v45  ;;  %v1445_v29 = vmul.f32 1.442695, %v14827_v17  ;;  %14828 = vst [vmem:[#allocation191_spill] sm:$0xff] %v7992_v56  ;;  %v14832_v5 = vld [vmem:[#allocation275_spill] sm:$0xff] }
 0x1b0   : > { %14818 = vst [vmem:[#allocation271_spill] sm:$0xff] %v7978_v23  ;;  %v14830_v19 = vand.u32 2147483647, %v14829_v48  ;;  %v14833_v23 = vand.u32 2147483647, %v14832_v5  ;;  %v14835_v31 = vld [vmem:[#allocation303_spill] sm:$0xff] }
 0x1b1   : > { %14823 = vst [vmem:[#allocation272_spill] sm:$0xff] %v7985_v26  ;;  %14826 = vst [vmem:[#allocation93_spill] sm:$0xff] %v7989_v18  ;;  %v1447_v33 = vmul.f32 1.442695, %v14835_v31  ;;  %v8003_v26 = vpop.eup %4716  ;;  %v14837_v45 = vld [vmem:[#allocation99_spill] sm:$0xff]  ;;  %v14840_v17 = vld [vmem:[#allocation277_spill] sm:$0xff]  ;;  %4740 = vpow2.f32 %v1445_v29 }
 0x1b2   : > { %v7996_v1 = vsub.f32 0.0, %v14830_v19  ;;  %v8000_v22 = vsub.f32 0.0, %v14833_v23  ;;  %14836 = vst [vmem:[#allocation303_spill] sm:$0xff] %v8003_v26  ;;  %v14838_v59 = vand.u32 2147483647, %v14837_v45  ;;  %v14843_v48 = vld [vmem:[#allocation304_spill] sm:$0xff] }
 0x1b3   : > { %v14841_v18 = vand.u32 2147483647, %v14840_v17  ;;  %v1449_v19 = vmul.f32 1.442695, %v14843_v48  ;;  %v14845_v23 = vld [vmem:[#allocation278_spill] sm:$0xff]  ;;  %v14848_v31 = vld [vmem:[#allocation103_spill] sm:$0xff]  ;;  %4742 = vpow2.f32 %v1447_v33 }
 0x1b4   : > { %14831 = vst [vmem:[#allocation274_spill] sm:$0xff] %v7996_v1  ;;  %14834 = vst [vmem:[#allocation275_spill] sm:$0xff] %v8000_v22  ;;  %v8007_v61 = vsub.f32 0.0, %v14838_v59  ;;  %v8014_v1 = vpop.eup %4718  ;;  %v14846_v5 = vand.u32 2147483647, %v14845_v23  ;;  %v14851_v45 = vld [vmem:[#allocation192_spill] sm:$0xff] }
 0x1b5   : > { %v8011_v56 = vsub.f32 0.0, %v14841_v18  ;;  %14844 = vst [vmem:[#allocation304_spill] sm:$0xff] %v8014_v1  ;;  %v14849_v22 = vand.u32 2147483647, %v14848_v31  ;;  %v1451_v59 = vmul.f32 1.442695, %v14851_v45  ;;  %4744 = vpow2.f32 %v1449_v19 }
 0x1b6   : > { %14839 = vst [vmem:[#allocation99_spill] sm:$0xff] %v8007_v61  ;;  %v8018_v4 = vsub.f32 0.0, %v14846_v5  ;;  %v8025_v61 = vpop.eup %4720  ;;  %v14853_v18 = vld [vmem:[#allocation280_spill] sm:$0xff]  ;;  %v14856_v48 = vld [vmem:[#allocation281_spill] sm:$0xff]  ;;  %v14859_v23 = vld [vmem:[#allocation306_spill] sm:$0xff] }
 0x1b7   : > { %14842 = vst [vmem:[#allocation277_spill] sm:$0xff] %v8011_v56  ;;  %v8022_v26 = vsub.f32 0.0, %v14849_v22  ;;  %14852 = vst [vmem:[#allocation192_spill] sm:$0xff] %v8025_v61  ;;  %v14854_v17 = vand.u32 2147483647, %v14853_v18  ;;  %v14861_v22 = vld [vmem:[#allocation107_spill] sm:$0xff]  ;;  %4746 = vpow2.f32 %v1451_v59 }
 0x1b8   : > { %14847 = vst [vmem:[#allocation278_spill] sm:$0xff] %v8018_v4  ;;  %v14857_v56 = vand.u32 2147483647, %v14856_v48  ;;  %v1453_v5 = vmul.f32 1.442695, %v14859_v23  ;;  %v8036_v4 = vpop.eup %4722  ;;  %v14864_v45 = vld [vmem:[#allocation283_spill] sm:$0xff] }
 0x1b9   : > { %14850 = vst [vmem:[#allocation103_spill] sm:$0xff] %v8022_v26  ;;  %v8029_v40 = vsub.f32 0.0, %v14854_v17  ;;  %14860 = vst [vmem:[#allocation306_spill] sm:$0xff] %v8036_v4  ;;  %v14862_v31 = vand.u32 2147483647, %v14861_v22  ;;  %v14867_v18 = vld [vmem:[#allocation307_spill] sm:$0xff] }
 0x1ba   : > { %v8033_v1 = vsub.f32 0.0, %v14857_v56  ;;  %v14865_v26 = vand.u32 2147483647, %v14864_v45  ;;  %v1455_v17 = vmul.f32 1.442695, %v14867_v18  ;;  %v14869_v56 = vld [vmem:[#allocation284_spill] sm:$0xff]  ;;  %4748 = vpow2.f32 %v1453_v5 }
 0x1bb   : > { %14855 = vst [vmem:[#allocation280_spill] sm:$0xff] %v8029_v40  ;;  %v8040_v25 = vsub.f32 0.0, %v14862_v31  ;;  %v8047_v40 = vpop.eup %4724  ;;  %v14870_v48 = vand.u32 2147483647, %v14869_v56  ;;  %v14872_v23 = vld [vmem:[#allocation111_spill] sm:$0xff]  ;;  %v14875_v22 = vld [vmem:[#allocation193_spill] sm:$0xff] }
 0x1bc   : > { %14858 = vst [vmem:[#allocation281_spill] sm:$0xff] %v8033_v1  ;;  %v8044_v61 = vsub.f32 0.0, %v14865_v26  ;;  %14868 = vst [vmem:[#allocation307_spill] sm:$0xff] %v8047_v40  ;;  %v14873_v1 = vand.u32 2147483647, %v14872_v23  ;;  %v14877_v26 = vld [vmem:[#allocation286_spill] sm:$0xff]  ;;  %4750 = vpow2.f32 %v1455_v17 }
 0x1bd   : > { %14863 = vst [vmem:[#allocation107_spill] sm:$0xff] %v8040_v25  ;;  %v8051_v29 = vsub.f32 0.0, %v14870_v48  ;;  %v1457_v31 = vmul.f32 1.442695, %v14875_v22  ;;  %v8058_v25 = vpop.eup %4726  ;;  %v14878_v45 = vand.u32 2147483647, %v14877_v26 }
 0x1be   : > { %14866 = vst [vmem:[#allocation283_spill] sm:$0xff] %v8044_v61  ;;  %v8055_v4 = vsub.f32 0.0, %v14873_v1  ;;  %14876 = vst [vmem:[#allocation193_spill] sm:$0xff] %v8058_v25  ;;  %v14880_v18 = vld [vmem:[#allocation287_spill] sm:$0xff]  ;;  %v14883_v56 = vld [vmem:[#allocation309_spill] sm:$0xff] }
 0x1bf   : > { %14871 = vst [vmem:[#allocation284_spill] sm:$0xff] %v8051_v29  ;;  %v8062_v33 = vsub.f32 0.0, %v14878_v45  ;;  %v14881_v61 = vand.u32 2147483647, %v14880_v18  ;;  %v1459_v48 = vmul.f32 1.442695, %v14883_v56  ;;  %v8069_v29 = vpop.eup %4728  ;;  %4752 = vpow2.f32 %v1457_v31 }
 0x1c0   : > { %14874 = vst [vmem:[#allocation111_spill] sm:$0xff] %v8055_v4  ;;  %14884 = vst [vmem:[#allocation309_spill] sm:$0xff] %v8069_v29  ;;  %v14885_v1 = vld [vmem:[#allocation114_spill] sm:$0xff]  ;;  %v14888_v22 = vld [vmem:[#allocation289_spill] sm:$0xff]  ;;  %v1473_v31 = vmul.f32 1.442695, %v7581_v8 }
 0x1c1   : > { %14879 = vst [vmem:[#allocation286_spill] sm:$0xff] %v8062_v33  ;;  %v8066_v40 = vsub.f32 0.0, %v14881_v61  ;;  %v14886_v23 = vand.u32 2147483647, %v14885_v1  ;;  %v14889_v4 = vand.u32 2147483647, %v14888_v22  ;;  %v8080_v33 = vpop.eup %4730  ;;  %4754 = vpow2.f32 %v1459_v48 }
 0x1c2   : > { %v14891_v26 = vld [vmem:[#allocation310_spill] sm:$0xff]  ;;  %v14896_v56 = vld [vmem:[#allocation116_spill] sm:$0xff]  ;;  %v1487_v8 = vmul.f32 1.442695, %v7618_v35 }
 0x1c3   : > { %14882 = vst [vmem:[#allocation287_spill] sm:$0xff] %v8066_v40  ;;  %v8073_v19 = vsub.f32 0.0, %v14886_v23  ;;  %v8077_v25 = vsub.f32 0.0, %v14889_v4  ;;  %v1461_v45 = vmul.f32 1.442695, %v14891_v26  ;;  %14892 = vst [vmem:[#allocation310_spill] sm:$0xff] %v8080_v33 }
 0x1c4   : > { %v14893_v61 = vld [vmem:[#allocation290_spill] sm:$0xff]  ;;  %v14897_v40 = vand.u32 2147483647, %v14896_v56  ;;  %v14901_v4 = vld [vmem:[#allocation292_spill] sm:$0xff]  ;;  %v14904_v26 = vld [vmem:[#allocation293_spill] sm:$0xff] }
 0x1c5   : > { %14887 = vst [vmem:[#allocation114_spill] sm:$0xff] %v8073_v19  ;;  %14890 = vst [vmem:[#allocation289_spill] sm:$0xff] %v8077_v25  ;;  %v14894_v18 = vand.u32 2147483647, %v14893_v61  ;;  %v14899_v1 = vld [vmem:[#allocation194_spill] sm:$0xff]  ;;  %v8091_v19 = vpop.eup %4732  ;;  %v14907_v61 = vld [vmem:[#allocation312_spill] sm:$0xff]  ;;  %4756 = vpow2.f32 %v1461_v45 }
 0x1c6   : > { %v8088_v29 = vsub.f32 0.0, %v14897_v40  ;;  %v1463_v23 = vmul.f32 1.442695, %v14899_v1  ;;  %14900 = vst [vmem:[#allocation194_spill] sm:$0xff] %v8091_v19  ;;  %v14902_v22 = vand.u32 2147483647, %v14901_v4 }
 0x1c7   : > { %v8084_v59 = vsub.f32 0.0, %v14894_v18  ;;  %v14905_v25 = vand.u32 2147483647, %v14904_v26  ;;  %v1465_v18 = vmul.f32 1.442695, %v14907_v61  ;;  %v14909_v40 = vld [vmem:[#allocation119_spill] sm:$0xff] }
 0x1c8   : > { %14898 = vst [vmem:[#allocation116_spill] sm:$0xff] %v8088_v29  ;;  %v8095_v5 = vsub.f32 0.0, %v14902_v22  ;;  %v14910_v56 = vand.u32 2147483647, %v14909_v40  ;;  %v14912_v1 = vld [vmem:[#allocation313_spill] sm:$0xff]  ;;  %v14914_v26 = vld [vmem:[#allocation195_spill] sm:$0xff]  ;;  %4758 = vpow2.f32 %v1463_v23 }
 0x1c9   : > { %14895 = vst [vmem:[#allocation290_spill] sm:$0xff] %v8084_v59  ;;  %v8099_v33 = vsub.f32 0.0, %v14905_v25  ;;  %v8102_v59 = vpop.eup %4734  ;;  %v1467_v19 = vmul.f32 1.442695, %v14912_v1  ;;  %v1469_v4 = vmul.f32 1.442695, %v7573_v16  ;;  %4760 = vpow2.f32 %v1465_v18 }
 0x1ca   : > { %14903 = vst [vmem:[#allocation292_spill] sm:$0xff] %v8095_v5  ;;  %14908 = vst [vmem:[#allocation312_spill] sm:$0xff] %v8102_v59  ;;  %v8106_v17 = vsub.f32 0.0, %v14910_v56  ;;  %v8110_v22 = vpop.eup %4736  ;;  %v1471_v25 = vmul.f32 1.442695, %v14914_v26  ;;  %v14917_v40 = vld [vmem:[#allocation316_spill] sm:$0xff] }
 0x1cb   : > { %14906 = vst [vmem:[#allocation293_spill] sm:$0xff] %v8099_v33  ;;  %14913 = vst [vmem:[#allocation313_spill] sm:$0xff] %v8110_v22  ;;  %v14915_v33 = vld [vmem:[#allocation196_spill] sm:$0xff]  ;;  %v8115_v5 = vpop.eup %4738  ;;  %v1477_v56 = vmul.f32 1.442695, %v14917_v40  ;;  %v14918_v59 = vld [vmem:[#allocation317_spill] sm:$0xff]  ;;  %4762 = vpow2.f32 %v1467_v19 }
 0x1cc   : > { %14911 = vst [vmem:[#allocation119_spill] sm:$0xff] %v8106_v17  ;;  %v1475_v61 = vmul.f32 1.442695, %v14915_v33  ;;  %14916 = vst [vmem:[#allocation195_spill] sm:$0xff] %v8115_v5  ;;  %v1479_v48 = vmul.f32 1.442695, %v14918_v59  ;;  %v8120_v17 = vpop.eup %4740  ;;  %4764 = vpow2.f32 %v1469_v4 }
 0x1cd   : > { %v1481_v1 = vmul.f32 1.442695, %v7603_v57  ;;  %14919 = vst [vmem:[#allocation196_spill] sm:$0xff] %v8120_v17  ;;  %v14920_v16 = vld [vmem:[#allocation198_spill] sm:$0xff]  ;;  %v14921_v22 = vld [vmem:[#allocation319_spill] sm:$0xff]  ;;  %v8125_v29 = vpop.eup %4742  ;;  %v14923_v40 = vld [vmem:[#allocation201_spill] sm:$0xff]  ;;  %4766 = vpow2.f32 %v1471_v25 }
 0x1ce   : > { %v1483_v45 = vmul.f32 1.442695, %v14920_v16  ;;  %v1485_v26 = vmul.f32 1.442695, %v14921_v22  ;;  %14922 = vst [vmem:[#allocation316_spill] sm:$0xff] %v8125_v29  ;;  %v8130_v5 = vpop.eup %4744  ;;  %v14925_v57 = vld [vmem:[#allocation321_spill] sm:$0xff]  ;;  %4768 = vpow2.f32 %v1473_v31 }
 0x1cf   : > { %v1489_v33 = vmul.f32 1.442695, %v7622_v49  ;;  %v1491_v23 = vmul.f32 1.442695, %v7626_v62  ;;  %v1493_v59 = vmul.f32 1.442695, %v14923_v40  ;;  %v8141_v29 = vpop.eup %4746  ;;  %4770 = vpow2.f32 %v1475_v61 }
 0x1d0   : > { %14924 = vst [vmem:[#allocation317_spill] sm:$0xff] %v8130_v5  ;;  %v8133_v18 = vmul.f32 1.442695, %v14925_v57  ;;  %v14926_v16 = vld [vmem:[#allocation322_spill] sm:$0xff]  ;;  %14928 = vst [vmem:[#allocation198_spill] sm:$0xff] %v8141_v29  ;;  %v14929_v49 = vld [vmem:[#allocation324_spill] sm:$0xff]  ;;  %v8152_v57 = vpop.eup %4748  ;;  %4772 = vpow2.f32 %v1477_v56 }
 0x1d1   : > { %v8136_v17 = vmul.f32 1.442695, %v14926_v16  ;;  %v14927_v22 = vld [vmem:[#allocation202_spill] sm:$0xff]  ;;  %v8144_v19 = vmul.f32 1.442695, %v14929_v49  ;;  %v14930_v62 = vld [vmem:[#allocation325_spill] sm:$0xff]  ;;  %v8163_v49 = vpop.eup %4750  ;;  %4774 = vpow2.f32 %v1479_v48 }
 0x1d2   : > { %v8139_v35 = vmul.f32 1.442695, %v14927_v22  ;;  %v8147_v40 = vmul.f32 1.442695, %v14930_v62  ;;  %v14931_v5 = vld [vmem:[#allocation204_spill] sm:$0xff]  ;;  %14932 = vst [vmem:[#allocation319_spill] sm:$0xff] %v8152_v57  ;;  %4776 = vpow2.f32 %v1481_v1 }
 0x1d3   : > { %v8150_v4 = vmul.f32 1.442695, %v14931_v5  ;;  %v14933_v16 = vld [vmem:[#allocation43_spill] sm:$0xff]  ;;  %v14934_v22 = vld [vmem:[#allocation44_spill] sm:$0xff]  ;;  %v8161_v25 = vmul.f32 1.442695, %v7678_v24  ;;  %4778 = vpow2.f32 %v1483_v45 }
 0x1d4   : > { %v8155_v27 = vmul.f32 1.442695, %v14933_v16  ;;  %v8158_v60 = vmul.f32 1.442695, %v14934_v22  ;;  %14935 = vst [vmem:[#allocation201_spill] sm:$0xff] %v8163_v49  ;;  %v14936_v62 = vld [vmem:[#allocation207_spill] sm:$0xff]  ;;  %v8174_v16 = vpop.eup %4752  ;;  %4780 = vpow2.f32 %v1485_v26 }
 0x1d5   : > { %v8166_v29 = vmul.f32 1.442695, %v14936_v62  ;;  %v8169_v5 = vmul.f32 1.442695, %v7686_v3  ;;  %v8172_v31 = vmul.f32 1.442695, %v7693_v12  ;;  %v8185_v62 = vpop.eup %4754  ;;  %4782 = vpow2.f32 %v1487_v8 }
 0x1d6   : > { %14937 = vst [vmem:[#allocation321_spill] sm:$0xff] %v8174_v16  ;;  %v14938_v22 = vld [vmem:[#allocation251_spill] sm:$0xff]  ;;  %v8180_v24 = vmul.f32 1.442695, %v7701_v20  ;;  %v8183_v61 = vmul.f32 1.442695, %v7708_v21  ;;  %4784 = vpow2.f32 %v1489_v33 }
 0x1d7   : > { %v8177_v57 = vmul.f32 1.442695, %v14938_v22  ;;  %14939 = vst [vmem:[#allocation322_spill] sm:$0xff] %v8185_v62  ;;  %v8188_v3 = vmul.f32 1.442695, %v7712_v44  ;;  %v8196_v22 = vpop.eup %4756  ;;  %4786 = vpow2.f32 %v1491_v23 }
 0x1d8   : > { %v8191_v12 = vmul.f32 1.442695, %v7716_v54  ;;  %v8194_v56 = vmul.f32 1.442695, %v7723_v28  ;;  %14940 = vst [vmem:[#allocation202_spill] sm:$0xff] %v8196_v22  ;;  %v8207_v44 = vpop.eup %4758  ;;  %4788 = vpow2.f32 %v1493_v59 }
 0x1d9   : > { %v8199_v20 = vmul.f32 1.442695, %v7727_v32  ;;  %v8202_v21 = vmul.f32 1.442695, %v7731_v51  ;;  %v8205_v48 = vmul.f32 1.442695, %v7738_v52  ;;  %v8218_v32 = vpop.eup %4760  ;;  %4790 = vpow2.f32 %v8133_v18 }
 0x1da   : > { %14941 = vst [vmem:[#allocation324_spill] sm:$0xff] %v8207_v44  ;;  %v8210_v54 = vmul.f32 1.442695, %v7742_v39  ;;  %v8213_v28 = vmul.f32 1.442695, %v7746_v0  ;;  %14942 = vst [vmem:[#allocation325_spill] sm:$0xff] %v8218_v32  ;;  %v8229_v39 = vpop.eup %4762  ;;  %4792 = vpow2.f32 %v8136_v17 }
 0x1db   : > { %v8216_v1 = vmul.f32 1.442695, %v7753_v15  ;;  %v8221_v51 = vmul.f32 1.442695, %v7757_v53  ;;  %v8224_v52 = vmul.f32 1.442695, %v7761_v46  ;;  %v8240_v53 = vpop.eup %4764  ;;  %4794 = vpow2.f32 %v8139_v35 }
 0x1dc   : > { %v8227_v45 = vmul.f32 1.442695, %v7768_v41  ;;  %14943 = vst [vmem:[#allocation204_spill] sm:$0xff] %v8229_v39  ;;  %v8232_v0 = vmul.f32 1.442695, %v7772_v58  ;;  %14944 = vst [vmem:[#allocation43_spill] sm:$0xff] %v8240_v53  ;;  %v8251_v58 = vpop.eup %4766  ;;  %4796 = vpow2.f32 %v8144_v19 }
 0x1dd   : > { %v8235_v15 = vmul.f32 1.442695, %v7776_v43  ;;  %v8238_v26 = vmul.f32 1.442695, %v7783_v37  ;;  %v8243_v46 = vmul.f32 1.442695, %v7787_v55  ;;  %v8262_v55 = vpop.eup %4768  ;;  %4798 = vpow2.f32 %v8147_v40 }
 0x1de   : > { %v8246_v41 = vmul.f32 1.442695, %v7791_v13  ;;  %v8249_v8 = vmul.f32 1.442695, %v7798_v50  ;;  %14945 = vst [vmem:[#allocation44_spill] sm:$0xff] %v8251_v58  ;;  %14946 = vst [vmem:[#allocation207_spill] sm:$0xff] %v8262_v55  ;;  %4800 = vpow2.f32 %v8150_v4 }
 0x1df   : > { %v8254_v43 = vmul.f32 1.442695, %v7802_v34  ;;  %v8257_v37 = vmul.f32 1.442695, %v7806_v36  ;;  %v8260_v33 = vmul.f32 1.442695, %v7813_v42  ;;  %v8273_v34 = vpop.eup %4770  ;;  %4802 = vpow2.f32 %v8155_v27 }
 0x1e0   : > { %v8265_v13 = vmul.f32 1.442695, %v7817_v7  ;;  %v8268_v50 = vmul.f32 1.442695, %v7821_v2  ;;  %v8271_v23 = vmul.f32 1.442695, %v7828_v47  ;;  %v8285_v7 = vpop.eup %4772  ;;  %4804 = vpow2.f32 %v8158_v60 }
 0x1e1   : > { %14947 = vst [vmem:[#allocation251_spill] sm:$0xff] %v8273_v34  ;;  %v8277_v36 = vmul.f32 1.442695, %v7832_v9  ;;  %v8280_v42 = vmul.f32 1.442695, %v7840_v6  ;;  %14948 = vst [vmem:[#allocation332_spill] sm:$0xff] %v8285_v7  ;;  %v8297_v9 = vpop.eup %4774  ;;  %4806 = vpow2.f32 %v8161_v25 }
 0x1e2   : > { %v8283_v59 = vmul.f32 1.442695, %v7844_v63  ;;  %v8289_v47 = vmul.f32 1.442695, %v7852_v14  ;;  %v8292_v2 = vmul.f32 1.442695, %v7856_v10  ;;  %v8309_v14 = vpop.eup %4776  ;;  %4808 = vpow2.f32 %v8166_v29 }
 0x1e3   : > { %v8295_v18 = vmul.f32 1.442695, %v7864_v11  ;;  %14949 = vst [vmem:[#allocation333_spill] sm:$0xff] %v8297_v9  ;;  %v14950_v6 = vld [vmem:[#allocation166_spill] sm:$0xff]  ;;  %v8304_v7 = vmul.f32 1.442695, %v7875_v38 }
 0x1e4   : > { %v8301_v63 = vmul.f32 1.442695, %v14950_v6  ;;  %v14951_v17 = vld [vmem:[#allocation175_spill] sm:$0xff]  ;;  %14952 = vst [vmem:[#allocation166_spill] sm:$0xff] %v8309_v14  ;;  %v8313_v11 = vmul.f32 1.442695, %v7886_v30  ;;  %v8321_v6 = vpop.eup %4778  ;;  %4810 = vpow2.f32 %v8169_v5 }
 0x1e5   : > { %v8307_v34 = vmul.f32 1.442695, %v14951_v17  ;;  %v14953_v10 = vld [vmem:[#allocation155_spill] sm:$0xff]  ;;  %v14954_v35 = vld [vmem:[#allocation256_spill] sm:$0xff]  ;;  %14955 = vst [vmem:[#allocation175_spill] sm:$0xff] %v8321_v6  ;;  %v14956_v38 = vld [vmem:[#allocation257_spill] sm:$0xff]  ;;  %v8333_v30 = vpop.eup %4780  ;;  %4812 = vpow2.f32 %v8172_v31 }
 0x1e6   : > { %v8316_v9 = vmul.f32 1.442695, %v14953_v10  ;;  %v8319_v55 = vmul.f32 1.442695, %v14954_v35  ;;  %v8325_v17 = vmul.f32 1.442695, %v14956_v38  ;;  %v8345_v38 = vpop.eup %4782  ;;  %4814 = vpow2.f32 %v8177_v57 }
 0x1e7   : > { %v14957_v58 = vld [vmem:[#allocation159_spill] sm:$0xff]  ;;  %14961 = vst [vmem:[#allocation257_spill] sm:$0xff] %v8333_v30  ;;  %v14962_v10 = vld [vmem:[#allocation260_spill] sm:$0xff]  ;;  %v14965_v40 = vld [vmem:[#allocation262_spill] sm:$0xff] }
 0x1e8   : > { %v8328_v14 = vmul.f32 1.442695, %v14957_v58  ;;  %v14959_v19 = vld [vmem:[#allocation259_spill] sm:$0xff]  ;;  %v8337_v35 = vmul.f32 1.442695, %v14962_v10  ;;  %14967 = vst [vmem:[#allocation260_spill] sm:$0xff] %v8345_v38  ;;  %v8357_v10 = vpop.eup %4784  ;;  %4816 = vpow2.f32 %v8180_v24 }
 0x1e9   : > { %v8331_v53 = vmul.f32 1.442695, %v14959_v19  ;;  %v14963_v39 = vld [vmem:[#allocation163_spill] sm:$0xff]  ;;  %v8343_v32 = vmul.f32 1.442695, %v14965_v40  ;;  %v14971_v4 = vld [vmem:[#allocation265_spill] sm:$0xff] }
 0x1ea   : > { %14958 = vst [vmem:[#allocation155_spill] sm:$0xff] %v8328_v14  ;;  %v8340_v6 = vmul.f32 1.442695, %v14963_v39  ;;  %v14968_v58 = vld [vmem:[#allocation263_spill] sm:$0xff]  ;;  %v8355_v14 = vmul.f32 1.442695, %v14971_v4 }
 0x1eb   : > { %14960 = vst [vmem:[#allocation256_spill] sm:$0xff] %v8331_v53  ;;  %14966 = vst [vmem:[#allocation259_spill] sm:$0xff] %v8343_v32  ;;  %v8349_v19 = vmul.f32 1.442695, %v14968_v58  ;;  %v14969_v53 = vld [vmem:[#allocation167_spill] sm:$0xff]  ;;  %v14974_v39 = vld [vmem:[#allocation266_spill] sm:$0xff]  ;;  %v8369_v58 = vpop.eup %4786  ;;  %4818 = vpow2.f32 %v8183_v61 }
 0x1ec   : > { %14964 = vst [vmem:[#allocation159_spill] sm:$0xff] %v8340_v6  ;;  %v8352_v30 = vmul.f32 1.442695, %v14969_v53  ;;  %14972 = vst [vmem:[#allocation262_spill] sm:$0xff] %v8355_v14  ;;  %v8361_v40 = vmul.f32 1.442695, %v14974_v39  ;;  %v8381_v39 = vpop.eup %4788  ;;  %4820 = vpow2.f32 %v8188_v3 }
 0x1ed   : > { %14973 = vst [vmem:[#allocation263_spill] sm:$0xff] %v8357_v10  ;;  %v14975_v32 = vld [vmem:[#allocation81_spill] sm:$0xff]  ;;  %v14977_v27 = vld [vmem:[#allocation268_spill] sm:$0xff]  ;;  %14979 = vst [vmem:[#allocation266_spill] sm:$0xff] %v8369_v58 }
 0x1ee   : > { %14970 = vst [vmem:[#allocation163_spill] sm:$0xff] %v8352_v30  ;;  %v8364_v38 = vmul.f32 1.442695, %v14975_v32  ;;  %v8367_v6 = vmul.f32 1.442695, %v14977_v27  ;;  %v14980_v53 = vld [vmem:[#allocation269_spill] sm:$0xff] }
 0x1ef   : > { %v8373_v4 = vmul.f32 1.442695, %v14980_v53  ;;  %v14981_v14 = vld [vmem:[#allocation87_spill] sm:$0xff]  ;;  %14985 = vst [vmem:[#allocation269_spill] sm:$0xff] %v8381_v39  ;;  %v14986_v32 = vld [vmem:[#allocation272_spill] sm:$0xff]  ;;  %v14989_v25 = vld [vmem:[#allocation274_spill] sm:$0xff]  ;;  %v8393_v53 = vpop.eup %4790  ;;  %4822 = vpow2.f32 %v8191_v12 }
 0x1f0   : > { %14976 = vst [vmem:[#allocation167_spill] sm:$0xff] %v8364_v38  ;;  %14978 = vst [vmem:[#allocation265_spill] sm:$0xff] %v8367_v6  ;;  %v8376_v10 = vmul.f32 1.442695, %v14981_v14  ;;  %v14983_v60 = vld [vmem:[#allocation271_spill] sm:$0xff]  ;;  %v14987_v6 = vld [vmem:[#allocation93_spill] sm:$0xff] }
 0x1f1   : > { %v8379_v30 = vmul.f32 1.442695, %v14983_v60  ;;  %v8385_v27 = vmul.f32 1.442695, %v14986_v32  ;;  %v8388_v58 = vmul.f32 1.442695, %v14987_v6  ;;  %v8405_v32 = vpop.eup %4792  ;;  %4824 = vpow2.f32 %v8194_v56 }
 0x1f2   : > { %14982 = vst [vmem:[#allocation81_spill] sm:$0xff] %v8376_v10  ;;  %v8391_v38 = vmul.f32 1.442695, %v14989_v25  ;;  %14991 = vst [vmem:[#allocation272_spill] sm:$0xff] %v8393_v53  ;;  %v14992_v14 = vld [vmem:[#allocation275_spill] sm:$0xff]  ;;  %v14995_v29 = vld [vmem:[#allocation277_spill] sm:$0xff] }
 0x1f3   : > { %14984 = vst [vmem:[#allocation268_spill] sm:$0xff] %v8379_v30  ;;  %14988 = vst [vmem:[#allocation87_spill] sm:$0xff] %v8388_v58  ;;  %v8397_v60 = vmul.f32 1.442695, %v14992_v14  ;;  %v14993_v30 = vld [vmem:[#allocation99_spill] sm:$0xff]  ;;  %v14998_v6 = vld [vmem:[#allocation278_spill] sm:$0xff]  ;;  %v8417_v14 = vpop.eup %4794  ;;  %4826 = vpow2.f32 %v8199_v20 }
 0x1f4   : > { %14990 = vst [vmem:[#allocation271_spill] sm:$0xff] %v8391_v38  ;;  %v8400_v39 = vmul.f32 1.442695, %v14993_v30  ;;  %v8403_v10 = vmul.f32 1.442695, %v14995_v29  ;;  %14997 = vst [vmem:[#allocation275_spill] sm:$0xff] %v8405_v32 }
 0x1f5   : > { %v8409_v25 = vmul.f32 1.442695, %v14998_v6  ;;  %v15000_v38 = vld [vmem:[#allocation103_spill] sm:$0xff]  ;;  %v15002_v5 = vld [vmem:[#allocation280_spill] sm:$0xff]  ;;  %v15005_v30 = vld [vmem:[#allocation281_spill] sm:$0xff]  ;;  %v8429_v6 = vpop.eup %4796  ;;  %4828 = vpow2.f32 %v8202_v21 }
 0x1f6   : > { %14994 = vst [vmem:[#allocation93_spill] sm:$0xff] %v8400_v39  ;;  %14996 = vst [vmem:[#allocation274_spill] sm:$0xff] %v8403_v10  ;;  %v8412_v53 = vmul.f32 1.442695, %v15000_v38  ;;  %v8415_v58 = vmul.f32 1.442695, %v15002_v5 }
 0x1f7   : > { %14999 = vst [vmem:[#allocation99_spill] sm:$0xff] %v8409_v25  ;;  %15004 = vst [vmem:[#allocation103_spill] sm:$0xff] %v8417_v14  ;;  %v8421_v29 = vmul.f32 1.442695, %v15005_v30  ;;  %v15007_v10 = vld [vmem:[#allocation107_spill] sm:$0xff]  ;;  %v15012_v38 = vld [vmem:[#allocation284_spill] sm:$0xff]  ;;  %v8439_v30 = vpop.eup %4798  ;;  %4830 = vpow2.f32 %v8205_v48 }
 0x1f8   : > { %15001 = vst [vmem:[#allocation277_spill] sm:$0xff] %v8412_v53  ;;  %15003 = vst [vmem:[#allocation278_spill] sm:$0xff] %v8415_v58  ;;  %v8424_v32 = vmul.f32 1.442695, %v15007_v10  ;;  %v15009_v31 = vld [vmem:[#allocation283_spill] sm:$0xff]  ;;  %v15016_v57 = vld [vmem:[#allocation301_spill] sm:$0xff] }
 0x1f9   : > { %15006 = vst [vmem:[#allocation280_spill] sm:$0xff] %v8421_v29  ;;  %v8427_v39 = vmul.f32 1.442695, %v15009_v31  ;;  %15011 = vst [vmem:[#allocation283_spill] sm:$0xff] %v8429_v6  ;;  %v8433_v5 = vmul.f32 1.442695, %v15012_v38 }
 0x1fa   : > { %15008 = vst [vmem:[#allocation281_spill] sm:$0xff] %v8424_v32  ;;  %v15014_v58 = vld [vmem:[#allocation111_spill] sm:$0xff]  ;;  %v1676_v53 = vmul.f32 -0.5, %v15016_v57  ;;  %15017 = vst [vmem:[#allocation334_spill] sm:$0xff] %v8439_v30  ;;  %v15018_v10 = vld [vmem:[#allocation286_spill] sm:$0xff]  ;;  %v8449_v32 = vpop.eup %4800  ;;  %4832 = vpow2.f32 %v8210_v54 }
 0x1fb   : > { %15010 = vst [vmem:[#allocation107_spill] sm:$0xff] %v8427_v39  ;;  %15013 = vst [vmem:[#allocation284_spill] sm:$0xff] %v8433_v5  ;;  %v8436_v14 = vmul.f32 1.442695, %v15014_v58  ;;  %v8443_v29 = vmul.f32 1.442695, %v15018_v10  ;;  %v8461_v10 = vpop.eup %4802  ;;  %4834 = vpow2.f32 %v8213_v28 }
 0x1fc   : > { %v15020_v31 = vld [vmem:[#allocation287_spill] sm:$0xff]  ;;  %15023 = vst [vmem:[#allocation335_spill] sm:$0xff] %v8449_v32  ;;  %v15024_v58 = vld [vmem:[#allocation114_spill] sm:$0xff] }
 0x1fd   : > { %15015 = vst [vmem:[#allocation111_spill] sm:$0xff] %v8436_v14  ;;  %15019 = vst [vmem:[#allocation286_spill] sm:$0xff] %v8443_v29  ;;  %v8446_v39 = vmul.f32 1.442695, %v15020_v31  ;;  %v15022_v6 = vld [vmem:[#allocation191_spill] sm:$0xff]  ;;  %v15025_v14 = vld [vmem:[#allocation289_spill] sm:$0xff] }
 0x1fe   : > { %v1685_v24 = vmul.f32 -0.5, %v15022_v6  ;;  %v8453_v38 = vmul.f32 1.442695, %v15024_v58  ;;  %v8456_v5 = vmul.f32 1.442695, %v15025_v14  ;;  %v15027_v30 = vld [vmem:[#allocation290_spill] sm:$0xff]  ;;  %v8471_v58 = vpop.eup %4804  ;;  %4836 = vpow2.f32 %v8216_v1 }
 0x1ff   : > { %15021 = vst [vmem:[#allocation287_spill] sm:$0xff] %v8446_v39  ;;  %v8459_v61 = vmul.f32 1.442695, %v15027_v30  ;;  %15029 = vst [vmem:[#allocation290_spill] sm:$0xff] %v8461_v10  ;;  %v15030_v31 = vld [vmem:[#allocation116_spill] sm:$0xff]  ;;  %v15034_v3 = vld [vmem:[#allocation303_spill] sm:$0xff]  ;;  %v8480_v12 = vpop.eup %4806  ;;  %4838 = vpow2.f32 %v8221_v51 }
 0x200   : > { %15026 = vst [vmem:[#allocation114_spill] sm:$0xff] %v8456_v5  ;;  %v8465_v39 = vmul.f32 1.442695, %v15030_v31  ;;  %v15032_v29 = vld [vmem:[#allocation292_spill] sm:$0xff]  ;;  %v1694_v25 = vmul.f32 -0.5, %v15034_v3  ;;  %15035 = vst [vmem:[#allocation336_spill] sm:$0xff] %v8471_v58  ;;  %v8487_v58 = vpop.eup %4808  ;;  %4840 = vpow2.f32 %v8224_v52 }
 0x201   : > { %15028 = vst [vmem:[#allocation289_spill] sm:$0xff] %v8459_v61  ;;  %v8468_v32 = vmul.f32 1.442695, %v15032_v29  ;;  %v15036_v14 = vld [vmem:[#allocation293_spill] sm:$0xff]  ;;  %v15038_v30 = vld [vmem:[#allocation119_spill] sm:$0xff]  ;;  %v1677_v10 = vadd.f32 1.0, %v1676_v53 }
 0x202   : > { %15031 = vst [vmem:[#allocation116_spill] sm:$0xff] %v8465_v39  ;;  %v8475_v5 = vmul.f32 1.442695, %v15036_v14  ;;  %v8478_v61 = vmul.f32 1.442695, %v15038_v30  ;;  %15039 = vst [vmem:[#allocation119_spill] sm:$0xff] %v8480_v12 }
 0x203   : > { %15033 = vst [vmem:[#allocation292_spill] sm:$0xff] %v8468_v32  ;;  %v8484_v29 = vadd.f32 1.0, %v15016_v57  ;;  %v1686_v31 = vadd.f32 1.0, %v1685_v24  ;;  %v15041_v39 = vld [vmem:[#allocation304_spill] sm:$0xff]  ;;  %15042 = vst [vmem:[#allocation338_spill] sm:$0xff] %v8487_v58  ;;  %v8492_v14 = vadd.f32 1.0, %v15022_v6  ;;  %v8506_v21 = vmul.f32 %v15016_v57, %v1677_v10 }
 0x204   : > { %15037 = vst [vmem:[#allocation293_spill] sm:$0xff] %v8475_v5  ;;  %v1703_v32 = vmul.f32 -0.5, %v15041_v39  ;;  %v15044_v53 = vld [vmem:[#allocation192_spill] sm:$0xff]  ;;  %v8495_v5 = vpop.eup %4810  ;;  %v8500_v24 = vadd.f32 1.0, %v15034_v3  ;;  %v1695_v12 = vadd.f32 1.0, %v1694_v25  ;;  %v8517_v25 = vadd.f32 1.0, %v15041_v39 }
 0x205   : > { %15040 = vst [vmem:[#allocation337_spill] sm:$0xff] %v8484_v29  ;;  %15043 = vst [vmem:[#allocation339_spill] sm:$0xff] %v8492_v14  ;;  %v1712_v30 = vmul.f32 -0.5, %v15044_v53  ;;  %v8502_v58 = vpop.eup %4812  ;;  %v15048_v14 = vld [vmem:[#allocation306_spill] sm:$0xff]  ;;  %v8514_v48 = vmul.f32 %v15022_v6, %v1686_v31  ;;  %v15051_v56 = vld [vmem:[#allocation307_spill] sm:$0xff]  ;;  %v8531_v31 = vadd.f32 1.0, %v15044_v53  ;;  %4842 = vpow2.f32 %v8227_v45 }
 0x206   : > { %15045 = vst [vmem:[#allocation340_spill] sm:$0xff] %v8495_v5  ;;  %15046 = vst [vmem:[#allocation341_spill] sm:$0xff] %v8502_v58  ;;  %v1721_v29 = vmul.f32 -0.5, %v15048_v14  ;;  %v8510_v5 = vpop.eup %4814  ;;  %v1704_v20 = vadd.f32 1.0, %v1703_v32  ;;  %v8528_v28 = vmul.f32 %v15034_v3, %v1695_v12  ;;  %v15054_v32 = vld [vmem:[#allocation193_spill] sm:$0xff]  ;;  %4844 = vpow2.f32 %v8232_v0  ;;  %v15062_v12 = vld [vmem:[#allocation310_spill] sm:$0xff] }
 0x207   : > { %15047 = vst [vmem:[#allocation342_spill] sm:$0xff] %v8506_v21  ;;  %15049 = vst [vmem:[#allocation343_spill] sm:$0xff] %v8514_v48  ;;  %v8519_v58 = vpop.eup %4816  ;;  %v1713_v10 = vadd.f32 1.0, %v1712_v30  ;;  %v1730_v21 = vmul.f32 -0.5, %v15051_v56  ;;  %v1739_v48 = vmul.f32 -0.5, %v15054_v32  ;;  %v8539_v30 = vadd.f32 1.0, %v15048_v14 }
 0x208   : > { %15050 = vst [vmem:[#allocation344_spill] sm:$0xff] %v8519_v58  ;;  %v8524_v57 = vpop.eup %4818  ;;  %15053 = vst [vmem:[#allocation346_spill] sm:$0xff] %v8528_v28  ;;  %v1722_v54 = vadd.f32 1.0, %v1721_v29  ;;  %v8545_v51 = vmul.f32 %v15041_v39, %v1704_v20  ;;  %v15058_v28 = vld [vmem:[#allocation309_spill] sm:$0xff]  ;;  %v8556_v29 = vadd.f32 1.0, %v15051_v56  ;;  %4846 = vpow2.f32 %v8235_v15 }
 0x209   : > { %15052 = vst [vmem:[#allocation345_spill] sm:$0xff] %v8524_v57  ;;  %v8534_v58 = vpop.eup %4820  ;;  %v1748_v3 = vmul.f32 -0.5, %v15058_v28  ;;  %v8553_v52 = vmul.f32 %v15044_v53, %v1713_v10  ;;  %v1731_v1 = vadd.f32 1.0, %v1730_v21  ;;  %v1740_v20 = vadd.f32 1.0, %v1739_v48  ;;  %v15065_v21 = vld [vmem:[#allocation194_spill] sm:$0xff] }
 0x20a   : > { %15055 = vst [vmem:[#allocation193_spill] sm:$0xff] %v8534_v58  ;;  %v8541_v6 = vpop.eup %4822  ;;  %15057 = vst [vmem:[#allocation348_spill] sm:$0xff] %v8545_v51  ;;  %v1757_v51 = vmul.f32 -0.5, %v15062_v12  ;;  %4848 = vpow2.f32 %v8238_v26  ;;  %v8567_v0 = vmul.f32 %v15048_v14, %v1722_v54  ;;  %v8570_v10 = vadd.f32 1.0, %v15054_v32  ;;  %v15071_v54 = vld [vmem:[#allocation313_spill] sm:$0xff] }
 0x20b   : > { %15056 = vst [vmem:[#allocation347_spill] sm:$0xff] %v8541_v6  ;;  %v8549_v58 = vpop.eup %4824  ;;  %15060 = vst [vmem:[#allocation350_spill] sm:$0xff] %v8553_v52  ;;  %4850 = vpow2.f32 %v8243_v46  ;;  %v8578_v48 = vadd.f32 1.0, %v15058_v28  ;;  %v1749_v45 = vadd.f32 1.0, %v1748_v3  ;;  %v8584_v26 = vmul.f32 %v15051_v56, %v1731_v1 }
 0x20c   : > { %15059 = vst [vmem:[#allocation349_spill] sm:$0xff] %v8549_v58  ;;  %v8558_v6 = vpop.eup %4826  ;;  %15064 = vst [vmem:[#allocation353_spill] sm:$0xff] %v8567_v0  ;;  %v1766_v58 = vmul.f32 -0.5, %v15065_v21  ;;  %4852 = vpow2.f32 %v8246_v41  ;;  %v15068_v0 = vld [vmem:[#allocation312_spill] sm:$0xff]  ;;  %v8592_v46 = vmul.f32 %v15054_v32, %v1740_v20  ;;  %v8595_v3 = vadd.f32 1.0, %v15062_v12 }
 0x20d   : > { %15061 = vst [vmem:[#allocation351_spill] sm:$0xff] %v8558_v6  ;;  %v8563_v39 = vpop.eup %4828  ;;  %15067 = vst [vmem:[#allocation354_spill] sm:$0xff] %v8584_v26  ;;  %v1775_v14 = vmul.f32 -0.5, %v15068_v0  ;;  %4854 = vpow2.f32 %v8249_v8  ;;  %v1758_v15 = vadd.f32 1.0, %v1757_v51  ;;  %v1784_v26 = vmul.f32 -0.5, %v15071_v54  ;;  %v15074_v51 = vld [vmem:[#allocation195_spill] sm:$0xff] }
 0x20e   : > { %15063 = vst [vmem:[#allocation352_spill] sm:$0xff] %v8563_v39  ;;  %v8573_v52 = vpop.eup %4830  ;;  %15069 = vst [vmem:[#allocation312_spill] sm:$0xff] %v8592_v46  ;;  %4856 = vpow2.f32 %v8254_v43  ;;  %v1767_v1 = vadd.f32 1.0, %v1766_v58  ;;  %v8606_v8 = vmul.f32 %v15058_v28, %v1749_v45  ;;  %v8609_v20 = vadd.f32 1.0, %v15065_v21  ;;  %v15082_v45 = vld [vmem:[#allocation316_spill] sm:$0xff] }
 0x20f   : > { %v8580_v39 = vpop.eup %4832  ;;  %4858 = vpow2.f32 %v8257_v37  ;;  %v1793_v46 = vmul.f32 -0.5, %v15074_v51  ;;  %v8617_v58 = vadd.f32 1.0, %v15068_v0  ;;  %v1776_v41 = vadd.f32 1.0, %v1775_v14 }
 0x210   : > { %15066 = vst [vmem:[#allocation194_spill] sm:$0xff] %v8580_v39  ;;  %v8588_v53 = vpop.eup %4834  ;;  %15073 = vst [vmem:[#allocation357_spill] sm:$0xff] %v8606_v8  ;;  %4860 = vpow2.f32 %v8260_v33  ;;  %v8623_v37 = vmul.f32 %v15062_v12, %v1758_v15  ;;  %v15078_v8 = vld [vmem:[#allocation196_spill] sm:$0xff]  ;;  %v8631_v33 = vmul.f32 %v15065_v21, %v1767_v1  ;;  %v8634_v14 = vadd.f32 1.0, %v15071_v54 }
 0x211   : > { %v8597_v39 = vpop.eup %4836  ;;  %4862 = vpow2.f32 %v8265_v13  ;;  %v1802_v28 = vmul.f32 -0.5, %v15078_v8  ;;  %v1785_v43 = vadd.f32 1.0, %v1784_v26  ;;  %v1794_v15 = vadd.f32 1.0, %v1793_v46  ;;  %v15085_v26 = vld [vmem:[#allocation317_spill] sm:$0xff] }
 0x212   : > { %15070 = vst [vmem:[#allocation355_spill] sm:$0xff] %v8597_v39  ;;  %v8602_v56 = vpop.eup %4838  ;;  %15077 = vst [vmem:[#allocation359_spill] sm:$0xff] %v8623_v37  ;;  %4864 = vpow2.f32 %v8268_v50  ;;  %v1811_v37 = vmul.f32 -0.5, %v15082_v45  ;;  %v8645_v50 = vmul.f32 %v15068_v0, %v1776_v41  ;;  %v8648_v1 = vadd.f32 1.0, %v15074_v51  ;;  %v15093_v41 = vld [vmem:[#allocation319_spill] sm:$0xff] }
 0x213   : > { %15072 = vst [vmem:[#allocation356_spill] sm:$0xff] %v8602_v56  ;;  %v8612_v39 = vpop.eup %4840  ;;  %15080 = vst [vmem:[#allocation360_spill] sm:$0xff] %v8631_v33  ;;  %4866 = vpow2.f32 %v8271_v23  ;;  %v8656_v46 = vadd.f32 1.0, %v15078_v8  ;;  %v1803_v13 = vadd.f32 1.0, %v1802_v28  ;;  %v8673_v28 = vadd.f32 1.0, %v15082_v45 }
 0x214   : > { %15075 = vst [vmem:[#allocation195_spill] sm:$0xff] %v8612_v39  ;;  %v8619_v56 = vpop.eup %4842  ;;  %4868 = vpow2.f32 %v8277_v36  ;;  %15084 = vst [vmem:[#allocation362_spill] sm:$0xff] %v8645_v50  ;;  %v8662_v36 = vmul.f32 %v15071_v54, %v1785_v43  ;;  %v15089_v50 = vld [vmem:[#allocation198_spill] sm:$0xff]  ;;  %v1812_v23 = vadd.f32 1.0, %v1811_v37  ;;  %v1847_v37 = vmul.f32 -0.5, %v8163_v49 }
 0x215   : > { %15076 = vst [vmem:[#allocation358_spill] sm:$0xff] %v8619_v56  ;;  %v8627_v39 = vpop.eup %4844  ;;  %4870 = vpow2.f32 %v8280_v42  ;;  %v1829_v33 = vmul.f32 -0.5, %v15089_v50  ;;  %v8670_v42 = vmul.f32 %v15074_v51, %v1794_v15  ;;  %v8687_v15 = vadd.f32 1.0, %v15085_v26 }
 0x216   : > { %15079 = vst [vmem:[#allocation196_spill] sm:$0xff] %v8627_v39  ;;  %v8636_v56 = vpop.eup %4846  ;;  %v1820_v39 = vmul.f32 -0.5, %v15085_v26  ;;  %4872 = vpow2.f32 %v8283_v59  ;;  %15088 = vst [vmem:[#allocation365_spill] sm:$0xff] %v8662_v36  ;;  %v1838_v36 = vmul.f32 -0.5, %v15093_v41 }
 0x217   : > { %15081 = vst [vmem:[#allocation361_spill] sm:$0xff] %v8636_v56  ;;  %v8641_v12 = vpop.eup %4848  ;;  %4874 = vpow2.f32 %v8289_v47  ;;  %15091 = vst [vmem:[#allocation367_spill] sm:$0xff] %v8670_v42  ;;  %v8684_v47 = vmul.f32 %v15078_v8, %v1803_v13  ;;  %v1830_v59 = vadd.f32 1.0, %v1829_v33  ;;  %v8712_v33 = vadd.f32 1.0, %v15093_v41  ;;  %v15121_v42 = vld [vmem:[#allocation43_spill] sm:$0xff] }
 0x218   : > { %15083 = vst [vmem:[#allocation316_spill] sm:$0xff] %v8641_v12  ;;  %v8651_v56 = vpop.eup %4850  ;;  %4876 = vpow2.f32 %v8292_v2  ;;  %v1821_v43 = vadd.f32 1.0, %v1820_v39  ;;  %v8695_v39 = vadd.f32 1.0, %v15089_v50  ;;  %v1839_v2 = vadd.f32 1.0, %v1838_v36 }
 0x219   : > { %15086 = vst [vmem:[#allocation363_spill] sm:$0xff] %v8651_v56  ;;  %v8658_v12 = vpop.eup %4852  ;;  %4878 = vpow2.f32 %v8295_v18  ;;  %15095 = vst [vmem:[#allocation370_spill] sm:$0xff] %v8684_v47  ;;  %v8701_v18 = vmul.f32 %v15082_v45, %v1812_v23  ;;  %v1848_v23 = vadd.f32 1.0, %v1847_v37  ;;  %v1865_v13 = vmul.f32 -0.5, %v8185_v62 }
 0x21a   : > { %15087 = vst [vmem:[#allocation364_spill] sm:$0xff] %v8658_v12  ;;  %v8666_v56 = vpop.eup %4854  ;;  %4880 = vpow2.f32 %v8301_v63  ;;  %v8709_v63 = vmul.f32 %v15085_v26, %v1821_v43  ;;  %v8726_v43 = vadd.f32 1.0, %v8163_v49  ;;  %v1874_v36 = vmul.f32 -0.5, %v8196_v22 }
 0x21b   : > { %15090 = vst [vmem:[#allocation366_spill] sm:$0xff] %v8666_v56  ;;  %v8675_v12 = vpop.eup %4856  ;;  %4882 = vpow2.f32 %v8304_v7  ;;  %15098 = vst [vmem:[#allocation373_spill] sm:$0xff] %v8701_v18  ;;  %v1856_v56 = vmul.f32 -0.5, %v8174_v16  ;;  %v8734_v37 = vadd.f32 1.0, %v8174_v16 }
 0x21c   : > { %15092 = vst [vmem:[#allocation368_spill] sm:$0xff] %v8675_v12  ;;  %v8680_v54 = vpop.eup %4858  ;;  %4884 = vpow2.f32 %v8307_v34  ;;  %15100 = vst [vmem:[#allocation375_spill] sm:$0xff] %v8709_v63  ;;  %v8723_v34 = vmul.f32 %v15089_v50, %v1830_v59  ;;  %v1875_v59 = vadd.f32 1.0, %v1874_v36 }
 0x21d   : > { %15094 = vst [vmem:[#allocation369_spill] sm:$0xff] %v8680_v54  ;;  %v8690_v12 = vpop.eup %4860  ;;  %4886 = vpow2.f32 %v8313_v11  ;;  %v1857_v7 = vadd.f32 1.0, %v1856_v56  ;;  %v8748_v11 = vmul.f32 %v8163_v49, %v1848_v23  ;;  %v8751_v56 = vadd.f32 1.0, %v8185_v62 }
 0x21e   : > { %15096 = vst [vmem:[#allocation371_spill] sm:$0xff] %v8690_v12  ;;  %v8697_v54 = vpop.eup %4862  ;;  %4888 = vpow2.f32 %v8316_v9  ;;  %15103 = vst [vmem:[#allocation378_spill] sm:$0xff] %v8723_v34  ;;  %v8740_v9 = vmul.f32 %v15093_v41, %v1839_v2  ;;  %v8773_v2 = vadd.f32 1.0, %v8207_v44 }
 0x21f   : > { %15097 = vst [vmem:[#allocation372_spill] sm:$0xff] %v8697_v54  ;;  %v8705_v12 = vpop.eup %4864  ;;  %4890 = vpow2.f32 %v8319_v55  ;;  %v15108_v55 = vld [vmem:[#allocation155_spill] sm:$0xff]  ;;  %v8762_v23 = vmul.f32 %v8174_v16, %v1857_v7  ;;  %v1910_v16 = vmul.f32 -0.5, %v15121_v42 }
 0x220   : > { %15099 = vst [vmem:[#allocation374_spill] sm:$0xff] %v8705_v12  ;;  %v8714_v54 = vpop.eup %4866  ;;  %4892 = vpow2.f32 %v8325_v17  ;;  %15106 = vst [vmem:[#allocation381_spill] sm:$0xff] %v8740_v9  ;;  %v15111_v17 = vld [vmem:[#allocation256_spill] sm:$0xff]  ;;  %v15112_v9 = vld [vmem:[#allocation325_spill] sm:$0xff] }
 0x221   : > { %15101 = vst [vmem:[#allocation376_spill] sm:$0xff] %v8714_v54  ;;  %v8719_v18 = vpop.eup %4868  ;;  %v1883_v54 = vmul.f32 -0.5, %v8207_v44  ;;  %4894 = vpow2.f32 %v15108_v55  ;;  %15109 = vst [vmem:[#allocation155_spill] sm:$0xff] %v8748_v11  ;;  %v1892_v63 = vmul.f32 -0.5, %v15112_v9  ;;  %v8765_v55 = vadd.f32 1.0, %v8196_v22 }
 0x222   : > { %15102 = vst [vmem:[#allocation377_spill] sm:$0xff] %v8719_v18  ;;  %v8729_v12 = vpop.eup %4870  ;;  %4896 = vpow2.f32 %v15111_v17  ;;  %15114 = vst [vmem:[#allocation384_spill] sm:$0xff] %v8762_v23  ;;  %v15117_v17 = vld [vmem:[#allocation159_spill] sm:$0xff] }
 0x223   : > { %15104 = vst [vmem:[#allocation379_spill] sm:$0xff] %v8729_v12  ;;  %v8736_v18 = vpop.eup %4872  ;;  %4898 = vpow2.f32 %v8337_v35  ;;  %v15119_v35 = vld [vmem:[#allocation259_spill] sm:$0xff]  ;;  %v1893_v36 = vadd.f32 1.0, %v1892_v63 }
 0x224   : > { %15105 = vst [vmem:[#allocation380_spill] sm:$0xff] %v8736_v18  ;;  %v8744_v12 = vpop.eup %4874  ;;  %v1866_v18 = vadd.f32 1.0, %v1865_v13  ;;  %v15115_v13 = vld [vmem:[#allocation204_spill] sm:$0xff]  ;;  %4900 = vpow2.f32 %v15117_v17  ;;  %v8787_v17 = vmul.f32 %v8196_v22, %v1875_v59  ;;  %v15130_v63 = vld [vmem:[#allocation207_spill] sm:$0xff] }
 0x225   : > { %15107 = vst [vmem:[#allocation382_spill] sm:$0xff] %v8744_v12  ;;  %v8753_v34 = vpop.eup %4876  ;;  %v1901_v12 = vmul.f32 -0.5, %v15115_v13  ;;  %4902 = vpow2.f32 %v15119_v35  ;;  %v15125_v35 = vld [vmem:[#allocation163_spill] sm:$0xff]  ;;  %v8804_v59 = vadd.f32 1.0, %v15115_v13 }
 0x226   : > { %15110 = vst [vmem:[#allocation383_spill] sm:$0xff] %v8753_v34  ;;  %v8758_v47 = vpop.eup %4878  ;;  %v8779_v7 = vmul.f32 %v8185_v62, %v1866_v18  ;;  %4904 = vpow2.f32 %v8349_v19  ;;  %15123 = vst [vmem:[#allocation387_spill] sm:$0xff] %v8787_v17  ;;  %v1928_v17 = vmul.f32 -0.5, %v15130_v63  ;;  %v1911_v18 = vadd.f32 1.0, %v1910_v16 }
 0x227   : > { %15113 = vst [vmem:[#allocation256_spill] sm:$0xff] %v8758_v47  ;;  %v8768_v34 = vpop.eup %4880  ;;  %v1884_v47 = vadd.f32 1.0, %v1883_v54  ;;  %v8790_v54 = vadd.f32 1.0, %v15112_v9  ;;  %4906 = vpow2.f32 %v15125_v35  ;;  %v1902_v23 = vadd.f32 1.0, %v1901_v12 }
 0x228   : > { %15116 = vst [vmem:[#allocation385_spill] sm:$0xff] %v8768_v34  ;;  %v8775_v11 = vpop.eup %4882  ;;  %15120 = vst [vmem:[#allocation259_spill] sm:$0xff] %v8779_v7  ;;  %v15126_v7 = vld [vmem:[#allocation44_spill] sm:$0xff]  ;;  %v8812_v35 = vadd.f32 1.0, %v15121_v42 }
 0x229   : > { %15118 = vst [vmem:[#allocation159_spill] sm:$0xff] %v8775_v11  ;;  %v8783_v34 = vpop.eup %4884  ;;  %v1919_v62 = vmul.f32 -0.5, %v15126_v7  ;;  %v8801_v19 = vmul.f32 %v8207_v44, %v1884_v47  ;;  %v8818_v47 = vmul.f32 %v15112_v9, %v1893_v36  ;;  %v15135_v44 = vld [vmem:[#allocation251_spill] sm:$0xff]  ;;  %v8826_v12 = vmul.f32 %v15115_v13, %v1902_v23 }
 0x22a   : > { %15122 = vst [vmem:[#allocation386_spill] sm:$0xff] %v8783_v34  ;;  %v8792_v11 = vpop.eup %4886  ;;  %v15128_v34 = vld [vmem:[#allocation262_spill] sm:$0xff]  ;;  %v1937_v22 = vmul.f32 -0.5, %v15135_v44  ;;  %v8829_v16 = vadd.f32 1.0, %v15126_v7  ;;  %v8840_v23 = vmul.f32 %v15121_v42, %v1911_v18  ;;  %v8851_v36 = vadd.f32 1.0, %v15135_v44 }
 0x22b   : > { %15124 = vst [vmem:[#allocation388_spill] sm:$0xff] %v8792_v11  ;;  %v8797_v49 = vpop.eup %4888  ;;  %4908 = vpow2.f32 %v15128_v34  ;;  %15129 = vst [vmem:[#allocation262_spill] sm:$0xff] %v8801_v19  ;;  %v15133_v34 = vld [vmem:[#allocation167_spill] sm:$0xff]  ;;  %v15140_v19 = vld [vmem:[#allocation332_spill] sm:$0xff] }
 0x22c   : > { %15127 = vst [vmem:[#allocation163_spill] sm:$0xff] %v8797_v49  ;;  %v8807_v11 = vpop.eup %4890  ;;  %4910 = vpow2.f32 %v8361_v40  ;;  %15134 = vst [vmem:[#allocation167_spill] sm:$0xff] %v8818_v47  ;;  %v15137_v40 = vld [vmem:[#allocation265_spill] sm:$0xff]  ;;  %v1946_v47 = vmul.f32 -0.5, %v15140_v19 }
 0x22d   : > { %15131 = vst [vmem:[#allocation389_spill] sm:$0xff] %v8807_v11  ;;  %v8814_v49 = vpop.eup %4892  ;;  %4912 = vpow2.f32 %v15133_v34  ;;  %15138 = vst [vmem:[#allocation265_spill] sm:$0xff] %v8826_v12  ;;  %v1929_v34 = vadd.f32 1.0, %v1928_v17 }
 0x22e   : > { %15132 = vst [vmem:[#allocation390_spill] sm:$0xff] %v8814_v49  ;;  %v8822_v11 = vpop.eup %4894  ;;  %4914 = vpow2.f32 %v15137_v40  ;;  %v1920_v49 = vadd.f32 1.0, %v1919_v62  ;;  %v8843_v40 = vadd.f32 1.0, %v15130_v63  ;;  %v15144_v62 = vld [vmem:[#allocation333_spill] sm:$0xff] }
 0x22f   : > { %15136 = vst [vmem:[#allocation391_spill] sm:$0xff] %v8822_v11  ;;  %v8831_v41 = vpop.eup %4896  ;;  %4916 = vpow2.f32 %v8373_v4  ;;  %v15142_v11 = vld [vmem:[#allocation81_spill] sm:$0xff]  ;;  %v1955_v12 = vmul.f32 -0.5, %v15144_v62  ;;  %v15146_v4 = vld [vmem:[#allocation268_spill] sm:$0xff]  ;;  %v8865_v17 = vmul.f32 %v15130_v63, %v1929_v34 }
 0x230   : > { %15139 = vst [vmem:[#allocation392_spill] sm:$0xff] %v8831_v41  ;;  %v8836_v9 = vpop.eup %4898  ;;  %4918 = vpow2.f32 %v15142_v11  ;;  %15143 = vst [vmem:[#allocation81_spill] sm:$0xff] %v8840_v23  ;;  %v8857_v11 = vmul.f32 %v15126_v7, %v1920_v49  ;;  %v15149_v23 = vld [vmem:[#allocation166_spill] sm:$0xff] }
 0x231   : > { %15141 = vst [vmem:[#allocation393_spill] sm:$0xff] %v8836_v9  ;;  %v8846_v41 = vpop.eup %4900  ;;  %4920 = vpow2.f32 %v15146_v4  ;;  %v1938_v9 = vadd.f32 1.0, %v1937_v22  ;;  %v1964_v42 = vmul.f32 -0.5, %v15149_v23  ;;  %v15151_v4 = vld [vmem:[#allocation87_spill] sm:$0xff]  ;;  %v8868_v22 = vadd.f32 1.0, %v15140_v19 }
 0x232   : > { %15145 = vst [vmem:[#allocation394_spill] sm:$0xff] %v8846_v41  ;;  %v8853_v13 = vpop.eup %4902  ;;  %4922 = vpow2.f32 %v8385_v27  ;;  %15148 = vst [vmem:[#allocation395_spill] sm:$0xff] %v8857_v11  ;;  %v15154_v27 = vld [vmem:[#allocation271_spill] sm:$0xff]  ;;  %v1956_v18 = vadd.f32 1.0, %v1955_v12  ;;  %v8890_v49 = vadd.f32 1.0, %v15149_v23 }
 0x233   : > { %15147 = vst [vmem:[#allocation268_spill] sm:$0xff] %v8853_v13  ;;  %v8861_v41 = vpop.eup %4904  ;;  %4924 = vpow2.f32 %v15151_v4  ;;  %15152 = vst [vmem:[#allocation87_spill] sm:$0xff] %v8865_v17  ;;  %v1947_v13 = vadd.f32 1.0, %v1946_v47  ;;  %v15155_v11 = vld [vmem:[#allocation175_spill] sm:$0xff]  ;;  %v8879_v34 = vmul.f32 %v15135_v44, %v1938_v9  ;;  %v8882_v4 = vadd.f32 1.0, %v15144_v62  ;;  %v15159_v47 = vld [vmem:[#allocation257_spill] sm:$0xff] }
 0x234   : > { %15150 = vst [vmem:[#allocation396_spill] sm:$0xff] %v8861_v41  ;;  %v8870_v50 = vpop.eup %4906  ;;  %4926 = vpow2.f32 %v15154_v27  ;;  %v1973_v7 = vmul.f32 -0.5, %v15155_v11  ;;  %v1982_v41 = vmul.f32 -0.5, %v15159_v47  ;;  %v15161_v27 = vld [vmem:[#allocation93_spill] sm:$0xff]  ;;  %v15166_v44 = vld [vmem:[#allocation260_spill] sm:$0xff]  ;;  %v8904_v12 = vmul.f32 %v15144_v62, %v1956_v18 }
 0x235   : > { %15153 = vst [vmem:[#allocation397_spill] sm:$0xff] %v8870_v50  ;;  %v8875_v26 = vpop.eup %4908  ;;  %4928 = vpow2.f32 %v8397_v60  ;;  %15157 = vst [vmem:[#allocation398_spill] sm:$0xff] %v8879_v34  ;;  %v15164_v60 = vld [vmem:[#allocation274_spill] sm:$0xff]  ;;  %v8896_v9 = vmul.f32 %v15140_v19, %v1947_v13  ;;  %v1991_v63 = vmul.f32 -0.5, %v15166_v44  ;;  %v8929_v13 = vadd.f32 1.0, %v15166_v44 }
 0x236   : > { %15156 = vst [vmem:[#allocation271_spill] sm:$0xff] %v8875_v26  ;;  %15158 = vst [vmem:[#allocation399_spill] sm:$0xff] %v8882_v4  ;;  %v8885_v50 = vpop.eup %4910  ;;  %4930 = vpow2.f32 %v15161_v27  ;;  %v1965_v26 = vadd.f32 1.0, %v1964_v42  ;;  %v15168_v27 = vld [vmem:[#allocation99_spill] sm:$0xff]  ;;  %v8907_v42 = vadd.f32 1.0, %v15155_v11  ;;  %v1983_v34 = vadd.f32 1.0, %v1982_v41 }
 0x237   : > { %15160 = vst [vmem:[#allocation400_spill] sm:$0xff] %v8885_v50  ;;  %15162 = vst [vmem:[#allocation93_spill] sm:$0xff] %v8890_v49  ;;  %v8892_v17 = vpop.eup %4912  ;;  %4932 = vpow2.f32 %v15164_v60  ;;  %v15171_v60 = vld [vmem:[#allocation277_spill] sm:$0xff] }
 0x238   : > { %15163 = vst [vmem:[#allocation401_spill] sm:$0xff] %v8892_v17  ;;  %15165 = vst [vmem:[#allocation274_spill] sm:$0xff] %v8896_v9  ;;  %v8900_v50 = vpop.eup %4914  ;;  %4934 = vpow2.f32 %v15168_v27  ;;  %v1974_v17 = vadd.f32 1.0, %v1973_v7  ;;  %v15172_v9 = vld [vmem:[#allocation263_spill] sm:$0xff]  ;;  %v8918_v18 = vmul.f32 %v15149_v23, %v1965_v26  ;;  %v8921_v27 = vadd.f32 1.0, %v15159_v47  ;;  %v15177_v7 = vld [vmem:[#allocation266_spill] sm:$0xff] }
 0x239   : > { %15167 = vst [vmem:[#allocation402_spill] sm:$0xff] %v8900_v50  ;;  %15169 = vst [vmem:[#allocation99_spill] sm:$0xff] %v8904_v12  ;;  %v8909_v49 = vpop.eup %4916  ;;  %4936 = vpow2.f32 %v15171_v60  ;;  %v2000_v19 = vmul.f32 -0.5, %v15172_v9  ;;  %v15174_v50 = vld [vmem:[#allocation278_spill] sm:$0xff]  ;;  %v2009_v12 = vmul.f32 -0.5, %v15177_v7  ;;  %v15179_v60 = vld [vmem:[#allocation281_spill] sm:$0xff]  ;;  %v8943_v41 = vmul.f32 %v15159_v47, %v1983_v34 }
 0x23a   : > { %15170 = vst [vmem:[#allocation403_spill] sm:$0xff] %v8909_v49  ;;  %v8914_v4 = vpop.eup %4918  ;;  %4938 = vpow2.f32 %v15174_v50  ;;  %15175 = vst [vmem:[#allocation278_spill] sm:$0xff] %v8918_v18  ;;  %v15182_v50 = vld [vmem:[#allocation284_spill] sm:$0xff]  ;;  %v8935_v26 = vmul.f32 %v15155_v11, %v1974_v17  ;;  %v15184_v23 = vld [vmem:[#allocation269_spill] sm:$0xff] }
 0x23b   : > { %15173 = vst [vmem:[#allocation277_spill] sm:$0xff] %v8914_v4  ;;  %15176 = vst [vmem:[#allocation404_spill] sm:$0xff] %v8921_v27  ;;  %v8924_v49 = vpop.eup %4920  ;;  %4940 = vpow2.f32 %v15179_v60  ;;  %v1992_v4 = vadd.f32 1.0, %v1991_v63  ;;  %v2018_v27 = vmul.f32 -0.5, %v15184_v23  ;;  %v15186_v60 = vld [vmem:[#allocation286_spill] sm:$0xff]  ;;  %v8946_v63 = vadd.f32 1.0, %v15172_v9 }
 0x23c   : > { %15178 = vst [vmem:[#allocation405_spill] sm:$0xff] %v8924_v49  ;;  %15180 = vst [vmem:[#allocation281_spill] sm:$0xff] %v8929_v13  ;;  %v8931_v62 = vpop.eup %4922  ;;  %4942 = vpow2.f32 %v15182_v50  ;;  %v2010_v50 = vadd.f32 1.0, %v2009_v12  ;;  %v15189_v18 = vld [vmem:[#allocation272_spill] sm:$0xff]  ;;  %v8968_v17 = vadd.f32 1.0, %v15184_v23 }
 0x23d   : > { %15181 = vst [vmem:[#allocation406_spill] sm:$0xff] %v8931_v62  ;;  %15183 = vst [vmem:[#allocation284_spill] sm:$0xff] %v8935_v26  ;;  %v8939_v49 = vpop.eup %4924  ;;  %4944 = vpow2.f32 %v15186_v60  ;;  %v2001_v62 = vadd.f32 1.0, %v2000_v19  ;;  %v2027_v26 = vmul.f32 -0.5, %v15189_v18  ;;  %v8957_v34 = vmul.f32 %v15166_v44, %v1992_v4  ;;  %v15194_v19 = vld [vmem:[#allocation275_spill] sm:$0xff] }
 0x23e   : > { %15185 = vst [vmem:[#allocation407_spill] sm:$0xff] %v8939_v49  ;;  %15187 = vst [vmem:[#allocation286_spill] sm:$0xff] %v8943_v41  ;;  %v8948_v13 = vpop.eup %4926  ;;  %4946 = vpow2.f32 %v8453_v38  ;;  %v15191_v49 = vld [vmem:[#allocation289_spill] sm:$0xff]  ;;  %v8960_v60 = vadd.f32 1.0, %v15177_v7  ;;  %v2036_v41 = vmul.f32 -0.5, %v15194_v19  ;;  %v15196_v38 = vld [vmem:[#allocation292_spill] sm:$0xff]  ;;  %v8982_v12 = vmul.f32 %v15177_v7, %v2010_v50 }
 0x23f   : > { %15188 = vst [vmem:[#allocation408_spill] sm:$0xff] %v8948_v13  ;;  %v8953_v11 = vpop.eup %4928  ;;  %4948 = vpow2.f32 %v15191_v49  ;;  %15192 = vst [vmem:[#allocation289_spill] sm:$0xff] %v8957_v34  ;;  %v8974_v49 = vmul.f32 %v15172_v9, %v2001_v62  ;;  %v15200_v34 = vld [vmem:[#allocation103_spill] sm:$0xff]  ;;  %v15253_v7 = vmov 0 }
 0x240   : > { %15190 = vst [vmem:[#allocation409_spill] sm:$0xff] %v8953_v11  ;;  %15193 = vst [vmem:[#allocation410_spill] sm:$0xff] %v8960_v60  ;;  %v8963_v13 = vpop.eup %4930  ;;  %4950 = vpow2.f32 %v15196_v38  ;;  %v2019_v11 = vadd.f32 1.0, %v2018_v27  ;;  %v2045_v44 = vmul.f32 -0.5, %v15200_v34  ;;  %v15202_v38 = vld [vmem:[#allocation337_spill] sm:$0xff]  ;;  %v8985_v27 = vadd.f32 1.0, %v15189_v18 }
 0x241   : > { %15195 = vst [vmem:[#allocation411_spill] sm:$0xff] %v8963_v13  ;;  %15197 = vst [vmem:[#allocation292_spill] sm:$0xff] %v8968_v17  ;;  %v8970_v47 = vpop.eup %4932  ;;  %4952 = vpow2.f32 %v8478_v61  ;;  %v15205_v61 = vld [vmem:[#allocation339_spill] sm:$0xff]  ;;  %v2037_v4 = vadd.f32 1.0, %v2036_v41 }
 0x242   : > { %15198 = vst [vmem:[#allocation412_spill] sm:$0xff] %v8970_v47  ;;  %15199 = vst [vmem:[#allocation413_spill] sm:$0xff] %v8974_v49  ;;  %v8978_v13 = vpop.eup %4934  ;;  %4954 = vlog2.f32 %v15202_v38  ;;  %v2028_v47 = vadd.f32 1.0, %v2027_v26  ;;  %v15206_v49 = vld [vmem:[#allocation283_spill] sm:$0xff]  ;;  %v8996_v50 = vmul.f32 %v15184_v23, %v2019_v11  ;;  %v8999_v38 = vadd.f32 1.0, %v15194_v19  ;;  %v15209_v26 = vld [vmem:[#allocation334_spill] sm:$0xff] }
 0x243   : > { %15201 = vst [vmem:[#allocation414_spill] sm:$0xff] %v8978_v13  ;;  %15203 = vst [vmem:[#allocation337_spill] sm:$0xff] %v8982_v12  ;;  %v8987_v17 = vpop.eup %4936  ;;  %4956 = vlog2.f32 %v15205_v61  ;;  %v2054_v9 = vmul.f32 -0.5, %v15206_v49  ;;  %v2063_v13 = vmul.f32 -0.5, %v15209_v26  ;;  %v9007_v61 = vadd.f32 1.0, %v15200_v34  ;;  %v15217_v11 = vld [vmem:[#allocation290_spill] sm:$0xff] }
 0x244   : > { %15204 = vst [vmem:[#allocation415_spill] sm:$0xff] %v8987_v17  ;;  %v8992_v60 = vpop.eup %4938  ;;  %4958 = vlog2.f32 %v8500_v24  ;;  %15208 = vst [vmem:[#allocation416_spill] sm:$0xff] %v8996_v50  ;;  %v2046_v62 = vadd.f32 1.0, %v2045_v44  ;;  %v9013_v24 = vmul.f32 %v15189_v18, %v2028_v47  ;;  %v15213_v50 = vld [vmem:[#allocation335_spill] sm:$0xff]  ;;  %v9024_v44 = vadd.f32 1.0, %v15206_v49 }
 0x245   : > { %15207 = vst [vmem:[#allocation339_spill] sm:$0xff] %v8992_v60  ;;  %v9002_v17 = vpop.eup %4940  ;;  %4960 = vlog2.f32 %v8517_v25  ;;  %v2072_v23 = vmul.f32 -0.5, %v15213_v50  ;;  %v9021_v25 = vmul.f32 %v15194_v19, %v2037_v4  ;;  %v2055_v41 = vadd.f32 1.0, %v2054_v9  ;;  %v15220_v9 = vld [vmem:[#allocation336_spill] sm:$0xff] }
 0x246   : > { %15210 = vst [vmem:[#allocation417_spill] sm:$0xff] %v9002_v17  ;;  %v9009_v60 = vpop.eup %4942  ;;  %4962 = vlog2.f32 %v8531_v31  ;;  %15212 = vst [vmem:[#allocation419_spill] sm:$0xff] %v9013_v24  ;;  %v2064_v47 = vadd.f32 1.0, %v2063_v13  ;;  %v2081_v24 = vmul.f32 -0.5, %v15217_v11  ;;  %v9038_v4 = vadd.f32 1.0, %v15209_v26 }
 0x247   : > { %15211 = vst [vmem:[#allocation418_spill] sm:$0xff] %v9009_v60  ;;  %v9017_v17 = vpop.eup %4944  ;;  %4964 = vlog2.f32 %v8539_v30  ;;  %15215 = vst [vmem:[#allocation421_spill] sm:$0xff] %v9021_v25  ;;  %v9035_v30 = vmul.f32 %v15200_v34, %v2046_v62  ;;  %v2090_v25 = vmul.f32 -0.5, %v15220_v9  ;;  %v9046_v13 = vadd.f32 1.0, %v15213_v50 }
 0x248   : > { %15214 = vst [vmem:[#allocation420_spill] sm:$0xff] %v9017_v17  ;;  %v9026_v60 = vpop.eup %4946  ;;  %4966 = vlog2.f32 %v8556_v29  ;;  %v2073_v31 = vadd.f32 1.0, %v2072_v23  ;;  %v9063_v23 = vadd.f32 1.0, %v15217_v11  ;;  %v2082_v29 = vadd.f32 1.0, %v2081_v24  ;;  %v15228_v24 = vld [vmem:[#allocation340_spill] sm:$0xff] }
 0x249   : > { %15216 = vst [vmem:[#allocation422_spill] sm:$0xff] %v9026_v60  ;;  %v9031_v12 = vpop.eup %4948  ;;  %4968 = vlog2.f32 %v8570_v10  ;;  %15219 = vst [vmem:[#allocation424_spill] sm:$0xff] %v9035_v30  ;;  %v9052_v10 = vmul.f32 %v15206_v49, %v2055_v41  ;;  %v15224_v60 = vld [vmem:[#allocation119_spill] sm:$0xff]  ;;  %v9070_v41 = vadd.f32 1.0, %v15220_v9  ;;  %v2091_v62 = vadd.f32 1.0, %v2090_v25  ;;  %v15230_v25 = vld [vmem:[#allocation338_spill] sm:$0xff] }
 0x24a   : > { %15218 = vst [vmem:[#allocation423_spill] sm:$0xff] %v9031_v12  ;;  %v9041_v19 = vpop.eup %4950  ;;  %4970 = vlog2.f32 %v8578_v48  ;;  %v2099_v17 = vmul.f32 -0.5, %v15224_v60  ;;  %v9060_v48 = vmul.f32 %v15209_v26, %v2064_v47  ;;  %v2117_v49 = vmul.f32 -0.5, %v15228_v24 }
 0x24b   : > { %15221 = vst [vmem:[#allocation425_spill] sm:$0xff] %v9041_v19  ;;  %v9048_v12 = vpop.eup %4952  ;;  %4972 = vlog2.f32 %v8595_v3  ;;  %15223 = vst [vmem:[#allocation427_spill] sm:$0xff] %v9052_v10  ;;  %v2108_v30 = vmul.f32 -0.5, %v15230_v25  ;;  %v2135_v47 = vmul.f32 -0.5, %v8510_v5  ;;  %v15248_v18 = vmov 0 }
 0x24c   : > { %15222 = vst [vmem:[#allocation426_spill] sm:$0xff] %v9048_v12  ;;  %v9056_v19 = vpop.eup %4954  ;;  %4974 = vlog2.f32 %v8609_v20  ;;  %15225 = vst [vmem:[#allocation428_spill] sm:$0xff] %v9060_v48  ;;  %v9076_v20 = vmul.f32 %v15213_v50, %v2073_v31  ;;  %v2100_v3 = vadd.f32 1.0, %v2099_v17  ;;  %v9102_v17 = vadd.f32 1.0, %v15230_v25 }
 0x24d   : > { %v9065_v12 = vpop.eup %4956  ;;  %4976 = vlog2.f32 %v8617_v58  ;;  %15226 = vst [vmem:[#allocation429_spill] sm:$0xff] %v9070_v41  ;;  %v9084_v58 = vadd.f32 1.0, %v15224_v60  ;;  %v2153_v50 = vmul.f32 -0.5, %v8524_v57  ;;  %v2118_v31 = vadd.f32 1.0, %v2117_v49 }
 0x24e   : > { %v9072_v10 = vpop.eup %4958  ;;  %4978 = vlog2.f32 %v8634_v14  ;;  %15227 = vst [vmem:[#allocation430_spill] sm:$0xff] %v9076_v20  ;;  %v9091_v14 = vmul.f32 %v15217_v11, %v2082_v29  ;;  %15233 = vst [vmem:[#allocation434_spill] sm:$0xff] %v9102_v17  ;;  %v2136_v49 = vadd.f32 1.0, %v2135_v47  ;;  %v2189_v29 = vmul.f32 -0.5, %v8558_v6 }
 0x24f   : > { %v9080_v48 = vpop.eup %4960  ;;  %4980 = vlog2.f32 %v8648_v1  ;;  %15229 = vst [vmem:[#allocation431_spill] sm:$0xff] %v9084_v58  ;;  %v9099_v1 = vmul.f32 %v15220_v9, %v2091_v62  ;;  %v9116_v62 = vadd.f32 1.0, %v2108_v30  ;;  %v15243_v30 = vld [vmem:[#allocation341_spill] sm:$0xff]  ;;  %v15271_v58 = vmov 0 }
 0x250   : > { %v9087_v26 = vpop.eup %4962  ;;  %4982 = vlog2.f32 %v8656_v46  ;;  %15231 = vst [vmem:[#allocation432_spill] sm:$0xff] %v9091_v14  ;;  %v15234_v14 = vld [vmem:[#allocation347_spill] sm:$0xff]  ;;  %v15276_v41 = vmov 0 }
 0x251   : > { %v9095_v20 = vpop.eup %4964  ;;  %4984 = vlog2.f32 %v8673_v28  ;;  %15232 = vst [vmem:[#allocation433_spill] sm:$0xff] %v9099_v1  ;;  %v2171_v11 = vmul.f32 -0.5, %v15234_v14  ;;  %v9114_v28 = vmul.f32 %v15224_v60, %v2100_v3  ;;  %15236 = vst [vmem:[#allocation436_spill] sm:$0xff] %v9116_v62  ;;  %v9119_v1 = vadd.f32 1.0, %v15228_v24 }
 0x252   : > { %v9105_v46 = vpop.eup %4966  ;;  %4986 = vlog2.f32 %v8687_v15  ;;  %v15240_v3 = vmov 0  ;;  %v9136_v62 = vadd.f32 1.0, %v15243_v30  ;;  %v2154_v15 = vadd.f32 1.0, %v2153_v50 }
 0x253   : > { %v9110_v34 = vpop.eup %4968  ;;  %4988 = vlog2.f32 %v8695_v39  ;;  %15235 = vst [vmem:[#allocation435_spill] sm:$0xff] %v9114_v28  ;;  %15237 = vst [vmem:[#allocation437_spill] sm:$0xff] %v9119_v1  ;;  %v15238_v39 = vld [vmem:[#allocation301_spill] sm:$0xff]  ;;  %v15246_v28 = vld [vmem:[#allocation191_spill] sm:$0xff]  ;;  %v2172_v50 = vadd.f32 1.0, %v2171_v11 }
 0x254   : > { %v9121_v9 = vpop.eup %4970  ;;  %4990 = vlog2.f32 %v8712_v33  ;;  %v15239_v17 = vand.u32 2147483647, %v15238_v39  ;;  %15244 = vst [vmem:[#allocation438_spill] sm:$0xff] %v9136_v62  ;;  %v9139_v33 = vadd.f32 1.0, %v8510_v5  ;;  %v15247_v60 = vand.u32 2147483647, %v15246_v28 }
 0x255   : > { %v9126_v25 = vpop.eup %4972  ;;  %4992 = vlog2.f32 %v8726_v43  ;;  %v9157_v43 = vmul.f32 %v15228_v24, %v2118_v31  ;;  %v2207_v62 = vmul.f32 -0.5, %v8573_v52  ;;  %v2225_v31 = vmul.f32 -0.5, %v8588_v53 }
 0x256   : > { %vm9130_vm0 = vcmp.lt.f32.partialorder %v15239_v17, 0.0004427343  ;;  %15245 = vst [vmem:[#allocation439_spill] sm:$0xff] %v9139_v33  ;;  %v9141_v47 = vpop.eup %4974  ;;  %vm9145_vm1 = vcmp.lt.f32.partialorder %v15247_v60, 0.0004427343  ;;  %v15251_v17 = vld [vmem:[#allocation303_spill] sm:$0xff]  ;;  %4994 = vlog2.f32 %v8734_v37 }
 0x257   : > { %v15241_v3 = vsel %vm9130_vm0, 4294967295, %v15240_v3  ;;  %v15249_v18 = vsel %vm9145_vm1, 4294967295, %v15248_v18  ;;  %v15252_v39 = vand.u32 2147483647, %v15251_v17  ;;  %15256 = vst [vmem:[#allocation440_spill] sm:$0xff] %v9157_v43  ;;  %v9160_v30 = vpop.eup %4976  ;;  %v15257_v60 = vld [vmem:[#allocation304_spill] sm:$0xff]  ;;  %4996 = vlog2.f32 %v8751_v56 }
 0x258   : > { %15242 = vst [vmem:[#allocation301_spill] sm:$0xff] %v15241_v3  ;;  %15250 = vst [vmem:[#allocation191_spill] sm:$0xff] %v15249_v18  ;;  %v15258_v28 = vand.u32 2147483647, %v15257_v60  ;;  %v15259_v33 = vmov 0  ;;  %v9171_v37 = vadd.f32 1.0, %v8524_v57  ;;  %v9174_v11 = vpop.eup %4978  ;;  %4998 = vlog2.f32 %v8765_v55 }
 0x259   : > { %vm9151_vm2 = vcmp.lt.f32.partialorder %v15252_v39, 0.0004427343  ;;  %v15263_v39 = vld [vmem:[#allocation192_spill] sm:$0xff]  ;;  %v15265_v24 = vmov 0  ;;  %v9184_v60 = vmul.f32 %v8510_v5, %v2136_v49  ;;  %v9187_v17 = vpop.eup %4980  ;;  %5000 = vlog2.f32 %v8773_v2  ;;  %v15337_v3 = vld [vmem:[#allocation399_spill] sm:$0xff] }
 0x25a   : > { %v15254_v7 = vsel %vm9151_vm2, 4294967295, %v15253_v7  ;;  %vm9164_vm3 = vcmp.lt.f32.partialorder %v15258_v28, 0.0004427343  ;;  %15262 = vst [vmem:[#allocation441_spill] sm:$0xff] %v9171_v37  ;;  %v15264_v43 = vand.u32 2147483647, %v15263_v39  ;;  %v9203_v55 = vmul.f32 %v8524_v57, %v2154_v15 }
 0x25b   : > { %15255 = vst [vmem:[#allocation303_spill] sm:$0xff] %v15254_v7  ;;  %v15260_v33 = vsel %vm9164_vm3, 4294967295, %v15259_v33  ;;  %15268 = vst [vmem:[#allocation442_spill] sm:$0xff] %v9184_v60  ;;  %v2190_v28 = vadd.f32 1.0, %v2189_v29  ;;  %v15269_v37 = vld [vmem:[#allocation306_spill] sm:$0xff]  ;;  %v9206_v29 = vadd.f32 1.0, %v15234_v14  ;;  %5002 = vlog2.f32 %v8790_v54 }
 0x25c   : > { %15261 = vst [vmem:[#allocation304_spill] sm:$0xff] %v15260_v33  ;;  %vm9178_vm4 = vcmp.lt.f32.partialorder %v15264_v43, 0.0004427343  ;;  %v15270_v1 = vand.u32 2147483647, %v15269_v37  ;;  %v15274_v43 = vld [vmem:[#allocation307_spill] sm:$0xff]  ;;  %v9213_v37 = vmul.f32 %v15234_v14, %v2172_v50  ;;  %5004 = vlog2.f32 %v8804_v59 }
 0x25d   : > { %v15266_v24 = vsel %vm9178_vm4, 4294967295, %v15265_v24  ;;  %v15275_v39 = vand.u32 2147483647, %v15274_v43  ;;  %15279 = vst [vmem:[#allocation443_spill] sm:$0xff] %v9203_v55  ;;  %v9216_v43 = vadd.f32 1.0, %v8558_v6  ;;  %v15282_v56 = vmov 0 }
 0x25e   : > { %15267 = vst [vmem:[#allocation192_spill] sm:$0xff] %v15266_v24  ;;  %vm9191_vm5 = vcmp.lt.f32.partialorder %v15270_v1, 0.0004427343  ;;  %v9209_v1 = vpop.eup %4982  ;;  %15280 = vst [vmem:[#allocation444_spill] sm:$0xff] %v9213_v37  ;;  %v15281_v15 = vand.u32 2147483647, %v15054_v32  ;;  %5006 = vlog2.f32 %v8812_v35 }
 0x25f   : > { %v15272_v58 = vsel %vm9191_vm5, 4294967295, %v15271_v58  ;;  %vm9197_vm6 = vcmp.lt.f32.partialorder %v15275_v39, 0.0004427343  ;;  %v2208_v39 = vadd.f32 1.0, %v2207_v62  ;;  %v9218_v2 = vpop.eup %4984  ;;  %v9229_v54 = vadd.f32 1.0, %v8573_v52  ;;  %v15286_v55 = vld [vmem:[#allocation309_spill] sm:$0xff] }
 0x260   : > { %15273 = vst [vmem:[#allocation306_spill] sm:$0xff] %v15272_v58  ;;  %v15277_v41 = vsel %vm9197_vm6, 4294967295, %v15276_v41  ;;  %vm9222_vm7 = vcmp.lt.f32.partialorder %v15281_v15, 0.0004427343  ;;  %v2226_v50 = vadd.f32 1.0, %v2225_v31  ;;  %v9231_v37 = vpop.eup %4986  ;;  %v15288_v32 = vmov 0 }
 0x261   : > { %15278 = vst [vmem:[#allocation307_spill] sm:$0xff] %v15277_v41  ;;  %v15283_v56 = vsel %vm9222_vm7, 4294967295, %v15282_v56  ;;  %v9234_v62 = vmul.f32 0.6931472, %v9056_v19  ;;  %v15287_v60 = vand.u32 2147483647, %v15286_v55  ;;  %v9250_v31 = vmul.f32 %v8558_v6, %v2190_v28  ;;  %v9253_v49 = vpop.eup %4988 }
 0x262   : > { %15284 = vst [vmem:[#allocation445_spill] sm:$0xff] %v15283_v56  ;;  %v15291_v15 = vld [vmem:[#allocation310_spill] sm:$0xff]  ;;  %v15293_v59 = vmov 0  ;;  %v9259_v55 = vmul.f32 0.6931472, %v9072_v10  ;;  %5008 = vlog2.f32 %v8829_v16  ;;  %v15304_v10 = vmov 0 }
 0x263   : > { %15285 = vst [vmem:[#allocation446_spill] sm:$0xff] %v9234_v62  ;;  %vm9238_vm8 = vcmp.lt.f32.partialorder %v15287_v60, 0.0004427343  ;;  %v15292_v14 = vand.u32 2147483647, %v15291_v15  ;;  %15296 = vst [vmem:[#allocation447_spill] sm:$0xff] %v9250_v31  ;;  %v9265_v15 = vpop.eup %4990  ;;  %5010 = vlog2.f32 %v8843_v40  ;;  %v9306_v40 = vmul.f32 %v8588_v53, %v2226_v50 }
 0x264   : > { %v15289_v32 = vsel %vm9238_vm8, 4294967295, %v15288_v32  ;;  %v9256_v60 = vmul.f32 0.6931472, %v9065_v12  ;;  %15298 = vst [vmem:[#allocation449_spill] sm:$0xff] %v9259_v55  ;;  %v9268_v35 = vmul.f32 0.6931472, %v9080_v48  ;;  %v9293_v57 = vpop.eup %4992  ;;  %5012 = vlog2.f32 %v8851_v36 }
 0x265   : > { %15290 = vst [vmem:[#allocation309_spill] sm:$0xff] %v15289_v32  ;;  %vm9244_vm9 = vcmp.lt.f32.partialorder %v15292_v14, 0.0004427343  ;;  %v9263_v14 = vadd.f32 1.0, %v8588_v53  ;;  %v15300_v28 = vand.u32 2147483647, %v15065_v21  ;;  %v9290_v21 = vmul.f32 %v8573_v52, %v2208_v39 }
 0x266   : > { %v15294_v59 = vsel %vm9244_vm9, 4294967295, %v15293_v59  ;;  %15297 = vst [vmem:[#allocation448_spill] sm:$0xff] %v9256_v60  ;;  %15299 = vst [vmem:[#allocation450_spill] sm:$0xff] %v9268_v35  ;;  %v15303_v12 = vand.u32 2147483647, %v15068_v0  ;;  %v15306_v16 = vld [vmem:[#allocation313_spill] sm:$0xff]  ;;  %5014 = vlog2.f32 %v8868_v22 }
 0x267   : > { %15295 = vst [vmem:[#allocation310_spill] sm:$0xff] %v15294_v59  ;;  %vm9272_vm10 = vcmp.lt.f32.partialorder %v15300_v28, 0.0004427343  ;;  %v15307_v31 = vand.u32 2147483647, %v15306_v16  ;;  %v15308_v6 = vmov 0  ;;  %5016 = vlog2.f32 %v15337_v3 }
 0x268   : > { %vm9278_vm11 = vcmp.lt.f32.partialorder %v15303_v12, 0.0004427343  ;;  %15311 = vst [vmem:[#allocation451_spill] sm:$0xff] %v9290_v21  ;;  %v15312_v48 = vld [vmem:[#allocation356_spill] sm:$0xff]  ;;  %v9296_v0 = vmul.f32 0.6931472, %v9087_v26 }
 0x269   : > { %v15305_v10 = vsel %vm9278_vm11, 4294967295, %v15304_v10  ;;  %vm9284_vm12 = vcmp.lt.f32.partialorder %v15307_v31, 0.0004427343  ;;  %v2243_v28 = vmul.f32 -0.5, %v15312_v48  ;;  %v15314_v12 = vand.u32 2147483647, %v15074_v51  ;;  %v9309_v31 = vpop.eup %4994 }
 0x26a   : > { %v15309_v6 = vsel %vm9284_vm12, 4294967295, %v15308_v6  ;;  %15313 = vst [vmem:[#allocation356_spill] sm:$0xff] %v9296_v0  ;;  %v15315_v16 = vmov 0  ;;  %15318 = vst [vmem:[#allocation453_spill] sm:$0xff] %v9306_v40  ;;  %v9316_v51 = vmul.f32 0.6931472, %v9095_v20  ;;  %v9328_v39 = vpop.eup %4996 }
 0x26b   : > { %15310 = vst [vmem:[#allocation313_spill] sm:$0xff] %v15309_v6  ;;  %vm9300_vm13 = vcmp.lt.f32.partialorder %v15314_v12, 0.0004427343  ;;  %v9319_v12 = vmul.f32 0.6931472, %v9105_v46  ;;  %v15323_v50 = vmov 0  ;;  %v9354_v60 = vpop.eup %4998 }
 0x26c   : > { %v15316_v16 = vsel %vm9300_vm13, 4294967295, %v15315_v16  ;;  %15320 = vst [vmem:[#allocation454_spill] sm:$0xff] %v9316_v51  ;;  %v15322_v36 = vand.u32 2147483647, %v15078_v8  ;;  %v15328_v8 = vand.u32 2147483647, %v15082_v45  ;;  %v9364_v55 = vpop.eup %5000 }
 0x26d   : > { %15317 = vst [vmem:[#allocation452_spill] sm:$0xff] %v15316_v16  ;;  %15321 = vst [vmem:[#allocation455_spill] sm:$0xff] %v9319_v12  ;;  %v15332_v62 = vld [vmem:[#allocation317_spill] sm:$0xff]  ;;  %v15334_v21 = vmov 0  ;;  %v9352_v26 = vadd.f32 1.0, %v15312_v48  ;;  %v15344_v45 = vld [vmem:[#allocation198_spill] sm:$0xff]  ;;  %v9389_v20 = vpop.eup %5002 }
 0x26e   : > { %vm9323_vm14 = vcmp.lt.f32.partialorder %v15322_v36, 0.0004427343  ;;  %vm9340_vm15 = vcmp.lt.f32.partialorder %v15328_v8, 0.0004427343  ;;  %v15329_v36 = vmov 0  ;;  %v15351_v46 = vmov 0  ;;  %v9407_v24 = vpop.eup %5004 }
 0x26f   : > { %v15324_v50 = vsel %vm9323_vm14, 4294967295, %v15323_v50  ;;  %v15330_v36 = vsel %vm9340_vm15, 4294967295, %v15329_v36  ;;  %v15333_v22 = vand.u32 2147483647, %v15332_v62  ;;  %v9361_v8 = vmul.f32 0.6931472, %v9110_v34 }
 0x270   : > { %15325 = vst [vmem:[#allocation456_spill] sm:$0xff] %v15324_v50  ;;  %15331 = vst [vmem:[#allocation457_spill] sm:$0xff] %v15330_v36  ;;  %v15340_v62 = vld [vmem:[#allocation93_spill] sm:$0xff]  ;;  %v9371_v7 = vmul.f32 0.6931472, %v9121_v9  ;;  %v15346_v34 = vmov 0 }
 0x271   : > { %vm9346_vm0 = vcmp.lt.f32.partialorder %v15333_v22, 0.0004427343  ;;  %15339 = vst [vmem:[#allocation399_spill] sm:$0xff] %v9361_v8  ;;  %5018 = vlog2.f32 %v15340_v62  ;;  %v2244_v22 = vadd.f32 1.0, %v2243_v28  ;;  %v9374_v40 = vmul.f32 0.6931472, %v9126_v25 }
 0x272   : > { %v15335_v21 = vsel %vm9346_vm0, 4294967295, %v15334_v21  ;;  %15342 = vst [vmem:[#allocation93_spill] sm:$0xff] %v9371_v7  ;;  %v15345_v35 = vand.u32 2147483647, %v15344_v45  ;;  %v15349_v28 = vld [vmem:[#allocation319_spill] sm:$0xff]  ;;  %5020 = vlog2.f32 %v8907_v42  ;;  %v15356_v0 = vld [vmem:[#allocation201_spill] sm:$0xff] }
 0x273   : > { %15336 = vst [vmem:[#allocation317_spill] sm:$0xff] %v15335_v21  ;;  %15343 = vst [vmem:[#allocation458_spill] sm:$0xff] %v9374_v40  ;;  %v15350_v62 = vand.u32 2147483647, %v15349_v28  ;;  %v15357_v28 = vand.u32 2147483647, %v15356_v0  ;;  %v9442_v56 = vmul.f32 %v15312_v48, %v2244_v22 }
 0x274   : > { %vm9378_vm3 = vcmp.lt.f32.partialorder %v15345_v35, 0.0004427343  ;;  %v15361_v3 = vld [vmem:[#allocation404_spill] sm:$0xff]  ;;  %v9410_v58 = vmul.f32 0.6931472, %v9141_v47  ;;  %v15364_v0 = vld [vmem:[#allocation281_spill] sm:$0xff] }
 0x275   : > { %v15347_v34 = vsel %vm9378_vm3, 4294967295, %v15346_v34  ;;  %vm9384_vm2 = vcmp.lt.f32.partialorder %v15350_v62, 0.0004427343  ;;  %vm9401_vm4 = vcmp.lt.f32.partialorder %v15357_v28, 0.0004427343  ;;  %v15358_v62 = vmov 0  ;;  %v9419_v28 = vpop.eup %5006 }
 0x276   : > { %15348 = vst [vmem:[#allocation198_spill] sm:$0xff] %v15347_v34  ;;  %v15352_v46 = vsel %vm9384_vm2, 4294967295, %v15351_v46  ;;  %v15359_v62 = vsel %vm9401_vm4, 4294967295, %v15358_v62  ;;  %5022 = vlog2.f32 %v15361_v3  ;;  %v9413_v25 = vmul.f32 0.6931472, %v9160_v30  ;;  %v15367_v47 = vld [vmem:[#allocation321_spill] sm:$0xff]  ;;  %v9444_v3 = vpop.eup %5008 }
 0x277   : > { %15353 = vst [vmem:[#allocation319_spill] sm:$0xff] %v15352_v46  ;;  %15360 = vst [vmem:[#allocation201_spill] sm:$0xff] %v15359_v62  ;;  %v9416_v45 = vmul.f32 0.6931472, %v9174_v11  ;;  %5024 = vlog2.f32 %v15364_v0  ;;  %v9426_v42 = vmul.f32 0.6931472, %v9187_v17  ;;  %v9464_v51 = vpop.eup %5010 }
 0x278   : > { %15362 = vst [vmem:[#allocation404_spill] sm:$0xff] %v9413_v25  ;;  %v15368_v35 = vand.u32 2147483647, %v15367_v47  ;;  %v15369_v30 = vmov 0  ;;  %v15372_v11 = vld [vmem:[#allocation322_spill] sm:$0xff]  ;;  %v15374_v0 = vmov 0  ;;  %5026 = vlog2.f32 %v8946_v63  ;;  %v9486_v17 = vpop.eup %5012 }
 0x279   : > { %15363 = vst [vmem:[#allocation459_spill] sm:$0xff] %v9416_v45  ;;  %15366 = vst [vmem:[#allocation281_spill] sm:$0xff] %v9426_v42  ;;  %v15373_v41 = vand.u32 2147483647, %v15372_v11  ;;  %v9455_v11 = vmul.f32 0.6931472, %v9209_v1 }
 0x27a   : > { %vm9430_vm6 = vcmp.lt.f32.partialorder %v15368_v35, 0.0004427343  ;;  %15377 = vst [vmem:[#allocation460_spill] sm:$0xff] %v9442_v56  ;;  %v15381_v8 = vld [vmem:[#allocation202_spill] sm:$0xff]  ;;  %v15383_v22 = vmov 0  ;;  %v15391_v1 = vmov 0 }
 0x27b   : > { %v15370_v30 = vsel %vm9430_vm6, 4294967295, %v15369_v30  ;;  %vm9436_vm5 = vcmp.lt.f32.partialorder %v15373_v41, 0.0004427343  ;;  %15380 = vst [vmem:[#allocation461_spill] sm:$0xff] %v9455_v11  ;;  %v15382_v63 = vand.u32 2147483647, %v15381_v8 }
 0x27c   : > { %15371 = vst [vmem:[#allocation321_spill] sm:$0xff] %v15370_v30  ;;  %v15375_v0 = vsel %vm9436_vm5, 4294967295, %v15374_v0  ;;  %v15386_v12 = vld [vmem:[#allocation410_spill] sm:$0xff]  ;;  %v9467_v35 = vmul.f32 0.6931472, %v9218_v2  ;;  %v15389_v41 = vld [vmem:[#allocation324_spill] sm:$0xff] }
 0x27d   : > { %15376 = vst [vmem:[#allocation322_spill] sm:$0xff] %v15375_v0  ;;  %vm9459_vm7 = vcmp.lt.f32.partialorder %v15382_v63, 0.0004427343  ;;  %5028 = vlog2.f32 %v15386_v12  ;;  %v9470_v7 = vmul.f32 0.6931472, %v9231_v37  ;;  %v15394_v8 = vld [vmem:[#allocation325_spill] sm:$0xff] }
 0x27e   : > { %v15384_v22 = vsel %vm9459_vm7, 4294967295, %v15383_v22  ;;  %15387 = vst [vmem:[#allocation410_spill] sm:$0xff] %v9467_v35  ;;  %v15390_v40 = vand.u32 2147483647, %v15389_v41  ;;  %v15395_v63 = vand.u32 2147483647, %v15394_v8  ;;  %v9513_v8 = vpop.eup %5014 }
 0x27f   : > { %15385 = vst [vmem:[#allocation202_spill] sm:$0xff] %v15384_v22  ;;  %15388 = vst [vmem:[#allocation462_spill] sm:$0xff] %v9470_v7  ;;  %v15396_v47 = vmov 0  ;;  %v15399_v12 = vld [vmem:[#allocation292_spill] sm:$0xff]  ;;  %v15400_v59 = vld [vmem:[#allocation358_spill] sm:$0xff]  ;;  %v15406_v33 = vmov 0 }
 0x280   : > { %vm9474_vm9 = vcmp.lt.f32.partialorder %v15390_v40, 0.0004427343  ;;  %vm9480_vm8 = vcmp.lt.f32.partialorder %v15395_v63, 0.0004427343  ;;  %5030 = vlog2.f32 %v15399_v12  ;;  %v2261_v2 = vmul.f32 -0.5, %v15400_v59  ;;  %v15401_v37 = vld [vmem:[#allocation360_spill] sm:$0xff] }
 0x281   : > { %v15392_v1 = vsel %vm9474_vm9, 4294967295, %v15391_v1  ;;  %v15397_v47 = vsel %vm9480_vm8, 4294967295, %v15396_v47  ;;  %v15402_v41 = vld [vmem:[#allocation362_spill] sm:$0xff]  ;;  %v15404_v12 = vld [vmem:[#allocation204_spill] sm:$0xff]  ;;  %v15409_v18 = vld [vmem:[#allocation43_spill] sm:$0xff]  ;;  %v15411_v40 = vmov 0  ;;  %5032 = vlog2.f32 %v8985_v27  ;;  %v9532_v27 = vpop.eup %5016 }
 0x282   : > { %15393 = vst [vmem:[#allocation324_spill] sm:$0xff] %v15392_v1  ;;  %15398 = vst [vmem:[#allocation325_spill] sm:$0xff] %v15397_v47  ;;  %v15405_v9 = vand.u32 2147483647, %v15404_v12  ;;  %v15410_v56 = vand.u32 2147483647, %v15409_v18  ;;  %5034 = vlog2.f32 %v8999_v38 }
 0x283   : > { %v9523_v12 = vmul.f32 0.6931472, %v9265_v15  ;;  %v15417_v18 = vld [vmem:[#allocation44_spill] sm:$0xff]  ;;  %v15419_v45 = vmov 0  ;;  %v15424_v15 = vld [vmem:[#allocation207_spill] sm:$0xff]  ;;  %5036 = vlog2.f32 %v9007_v61  ;;  %v9549_v38 = vadd.f32 1.0, %v15400_v59 }
 0x284   : > { %vm9502_vm1 = vcmp.lt.f32.partialorder %v15405_v9, 0.0004427343  ;;  %vm9508_vm8 = vcmp.lt.f32.partialorder %v15410_v56, 0.0004427343  ;;  %v9520_v9 = vmul.f32 0.6931472, %v9253_v49  ;;  %5038 = vlog2.f32 %v9024_v44 }
 0x285   : > { %v15407_v33 = vsel %vm9502_vm1, 4294967295, %v15406_v33  ;;  %v15412_v40 = vsel %vm9508_vm8, 4294967295, %v15411_v40  ;;  %15416 = vst [vmem:[#allocation362_spill] sm:$0xff] %v9523_v12  ;;  %v15418_v56 = vand.u32 2147483647, %v15417_v18  ;;  %v15426_v18 = vmov 0 }
 0x286   : > { %15408 = vst [vmem:[#allocation292_spill] sm:$0xff] %v15407_v33  ;;  %15413 = vst [vmem:[#allocation358_spill] sm:$0xff] %v15412_v40  ;;  %v9539_v49 = vmul.f32 0.6931472, %v9293_v57  ;;  %v15425_v42 = vand.u32 2147483647, %v15424_v15  ;;  %5040 = vlog2.f32 %v9038_v4 }
 0x287   : > { %15415 = vst [vmem:[#allocation360_spill] sm:$0xff] %v9520_v9  ;;  %vm9527_vm12 = vcmp.lt.f32.partialorder %v15418_v56, 0.0004427343  ;;  %v9551_v56 = vpop.eup %5018  ;;  %v15431_v15 = vld [vmem:[#allocation251_spill] sm:$0xff]  ;;  %v15433_v63 = vmov 0  ;;  %v2262_v61 = vadd.f32 1.0, %v2261_v2  ;;  %5042 = vlog2.f32 %v9046_v13 }
 0x288   : > { %v15420_v45 = vsel %vm9527_vm12, 4294967295, %v15419_v45  ;;  %15423 = vst [vmem:[#allocation43_spill] sm:$0xff] %v9539_v49  ;;  %vm9543_vm13 = vcmp.lt.f32.partialorder %v15425_v42, 0.0004427343  ;;  %v15432_v11 = vand.u32 2147483647, %v15431_v15  ;;  %v9568_v50 = vpop.eup %5020  ;;  %5044 = vlog2.f32 %v9063_v23 }
 0x289   : > { %15421 = vst [vmem:[#allocation204_spill] sm:$0xff] %v15420_v45  ;;  %v15427_v18 = vsel %vm9543_vm13, 4294967295, %v15426_v18  ;;  %v9571_v16 = vmul.f32 0.6931472, %v9309_v31  ;;  %v9574_v32 = vmul.f32 0.6931472, %v9328_v39  ;;  %v9584_v44 = vpop.eup %5022 }
 0x28a   : > { %15428 = vst [vmem:[#allocation44_spill] sm:$0xff] %v15427_v18  ;;  %vm9563_vm14 = vcmp.lt.f32.partialorder %v15432_v11, 0.0004427343  ;;  %v15438_v35 = vld [vmem:[#allocation332_spill] sm:$0xff]  ;;  %v15440_v42 = vmov 0  ;;  %v15446_v15 = vld [vmem:[#allocation333_spill] sm:$0xff]  ;;  %v9604_v11 = vpop.eup %5024 }
 0x28b   : > { %v15434_v63 = vsel %vm9563_vm14, 4294967295, %v15433_v63  ;;  %15436 = vst [vmem:[#allocation251_spill] sm:$0xff] %v9571_v16  ;;  %15437 = vst [vmem:[#allocation463_spill] sm:$0xff] %v9574_v32  ;;  %v15439_v21 = vand.u32 2147483647, %v15438_v35  ;;  %v15448_v4 = vmov 0 }
 0x28c   : > { %15435 = vst [vmem:[#allocation207_spill] sm:$0xff] %v15434_v63  ;;  %v15447_v7 = vand.u32 2147483647, %v15446_v15  ;;  %v9611_v35 = vmul.f32 0.6931472, %v9364_v55  ;;  %v15456_v12 = vld [vmem:[#allocation166_spill] sm:$0xff] }
 0x28d   : > { %vm9578_vm0 = vcmp.lt.f32.partialorder %v15439_v21, 0.0004427343  ;;  %v9595_v21 = vmul.f32 0.6931472, %v9354_v60  ;;  %v9614_v60 = vmul.f32 0.6931472, %v9389_v20 }
 0x28e   : > { %v15441_v42 = vsel %vm9578_vm0, 4294967295, %v15440_v42  ;;  %vm9599_vm15 = vcmp.lt.f32.partialorder %v15447_v7, 0.0004427343  ;;  %15452 = vst [vmem:[#allocation465_spill] sm:$0xff] %v9611_v35  ;;  %v5027_v7 = vpop.eup %5026  ;;  %v9618_v15 = vmul.f32 0.6931472, %v9407_v24  ;;  %v9637_v24 = vmul.f32 %v15400_v59, %v2262_v61 }
 0x28f   : > { %15442 = vst [vmem:[#allocation332_spill] sm:$0xff] %v15441_v42  ;;  %15445 = vst [vmem:[#allocation464_spill] sm:$0xff] %v9595_v21  ;;  %v15449_v4 = vsel %vm9599_vm15, 4294967295, %v15448_v4  ;;  %v9621_v13 = vmul.f32 0.6931472, %v9419_v28  ;;  %v15458_v62 = vmov 0  ;;  %v9639_v49 = vpop.eup %5028 }
 0x290   : > { %15450 = vst [vmem:[#allocation333_spill] sm:$0xff] %v15449_v4  ;;  %15453 = vst [vmem:[#allocation466_spill] sm:$0xff] %v9614_v60  ;;  %v15457_v39 = vand.u32 2147483647, %v15456_v12  ;;  %v15461_v55 = vld [vmem:[#allocation175_spill] sm:$0xff]  ;;  %v15463_v20 = vmov 0  ;;  %v9659_v2 = vpop.eup %5030 }
 0x291   : > { %15454 = vst [vmem:[#allocation467_spill] sm:$0xff] %v9618_v15  ;;  %15455 = vst [vmem:[#allocation468_spill] sm:$0xff] %v9621_v13  ;;  %v15462_v9 = vand.u32 2147483647, %v15461_v55  ;;  %v15466_v23 = vld [vmem:[#allocation429_spill] sm:$0xff]  ;;  %v15473_v61 = vmov 0  ;;  %v5033_v16 = vpop.eup %5032 }
 0x292   : > { %vm9625_vm2 = vcmp.lt.f32.partialorder %v15457_v39, 0.0004427343  ;;  %5046 = vlog2.f32 %v15466_v23  ;;  %15467 = vst [vmem:[#allocation429_spill] sm:$0xff] %v9637_v24  ;;  %v9650_v55 = vmul.f32 0.6931472, %v9444_v3  ;;  %v15471_v31 = vld [vmem:[#allocation257_spill] sm:$0xff]  ;;  %v9694_v12 = vpop.eup %5034 }
 0x293   : > { %v15459_v62 = vsel %vm9625_vm2, 4294967295, %v15458_v62  ;;  %vm9631_vm4 = vcmp.lt.f32.partialorder %v15462_v9, 0.0004427343  ;;  %v15472_v23 = vand.u32 2147483647, %v15471_v31  ;;  %v15476_v46 = vld [vmem:[#allocation431_spill] sm:$0xff] }
 0x294   : > { %15460 = vst [vmem:[#allocation166_spill] sm:$0xff] %v15459_v62  ;;  %v15464_v20 = vsel %vm9631_vm4, 4294967295, %v15463_v20  ;;  %15470 = vst [vmem:[#allocation469_spill] sm:$0xff] %v9650_v55  ;;  %5048 = vlog2.f32 %v15476_v46  ;;  %v9666_v9 = vmul.f32 0.6931472, %v9464_v51  ;;  %v15480_v3 = vld [vmem:[#allocation260_spill] sm:$0xff] }
 0x295   : > { %15465 = vst [vmem:[#allocation175_spill] sm:$0xff] %v15464_v20  ;;  %vm9654_vm3 = vcmp.lt.f32.partialorder %v15472_v23, 0.0004427343  ;;  %15477 = vst [vmem:[#allocation431_spill] sm:$0xff] %v9659_v2  ;;  %v15481_v32 = vand.u32 2147483647, %v15480_v3 }
 0x296   : > { %v15474_v61 = vsel %vm9654_vm3, 4294967295, %v15473_v61  ;;  %15479 = vst [vmem:[#allocation470_spill] sm:$0xff] %v9666_v9  ;;  %v15484_v23 = vld [vmem:[#allocation263_spill] sm:$0xff]  ;;  %v15486_v46 = vmov 0  ;;  %v15489_v2 = vld [vmem:[#allocation437_spill] sm:$0xff]  ;;  %v15500_v21 = vld [vmem:[#allocation266_spill] sm:$0xff] }
 0x297   : > { %15475 = vst [vmem:[#allocation257_spill] sm:$0xff] %v15474_v61  ;;  %vm9670_vm5 = vcmp.lt.f32.partialorder %v15481_v32, 0.0004427343  ;;  %v15485_v39 = vand.u32 2147483647, %v15484_v23  ;;  %5050 = vlog2.f32 %v15489_v2  ;;  %v15490_v0 = vld [vmem:[#allocation361_spill] sm:$0xff] }
 0x298   : > { %v2279_v22 = vmul.f32 -0.5, %v15490_v0  ;;  %v15495_v23 = vld [vmem:[#allocation439_spill] sm:$0xff]  ;;  %15496 = vst [vmem:[#allocation437_spill] sm:$0xff] %v9694_v12  ;;  %v9705_v47 = vmul.f32 0.6931472, %v9513_v8  ;;  %v5037_v12 = vpop.eup %5036  ;;  %v15507_v3 = vld [vmem:[#allocation272_spill] sm:$0xff] }
 0x299   : > { %vm9676_vm6 = vcmp.lt.f32.partialorder %v15485_v39, 0.0004427343  ;;  %v9691_v39 = vmul.f32 0.6931472, %v9486_v17  ;;  %5052 = vlog2.f32 %v15495_v23  ;;  %v15501_v17 = vand.u32 2147483647, %v15500_v21 }
 0x29a   : > { %v15487_v46 = vsel %vm9676_vm6, 4294967295, %v15486_v46  ;;  %15499 = vst [vmem:[#allocation361_spill] sm:$0xff] %v9705_v47  ;;  %v15504_v23 = vld [vmem:[#allocation441_spill] sm:$0xff]  ;;  %v9719_v40 = vmul.f32 0.6931472, %v9532_v27  ;;  %v15509_v13 = vmov 0 }
 0x29b   : > { %15488 = vst [vmem:[#allocation260_spill] sm:$0xff] %v15487_v46  ;;  %15494 = vst [vmem:[#allocation263_spill] sm:$0xff] %v9691_v39  ;;  %vm9709_vm7 = vcmp.lt.f32.partialorder %v15501_v17, 0.0004427343  ;;  %5054 = vlog2.f32 %v15504_v23  ;;  %v15508_v8 = vand.u32 2147483647, %v15507_v3  ;;  %v9729_v17 = vpop.eup %5038 }
 0x29c   : > { %15506 = vst [vmem:[#allocation439_spill] sm:$0xff] %v9719_v40  ;;  %5056 = vlog2.f32 %v9206_v29  ;;  %v2276_v21 = vadd.f32 1.0, %v15490_v0  ;;  %15511 = vst [vmem:[#allocation266_spill] sm:$0xff] %v9729_v17  ;;  %v15513_v55 = vld [vmem:[#allocation103_spill] sm:$0xff]  ;;  %v15515_v33 = vmov 0  ;;  %v15517_v3 = vld [vmem:[#allocation334_spill] sm:$0xff]  ;;  %v5041_v1 = vpop.eup %5040 }
 0x29d   : > { %vm9723_vm8 = vcmp.lt.f32.partialorder %v15508_v8, 0.0004427343  ;;  %v15514_v27 = vand.u32 2147483647, %v15513_v55  ;;  %v15518_v8 = vand.u32 2147483647, %v15517_v3  ;;  %5058 = vlog2.f32 %v9216_v43  ;;  %v9766_v43 = vpop.eup %5042 }
 0x29e   : > { %v15510_v13 = vsel %vm9723_vm8, 4294967295, %v15509_v13  ;;  %v15519_v45 = vmov 0  ;;  %v2280_v29 = vadd.f32 1.0, %v2279_v22  ;;  %v9757_v3 = vmul.f32 0.6931472, %v9568_v50  ;;  %15528 = vst [vmem:[#allocation103_spill] sm:$0xff] %v9766_v43  ;;  %v5045_v39 = vpop.eup %5044 }
 0x29f   : > { %vm9737_vm12 = vcmp.lt.f32.partialorder %v15514_v27, 0.0004427343  ;;  %vm9743_vm1 = vcmp.lt.f32.partialorder %v15518_v8, 0.0004427343  ;;  %v9754_v27 = vmul.f32 0.6931472, %v9551_v56  ;;  %5060 = vlog2.f32 %v9229_v54  ;;  %v9805_v42 = vpop.eup %5046 }
 0x2a0   : > { %v15516_v33 = vsel %vm9737_vm12, 4294967295, %v15515_v33  ;;  %v15520_v45 = vsel %vm9743_vm1, 4294967295, %v15519_v45  ;;  %15523 = vst [vmem:[#allocation272_spill] sm:$0xff] %v9757_v3  ;;  %v15524_v8 = vld [vmem:[#allocation290_spill] sm:$0xff]  ;;  %v9773_v56 = vmul.f32 0.6931472, %v9584_v44  ;;  %5062 = vlog2.f32 %v9263_v14  ;;  %v5049_v43 = vpop.eup %5048 }
 0x2a1   : > { %15522 = vst [vmem:[#allocation441_spill] sm:$0xff] %v9754_v27  ;;  %v15525_v9 = vand.u32 2147483647, %v15524_v8  ;;  %v15531_v50 = vld [vmem:[#allocation119_spill] sm:$0xff]  ;;  %v15533_v8 = vmov 0  ;;  %v15541_v47 = vmov 0  ;;  %5064 = vlog2.f32 %v9352_v26  ;;  %v5051_v63 = vpop.eup %5050 }
 0x2a2   : > { %15530 = vst [vmem:[#allocation334_spill] sm:$0xff] %v9773_v56  ;;  %v15532_v17 = vand.u32 2147483647, %v15531_v50  ;;  %v9788_v55 = vmul.f32 0.6931472, %v9604_v11  ;;  %v15539_v50 = vld [vmem:[#allocation340_spill] sm:$0xff]  ;;  %5066 = vlog2.f32 %v9549_v38 }
 0x2a3   : > { %vm9761_vm13 = vcmp.lt.f32.partialorder %v15525_v9, 0.0004427343  ;;  %v15536_v9 = vld [vmem:[#allocation363_spill] sm:$0xff]  ;;  %v9790_v44 = vmul.f32 0.6931472, %v5027_v7  ;;  %v15544_v22 = vmov 0  ;;  %5068 = vlog2.f32 %v2276_v21  ;;  %v5053_v3 = vpop.eup %5052 }
 0x2a4   : > { %vm9777_vm14 = vcmp.lt.f32.partialorder %v15532_v17, 0.0004427343  ;;  %v2294_v54 = vadd.f32 1.0, %v15536_v9  ;;  %v15540_v17 = vand.u32 2147483647, %v15539_v50  ;;  %15547 = vst [vmem:[#allocation340_spill] sm:$0xff] %v9805_v42  ;;  %v9815_v50 = vmul.f32 %v15490_v0, %v2280_v29 }
 0x2a5   : > { %v15534_v8 = vsel %vm9777_vm14, 4294967295, %v15533_v8  ;;  %15538 = vst [vmem:[#allocation119_spill] sm:$0xff] %v9790_v44  ;;  %v15543_v14 = vand.u32 2147483647, %v8510_v5  ;;  %v15548_v11 = vld [vmem:[#allocation345_spill] sm:$0xff]  ;;  %v15550_v7 = vmov 0 }
 0x2a6   : > { %15535 = vst [vmem:[#allocation290_spill] sm:$0xff] %v15534_v8  ;;  %vm9794_vm0 = vcmp.lt.f32.partialorder %v15540_v17, 0.0004427343  ;;  %v15549_v40 = vand.u32 2147483647, %v15548_v11  ;;  %15553 = vst [vmem:[#allocation471_spill] sm:$0xff] %v9815_v50  ;;  %5070 = vlog2.f32 %v2294_v54 }
 0x2a7   : > { %v15542_v47 = vsel %vm9794_vm0, 4294967295, %v15541_v47  ;;  %vm9800_vm9 = vcmp.lt.f32.partialorder %v15543_v14, 0.0004427343  ;;  %v2297_v5 = vmul.f32 -0.5, %v15536_v9  ;;  %v15554_v17 = vld [vmem:[#allocation366_spill] sm:$0xff]  ;;  %v15557_v29 = vld [vmem:[#allocation347_spill] sm:$0xff] }
 0x2a8   : > { %v15545_v22 = vsel %vm9800_vm9, 4294967295, %v15544_v22  ;;  %vm9809_vm15 = vcmp.lt.f32.partialorder %v15549_v40, 0.0004427343  ;;  %v2312_v14 = vadd.f32 1.0, %v15554_v17  ;;  %v9828_v38 = vmul.f32 0.6931472, %v9639_v49 }
 0x2a9   : > { %15546 = vst [vmem:[#allocation363_spill] sm:$0xff] %v15545_v22  ;;  %v15551_v7 = vsel %vm9809_vm15, 4294967295, %v15550_v7  ;;  %v15558_v4 = vand.u32 2147483647, %v15557_v29  ;;  %v15559_v28 = vmov 0  ;;  %v15563_v20 = vld [vmem:[#allocation351_spill] sm:$0xff] }
 0x2aa   : > { %15552 = vst [vmem:[#allocation345_spill] sm:$0xff] %v15551_v7  ;;  %v9840_v27 = vmul.f32 0.6931472, %v5033_v16  ;;  %v15564_v11 = vand.u32 2147483647, %v15563_v20  ;;  %v15565_v49 = vmov 0  ;;  %5072 = vlog2.f32 %v2312_v14 }
 0x2ab   : > { %vm9832_vm11 = vcmp.lt.f32.partialorder %v15558_v4, 0.0004427343  ;;  %v15568_v4 = vld [vmem:[#allocation369_spill] sm:$0xff]  ;;  %v9857_v42 = vmul.f32 0.6931472, %v5037_v12  ;;  %v15576_v26 = vmov 0 }
 0x2ac   : > { %v15560_v28 = vsel %vm9832_vm11, 4294967295, %v15559_v28  ;;  %vm9844_vm4 = vcmp.lt.f32.partialorder %v15564_v11, 0.0004427343  ;;  %v2330_v29 = vadd.f32 1.0, %v15568_v4  ;;  %v15569_v21 = vld [vmem:[#allocation289_spill] sm:$0xff]  ;;  %v5055_v11 = vpop.eup %5054  ;;  %v2298_v16 = vadd.f32 1.0, %v2297_v5 }
 0x2ad   : > { %15561 = vst [vmem:[#allocation366_spill] sm:$0xff] %v15560_v28  ;;  %v15566_v49 = vsel %vm9844_vm4, 4294967295, %v15565_v49  ;;  %v9859_v20 = vmul.f32 0.6931472, %v5041_v1  ;;  %v9861_v56 = vmul.f32 0.6931472, %v5045_v39  ;;  %v5057_v1 = vpop.eup %5056  ;;  %v15867_v19 = vsel %vm9670_vm5, %v15569_v21, %v9788_v55 }
 0x2ae   : > { %15567 = vst [vmem:[#allocation347_spill] sm:$0xff] %v15566_v49  ;;  %v15572_v54 = vand.u32 2147483647, %v8573_v52  ;;  %v15575_v40 = vand.u32 2147483647, %v8588_v53  ;;  %v15579_v39 = vld [vmem:[#allocation337_spill] sm:$0xff]  ;;  %v5059_v46 = vpop.eup %5058  ;;  %5074 = vlog2.f32 %v2330_v29  ;;  %vm15881_vm5 = vnez %v15520_v45 }
 0x2af   : > { %15571 = vst [vmem:[#allocation351_spill] sm:$0xff] %v9861_v56  ;;  %v2300_v12 = vand.u32 2147483647, %v15536_v9  ;;  %v15581_v44 = vand.u32 2147483647, %v15312_v48  ;;  %v15582_v53 = vmov 0  ;;  %v5061_v48 = vpop.eup %5060 }
 0x2b0   : > { %vm9865_vm3 = vcmp.lt.f32.partialorder %v15572_v54, 0.0004427343  ;;  %vm9871_vm2 = vcmp.lt.f32.partialorder %v15575_v40, 0.0004427343  ;;  %v9880_v54 = vmul.f32 0.6931472, %v5049_v43  ;;  %v5063_v29 = vpop.eup %5062 }
 0x2b1   : > { %v15577_v26 = vsel %vm9871_vm2, 4294967295, %v15576_v26  ;;  %vm9884_vm6 = vcmp.lt.f32.partialorder %v15581_v44, 0.0004427343  ;;  %v2315_v40 = vmul.f32 -0.5, %v15554_v17  ;;  %v15585_v5 = vld [vmem:[#allocation372_spill] sm:$0xff]  ;;  %v15586_v14 = vld [vmem:[#allocation419_spill] sm:$0xff]  ;;  %v5065_v25 = vpop.eup %5064 }
 0x2b2   : > { %15578 = vst [vmem:[#allocation369_spill] sm:$0xff] %v15577_v26  ;;  %15580 = vst [vmem:[#allocation289_spill] sm:$0xff] %v9880_v54  ;;  %v15583_v53 = vsel %vm9884_vm6, 4294967295, %v15582_v53  ;;  %v2348_v61 = vadd.f32 1.0, %v15585_v5  ;;  %v9894_v15 = vmul.f32 0.6931472, %v5051_v63  ;;  %v5067_v36 = vpop.eup %5066 }
 0x2b3   : > { %15584 = vst [vmem:[#allocation337_spill] sm:$0xff] %v15583_v53  ;;  %v9896_v43 = vmul.f32 0.6931472, %v5053_v3  ;;  %v15589_v44 = vld [vmem:[#allocation424_spill] sm:$0xff]  ;;  %v9906_v35 = vmul.f32 0.6931472, %v5055_v11 }
 0x2b4   : > { %15587 = vst [vmem:[#allocation372_spill] sm:$0xff] %v9894_v15  ;;  %v15590_v2 = vld [vmem:[#allocation428_spill] sm:$0xff]  ;;  %v15592_v62 = vand.u32 2147483647, %v15400_v59  ;;  %v15593_v63 = vmov 0  ;;  %v15599_v11 = vmov 0  ;;  %v9928_v59 = vmul.f32 %v15536_v9, %v2298_v16 }
 0x2b5   : > { %15588 = vst [vmem:[#allocation419_spill] sm:$0xff] %v9896_v43  ;;  %15591 = vst [vmem:[#allocation424_spill] sm:$0xff] %v9906_v35  ;;  %v2318_v3 = vand.u32 2147483647, %v15554_v17  ;;  %v9919_v30 = vmul.f32 0.6931472, %v5057_v1  ;;  %5076 = vlog2.f32 %v2348_v61  ;;  %v5069_v1 = vpop.eup %5068 }
 0x2b6   : > { %vm9910_vm8 = vcmp.lt.f32.partialorder %v15592_v62, 0.0004427343  ;;  %v15598_v32 = vand.u32 2147483647, %v15490_v0  ;;  %15602 = vst [vmem:[#allocation474_spill] sm:$0xff] %v9928_v59  ;;  %v15603_v62 = vmov 0  ;;  %v5071_v22 = vpop.eup %5070 }
 0x2b7   : > { %v15594_v63 = vsel %vm9910_vm8, 4294967295, %v15593_v63  ;;  %15597 = vst [vmem:[#allocation472_spill] sm:$0xff] %v9919_v30  ;;  %vm9930_vm12 = vcmp.lt.f32.partialorder %v2300_v12, 0.0004427343  ;;  %v15606_v34 = vld [vmem:[#allocation376_spill] sm:$0xff]  ;;  %v15607_v52 = vld [vmem:[#allocation435_spill] sm:$0xff]  ;;  %v5073_v7 = vpop.eup %5072 }
 0x2b8   : > { %15595 = vst [vmem:[#allocation428_spill] sm:$0xff] %v15594_v63  ;;  %vm9923_vm1 = vcmp.lt.f32.partialorder %v15598_v32, 0.0004427343  ;;  %v15604_v62 = vsel %vm9930_vm12, 4294967295, %v15603_v62  ;;  %v2366_v57 = vadd.f32 1.0, %v15606_v34  ;;  %v2316_v32 = vadd.f32 1.0, %v2315_v40 }
 0x2b9   : > { %v15600_v11 = vsel %vm9923_vm1, 4294967295, %v15599_v11  ;;  %15605 = vst [vmem:[#allocation475_spill] sm:$0xff] %v15604_v62  ;;  %v9939_v0 = vmul.f32 0.6931472, %v5059_v46  ;;  %v15609_v9 = vld [vmem:[#allocation440_spill] sm:$0xff]  ;;  %v2333_v56 = vmul.f32 -0.5, %v15568_v4 }
 0x2ba   : > { %15601 = vst [vmem:[#allocation473_spill] sm:$0xff] %v15600_v11  ;;  %v15611_v51 = vld [vmem:[#allocation379_spill] sm:$0xff]  ;;  %v9955_v40 = vmul.f32 0.6931472, %v5061_v48  ;;  %v9957_v54 = vmul.f32 0.6931472, %v5063_v29  ;;  %5078 = vlog2.f32 %v2366_v57 }
 0x2bb   : > { %15608 = vst [vmem:[#allocation376_spill] sm:$0xff] %v9939_v0  ;;  %v2384_v8 = vadd.f32 1.0, %v15611_v51  ;;  %vm9959_vm0 = vcmp.lt.f32.partialorder %v2318_v3, 0.0004427343  ;;  %v15615_v16 = vmov 0  ;;  %v15618_v6 = vld [vmem:[#allocation444_spill] sm:$0xff]  ;;  %v9975_v3 = vmul.f32 %v15554_v17, %v2316_v32 }
 0x2bc   : > { %15613 = vst [vmem:[#allocation435_spill] sm:$0xff] %v9955_v40  ;;  %15614 = vst [vmem:[#allocation440_spill] sm:$0xff] %v9957_v54  ;;  %v15616_v16 = vsel %vm9959_vm0, 4294967295, %v15615_v16  ;;  %v9967_v12 = vmul.f32 0.6931472, %v5065_v25  ;;  %v2351_v61 = vmul.f32 -0.5, %v15585_v5 }
 0x2bd   : > { %15617 = vst [vmem:[#allocation379_spill] sm:$0xff] %v15616_v16  ;;  %v2336_v15 = vand.u32 2147483647, %v15568_v4  ;;  %15621 = vst [vmem:[#allocation476_spill] sm:$0xff] %v9975_v3  ;;  %v15622_v35 = vld [vmem:[#allocation382_spill] sm:$0xff]  ;;  %v2334_v25 = vadd.f32 1.0, %v2333_v56  ;;  %5080 = vlog2.f32 %v2384_v8 }
 0x2be   : > { %15619 = vst [vmem:[#allocation444_spill] sm:$0xff] %v9967_v12  ;;  %v2402_v46 = vadd.f32 1.0, %v15622_v35  ;;  %v9979_v28 = vmul.f32 0.6931472, %v5067_v36  ;;  %v15624_v43 = vld [vmem:[#allocation256_spill] sm:$0xff]  ;;  %v15626_v29 = vld [vmem:[#allocation453_spill] sm:$0xff]  ;;  %v5075_v36 = vpop.eup %5074 }
 0x2bf   : > { %v2420_v30 = vadd.f32 1.0, %v15624_v43  ;;  %v9990_v32 = vmul.f32 0.6931472, %v5069_v1  ;;  %v9992_v0 = vmul.f32 0.6931472, %v5071_v22  ;;  %v15630_v48 = vmov 0  ;;  %v5077_v12 = vpop.eup %5076 }
 0x2c0   : > { %15623 = vst [vmem:[#allocation382_spill] sm:$0xff] %v9979_v28  ;;  %vm9998_vm4 = vcmp.lt.f32.partialorder %v2336_v15, 0.0004427343  ;;  %v2369_v49 = vmul.f32 -0.5, %v15606_v34  ;;  %v15633_v40 = vld [vmem:[#allocation159_spill] sm:$0xff]  ;;  %v2352_v1 = vadd.f32 1.0, %v2351_v61  ;;  %5082 = vlog2.f32 %v2402_v46 }
 0x2c1   : > { %15627 = vst [vmem:[#allocation256_spill] sm:$0xff] %v9990_v32  ;;  %15628 = vst [vmem:[#allocation453_spill] sm:$0xff] %v9992_v0  ;;  %v15631_v48 = vsel %vm9998_vm4, 4294967295, %v15630_v48  ;;  %v2438_v57 = vadd.f32 1.0, %v15633_v40  ;;  %v10004_v26 = vmul.f32 0.6931472, %v5073_v7  ;;  %v10012_v15 = vmul.f32 %v15568_v4, %v2334_v25 }
 0x2c2   : > { %15632 = vst [vmem:[#allocation477_spill] sm:$0xff] %v15631_v48  ;;  %v2354_v22 = vand.u32 2147483647, %v15585_v5  ;;  %v2387_v8 = vmul.f32 -0.5, %v15611_v51  ;;  %5084 = vlog2.f32 %v2420_v30  ;;  %v10023_v61 = vmul.f32 0.6931472, %v5075_v36 }
 0x2c3   : > { %15634 = vst [vmem:[#allocation159_spill] sm:$0xff] %v10004_v26  ;;  %15635 = vst [vmem:[#allocation478_spill] sm:$0xff] %v10012_v15  ;;  %v15637_v17 = vld [vmem:[#allocation388_spill] sm:$0xff]  ;;  %v2370_v4 = vadd.f32 1.0, %v2369_v49  ;;  %v2372_v25 = vand.u32 2147483647, %v15606_v34  ;;  %5086 = vlog2.f32 %v2438_v57  ;;  %v10033_v32 = vmul.f32 %v15585_v5, %v2352_v1 }
 0x2c4   : > { %15636 = vst [vmem:[#allocation479_spill] sm:$0xff] %v10023_v61  ;;  %v2456_v28 = vadd.f32 1.0, %v15637_v17  ;;  %v2405_v30 = vmul.f32 -0.5, %v15622_v35  ;;  %vm10035_vm1 = vcmp.lt.f32.partialorder %v2354_v22, 0.0004427343  ;;  %v15639_v46 = vmov 0  ;;  %v5079_v49 = vpop.eup %5078 }
 0x2c5   : > { %15638 = vst [vmem:[#allocation388_spill] sm:$0xff] %v10033_v32  ;;  %v15640_v46 = vsel %vm10035_vm1, 4294967295, %v15639_v46  ;;  %v15642_v36 = vld [vmem:[#allocation389_spill] sm:$0xff]  ;;  %v10040_v59 = vmul.f32 0.6931472, %v5077_v12  ;;  %v2388_v62 = vadd.f32 1.0, %v2387_v8  ;;  %v10051_v3 = vmul.f32 %v15606_v34, %v2370_v4 }
 0x2c6   : > { %15641 = vst [vmem:[#allocation480_spill] sm:$0xff] %v15640_v46  ;;  %v2474_v0 = vadd.f32 1.0, %v15642_v36  ;;  %v2390_v57 = vand.u32 2147483647, %v15611_v51  ;;  %v2423_v50 = vmul.f32 -0.5, %v15624_v43  ;;  %5088 = vlog2.f32 %v2456_v28  ;;  %v15644_v22 = vld [vmem:[#allocation391_spill] sm:$0xff] }
 0x2c7   : > { %15643 = vst [vmem:[#allocation389_spill] sm:$0xff] %v10040_v59  ;;  %v2408_v1 = vand.u32 2147483647, %v15622_v35  ;;  %v2492_v7 = vadd.f32 1.0, %v15644_v22  ;;  %v5081_v26 = vpop.eup %5080  ;;  %15645 = vst [vmem:[#allocation391_spill] sm:$0xff] %v10051_v3  ;;  %v15646_v12 = vmov 0  ;;  %v10067_v4 = vmul.f32 %v15611_v51, %v2388_v62 }
 0x2c8   : > { %vm10053_vm0 = vcmp.lt.f32.partialorder %v2372_v25, 0.0004427343  ;;  %v2406_v8 = vadd.f32 1.0, %v2405_v30  ;;  %v2441_v16 = vmul.f32 -0.5, %v15633_v40  ;;  %v10058_v11 = vmul.f32 0.6931472, %v5079_v49 }
 0x2c9   : > { %v15647_v12 = vsel %vm10053_vm0, 4294967295, %v15646_v12  ;;  %v2426_v5 = vand.u32 2147483647, %v15624_v43  ;;  %5090 = vlog2.f32 %v2474_v0  ;;  %v15650_v61 = vld [vmem:[#allocation393_spill] sm:$0xff]  ;;  %vm10069_vm4 = vcmp.lt.f32.partialorder %v2390_v57, 0.0004427343 }
 0x2ca   : > { %15648 = vst [vmem:[#allocation481_spill] sm:$0xff] %v15647_v12  ;;  %15649 = vst [vmem:[#allocation482_spill] sm:$0xff] %v10058_v11  ;;  %v2510_v28 = vadd.f32 1.0, %v15650_v61  ;;  %v15652_v25 = vmov 0  ;;  %v2424_v30 = vadd.f32 1.0, %v2423_v50  ;;  %v5083_v49 = vpop.eup %5082  ;;  %v15656_v0 = vmov 0 }
 0x2cb   : > { %15651 = vst [vmem:[#allocation393_spill] sm:$0xff] %v10067_v4  ;;  %v15653_v25 = vsel %vm10069_vm4, 4294967295, %v15652_v25  ;;  %v10073_v15 = vmul.f32 0.6931472, %v5081_v26  ;;  %vm10075_vm12 = vcmp.lt.f32.partialorder %v2408_v1, 0.0004427343  ;;  %5092 = vlog2.f32 %v2492_v7 }
 0x2cc   : > { %15654 = vst [vmem:[#allocation483_spill] sm:$0xff] %v15653_v25  ;;  %v15657_v0 = vsel %vm10075_vm12, 4294967295, %v15656_v0  ;;  %v15659_v48 = vld [vmem:[#allocation268_spill] sm:$0xff]  ;;  %v5085_v46 = vpop.eup %5084  ;;  %v10081_v34 = vmul.f32 %v15622_v35, %v2406_v8  ;;  %v2442_v51 = vadd.f32 1.0, %v2441_v16  ;;  %v2444_v62 = vand.u32 2147483647, %v15633_v40 }
 0x2cd   : > { %15655 = vst [vmem:[#allocation484_spill] sm:$0xff] %v10073_v15  ;;  %15658 = vst [vmem:[#allocation485_spill] sm:$0xff] %v15657_v0  ;;  %v2528_v24 = vadd.f32 1.0, %v15659_v48  ;;  %v2459_v57 = vmul.f32 -0.5, %v15637_v17  ;;  %vm10089_vm1 = vcmp.lt.f32.partialorder %v2426_v5, 0.0004427343  ;;  %5094 = vlog2.f32 %v2510_v28  ;;  %v5087_v1 = vpop.eup %5086 }
 0x2ce   : > { %15660 = vst [vmem:[#allocation268_spill] sm:$0xff] %v10081_v34  ;;  %v15661_v26 = vmov 0  ;;  %v2477_v7 = vmul.f32 -0.5, %v15642_v36  ;;  %v10094_v35 = vmul.f32 0.6931472, %v5083_v49  ;;  %v10097_v16 = vmul.f32 %v15624_v43, %v2424_v30  ;;  %v15666_v59 = vld [vmem:[#allocation397_spill] sm:$0xff] }
 0x2cf   : > { %v15662_v26 = vsel %vm10089_vm1, 4294967295, %v15661_v26  ;;  %v2462_v8 = vand.u32 2147483647, %v15637_v17  ;;  %v2546_v32 = vadd.f32 1.0, %v15666_v59  ;;  %v10105_v50 = vmul.f32 0.6931472, %v5085_v46 }
 0x2d0   : > { %15663 = vst [vmem:[#allocation486_spill] sm:$0xff] %v15662_v26  ;;  %15664 = vst [vmem:[#allocation487_spill] sm:$0xff] %v10094_v35  ;;  %v2495_v11 = vmul.f32 -0.5, %v15644_v22  ;;  %5096 = vlog2.f32 %v2528_v24  ;;  %v10109_v28 = vmul.f32 %v15633_v40, %v2442_v51  ;;  %vm10111_vm0 = vcmp.lt.f32.partialorder %v2444_v62, 0.0004427343  ;;  %v5089_v3 = vpop.eup %5088  ;;  %v15673_v5 = vld [vmem:[#allocation400_spill] sm:$0xff] }
 0x2d1   : > { %15665 = vst [vmem:[#allocation488_spill] sm:$0xff] %v10097_v16  ;;  %15667 = vst [vmem:[#allocation397_spill] sm:$0xff] %v10105_v50  ;;  %v15669_v43 = vmov 0  ;;  %v2460_v30 = vadd.f32 1.0, %v2459_v57  ;;  %v2480_v49 = vand.u32 2147483647, %v15642_v36  ;;  %5098 = vlog2.f32 %v2546_v32 }
 0x2d2   : > { %15668 = vst [vmem:[#allocation489_spill] sm:$0xff] %v10109_v28  ;;  %v15670_v43 = vsel %vm10111_vm0, 4294967295, %v15669_v43  ;;  %v10116_v12 = vmul.f32 0.6931472, %v5087_v1  ;;  %v2478_v25 = vadd.f32 1.0, %v2477_v7  ;;  %v2513_v46 = vmul.f32 -0.5, %v15650_v61 }
 0x2d3   : > { %15671 = vst [vmem:[#allocation490_spill] sm:$0xff] %v15670_v43  ;;  %v2564_v15 = vadd.f32 1.0, %v15673_v5  ;;  %vm10124_vm4 = vcmp.lt.f32.partialorder %v2462_v8, 0.0004427343  ;;  %v15674_v40 = vmov 0  ;;  %v5091_v62 = vpop.eup %5090  ;;  %v2496_v7 = vadd.f32 1.0, %v2495_v11 }
 0x2d4   : > { %15672 = vst [vmem:[#allocation491_spill] sm:$0xff] %v10116_v12  ;;  %v15675_v40 = vsel %vm10124_vm4, 4294967295, %v15674_v40  ;;  %v2498_v51 = vand.u32 2147483647, %v15644_v22  ;;  %v2531_v1 = vmul.f32 -0.5, %v15659_v48  ;;  %v15677_v4 = vld [vmem:[#allocation402_spill] sm:$0xff]  ;;  %v10138_v8 = vmul.f32 %v15637_v17, %v2460_v30 }
 0x2d5   : > { %15676 = vst [vmem:[#allocation400_spill] sm:$0xff] %v15675_v40  ;;  %v2582_v63 = vadd.f32 1.0, %v15677_v4  ;;  %v10135_v0 = vmul.f32 0.6931472, %v5089_v3  ;;  %vm10140_vm12 = vcmp.lt.f32.partialorder %v2480_v49, 0.0004427343  ;;  %v5093_v35 = vpop.eup %5092  ;;  %v10150_v57 = vmul.f32 %v15642_v36, %v2478_v25 }
 0x2d6   : > { %15679 = vst [vmem:[#allocation492_spill] sm:$0xff] %v10138_v8  ;;  %v15680_v24 = vmov 0  ;;  %v2516_v32 = vand.u32 2147483647, %v15650_v61  ;;  %v2514_v3 = vadd.f32 1.0, %v2513_v46  ;;  %5100 = vlog2.f32 %v2564_v15  ;;  %v15688_v49 = vld [vmem:[#allocation277_spill] sm:$0xff] }
 0x2d7   : > { %15678 = vst [vmem:[#allocation402_spill] sm:$0xff] %v10135_v0  ;;  %v15681_v24 = vsel %vm10140_vm12, 4294967295, %v15680_v24  ;;  %15683 = vst [vmem:[#allocation494_spill] sm:$0xff] %v10150_v57  ;;  %v10152_v50 = vmul.f32 0.6931472, %v5091_v62  ;;  %v15685_v17 = vmov 0  ;;  %v5095_v26 = vpop.eup %5094  ;;  %v10161_v34 = vmul.f32 %v15644_v22, %v2496_v7 }
 0x2d8   : > { %15682 = vst [vmem:[#allocation493_spill] sm:$0xff] %v15681_v24  ;;  %vm10154_vm1 = vcmp.lt.f32.partialorder %v2498_v51, 0.0004427343  ;;  %v2549_v30 = vmul.f32 -0.5, %v15666_v59  ;;  %v2600_v16 = vadd.f32 1.0, %v15688_v49  ;;  %v2532_v11 = vadd.f32 1.0, %v2531_v1 }
 0x2d9   : > { %15684 = vst [vmem:[#allocation495_spill] sm:$0xff] %v10152_v50  ;;  %v15686_v17 = vsel %vm10154_vm1, 4294967295, %v15685_v17  ;;  %15689 = vst [vmem:[#allocation277_spill] sm:$0xff] %v10161_v34  ;;  %v2534_v36 = vand.u32 2147483647, %v15659_v48  ;;  %5102 = vlog2.f32 %v2582_v63  ;;  %v15691_v46 = vmov 0 }
 0x2da   : > { %15687 = vst [vmem:[#allocation496_spill] sm:$0xff] %v15686_v17  ;;  %v10168_v25 = vmul.f32 0.6931472, %v5093_v35  ;;  %vm10170_vm0 = vcmp.lt.f32.partialorder %v2516_v32, 0.0004427343  ;;  %v2567_v51 = vmul.f32 -0.5, %v15673_v5  ;;  %v5097_v62 = vpop.eup %5096  ;;  %v10176_v22 = vmul.f32 %v15650_v61, %v2514_v3 }
 0x2db   : > { %v15692_v46 = vsel %vm10170_vm0, 4294967295, %v15691_v46  ;;  %v2552_v7 = vand.u32 2147483647, %v15666_v59  ;;  %v2585_v63 = vmul.f32 -0.5, %v15677_v4  ;;  %v15695_v1 = vld [vmem:[#allocation406_spill] sm:$0xff]  ;;  %v2550_v15 = vadd.f32 1.0, %v2549_v30  ;;  %v5099_v28 = vpop.eup %5098 }
 0x2dc   : > { %15690 = vst [vmem:[#allocation497_spill] sm:$0xff] %v10168_v25  ;;  %15693 = vst [vmem:[#allocation498_spill] sm:$0xff] %v15692_v46  ;;  %v2618_v12 = vadd.f32 1.0, %v15695_v1  ;;  %v10185_v32 = vmul.f32 0.6931472, %v5095_v26  ;;  %5104 = vlog2.f32 %v2600_v16  ;;  %v10188_v0 = vmul.f32 %v15659_v48, %v2532_v11  ;;  %v15701_v8 = vld [vmem:[#allocation408_spill] sm:$0xff] }
 0x2dd   : > { %15694 = vst [vmem:[#allocation499_spill] sm:$0xff] %v10176_v22  ;;  %vm10190_vm4 = vcmp.lt.f32.partialorder %v2534_v36, 0.0004427343  ;;  %v15698_v61 = vmov 0  ;;  %v2570_v3 = vand.u32 2147483647, %v15673_v5  ;;  %v10213_v26 = vmul.f32 %v15666_v59, %v2550_v15 }
 0x2de   : > { %15696 = vst [vmem:[#allocation406_spill] sm:$0xff] %v10185_v32  ;;  %15697 = vst [vmem:[#allocation500_spill] sm:$0xff] %v10188_v0  ;;  %v15699_v61 = vsel %vm10190_vm4, 4294967295, %v15698_v61  ;;  %v2636_v40 = vadd.f32 1.0, %v15701_v8  ;;  %v10200_v35 = vmul.f32 0.6931472, %v5097_v62  ;;  %5106 = vlog2.f32 %v2618_v12 }
 0x2df   : > { %15700 = vst [vmem:[#allocation501_spill] sm:$0xff] %v15699_v61  ;;  %v2568_v16 = vadd.f32 1.0, %v2567_v51  ;;  %v2588_v48 = vand.u32 2147483647, %v15677_v4  ;;  %vm10203_vm12 = vcmp.lt.f32.partialorder %v2552_v7, 0.0004427343 }
 0x2e0   : > { %15702 = vst [vmem:[#allocation408_spill] sm:$0xff] %v10200_v35  ;;  %v15703_v11 = vmov 0  ;;  %v2586_v30 = vadd.f32 1.0, %v2585_v63  ;;  %v2603_v36 = vmul.f32 -0.5, %v15688_v49  ;;  %15706 = vst [vmem:[#allocation503_spill] sm:$0xff] %v10213_v26  ;;  %v2621_v51 = vmul.f32 -0.5, %v15695_v1  ;;  %v5101_v7 = vpop.eup %5100 }
 0x2e1   : > { %v15704_v11 = vsel %vm10203_vm12, 4294967295, %v15703_v11  ;;  %v15707_v62 = vld [vmem:[#allocation411_spill] sm:$0xff]  ;;  %v10217_v34 = vmul.f32 0.6931472, %v5099_v28  ;;  %vm10219_vm1 = vcmp.lt.f32.partialorder %v2570_v3, 0.0004427343  ;;  %5108 = vlog2.f32 %v2636_v40 }
 0x2e2   : > { %15705 = vst [vmem:[#allocation502_spill] sm:$0xff] %v15704_v11  ;;  %v2654_v25 = vadd.f32 1.0, %v15707_v62  ;;  %v15709_v63 = vmov 0  ;;  %v2606_v12 = vand.u32 2147483647, %v15688_v49  ;;  %v10229_v15 = vmul.f32 %v15673_v5, %v2568_v16  ;;  %v15716_v28 = vld [vmem:[#allocation414_spill] sm:$0xff] }
 0x2e3   : > { %15708 = vst [vmem:[#allocation411_spill] sm:$0xff] %v10217_v34  ;;  %v15710_v63 = vsel %vm10219_vm1, 4294967295, %v15709_v63  ;;  %vm10231_vm0 = vcmp.lt.f32.partialorder %v2588_v48, 0.0004427343  ;;  %v15713_v50 = vmov 0  ;;  %v2672_v3 = vadd.f32 1.0, %v15716_v28  ;;  %v5103_v32 = vpop.eup %5102 }
 0x2e4   : > { %15711 = vst [vmem:[#allocation504_spill] sm:$0xff] %v15710_v63  ;;  %15712 = vst [vmem:[#allocation505_spill] sm:$0xff] %v10229_v15  ;;  %v15714_v50 = vsel %vm10231_vm0, 4294967295, %v15713_v50  ;;  %v10237_v22 = vmul.f32 %v15677_v4, %v2586_v30  ;;  %v2604_v46 = vadd.f32 1.0, %v2603_v36  ;;  %v2639_v40 = vmul.f32 -0.5, %v15701_v8  ;;  %v15718_v17 = vld [vmem:[#allocation339_spill] sm:$0xff] }
 0x2e5   : > { %15715 = vst [vmem:[#allocation506_spill] sm:$0xff] %v15714_v50  ;;  %v2690_v57 = vadd.f32 1.0, %v15718_v17  ;;  %v10241_v61 = vmul.f32 0.6931472, %v5101_v7  ;;  %v2622_v59 = vadd.f32 1.0, %v2621_v51  ;;  %5110 = vlog2.f32 %v2654_v25  ;;  %v15723_v30 = vld [vmem:[#allocation417_spill] sm:$0xff] }
 0x2e6   : > { %15717 = vst [vmem:[#allocation414_spill] sm:$0xff] %v10237_v22  ;;  %v2624_v5 = vand.u32 2147483647, %v15695_v1  ;;  %vm10248_vm4 = vcmp.lt.f32.partialorder %v2606_v12, 0.0004427343  ;;  %v15720_v48 = vmov 0  ;;  %v5105_v35 = vpop.eup %5104  ;;  %5112 = vlog2.f32 %v2672_v3 }
 0x2e7   : > { %15719 = vst [vmem:[#allocation339_spill] sm:$0xff] %v10241_v61  ;;  %v15721_v48 = vsel %vm10248_vm4, 4294967295, %v15720_v48  ;;  %v2657_v4 = vmul.f32 -0.5, %v15707_v62  ;;  %v2708_v36 = vadd.f32 1.0, %v15723_v30  ;;  %v10254_v7 = vmul.f32 0.6931472, %v5103_v32 }
 0x2e8   : > { %15722 = vst [vmem:[#allocation507_spill] sm:$0xff] %v15721_v48  ;;  %v2642_v51 = vand.u32 2147483647, %v15701_v8  ;;  %v15725_v25 = vld [vmem:[#allocation418_spill] sm:$0xff]  ;;  %v10259_v24 = vmul.f32 %v15688_v49, %v2604_v46  ;;  %v2640_v16 = vadd.f32 1.0, %v2639_v40  ;;  %5114 = vlog2.f32 %v2690_v57  ;;  %v15727_v12 = vld [vmem:[#allocation420_spill] sm:$0xff]  ;;  %v5107_v49 = vpop.eup %5106 }
 0x2e9   : > { %15724 = vst [vmem:[#allocation417_spill] sm:$0xff] %v10254_v7  ;;  %v2726_v0 = vadd.f32 1.0, %v15725_v25  ;;  %v2744_v34 = vadd.f32 1.0, %v15727_v12  ;;  %v10267_v32 = vmul.f32 %v15695_v1, %v2622_v59  ;;  %vm10269_vm12 = vcmp.lt.f32.partialorder %v2624_v5, 0.0004427343  ;;  %v15732_v3 = vld [vmem:[#allocation422_spill] sm:$0xff] }
 0x2ea   : > { %15726 = vst [vmem:[#allocation418_spill] sm:$0xff] %v10259_v24  ;;  %v15729_v11 = vmov 0  ;;  %v2762_v43 = vadd.f32 1.0, %v15732_v3  ;;  %v10274_v46 = vmul.f32 0.6931472, %v5105_v35  ;;  %v2658_v57 = vadd.f32 1.0, %v2657_v4 }
 0x2eb   : > { %15728 = vst [vmem:[#allocation420_spill] sm:$0xff] %v10267_v32  ;;  %v15730_v11 = vsel %vm10269_vm12, 4294967295, %v15729_v11  ;;  %v2660_v40 = vand.u32 2147483647, %v15707_v62  ;;  %5116 = vlog2.f32 %v2708_v36  ;;  %vm10281_vm1 = vcmp.lt.f32.partialorder %v2642_v51, 0.0004427343  ;;  %v5109_v5 = vpop.eup %5108 }
 0x2ec   : > { %15731 = vst [vmem:[#allocation508_spill] sm:$0xff] %v15730_v11  ;;  %15733 = vst [vmem:[#allocation422_spill] sm:$0xff] %v10274_v46  ;;  %v15734_v1 = vmov 0  ;;  %v2675_v59 = vmul.f32 -0.5, %v15716_v28  ;;  %5118 = vlog2.f32 %v2726_v0  ;;  %v10287_v35 = vmul.f32 %v15701_v8, %v2640_v16  ;;  %v15738_v36 = vld [vmem:[#allocation423_spill] sm:$0xff]  ;;  %v15740_v51 = vld [vmem:[#allocation425_spill] sm:$0xff] }
 0x2ed   : > { %v15735_v1 = vsel %vm10281_vm1, 4294967295, %v15734_v1  ;;  %v2693_v4 = vmul.f32 -0.5, %v15718_v17  ;;  %5120 = vlog2.f32 %v2744_v34  ;;  %v2780_v61 = vadd.f32 1.0, %v15738_v36  ;;  %v15745_v34 = vld [vmem:[#allocation426_spill] sm:$0xff]  ;;  %v15875_v21 = vld [vmem:[#allocation184_spill] sm:$0xff] }
 0x2ee   : > { %15736 = vst [vmem:[#allocation509_spill] sm:$0xff] %v15735_v1  ;;  %15737 = vst [vmem:[#allocation510_spill] sm:$0xff] %v10287_v35  ;;  %v10291_v15 = vmul.f32 0.6931472, %v5107_v49  ;;  %v2678_v26 = vand.u32 2147483647, %v15716_v28  ;;  %5122 = vlog2.f32 %v2762_v43  ;;  %v10300_v8 = vmul.f32 %v15707_v62, %v2658_v57 }
 0x2ef   : > { %v2798_v7 = vadd.f32 1.0, %v15740_v51  ;;  %vm10302_vm0 = vcmp.lt.f32.partialorder %v2660_v40, 0.0004427343  ;;  %v15742_v16 = vmov 0  ;;  %v2816_v49 = vadd.f32 1.0, %v15745_v34  ;;  %v5111_v22 = vpop.eup %5110 }
 0x2f0   : > { %15739 = vst [vmem:[#allocation423_spill] sm:$0xff] %v10291_v15  ;;  %15741 = vst [vmem:[#allocation425_spill] sm:$0xff] %v10300_v8  ;;  %v15743_v16 = vsel %vm10302_vm0, 4294967295, %v15742_v16  ;;  %v10307_v50 = vmul.f32 0.6931472, %v5109_v5  ;;  %v2676_v43 = vadd.f32 1.0, %v2675_v59  ;;  %5124 = vlog2.f32 %v2780_v61  ;;  %v5113_v57 = vpop.eup %5112 }
 0x2f1   : > { %15744 = vst [vmem:[#allocation511_spill] sm:$0xff] %v15743_v16  ;;  %v2696_v63 = vand.u32 2147483647, %v15718_v17  ;;  %v2711_v56 = vmul.f32 -0.5, %v15723_v30  ;;  %v2694_v53 = vadd.f32 1.0, %v2693_v4  ;;  %v2729_v62 = vmul.f32 -0.5, %v15725_v25 }
 0x2f2   : > { %15746 = vst [vmem:[#allocation426_spill] sm:$0xff] %v10307_v50  ;;  %v2714_v0 = vand.u32 2147483647, %v15723_v30  ;;  %vm10317_vm4 = vcmp.lt.f32.partialorder %v2678_v26, 0.0004427343  ;;  %v15747_v5 = vmov 0  ;;  %5126 = vlog2.f32 %v2798_v7  ;;  %v5115_v46 = vpop.eup %5114 }
 0x2f3   : > { %v15748_v5 = vsel %vm10317_vm4, 4294967295, %v15747_v5  ;;  %v2747_v59 = vmul.f32 -0.5, %v15727_v12  ;;  %v10322_v4 = vmul.f32 0.6931472, %v5111_v22  ;;  %v2732_v24 = vand.u32 2147483647, %v15725_v25 }
 0x2f4   : > { %15749 = vst [vmem:[#allocation512_spill] sm:$0xff] %v15748_v5  ;;  %v2765_v61 = vmul.f32 -0.5, %v15732_v3  ;;  %5128 = vlog2.f32 %v2816_v49  ;;  %v10331_v26 = vmul.f32 %v15716_v28, %v2676_v43  ;;  %vm10333_vm12 = vcmp.lt.f32.partialorder %v2696_v63, 0.0004427343 }
 0x2f5   : > { %15750 = vst [vmem:[#allocation513_spill] sm:$0xff] %v10322_v4  ;;  %v15752_v15 = vmov 0  ;;  %v2712_v7 = vadd.f32 1.0, %v2711_v56  ;;  %v5117_v22 = vpop.eup %5116  ;;  %v10338_v32 = vmul.f32 %v15718_v17, %v2694_v53  ;;  %vm10340_vm8 = vcmp.lt.f32.partialorder %v2714_v0, 0.0004427343 }
 0x2f6   : > { %15751 = vst [vmem:[#allocation514_spill] sm:$0xff] %v10331_v26  ;;  %v15753_v15 = vsel %vm10333_vm12, 4294967295, %v15752_v15  ;;  %v15756_v11 = vmov 0  ;;  %v2730_v49 = vadd.f32 1.0, %v2729_v62  ;;  %v2783_v1 = vmul.f32 -0.5, %v15738_v36  ;;  %v5119_v40 = vpop.eup %5118 }
 0x2f7   : > { %15754 = vst [vmem:[#allocation515_spill] sm:$0xff] %v15753_v15  ;;  %15755 = vst [vmem:[#allocation516_spill] sm:$0xff] %v10338_v32  ;;  %v15757_v11 = vsel %vm10340_vm8, 4294967295, %v15756_v11  ;;  %v10345_v50 = vmul.f32 0.6931472, %v5113_v57  ;;  %v2748_v63 = vadd.f32 1.0, %v2747_v59  ;;  %v5121_v56 = vpop.eup %5120 }
 0x2f8   : > { %15758 = vst [vmem:[#allocation517_spill] sm:$0xff] %v15757_v11  ;;  %v10347_v28 = vmul.f32 0.6931472, %v5115_v46  ;;  %v2801_v43 = vmul.f32 -0.5, %v15740_v51  ;;  %vm10354_vm1 = vcmp.lt.f32.partialorder %v2732_v24, 0.0004427343  ;;  %v5123_v57 = vpop.eup %5122  ;;  %v10362_v46 = vmul.f32 %v15723_v30, %v2712_v7 }
 0x2f9   : > { %15759 = vst [vmem:[#allocation518_spill] sm:$0xff] %v10345_v50  ;;  %v15761_v17 = vmov 0  ;;  %v2750_v0 = vand.u32 2147483647, %v15727_v12  ;;  %v2766_v62 = vadd.f32 1.0, %v2765_v61  ;;  %v2819_v48 = vmul.f32 -0.5, %v15745_v34 }
 0x2fa   : > { %15760 = vst [vmem:[#allocation519_spill] sm:$0xff] %v10347_v28  ;;  %v15762_v17 = vsel %vm10354_vm1, 4294967295, %v15761_v17  ;;  %v10359_v35 = vmul.f32 0.6931472, %v5117_v22  ;;  %15765 = vst [vmem:[#allocation522_spill] sm:$0xff] %v10362_v46  ;;  %v10369_v24 = vmul.f32 %v15725_v25, %v2730_v49  ;;  %v2784_v53 = vadd.f32 1.0, %v2783_v1  ;;  %v5125_v7 = vpop.eup %5124 }
 0x2fb   : > { %15763 = vst [vmem:[#allocation520_spill] sm:$0xff] %v15762_v17  ;;  %v2768_v59 = vand.u32 2147483647, %v15732_v3  ;;  %v10366_v54 = vmul.f32 0.6931472, %v5119_v40  ;;  %v10375_v61 = vmul.f32 %v15727_v12, %v2748_v63  ;;  %v2802_v22 = vadd.f32 1.0, %v2801_v43 }
 0x2fc   : > { %15764 = vst [vmem:[#allocation521_spill] sm:$0xff] %v10359_v35  ;;  %15767 = vst [vmem:[#allocation524_spill] sm:$0xff] %v10369_v24  ;;  %v2786_v4 = vand.u32 2147483647, %v15738_v36  ;;  %v10372_v8 = vmul.f32 0.6931472, %v5121_v56  ;;  %v10385_v25 = vmul.f32 %v15732_v3, %v2766_v62  ;;  %v5127_v49 = vpop.eup %5126 }
 0x2fd   : > { %15766 = vst [vmem:[#allocation523_spill] sm:$0xff] %v10366_v54  ;;  %15769 = vst [vmem:[#allocation526_spill] sm:$0xff] %v10375_v61  ;;  %v2804_v30 = vand.u32 2147483647, %v15740_v51  ;;  %vm10378_vm0 = vcmp.lt.f32.partialorder %v2750_v0, 0.0004427343  ;;  %v10422_v0 = vmul.f32 %v15740_v51, %v2802_v22 }
 0x2fe   : > { %15768 = vst [vmem:[#allocation525_spill] sm:$0xff] %v10372_v8  ;;  %v15770_v16 = vmov 0  ;;  %v10382_v40 = vmul.f32 0.6931472, %v5123_v57  ;;  %15774 = vst [vmem:[#allocation529_spill] sm:$0xff] %v10385_v25  ;;  %v15775_v43 = vmov 0  ;;  %v5129_v3 = vpop.eup %5128  ;;  %v10409_v57 = vmul.f32 %v15738_v36, %v2784_v53 }
 0x2ff   : > { %v15771_v16 = vsel %vm10378_vm0, 4294967295, %v15770_v16  ;;  %v2822_v1 = vand.u32 2147483647, %v15745_v34  ;;  %vm10396_vm6 = vcmp.lt.f32.partialorder %v2768_v59, 0.0004427343  ;;  %v2820_v56 = vadd.f32 1.0, %v2819_v48 }
 0x300   : > { %15772 = vst [vmem:[#allocation527_spill] sm:$0xff] %v15771_v16  ;;  %15773 = vst [vmem:[#allocation528_spill] sm:$0xff] %v10382_v40  ;;  %v15776_v43 = vsel %vm10396_vm6, 4294967295, %v15775_v43  ;;  %vm10411_vm12 = vcmp.lt.f32.partialorder %v2786_v4, 0.0004427343  ;;  %v15786_v62 = vld [vmem:[#allocation301_spill] sm:$0xff] }
 0x301   : > { %15777 = vst [vmem:[#allocation530_spill] sm:$0xff] %v15776_v43  ;;  %v10419_v63 = vmul.f32 0.6931472, %v5125_v7  ;;  %vm10424_vm8 = vcmp.lt.f32.partialorder %v2804_v30, 0.0004427343  ;;  %v15784_v7 = vld [vmem:[#allocation8_spill] sm:$0xff]  ;;  %vm15787_vm0 = vnez %v15786_v62  ;;  %v2821_v43 = vmul.f32 %v15745_v34, %v2820_v56 }
 0x302   : > { %v10432_v4 = vmul.f32 0.6931472, %v5127_v49  ;;  %vm10434_vm1 = vcmp.lt.f32.partialorder %v2822_v1, 0.0004427343  ;;  %v15785_v48 = vmax.f32 %v15784_v7, 0.0  ;;  %v15788_v51 = vld [vmem:[#allocation342_spill] sm:$0xff] }
 0x303   : > { %v15789_v22 = vld [vmem:[#allocation446_spill] sm:$0xff]  ;;  %v10447_v61 = vmul.f32 0.6931472, %v5129_v3  ;;  %v15792_v36 = vld [vmem:[#allocation9_spill] sm:$0xff]  ;;  %v15794_v40 = vld [vmem:[#allocation191_spill] sm:$0xff] }
 0x304   : > { %v15790_v30 = vsel %vm15787_vm0, %v15788_v51, %v15789_v22  ;;  %v15793_v49 = vmax.f32 %v15792_v36, 0.0  ;;  %vm15795_vm6 = vnez %v15794_v40  ;;  %v15796_v1 = vld [vmem:[#allocation343_spill] sm:$0xff]  ;;  %v15797_v25 = vld [vmem:[#allocation448_spill] sm:$0xff]  ;;  %v15799_v7 = vld [vmem:[#allocation10_spill] sm:$0xff] }
 0x305   : > { %v10445_v8 = vadd.f32 %v15790_v30, %v15785_v48  ;;  %v15798_v16 = vsel %vm15795_vm6, %v15796_v1, %v15797_v25  ;;  %v15800_v24 = vmax.f32 %v15799_v7, 0.0  ;;  %v15801_v62 = vld [vmem:[#allocation303_spill] sm:$0xff]  ;;  %v15803_v17 = vld [vmem:[#allocation346_spill] sm:$0xff]  ;;  %v15804_v51 = vld [vmem:[#allocation449_spill] sm:$0xff] }
 0x306   : > { %v2826_v54 = vadd.f32 %v15798_v16, %v15793_v49  ;;  %vm15802_vm4 = vnez %v15801_v62  ;;  %v15806_v3 = vld [vmem:[#allocation11_spill] sm:$0xff]  ;;  %v15810_v34 = vld [vmem:[#allocation348_spill] sm:$0xff]  ;;  %v15811_v56 = vld [vmem:[#allocation450_spill] sm:$0xff] }
 0x307   : > { %15791 = vst [vmem:[#allocation8_spill] sm:$0xff] %v10445_v8  ;;  %v15805_v48 = vsel %vm15802_vm4, %v15803_v17, %v15804_v51  ;;  %v15807_v30 = vmax.f32 %v15806_v3, 0.0  ;;  %v15808_v8 = vld [vmem:[#allocation304_spill] sm:$0xff]  ;;  %v15813_v35 = vld [vmem:[#allocation131_spill] sm:$0xff]  ;;  %v15817_v16 = vld [vmem:[#allocation350_spill] sm:$0xff] }
 0x308   : > { %v2827_v22 = vadd.f32 %v15805_v48, %v15800_v24  ;;  %vm15809_vm0 = vnez %v15808_v8  ;;  %v15814_v46 = vmax.f32 %v15813_v35, 0.0  ;;  %v15815_v25 = vld [vmem:[#allocation192_spill] sm:$0xff]  ;;  %v15822_v17 = vld [vmem:[#allocation306_spill] sm:$0xff]  ;;  %v15824_v24 = vld [vmem:[#allocation353_spill] sm:$0xff] }
 0x309   : > { %v15812_v36 = vsel %vm15809_vm0, %v15810_v34, %v15811_v56  ;;  %vm15816_vm6 = vnez %v15815_v25  ;;  %v15818_v49 = vld [vmem:[#allocation356_spill] sm:$0xff]  ;;  %vm15823_vm4 = vnez %v15822_v17  ;;  %v15825_v51 = vld [vmem:[#allocation454_spill] sm:$0xff]  ;;  %v15829_v34 = vld [vmem:[#allocation307_spill] sm:$0xff] }
 0x30a   : > { %v2828_v40 = vadd.f32 %v15812_v36, %v15807_v30  ;;  %v15819_v1 = vsel %vm15816_vm6, %v15817_v16, %v15818_v49  ;;  %v15820_v62 = vld [vmem:[#allocation132_spill] sm:$0xff]  ;;  %v15826_v48 = vsel %vm15823_vm4, %v15824_v24, %v15825_v51  ;;  %v15827_v3 = vld [vmem:[#allocation134_spill] sm:$0xff]  ;;  %vm15830_vm0 = vnez %v15829_v34  ;;  %v15832_v35 = vld [vmem:[#allocation455_spill] sm:$0xff] }
 0x30b   : > { %v2829_v7 = vadd.f32 %v15819_v1, %v15814_v46  ;;  %v15821_v11 = vmax.f32 %v15820_v62, 0.0  ;;  %v15828_v28 = vmax.f32 %v15827_v3, 0.0  ;;  %v15831_v30 = vld [vmem:[#allocation354_spill] sm:$0xff]  ;;  %v2788_v46 = vsel %vm10411_vm12, %v10409_v57, %v10419_v63  ;;  %v15834_v25 = vld [vmem:[#allocation135_spill] sm:$0xff]  ;;  %v15836_v49 = vld [vmem:[#allocation445_spill] sm:$0xff] }
 0x30c   : > { %v15833_v56 = vsel %vm15830_vm0, %v15831_v30, %v15832_v35  ;;  %v15835_v16 = vmax.f32 %v15834_v25, 0.0  ;;  %vm15837_vm6 = vnez %v15836_v49  ;;  %v15838_v1 = vld [vmem:[#allocation312_spill] sm:$0xff]  ;;  %v15839_v62 = vld [vmem:[#allocation399_spill] sm:$0xff]  ;;  %v15841_v24 = vld [vmem:[#allocation137_spill] sm:$0xff]  ;;  %vm15861_vm0 = vnez %v15305_v10 }
 0x30d   : > { %v2830_v8 = vadd.f32 %v15826_v48, %v15821_v11  ;;  %v2831_v36 = vadd.f32 %v15833_v56, %v15828_v28  ;;  %v15840_v11 = vsel %vm15837_vm6, %v15838_v1, %v15839_v62  ;;  %v15842_v51 = vmax.f32 %v15841_v24, 0.0  ;;  %v15843_v48 = vld [vmem:[#allocation309_spill] sm:$0xff]  ;;  %v15848_v35 = vld [vmem:[#allocation138_spill] sm:$0xff]  ;;  %v15852_v63 = vld [vmem:[#allocation359_spill] sm:$0xff] }
 0x30e   : > { %v2832_v17 = vadd.f32 %v15840_v11, %v15835_v16  ;;  %vm15844_vm4 = vnez %v15843_v48  ;;  %v15845_v3 = vld [vmem:[#allocation357_spill] sm:$0xff]  ;;  %v15849_v56 = vmax.f32 %v15848_v35, 0.0  ;;  %v15850_v59 = vld [vmem:[#allocation310_spill] sm:$0xff]  ;;  %v2806_v16 = vsel %vm10424_vm8, %v10422_v0, %v10432_v4  ;;  %v15855_v1 = vld [vmem:[#allocation140_spill] sm:$0xff] }
 0x30f   : > { %v15846_v34 = vld [vmem:[#allocation93_spill] sm:$0xff]  ;;  %vm15851_vm12 = vnez %v15850_v59  ;;  %v15853_v57 = vld [vmem:[#allocation458_spill] sm:$0xff]  ;;  %v15856_v62 = vmax.f32 %v15855_v1, 0.0  ;;  %v15857_v11 = vsel %vm9272_vm10, %v15401_v37, %v9410_v58  ;;  %v2824_v58 = vsel %vm10434_vm1, %v2821_v43, %v10447_v61  ;;  %v15868_v37 = vld [vmem:[#allocation180_spill] sm:$0xff] }
 0x310   : > { %v15847_v28 = vsel %vm15844_vm4, %v15845_v3, %v15846_v34  ;;  %v15854_v25 = vsel %vm15851_vm12, %v15852_v63, %v15853_v57  ;;  %v15862_v3 = vld [vmem:[#allocation404_spill] sm:$0xff]  ;;  %v15865_v12 = vld [vmem:[#allocation178_spill] sm:$0xff]  ;;  %v15869_v35 = vmax.f32 %v15868_v37, 0.0  ;;  %v15870_v10 = vsel %vm9709_vm7, %v15579_v39, %v9828_v38 }
 0x311   : > { %v2833_v30 = vadd.f32 %v15847_v28, %v15842_v51  ;;  %v2834_v49 = vadd.f32 %v15854_v25, %v15849_v56  ;;  %v10528_v24 = vadd.f32 %v15857_v11, %v15856_v62  ;;  %v15859_v51 = vld [vmem:[#allocation141_spill] sm:$0xff]  ;;  %v15863_v34 = vsel %vm15861_vm0, %v15402_v41, %v15862_v3  ;;  %v15871_v56 = vld [vmem:[#allocation182_spill] sm:$0xff]  ;;  %v15883_v39 = vld [vmem:[#allocation12_spill] sm:$0xff] }
 0x312   : > { %v15860_v48 = vmax.f32 %v15859_v51, 0.0  ;;  %v15866_v0 = vmax.f32 %v15865_v12, 0.0  ;;  %v2862_v41 = vadd.f32 %v15870_v10, %v15869_v35  ;;  %v15872_v59 = vmax.f32 %v15871_v56, 0.0  ;;  %v15879_v43 = vld [vmem:[#allocation186_spill] sm:$0xff]  ;;  %v15893_v51 = vld [vmem:[#allocation16_spill] sm:$0xff] }
 0x313   : > { %15858 = vst [vmem:[#allocation301_spill] sm:$0xff] %v10528_v24  ;;  %vm15873_vm8 = vnez %v15510_v13  ;;  %v15876_v63 = vmax.f32 %v15875_v21, 0.0  ;;  %vm15877_vm1 = vnez %v15516_v33  ;;  %v15880_v53 = vmax.f32 %v15879_v43, 0.0  ;;  %v15888_v1 = vld [vmem:[#allocation14_spill] sm:$0xff]  ;;  %v15904_v10 = vld [vmem:[#allocation20_spill] sm:$0xff] }
 0x314   : > { %v10537_v28 = vadd.f32 %v15863_v34, %v15860_v48  ;;  %v2860_v4 = vadd.f32 %v15867_v19, %v15866_v0  ;;  %v15874_v31 = vsel %vm15873_vm8, %v15586_v14, %v9840_v27  ;;  %v15878_v61 = vsel %vm15877_vm1, %v15589_v44, %v9857_v42  ;;  %v15885_v27 = vld [vmem:[#allocation432_spill] sm:$0xff]  ;;  %v15886_v14 = vld [vmem:[#allocation351_spill] sm:$0xff]  ;;  %v15891_v44 = vld [vmem:[#allocation289_spill] sm:$0xff] }
 0x315   : > { %v2864_v55 = vadd.f32 %v15874_v31, %v15872_v59  ;;  %v2866_v60 = vadd.f32 %v15878_v61, %v15876_v63  ;;  %v15882_v38 = vsel %vm15881_vm5, %v15590_v2, %v9859_v20  ;;  %v15884_v57 = vmax.f32 %v15883_v39, 0.0  ;;  %v15896_v2 = vld [vmem:[#allocation372_spill] sm:$0xff]  ;;  %v15898_v3 = vld [vmem:[#allocation18_spill] sm:$0xff]  ;;  %v15902_v19 = vld [vmem:[#allocation419_spill] sm:$0xff] }
 0x316   : > { %15864 = vst [vmem:[#allocation342_spill] sm:$0xff] %v10537_v28  ;;  %v2868_v13 = vadd.f32 %v15882_v38, %v15880_v53  ;;  %v15887_v25 = vsel %vm9761_vm13, %v15885_v27, %v15886_v14  ;;  %v15889_v62 = vmax.f32 %v15888_v1, 0.0  ;;  %v15892_v11 = vsel %vm9777_vm14, %v15607_v52, %v15891_v44  ;;  %v15901_v0 = vld [vmem:[#allocation442_spill] sm:$0xff]  ;;  %v15907_v59 = vld [vmem:[#allocation443_spill] sm:$0xff]  ;;  %v15908_v31 = vld [vmem:[#allocation424_spill] sm:$0xff] }
 0x317   : > { %v2870_v33 = vadd.f32 %v15887_v25, %v15884_v57  ;;  %v15894_v48 = vmax.f32 %v15893_v51, 0.0  ;;  %vm15895_vm7 = vnez %v15542_v47  ;;  %v15899_v34 = vmax.f32 %v15898_v3, 0.0  ;;  %v15910_v63 = vld [vmem:[#allocation91_spill] sm:$0xff]  ;;  %v15913_v43 = vld [vmem:[#allocation472_spill] sm:$0xff]  ;;  %v15915_v39 = vld [vmem:[#allocation205_spill] sm:$0xff] }
 0x318   : > { %v2872_v45 = vadd.f32 %v15892_v11, %v15889_v62  ;;  %v15897_v20 = vsel %vm15895_vm7, %v15609_v9, %v15896_v2  ;;  %v15903_v37 = vsel %vm9800_vm9, %v15901_v0, %v15902_v19  ;;  %v15905_v56 = vmax.f32 %v15904_v10, 0.0  ;;  %v15917_v27 = vld [vmem:[#allocation347_spill] sm:$0xff]  ;;  %v15920_v25 = vld [vmem:[#allocation376_spill] sm:$0xff]  ;;  %v15934_v10 = vld [vmem:[#allocation337_spill] sm:$0xff] }
 0x319   : > { %v2874_v23 = vadd.f32 %v15897_v20, %v15894_v48  ;;  %v2876_v35 = vadd.f32 %v15903_v37, %v15899_v34  ;;  %v15909_v21 = vsel %vm9809_vm15, %v15907_v59, %v15908_v31  ;;  %v15911_v61 = vmax.f32 %v15910_v63, 0.0  ;;  %v15919_v14 = vld [vmem:[#allocation447_spill] sm:$0xff]  ;;  %v15927_v20 = vld [vmem:[#allocation121_spill] sm:$0xff]  ;;  %v15930_v34 = vld [vmem:[#allocation440_spill] sm:$0xff] }
 0x31a   : > { %v2878_v47 = vadd.f32 %v15909_v21, %v15905_v56  ;;  %v15914_v53 = vsel %vm9832_vm11, %v15618_v6, %v15913_v43  ;;  %v15916_v57 = vmax.f32 %v15915_v39, 0.0  ;;  %vm15918_vm9 = vnez %v15917_v27  ;;  %v15922_v42 = vld [vmem:[#allocation215_spill] sm:$0xff]  ;;  %v15936_v56 = vld [vmem:[#allocation460_spill] sm:$0xff]  ;;  %v15939_v31 = vld [vmem:[#allocation225_spill] sm:$0xff] }
 0x31b   : > { %v2880_v38 = vadd.f32 %v15914_v53, %v15911_v61  ;;  %v15921_v1 = vsel %vm15918_vm9, %v15919_v14, %v15920_v25  ;;  %v15923_v44 = vmax.f32 %v15922_v42, 0.0  ;;  %v15924_v11 = vld [vmem:[#allocation451_spill] sm:$0xff]  ;;  %v15928_v3 = vmax.f32 %v15927_v20, 0.0  ;;  %v15937_v52 = vld [vmem:[#allocation444_spill] sm:$0xff]  ;;  %v15943_v61 = vld [vmem:[#allocation429_spill] sm:$0xff] }
 0x31c   : > { %v2882_v62 = vadd.f32 %v15921_v1, %v15916_v57  ;;  %v15925_v51 = vld [vmem:[#allocation435_spill] sm:$0xff]  ;;  %v15931_v12 = vsel %vm9871_vm2, %v15626_v29, %v15930_v34  ;;  %vm15935_vm10 = vnez %v15934_v10  ;;  %v15940_v21 = vmax.f32 %v15939_v31, 0.0  ;;  %v15941_v63 = vld [vmem:[#allocation428_spill] sm:$0xff]  ;;  %v15944_v9 = vld [vmem:[#allocation382_spill] sm:$0xff] }
 0x31d   : > { %v15926_v48 = vsel %vm9865_vm3, %v15924_v11, %v15925_v51  ;;  %v2886_v0 = vadd.f32 %v15931_v12, %v15928_v3  ;;  %v15932_v19 = vld [vmem:[#allocation223_spill] sm:$0xff]  ;;  %v15938_v59 = vsel %vm15935_vm10, %v15936_v56, %v15937_v52  ;;  %vm15942_vm3 = vnez %v15941_v63  ;;  %v15948_v29 = vld [vmem:[#allocation473_spill] sm:$0xff]  ;;  %v15951_v14 = vld [vmem:[#allocation256_spill] sm:$0xff] }
 0x31e   : > { %v2884_v2 = vadd.f32 %v15926_v48, %v15923_v44  ;;  %v15933_v37 = vmax.f32 %v15932_v19, 0.0  ;;  %v15945_v43 = vsel %vm15942_vm3, %v15943_v61, %v15944_v9  ;;  %v15946_v39 = vld [vmem:[#allocation227_spill] sm:$0xff]  ;;  %vm15949_vm2 = vnez %v15948_v29  ;;  %v15953_v42 = vld [vmem:[#allocation229_spill] sm:$0xff]  ;;  %v15957_v51 = vld [vmem:[#allocation474_spill] sm:$0xff] }
 0x31f   : > { %v2890_v53 = vadd.f32 %v15945_v43, %v15940_v21  ;;  %v15947_v57 = vmax.f32 %v15946_v39, 0.0  ;;  %v15950_v27 = vld [vmem:[#allocation471_spill] sm:$0xff]  ;;  %v15954_v44 = vmax.f32 %v15953_v42, 0.0  ;;  %v15958_v48 = vld [vmem:[#allocation453_spill] sm:$0xff]  ;;  %v15964_v19 = vld [vmem:[#allocation476_spill] sm:$0xff] }
 0x320   : > { %v2888_v18 = vadd.f32 %v15938_v59, %v15933_v37  ;;  %v15952_v25 = vsel %vm15949_vm2, %v15950_v27, %v15951_v14  ;;  %v15955_v11 = vld [vmem:[#allocation475_spill] sm:$0xff]  ;;  %v15967_v52 = vld [vmem:[#allocation233_spill] sm:$0xff]  ;;  %v15971_v21 = vld [vmem:[#allocation478_spill] sm:$0xff] }
 0x321   : > { %v2892_v1 = vadd.f32 %v15952_v25, %v15947_v57  ;;  %vm15956_vm11 = vnez %v15955_v11  ;;  %v15960_v6 = vld [vmem:[#allocation231_spill] sm:$0xff]  ;;  %v15968_v59 = vmax.f32 %v15967_v52, 0.0  ;;  %v15969_v31 = vld [vmem:[#allocation477_spill] sm:$0xff]  ;;  %v15976_v57 = vld [vmem:[#allocation480_spill] sm:$0xff] }
 0x322   : > { %v15959_v20 = vsel %vm15956_vm11, %v15957_v51, %v15958_v48  ;;  %v15961_v34 = vmax.f32 %v15960_v6, 0.0  ;;  %v15962_v12 = vld [vmem:[#allocation379_spill] sm:$0xff]  ;;  %vm15970_vm14 = vnez %v15969_v31  ;;  %vm15977_vm15 = vnez %v15976_v57  ;;  %v15978_v29 = vld [vmem:[#allocation388_spill] sm:$0xff]  ;;  %v15979_v27 = vld [vmem:[#allocation389_spill] sm:$0xff] }
 0x323   : > { %v2894_v3 = vadd.f32 %v15959_v20, %v15954_v44  ;;  %vm15963_vm13 = vnez %v15962_v12  ;;  %v15965_v37 = vld [vmem:[#allocation159_spill] sm:$0xff]  ;;  %v15980_v14 = vsel %vm15977_vm15, %v15978_v29, %v15979_v27  ;;  %v15981_v42 = vld [vmem:[#allocation237_spill] sm:$0xff]  ;;  %v15986_v48 = vld [vmem:[#allocation482_spill] sm:$0xff] }
 0x324   : > { %v15966_v10 = vsel %vm15963_vm13, %v15964_v19, %v15965_v37  ;;  %v15972_v63 = vld [vmem:[#allocation479_spill] sm:$0xff]  ;;  %v15982_v44 = vmax.f32 %v15981_v42, 0.0  ;;  %v15983_v11 = vld [vmem:[#allocation481_spill] sm:$0xff]  ;;  %v15995_v31 = vld [vmem:[#allocation24_spill] sm:$0xff] }
 0x325   : > { %v2896_v56 = vadd.f32 %v15966_v10, %v15961_v34  ;;  %v15973_v61 = vsel %vm15970_vm14, %v15971_v21, %v15972_v63  ;;  %v15974_v43 = vld [vmem:[#allocation235_spill] sm:$0xff]  ;;  %vm15984_vm6 = vnez %v15983_v11  ;;  %v15992_v37 = vld [vmem:[#allocation393_spill] sm:$0xff]  ;;  %v15993_v10 = vld [vmem:[#allocation484_spill] sm:$0xff]  ;;  %v15996_v21 = vmax.f32 %v15995_v31, 0.0 }
 0x326   : > { %v2898_v9 = vadd.f32 %v15973_v61, %v15968_v59  ;;  %v15975_v39 = vmax.f32 %v15974_v43, 0.0  ;;  %v15985_v51 = vld [vmem:[#allocation391_spill] sm:$0xff]  ;;  %v15997_v63 = vld [vmem:[#allocation485_spill] sm:$0xff]  ;;  %v15999_v61 = vld [vmem:[#allocation268_spill] sm:$0xff] }
 0x327   : > { %v15987_v20 = vsel %vm15984_vm6, %v15985_v51, %v15986_v48  ;;  %v15988_v34 = vld [vmem:[#allocation23_spill] sm:$0xff]  ;;  %vm15998_vm12 = vnez %v15997_v63  ;;  %v16006_v42 = vld [vmem:[#allocation488_spill] sm:$0xff]  ;;  %v16009_v48 = vld [vmem:[#allocation245_spill] sm:$0xff] }
 0x328   : > { %v2900_v25 = vadd.f32 %v15980_v14, %v15975_v39  ;;  %v2902_v6 = vadd.f32 %v15987_v20, %v15982_v44  ;;  %v15989_v12 = vmax.f32 %v15988_v34, 0.0  ;;  %v15990_v19 = vld [vmem:[#allocation483_spill] sm:$0xff]  ;;  %v16004_v14 = vld [vmem:[#allocation486_spill] sm:$0xff]  ;;  %v16007_v44 = vld [vmem:[#allocation397_spill] sm:$0xff]  ;;  %v16010_v20 = vmax.f32 %v16009_v48, 0.0 }
 0x329   : > { %vm15991_vm4 = vnez %v15990_v19  ;;  %v16000_v43 = vld [vmem:[#allocation487_spill] sm:$0xff]  ;;  %vm16005_vm0 = vnez %v16004_v14  ;;  %v16011_v34 = vld [vmem:[#allocation490_spill] sm:$0xff]  ;;  %v16018_v63 = vld [vmem:[#allocation400_spill] sm:$0xff] }
 0x32a   : > { %v15994_v52 = vsel %vm15991_vm4, %v15992_v37, %v15993_v10  ;;  %v16001_v39 = vsel %vm15998_vm12, %v15999_v61, %v16000_v43  ;;  %v16002_v29 = vld [vmem:[#allocation243_spill] sm:$0xff]  ;;  %v16008_v11 = vsel %vm16005_vm0, %v16006_v42, %v16007_v44  ;;  %vm16012_vm8 = vnez %v16011_v34  ;;  %v16021_v61 = vld [vmem:[#allocation402_spill] sm:$0xff]  ;;  %v16025_v42 = vld [vmem:[#allocation493_spill] sm:$0xff] }
 0x32b   : > { %v2904_v59 = vadd.f32 %v15994_v52, %v15989_v12  ;;  %v2906_v57 = vadd.f32 %v16001_v39, %v15996_v21  ;;  %v16003_v27 = vmax.f32 %v16002_v29, 0.0  ;;  %v16013_v12 = vld [vmem:[#allocation489_spill] sm:$0xff]  ;;  %v16014_v19 = vld [vmem:[#allocation491_spill] sm:$0xff]  ;;  %vm16019_vm1 = vnez %v16018_v63  ;;  %v16020_v21 = vld [vmem:[#allocation492_spill] sm:$0xff] }
 0x32c   : > { %v16015_v37 = vsel %vm16012_vm8, %v16013_v12, %v16014_v19  ;;  %v16016_v52 = vld [vmem:[#allocation247_spill] sm:$0xff]  ;;  %v16022_v43 = vsel %vm16019_vm1, %v16020_v21, %v16021_v61  ;;  %v16023_v29 = vld [vmem:[#allocation50_spill] sm:$0xff]  ;;  %vm16026_vm5 = vnez %v16025_v42  ;;  %v16032_v12 = vld [vmem:[#allocation496_spill] sm:$0xff] }
 0x32d   : > { %v2908_v51 = vadd.f32 %v16008_v11, %v16003_v27  ;;  %v2910_v10 = vadd.f32 %v16015_v37, %v16010_v20  ;;  %v16017_v31 = vmax.f32 %v16016_v52, 0.0  ;;  %v16024_v14 = vmax.f32 %v16023_v29, 0.0  ;;  %v16027_v27 = vld [vmem:[#allocation494_spill] sm:$0xff]  ;;  %v16028_v44 = vld [vmem:[#allocation495_spill] sm:$0xff]  ;;  %v16034_v20 = vld [vmem:[#allocation277_spill] sm:$0xff] }
 0x32e   : > { %v16029_v11 = vsel %vm16026_vm5, %v16027_v27, %v16028_v44  ;;  %v16030_v34 = vld [vmem:[#allocation55_spill] sm:$0xff]  ;;  %vm16033_vm7 = vnez %v16032_v12  ;;  %v16035_v19 = vld [vmem:[#allocation497_spill] sm:$0xff]  ;;  %v16039_v21 = vld [vmem:[#allocation498_spill] sm:$0xff] }
 0x32f   : > { %v2912_v39 = vadd.f32 %v16022_v43, %v16017_v31  ;;  %v2914_v48 = vadd.f32 %v16029_v11, %v16024_v14  ;;  %v16031_v24 = vmax.f32 %v16030_v34, 0.0  ;;  %v16036_v37 = vsel %vm16033_vm7, %v16034_v20, %v16035_v19  ;;  %v16037_v63 = vld [vmem:[#allocation61_spill] sm:$0xff]  ;;  %v16041_v31 = vld [vmem:[#allocation499_spill] sm:$0xff]  ;;  %v16042_v61 = vld [vmem:[#allocation406_spill] sm:$0xff] }
 0x330   : > { %v16038_v28 = vmax.f32 %v16037_v63, 0.0  ;;  %vm16040_vm9 = vnez %v16039_v21  ;;  %v16044_v42 = vld [vmem:[#allocation67_spill] sm:$0xff]  ;;  %v16046_v27 = vld [vmem:[#allocation501_spill] sm:$0xff]  ;;  %v16048_v14 = vld [vmem:[#allocation500_spill] sm:$0xff] }
 0x331   : > { %v2916_v52 = vadd.f32 %v16036_v37, %v16031_v24  ;;  %v16043_v43 = vsel %vm16040_vm9, %v16041_v31, %v16042_v61  ;;  %v16045_v32 = vmax.f32 %v16044_v42, 0.0  ;;  %vm16047_vm10 = vnez %v16046_v27  ;;  %v16049_v44 = vld [vmem:[#allocation408_spill] sm:$0xff]  ;;  %v16051_v12 = vld [vmem:[#allocation73_spill] sm:$0xff]  ;;  %v16053_v20 = vld [vmem:[#allocation502_spill] sm:$0xff] }
 0x332   : > { %v2918_v29 = vadd.f32 %v16043_v43, %v16038_v28  ;;  %v16050_v11 = vsel %vm16047_vm10, %v16048_v14, %v16049_v44  ;;  %v16052_v15 = vmax.f32 %v16051_v12, 0.0  ;;  %vm16054_vm3 = vnez %v16053_v20  ;;  %v16055_v24 = vld [vmem:[#allocation503_spill] sm:$0xff]  ;;  %v16058_v21 = vld [vmem:[#allocation77_spill] sm:$0xff]  ;;  %v16060_v31 = vld [vmem:[#allocation504_spill] sm:$0xff] }
 0x333   : > { %v2920_v34 = vadd.f32 %v16050_v11, %v16045_v32  ;;  %v16056_v19 = vld [vmem:[#allocation411_spill] sm:$0xff]  ;;  %v16059_v50 = vmax.f32 %v16058_v21, 0.0  ;;  %vm16061_vm2 = vnez %v16060_v31  ;;  %v16062_v28 = vld [vmem:[#allocation505_spill] sm:$0xff]  ;;  %v16065_v27 = vld [vmem:[#allocation82_spill] sm:$0xff] }
 0x334   : > { %v16057_v37 = vsel %vm16054_vm3, %v16055_v24, %v16056_v19  ;;  %v16063_v61 = vld [vmem:[#allocation339_spill] sm:$0xff]  ;;  %v16066_v26 = vmax.f32 %v16065_v27, 0.0  ;;  %v16067_v14 = vld [vmem:[#allocation506_spill] sm:$0xff]  ;;  %v16070_v44 = vld [vmem:[#allocation417_spill] sm:$0xff] }
 0x335   : > { %v2922_v63 = vadd.f32 %v16057_v37, %v16052_v15  ;;  %v16064_v43 = vsel %vm16061_vm2, %v16062_v28, %v16063_v61  ;;  %vm16068_vm11 = vnez %v16067_v14  ;;  %v16069_v32 = vld [vmem:[#allocation414_spill] sm:$0xff]  ;;  %v16072_v20 = vld [vmem:[#allocation84_spill] sm:$0xff]  ;;  %v16074_v24 = vld [vmem:[#allocation507_spill] sm:$0xff] }
 0x336   : > { %v2924_v42 = vadd.f32 %v16064_v43, %v16059_v50  ;;  %v16071_v11 = vsel %vm16068_vm11, %v16069_v32, %v16070_v44  ;;  %v16073_v5 = vmax.f32 %v16072_v20, 0.0  ;;  %vm16075_vm13 = vnez %v16074_v24  ;;  %v16076_v15 = vld [vmem:[#allocation418_spill] sm:$0xff]  ;;  %v16079_v31 = vld [vmem:[#allocation89_spill] sm:$0xff]  ;;  %v16081_v61 = vld [vmem:[#allocation508_spill] sm:$0xff] }
 0x337   : > { %v2926_v12 = vadd.f32 %v16071_v11, %v16066_v26  ;;  %v16077_v19 = vld [vmem:[#allocation422_spill] sm:$0xff]  ;;  %v16080_v28 = vmax.f32 %v16079_v31, 0.0  ;;  %vm16082_vm14 = vnez %v16081_v61  ;;  %v16083_v50 = vld [vmem:[#allocation420_spill] sm:$0xff]  ;;  %v16084_v43 = vld [vmem:[#allocation423_spill] sm:$0xff] }
 0x338   : > { %v16078_v37 = vsel %vm16075_vm13, %v16076_v15, %v16077_v19  ;;  %v16085_v27 = vsel %vm16082_vm14, %v16083_v50, %v16084_v43  ;;  %v16086_v32 = vld [vmem:[#allocation94_spill] sm:$0xff]  ;;  %v16088_v11 = vld [vmem:[#allocation509_spill] sm:$0xff]  ;;  %v16093_v19 = vld [vmem:[#allocation96_spill] sm:$0xff] }
 0x339   : > { %v2928_v21 = vadd.f32 %v16078_v37, %v16073_v5  ;;  %v2930_v14 = vadd.f32 %v16085_v27, %v16080_v28  ;;  %v16087_v44 = vmax.f32 %v16086_v32, 0.0  ;;  %vm16089_vm15 = vnez %v16088_v11  ;;  %v16090_v26 = vld [vmem:[#allocation510_spill] sm:$0xff]  ;;  %v16095_v37 = vld [vmem:[#allocation511_spill] sm:$0xff]  ;;  %v16097_v31 = vld [vmem:[#allocation425_spill] sm:$0xff] }
 0x33a   : > { %v16091_v20 = vld [vmem:[#allocation426_spill] sm:$0xff]  ;;  %v16094_v5 = vmax.f32 %v16093_v19, 0.0  ;;  %vm16096_vm6 = vnez %v16095_v37  ;;  %v16098_v61 = vld [vmem:[#allocation513_spill] sm:$0xff]  ;;  %v16102_v32 = vld [vmem:[#allocation512_spill] sm:$0xff] }
 0x33b   : > { %v16092_v24 = vsel %vm16089_vm15, %v16090_v26, %v16091_v20  ;;  %v16099_v43 = vsel %vm16096_vm6, %v16097_v31, %v16098_v61  ;;  %v16100_v27 = vld [vmem:[#allocation101_spill] sm:$0xff]  ;;  %vm16103_vm4 = vnez %v16102_v32  ;;  %v16104_v11 = vld [vmem:[#allocation514_spill] sm:$0xff]  ;;  %v16109_v37 = vld [vmem:[#allocation515_spill] sm:$0xff] }
 0x33c   : > { %v2932_v15 = vadd.f32 %v16092_v24, %v16087_v44  ;;  %v2934_v50 = vadd.f32 %v16099_v43, %v16094_v5  ;;  %v16101_v28 = vmax.f32 %v16100_v27, 0.0  ;;  %v16105_v20 = vld [vmem:[#allocation518_spill] sm:$0xff]  ;;  %v16107_v44 = vld [vmem:[#allocation104_spill] sm:$0xff]  ;;  %vm16110_vm12 = vnez %v16109_v37  ;;  %v16112_v61 = vld [vmem:[#allocation519_spill] sm:$0xff] }
 0x33d   : > { %v16106_v26 = vsel %vm16103_vm4, %v16104_v11, %v16105_v20  ;;  %v16108_v19 = vmax.f32 %v16107_v44, 0.0  ;;  %v16111_v31 = vld [vmem:[#allocation516_spill] sm:$0xff]  ;;  %v16114_v27 = vld [vmem:[#allocation106_spill] sm:$0xff]  ;;  %v16116_v11 = vld [vmem:[#allocation517_spill] sm:$0xff] }
 0x33e   : > { %v2936_v24 = vadd.f32 %v16106_v26, %v16101_v28  ;;  %v16113_v5 = vsel %vm16110_vm12, %v16111_v31, %v16112_v61  ;;  %v16115_v32 = vmax.f32 %v16114_v27, 0.0  ;;  %vm16117_vm0 = vnez %v16116_v11  ;;  %v16118_v20 = vld [vmem:[#allocation522_spill] sm:$0xff]  ;;  %v16119_v26 = vld [vmem:[#allocation521_spill] sm:$0xff]  ;;  %v16123_v61 = vld [vmem:[#allocation520_spill] sm:$0xff] }
 0x33f   : > { %v2938_v43 = vadd.f32 %v16113_v5, %v16108_v19  ;;  %v16120_v28 = vsel %vm16117_vm0, %v16118_v20, %v16119_v26  ;;  %v16121_v37 = vld [vmem:[#allocation109_spill] sm:$0xff]  ;;  %vm16124_vm8 = vnez %v16123_v61  ;;  %v16125_v5 = vld [vmem:[#allocation524_spill] sm:$0xff]  ;;  %v16126_v19 = vld [vmem:[#allocation523_spill] sm:$0xff] }
 0x340   : > { %v2940_v44 = vadd.f32 %v16120_v28, %v16115_v32  ;;  %v16122_v31 = vmax.f32 %v16121_v37, 0.0  ;;  %v16127_v27 = vsel %vm16124_vm8, %v16125_v5, %v16126_v19  ;;  %v16128_v20 = vld [vmem:[#allocation112_spill] sm:$0xff]  ;;  %v16130_v28 = vld [vmem:[#allocation527_spill] sm:$0xff]  ;;  %v16132_v32 = vld [vmem:[#allocation526_spill] sm:$0xff] }
 0x341   : > { %v16129_v26 = vmax.f32 %v16128_v20, 0.0  ;;  %vm16131_vm1 = vnez %v16130_v28  ;;  %v16133_v37 = vld [vmem:[#allocation525_spill] sm:$0xff]  ;;  %v16140_v28 = vld [vmem:[#allocation528_spill] sm:$0xff] }
 0x342   : > { %v2942_v11 = vadd.f32 %v16127_v27, %v16122_v31  ;;  %v16134_v61 = vsel %vm16131_vm1, %v16132_v32, %v16133_v37  ;;  %v16135_v19 = vld [vmem:[#allocation113_spill] sm:$0xff]  ;;  %v16137_v31 = vld [vmem:[#allocation530_spill] sm:$0xff] }
 0x343   : > { %v2944_v5 = vadd.f32 %v16134_v61, %v16129_v26  ;;  %v16136_v27 = vmax.f32 %v16135_v19, 0.0  ;;  %vm16138_vm5 = vnez %v16137_v31  ;;  %v16139_v20 = vld [vmem:[#allocation529_spill] sm:$0xff]  ;;  %v16142_v26 = vld [vmem:[#allocation115_spill] sm:$0xff] }
 0x344   : > { %v16141_v32 = vsel %vm16138_vm5, %v16139_v20, %v16140_v28  ;;  %v16143_v61 = vmax.f32 %v16142_v26, 0.0  ;;  %v16144_v31 = vld [vmem:[#allocation117_spill] sm:$0xff] }
 0x345   : > { %v2946_v37 = vadd.f32 %v16141_v32, %v16136_v27  ;;  %v16145_v20 = vmax.f32 %v16144_v31, 0.0  ;;  %v16146_v27 = vld [vmem:[#allocation118_spill] sm:$0xff]  ;;  %v2954_v31 = vmul.f32 0.75, %v2826_v54  ;;  %v10857_v54 = vmul.f32 0.75, %v2833_v30 }
 0x346   : > { %v2948_v19 = vadd.f32 %v2788_v46, %v16143_v61  ;;  %v16147_v32 = vmax.f32 %v16146_v27, 0.0  ;;  %v16148_v46 = vld [vmem:[#allocation8_spill] sm:$0xff]  ;;  %v2957_v27 = vmul.f32 0.75, %v2829_v7  ;;  %v2990_v7 = vmul.f32 0.75, %v2862_v41 }
 0x347   : > { %v2950_v28 = vadd.f32 %v2806_v16, %v16145_v20  ;;  %v2953_v61 = vmul.f32 0.75, %v16148_v46  ;;  %v2955_v16 = vmul.f32 0.75, %v2827_v22  ;;  %v2956_v20 = vmul.f32 0.75, %v2828_v40  ;;  %16149 = vst [vmem:[#allocation446_spill] sm:$0xff] %v10857_v54 }
 0x348   : > { %v2952_v26 = vadd.f32 %v2824_v58, %v16147_v32  ;;  %v2958_v32 = vmul.f32 0.75, %v2830_v8  ;;  %v2959_v58 = vmul.f32 0.75, %v2831_v36  ;;  %v2960_v46 = vmul.f32 0.75, %v2832_v17 }
 0x349   : > { %v10859_v22 = vmul.f32 0.75, %v2834_v49  ;;  %v2988_v40 = vmul.f32 0.75, %v2860_v4  ;;  %v2992_v8 = vmul.f32 0.75, %v2864_v55  ;;  %v2994_v36 = vmul.f32 0.75, %v2866_v60 }
 0x34a   : > { %v2996_v17 = vmul.f32 0.75, %v2868_v13  ;;  %v2998_v30 = vmul.f32 0.75, %v2870_v33  ;;  %v3000_v54 = vmul.f32 0.75, %v2872_v45  ;;  %v3002_v49 = vmul.f32 0.75, %v2874_v23 }
 0x34b   : > { %16150 = vst [vmem:[#allocation9_spill] sm:$0xff] %v10859_v22  ;;  %v3004_v22 = vmul.f32 0.75, %v2876_v35  ;;  %v3006_v4 = vmul.f32 0.75, %v2878_v47  ;;  %v3008_v41 = vmul.f32 0.75, %v2880_v38  ;;  %v3010_v55 = vmul.f32 0.75, %v2882_v62 }
 0x34c   : > { %v3012_v60 = vmul.f32 0.75, %v2884_v2  ;;  %v3014_v13 = vmul.f32 0.75, %v2886_v0  ;;  %v3016_v33 = vmul.f32 0.75, %v2888_v18  ;;  %v3018_v45 = vmul.f32 0.75, %v2890_v53 }
 0x34d   : > { %v3020_v23 = vmul.f32 0.75, %v2892_v1  ;;  %v3022_v35 = vmul.f32 0.75, %v2894_v3  ;;  %v3024_v47 = vmul.f32 0.75, %v2896_v56  ;;  %v3026_v38 = vmul.f32 0.75, %v2898_v9 }
 0x34e   : > { %v3028_v62 = vmul.f32 0.75, %v2900_v25  ;;  %v3030_v2 = vmul.f32 0.75, %v2902_v6  ;;  %v3032_v0 = vmul.f32 0.75, %v2904_v59  ;;  %v3034_v18 = vmul.f32 0.75, %v2906_v57 }
 0x34f   : > { %v3036_v53 = vmul.f32 0.75, %v2908_v51  ;;  %v3038_v1 = vmul.f32 0.75, %v2910_v10  ;;  %v3040_v3 = vmul.f32 0.75, %v2912_v39  ;;  %v3042_v56 = vmul.f32 0.75, %v2914_v48 }
 0x350   : > { %v3044_v9 = vmul.f32 0.75, %v2916_v52  ;;  %v3046_v25 = vmul.f32 0.75, %v2918_v29  ;;  %v3048_v6 = vmul.f32 0.75, %v2920_v34  ;;  %v3050_v59 = vmul.f32 0.75, %v2922_v63 }
 0x351   : > { %v3052_v57 = vmul.f32 0.75, %v2924_v42  ;;  %v3054_v51 = vmul.f32 0.75, %v2926_v12  ;;  %v3056_v10 = vmul.f32 0.75, %v2928_v21  ;;  %v3058_v39 = vmul.f32 0.75, %v2930_v14 }
 0x352   : > { %v3060_v48 = vmul.f32 0.75, %v2932_v15  ;;  %v3062_v52 = vmul.f32 0.75, %v2934_v50  ;;  %v3064_v29 = vmul.f32 0.75, %v2936_v24  ;;  %v3066_v34 = vmul.f32 0.75, %v2938_v43  ;;  %v16151_v24 = vld [vmem:[#allocation181_spill] sm:$0xff] }
 0x353   : > { %v3068_v63 = vmul.f32 0.75, %v2940_v44  ;;  %v3070_v42 = vmul.f32 0.75, %v2942_v11  ;;  %v3072_v12 = vmul.f32 0.75, %v2944_v5  ;;  %v3074_v21 = vmul.f32 0.75, %v2946_v37  ;;  %v16152_v44 = vld [vmem:[#allocation183_spill] sm:$0xff]  ;;  %v16153_v5 = vld [vmem:[#allocation185_spill] sm:$0xff] }
 0x354   : > { %v3076_v14 = vmul.f32 0.75, %v2948_v19  ;;  %v3078_v15 = vmul.f32 0.75, %v2950_v28  ;;  %v3080_v50 = vmul.f32 0.75, %v2952_v26  ;;  %v3081_v43 = vmul.f32 %v16151_v24, %v2953_v61  ;;  %v16154_v19 = vld [vmem:[#allocation187_spill] sm:$0xff]  ;;  %v16155_v26 = vld [vmem:[#allocation188_spill] sm:$0xff] }
 0x355   : > { %v3082_v11 = vmul.f32 %v16152_v44, %v2954_v31  ;;  %v3083_v37 = vmul.f32 %v16153_v5, %v2955_v16  ;;  %v3084_v28 = vmul.f32 %v16154_v19, %v2956_v20  ;;  %v3085_v24 = vmul.f32 %v16155_v26, %v2957_v27  ;;  %v16156_v61 = vld [vmem:[#allocation68_spill] sm:$0xff]  ;;  %v16157_v44 = vld [vmem:[#allocation69_spill] sm:$0xff]  ;;  %v16159_v16 = vld [vmem:[#allocation71_spill] sm:$0xff] }
 0x356   : > { %v3086_v31 = vmul.f32 %v16156_v61, %v2958_v32  ;;  %v10868_v5 = vmul.f32 %v16157_v44, %v2959_v58  ;;  %v10871_v19 = vmul.f32 %v16159_v16, %v2960_v46  ;;  %v16161_v20 = vld [vmem:[#allocation239_spill] sm:$0xff]  ;;  %v16162_v27 = vld [vmem:[#allocation244_spill] sm:$0xff]  ;;  %v16165_v16 = vld [vmem:[#allocation30_spill] sm:$0xff] }
 0x357   : > { %v3116_v26 = vmul.f32 %v16161_v20, %v2988_v40  ;;  %v3118_v32 = vmul.f32 %v16162_v27, %v2990_v7  ;;  %v16163_v61 = vld [vmem:[#allocation248_spill] sm:$0xff]  ;;  %v3124_v46 = vmul.f32 %v16165_v16, %v2996_v17  ;;  %v16167_v40 = vld [vmem:[#allocation34_spill] sm:$0xff] }
 0x358   : > { %16158 = vst [vmem:[#allocation191_spill] sm:$0xff] %v10868_v5  ;;  %16160 = vst [vmem:[#allocation343_spill] sm:$0xff] %v10871_v19  ;;  %v3120_v44 = vmul.f32 %v16163_v61, %v2992_v8  ;;  %v16164_v58 = vld [vmem:[#allocation28_spill] sm:$0xff]  ;;  %v3128_v7 = vmul.f32 %v16167_v40, %v3000_v54  ;;  %v16169_v61 = vld [vmem:[#allocation38_spill] sm:$0xff] }
 0x359   : > { %v3122_v5 = vmul.f32 %v16164_v58, %v2994_v36  ;;  %v16166_v19 = vld [vmem:[#allocation32_spill] sm:$0xff]  ;;  %v3132_v36 = vmul.f32 %v16169_v61, %v3004_v22  ;;  %v16171_v17 = vld [vmem:[#allocation42_spill] sm:$0xff]  ;;  %v16178_v61 = vld [vmem:[#allocation129_spill] sm:$0xff] }
 0x35a   : > { %v3126_v20 = vmul.f32 %v16166_v19, %v2998_v30  ;;  %v16168_v27 = vld [vmem:[#allocation36_spill] sm:$0xff]  ;;  %v3136_v19 = vmul.f32 %v16171_v17, %v3008_v41  ;;  %v16180_v41 = vld [vmem:[#allocation139_spill] sm:$0xff] }
 0x35b   : > { %v3130_v8 = vmul.f32 %v16168_v27, %v3002_v49  ;;  %v16170_v58 = vld [vmem:[#allocation40_spill] sm:$0xff]  ;;  %v16176_v49 = vld [vmem:[#allocation47_spill] sm:$0xff] }
 0x35c   : > { %v3134_v16 = vmul.f32 %v16170_v58, %v3006_v4  ;;  %v16172_v30 = vld [vmem:[#allocation252_spill] sm:$0xff]  ;;  %v10891_v22 = vmul.f32 %v16176_v49, %v3014_v13  ;;  %v10894_v4 = vmul.f32 %v16178_v61, %v3016_v33  ;;  %v16179_v58 = vld [vmem:[#allocation133_spill] sm:$0xff]  ;;  %v16184_v49 = vld [vmem:[#allocation270_spill] sm:$0xff] }
 0x35d   : > { %v10885_v40 = vmul.f32 %v16172_v30, %v3010_v55  ;;  %v16174_v54 = vld [vmem:[#allocation128_spill] sm:$0xff]  ;;  %v10897_v17 = vmul.f32 %v16179_v58, %v3018_v45  ;;  %v10900_v30 = vmul.f32 %v16180_v41, %v3020_v23  ;;  %v16181_v55 = vld [vmem:[#allocation147_spill] sm:$0xff]  ;;  %v16186_v45 = vld [vmem:[#allocation282_spill] sm:$0xff] }
 0x35e   : > { %v10888_v27 = vmul.f32 %v16174_v54, %v3012_v60  ;;  %16177 = vst [vmem:[#allocation303_spill] sm:$0xff] %v10891_v22  ;;  %v16182_v54 = vld [vmem:[#allocation258_spill] sm:$0xff]  ;;  %v10912_v22 = vmul.f32 %v16184_v49, %v3028_v62  ;;  %v16185_v33 = vld [vmem:[#allocation276_spill] sm:$0xff]  ;;  %v10918_v58 = vmul.f32 %v16186_v45, %v3032_v0  ;;  %v16196_v62 = vld [vmem:[#allocation305_spill] sm:$0xff] }
 0x35f   : > { %16173 = vst [vmem:[#allocation448_spill] sm:$0xff] %v10885_v40  ;;  %v10903_v40 = vmul.f32 %v16181_v55, %v3022_v35  ;;  %v10906_v60 = vmul.f32 %v16182_v54, %v3024_v47  ;;  %v10915_v61 = vmul.f32 %v16185_v33, %v3030_v2  ;;  %v16188_v23 = vld [vmem:[#allocation288_spill] sm:$0xff]  ;;  %v16190_v35 = vld [vmem:[#allocation294_spill] sm:$0xff]  ;;  %v16192_v47 = vld [vmem:[#allocation189_spill] sm:$0xff]  ;;  %v10933_v49 = vmul.f32 %v16196_v62, %v3042_v56 }
 0x360   : > { %16175 = vst [vmem:[#allocation10_spill] sm:$0xff] %v10888_v27  ;;  %v16183_v27 = vld [vmem:[#allocation264_spill] sm:$0xff]  ;;  %16187 = vst [vmem:[#allocation346_spill] sm:$0xff] %v10918_v58  ;;  %v10921_v41 = vmul.f32 %v16188_v23, %v3034_v18  ;;  %v10924_v55 = vmul.f32 %v16190_v35, %v3036_v53  ;;  %v10927_v54 = vmul.f32 %v16192_v47, %v3038_v1  ;;  %v16198_v2 = vld [vmem:[#allocation311_spill] sm:$0xff] }
 0x361   : > { %v10909_v13 = vmul.f32 %v16183_v27, %v3026_v38  ;;  %v16194_v38 = vld [vmem:[#allocation299_spill] sm:$0xff]  ;;  %16197 = vst [vmem:[#allocation450_spill] sm:$0xff] %v10933_v49  ;;  %v10936_v33 = vmul.f32 %v16198_v2, %v3044_v9  ;;  %v16202_v18 = vld [vmem:[#allocation320_spill] sm:$0xff]  ;;  %v16210_v56 = vld [vmem:[#allocation253_spill] sm:$0xff] }
 0x362   : > { %16189 = vst [vmem:[#allocation449_spill] sm:$0xff] %v10921_v41  ;;  %16191 = vst [vmem:[#allocation11_spill] sm:$0xff] %v10924_v55  ;;  %v10930_v27 = vmul.f32 %v16194_v38, %v3040_v3  ;;  %v16200_v0 = vld [vmem:[#allocation315_spill] sm:$0xff]  ;;  %v10942_v23 = vmul.f32 %v16202_v18, %v3048_v6  ;;  %v16208_v3 = vld [vmem:[#allocation45_spill] sm:$0xff]  ;;  %v10954_v62 = vmul.f32 %v16210_v56, %v3056_v10 }
 0x363   : > { %16193 = vst [vmem:[#allocation304_spill] sm:$0xff] %v10927_v54  ;;  %16199 = vst [vmem:[#allocation131_spill] sm:$0xff] %v10936_v33  ;;  %v10939_v45 = vmul.f32 %v16200_v0, %v3046_v25  ;;  %v16204_v53 = vld [vmem:[#allocation323_spill] sm:$0xff]  ;;  %v10951_v38 = vmul.f32 %v16208_v3, %v3054_v51  ;;  %v16214_v25 = vld [vmem:[#allocation217_spill] sm:$0xff] }
 0x364   : > { %16195 = vst [vmem:[#allocation348_spill] sm:$0xff] %v10930_v27  ;;  %16203 = vst [vmem:[#allocation350_spill] sm:$0xff] %v10942_v23  ;;  %v10945_v35 = vmul.f32 %v16204_v53, %v3050_v59  ;;  %v16206_v1 = vld [vmem:[#allocation327_spill] sm:$0xff]  ;;  %v10960_v0 = vmul.f32 %v16214_v25, %v3060_v48  ;;  %v16216_v6 = vld [vmem:[#allocation142_spill] sm:$0xff] }
 0x365   : > { %16201 = vst [vmem:[#allocation192_spill] sm:$0xff] %v10939_v45  ;;  %v10948_v47 = vmul.f32 %v16206_v1, %v3052_v57  ;;  %16209 = vst [vmem:[#allocation306_spill] sm:$0xff] %v10951_v38  ;;  %v16212_v9 = vld [vmem:[#allocation211_spill] sm:$0xff]  ;;  %v10963_v18 = vmul.f32 %v16216_v6, %v3062_v52  ;;  %v16218_v59 = vld [vmem:[#allocation150_spill] sm:$0xff] }
 0x366   : > { %16205 = vst [vmem:[#allocation356_spill] sm:$0xff] %v10945_v35  ;;  %16211 = vst [vmem:[#allocation353_spill] sm:$0xff] %v10954_v62  ;;  %v10957_v2 = vmul.f32 %v16212_v9, %v3058_v39  ;;  %v10966_v53 = vmul.f32 %v16218_v59, %v3064_v29  ;;  %v16220_v57 = vld [vmem:[#allocation171_spill] sm:$0xff]  ;;  %v16222_v51 = vld [vmem:[#allocation328_spill] sm:$0xff] }
 0x367   : > { %16207 = vst [vmem:[#allocation132_spill] sm:$0xff] %v10948_v47  ;;  %16215 = vst [vmem:[#allocation134_spill] sm:$0xff] %v10960_v0  ;;  %v10969_v1 = vmul.f32 %v16220_v57, %v3066_v34  ;;  %v10972_v3 = vmul.f32 %v16222_v51, %v3068_v63  ;;  %v16224_v10 = vld [vmem:[#allocation330_spill] sm:$0xff]  ;;  %v16226_v39 = vld [vmem:[#allocation331_spill] sm:$0xff] }
 0x368   : > { %16213 = vst [vmem:[#allocation454_spill] sm:$0xff] %v10957_v2  ;;  %16217 = vst [vmem:[#allocation307_spill] sm:$0xff] %v10963_v18  ;;  %v10975_v56 = vmul.f32 %v16224_v10, %v3070_v42  ;;  %v10978_v9 = vmul.f32 %v16226_v39, %v3072_v12  ;;  %v16228_v25 = vld [vmem:[#allocation297_spill] sm:$0xff]  ;;  %v16230_v6 = vld [vmem:[#allocation298_spill] sm:$0xff] }
 0x369   : > { %16219 = vst [vmem:[#allocation354_spill] sm:$0xff] %v10966_v53  ;;  %16221 = vst [vmem:[#allocation455_spill] sm:$0xff] %v10969_v1  ;;  %v10981_v52 = vmul.f32 %v16228_v25, %v3074_v21  ;;  %v10984_v29 = vmul.f32 %v16230_v6, %v3076_v14  ;;  %v16232_v59 = vld [vmem:[#allocation190_spill] sm:$0xff]  ;;  %v16234_v57 = vld [vmem:[#allocation300_spill] sm:$0xff] }
 0x36a   : > { %16223 = vst [vmem:[#allocation135_spill] sm:$0xff] %v10972_v3  ;;  %16225 = vst [vmem:[#allocation445_spill] sm:$0xff] %v10975_v56  ;;  %v10987_v34 = vmul.f32 %v16232_v59, %v3078_v15  ;;  %v10990_v63 = vmul.f32 %v16234_v57, %v3080_v50  ;;  %v16236_v51 = vld [vmem:[#allocation181_spill] sm:$0xff]  ;;  %v16238_v42 = vld [vmem:[#allocation183_spill] sm:$0xff] }
 0x36b   : > { %16227 = vst [vmem:[#allocation312_spill] sm:$0xff] %v10978_v9  ;;  %16229 = vst [vmem:[#allocation399_spill] sm:$0xff] %v10981_v52  ;;  %v10993_v3 = vmul.f32 %v16236_v51, %v3081_v43  ;;  %v10996_v10 = vmul.f32 %v16238_v42, %v3082_v11  ;;  %v16240_v12 = vld [vmem:[#allocation185_spill] sm:$0xff]  ;;  %v16242_v21 = vld [vmem:[#allocation187_spill] sm:$0xff] }
 0x36c   : > { %16231 = vst [vmem:[#allocation137_spill] sm:$0xff] %v10984_v29  ;;  %16233 = vst [vmem:[#allocation309_spill] sm:$0xff] %v10987_v34  ;;  %v10999_v48 = vmul.f32 %v16240_v12, %v3083_v37  ;;  %v11002_v25 = vmul.f32 %v16242_v21, %v3084_v28  ;;  %v16244_v14 = vld [vmem:[#allocation188_spill] sm:$0xff]  ;;  %v16248_v50 = vld [vmem:[#allocation239_spill] sm:$0xff] }
 0x36d   : > { %16235 = vst [vmem:[#allocation357_spill] sm:$0xff] %v10990_v63  ;;  %16237 = vst [vmem:[#allocation93_spill] sm:$0xff] %v10993_v3  ;;  %v11005_v6 = vmul.f32 %v16244_v14, %v3085_v24  ;;  %v16246_v15 = vld [vmem:[#allocation68_spill] sm:$0xff]  ;;  %v11011_v57 = vmul.f32 %v16248_v50, %v3116_v26  ;;  %v16256_v28 = vld [vmem:[#allocation30_spill] sm:$0xff]  ;;  %v16258_v24 = vlaneseq }
 0x36e   : > { %16239 = vst [vmem:[#allocation138_spill] sm:$0xff] %v10996_v10  ;;  %16241 = vst [vmem:[#allocation310_spill] sm:$0xff] %v10999_v48  ;;  %v11008_v59 = vmul.f32 %v16246_v15, %v3086_v31  ;;  %v16250_v43 = vld [vmem:[#allocation244_spill] sm:$0xff]  ;;  %v11024_v21 = vmul.f32 %v16256_v28, %v3124_v46  ;;  %v16262_v26 = vld [vmem:[#allocation34_spill] sm:$0xff] }
 0x36f   : > { %16243 = vst [vmem:[#allocation359_spill] sm:$0xff] %v11002_v25  ;;  %16245 = vst [vmem:[#allocation458_spill] sm:$0xff] %v11005_v6  ;;  %v11014_v51 = vmul.f32 %v16250_v43, %v3118_v32  ;;  %v16252_v11 = vld [vmem:[#allocation248_spill] sm:$0xff]  ;;  %v11027_v14 = vshrl.u32 %v16258_v24, 7  ;;  %v11033_v50 = vmul.f32 %v16262_v26, %v3128_v7  ;;  %v16270_v46 = vld [vmem:[#allocation42_spill] sm:$0xff] }
 0x370   : > { %16247 = vst [vmem:[#allocation140_spill] sm:$0xff] %v11008_v59  ;;  %16249 = vst [vmem:[#allocation141_spill] sm:$0xff] %v11011_v57  ;;  %v11018_v42 = vmul.f32 %v16252_v11, %v3120_v44  ;;  %v16254_v37 = vld [vmem:[#allocation28_spill] sm:$0xff]  ;;  %v16266_v44 = vld [vmem:[#allocation38_spill] sm:$0xff]  ;;  %v11045_v28 = vmul.f32 %v16270_v46, %v3136_v19  ;;  %v11048_v59 = vstv %s4153_s17 }
 0x371   : > { %16251 = vst [vmem:[#allocation404_spill] sm:$0xff] %v11014_v51  ;;  %v11021_v12 = vmul.f32 %v16254_v37, %v3122_v5  ;;  %16257 = vst [vmem:[#allocation182_spill] sm:$0xff] %v11024_v21  ;;  %v16260_v31 = vld [vmem:[#allocation32_spill] sm:$0xff]  ;;  %v11039_v11 = vmul.f32 %v16266_v44, %v3132_v36  ;;  %v3488_v6 = vadd.s32 136, %v11027_v14  ;;  %v3490_v7 = vadd.s32 152, %v11027_v14 }
 0x372   : > { %16253 = vst [vmem:[#allocation178_spill] sm:$0xff] %v11018_v42  ;;  %16259 = vst [vmem:[#allocation184_spill] sm:$0xff] %v11027_v14  ;;  %v11030_v15 = vmul.f32 %v16260_v31, %v3126_v20  ;;  %v16264_v32 = vld [vmem:[#allocation36_spill] sm:$0xff]  ;;  %v3489_v20 = vadd.s32 144, %v11027_v14  ;;  %v3492_v31 = vadd.s32 168, %v11027_v14  ;;  %v3493_v36 = vadd.s32 176, %v11027_v14 }
 0x373   : > { %16255 = vst [vmem:[#allocation180_spill] sm:$0xff] %v11021_v12  ;;  %16263 = vst [vmem:[#allocation12_spill] sm:$0xff] %v11033_v50  ;;  %v11036_v43 = vmul.f32 %v16264_v32, %v3130_v8  ;;  %v16268_v5 = vld [vmem:[#allocation40_spill] sm:$0xff]  ;;  %v3491_v8 = vadd.s32 160, %v11027_v14  ;;  %v3495_v26 = vadd.s32 192, %v11027_v14  ;;  %v3496_v19 = vadd.s32 200, %v11027_v14 }
 0x374   : > { %16261 = vst [vmem:[#allocation186_spill] sm:$0xff] %v11030_v15  ;;  %16267 = vst [vmem:[#allocation351_spill] sm:$0xff] %v11039_v11  ;;  %v11042_v37 = vmul.f32 %v16268_v5, %v3134_v16  ;;  %v3494_v16 = vadd.s32 184, %v11027_v14  ;;  %v3497_v32 = vadd.s32 208, %v11027_v14  ;;  %v3498_v44 = vadd.s32 216, %v11027_v14 }
 0x375   : > { %16265 = vst [vmem:[#allocation432_spill] sm:$0xff] %v11036_v43  ;;  %16271 = vst [vmem:[#allocation290_spill] sm:$0xff] %v11045_v28  ;;  %v3499_v5 = vadd.s32 224, %v11027_v14  ;;  %v3500_v46 = vadd.s32 232, %v11027_v14  ;;  %v3501_v48 = vadd.s32 240, %v11027_v14  ;;  %v3502_v3 = vadd.s32 248, %v11027_v14 }
 0x376   : > { %16269 = vst [vmem:[#allocation14_spill] sm:$0xff] %v11042_v37  ;;  %v3503_v28 = vadd.s32 256, %v11027_v14  ;;  %v3504_v37 = vadd.s32 264, %v11027_v14  ;;  %v3505_v11 = vadd.s32 272, %v11027_v14  ;;  %v3506_v43 = vadd.s32 280, %v11027_v14 }
 0x377   : > { %v3507_v50 = vadd.s32 288, %v11027_v14  ;;  %v3508_v15 = vadd.s32 296, %v11027_v14  ;;  %v3509_v21 = vadd.s32 304, %v11027_v14  ;;  %v3510_v12 = vadd.s32 312, %v11027_v14 }
 0x378   : > { %v3511_v42 = vadd.s32 320, %v11027_v14  ;;  %v3512_v51 = vadd.s32 328, %v11027_v14  ;;  %v3513_v57 = vadd.s32 336, %v11027_v14  ;;  %v3514_v25 = vadd.s32 344, %v11027_v14 }
 0x379   : > { %v3515_v10 = vadd.s32 352, %v11027_v14  ;;  %v3516_v63 = vadd.s32 360, %v11027_v14  ;;  %v3517_v34 = vadd.s32 368, %v11027_v14  ;;  %v3518_v29 = vadd.s32 376, %v11027_v14 }
 0x37a   : > { %v3519_v52 = vadd.s32 384, %v11027_v14  ;;  %v3520_v39 = vadd.s32 392, %v11027_v14  ;;  %v3521_v9 = vadd.s32 400, %v11027_v14  ;;  %v3522_v56 = vadd.s32 408, %v11027_v14 }
 0x37b   : > { %v3523_v1 = vadd.s32 416, %v11027_v14  ;;  %v3524_v53 = vadd.s32 424, %v11027_v14  ;;  %v3525_v18 = vadd.s32 432, %v11027_v14  ;;  %v3526_v0 = vadd.s32 440, %v11027_v14 }
 0x37c   : > { %v3527_v2 = vadd.s32 448, %v11027_v14  ;;  %v3528_v62 = vadd.s32 456, %v11027_v14  ;;  %v3529_v38 = vadd.s32 464, %v11027_v14  ;;  %v3530_v47 = vadd.s32 472, %v11027_v14 }
 0x37d   : > { %v3531_v35 = vadd.s32 480, %v11027_v14  ;;  %v3532_v23 = vadd.s32 488, %v11027_v14  ;;  %v3533_v45 = vadd.s32 496, %v11027_v14  ;;  %v3534_v33 = vadd.s32 504, %v11027_v14 }
 0x37e   : > { %v11097_v49 = vadd.s32 %v11048_v59, %v3488_v6  ;;  %v11100_v27 = vadd.s32 %v11048_v59, %v3489_v20  ;;  %v11103_v54 = vadd.s32 %v11048_v59, %v3490_v7  ;;  %v11106_v55 = vadd.s32 %v11048_v59, %v3491_v8 }
 0x37f   : > { %v11109_v41 = vadd.s32 %v11048_v59, %v3492_v31  ;;  %v11112_v58 = vadd.s32 %v11048_v59, %v3493_v36  ;;  %v11115_v14 = vadd.s32 %v11048_v59, %v3494_v16  ;;  %v11118_v6 = vadd.s32 %v11048_v59, %v3495_v26 }
 0x380   : > { %v11121_v20 = vadd.s32 %v11048_v59, %v3496_v19  ;;  %v11124_v7 = vadd.s32 %v11048_v59, %v3497_v32  ;;  %v11127_v8 = vadd.s32 %v11048_v59, %v3498_v44  ;;  %v11130_v31 = vadd.s32 %v11048_v59, %v3499_v5 }
 0x381   : > { %16272 = vst [vmem:[#allocation289_spill] sm:$0xff] %v11118_v6  ;;  %v11133_v36 = vadd.s32 %v11048_v59, %v3500_v46  ;;  %v11136_v16 = vadd.s32 %v11048_v59, %v3501_v48  ;;  %v11139_v26 = vadd.s32 %v11048_v59, %v3502_v3  ;;  %v11142_v19 = vadd.s32 %v11048_v59, %v3503_v28  ;;  %v16393_v6 = vld [vmem:[#allocation290_spill] sm:$0xff] }
 0x382   : > { %16273 = vst [vmem:[#allocation16_spill] sm:$0xff] %v11121_v20  ;;  %16274 = vst [vmem:[#allocation372_spill] sm:$0xff] %v11124_v7  ;;  %v11145_v32 = vadd.s32 %v11048_v59, %v3504_v37  ;;  %v11148_v44 = vadd.s32 %v11048_v59, %v3505_v11  ;;  %v11151_v5 = vadd.s32 %v11048_v59, %v3506_v43  ;;  %v16391_v7 = vld [vmem:[#allocation351_spill] sm:$0xff]  ;;  %v16392_v20 = vld [vmem:[#allocation14_spill] sm:$0xff]  ;;  %vm3618_vm9 = vcmp.lt.s32.totalorder %v11097_v49, 1200 }
 0x383   : > { %16275 = vst [vmem:[#allocation18_spill] sm:$0xff] %v11127_v8  ;;  %16276 = vst [vmem:[#allocation363_spill] sm:$0xff] %v11130_v31  ;;  %v11154_v46 = vadd.s32 %v11048_v59, %v3507_v50  ;;  %v11157_v48 = vadd.s32 %v11048_v59, %v3508_v15  ;;  %v11160_v3 = vadd.s32 %v11048_v59, %v3509_v21  ;;  %v16389_v31 = vld [vmem:[#allocation12_spill] sm:$0xff]  ;;  %vm3619_vm10 = vcmp.lt.s32.totalorder %v11100_v27, 1200  ;;  %v16746_v49 = vld [vmem:[#allocation433_spill] sm:$0xff] }
 0x384   : > { %16277 = vst [vmem:[#allocation442_spill] sm:$0xff] %v11133_v36  ;;  %16278 = vst [vmem:[#allocation419_spill] sm:$0xff] %v11136_v16  ;;  %v11163_v28 = vadd.s32 %v11048_v59, %v3510_v12  ;;  %v11166_v37 = vadd.s32 %v11048_v59, %v3511_v42  ;;  %v11169_v11 = vadd.s32 %v11048_v59, %v3512_v51  ;;  %v16375_v16 = vld [vmem:[#allocation300_spill] sm:$0xff]  ;;  %vm3620_vm3 = vcmp.lt.s32.totalorder %v11103_v54, 1200 }
 0x385   : > { %16279 = vst [vmem:[#allocation20_spill] sm:$0xff] %v11139_v26  ;;  %16280 = vst [vmem:[#allocation345_spill] sm:$0xff] %v11142_v19  ;;  %v11172_v43 = vadd.s32 %v11048_v59, %v3513_v57  ;;  %v11175_v50 = vadd.s32 %v11048_v59, %v3514_v25  ;;  %v11178_v15 = vadd.s32 %v11048_v59, %v3515_v10  ;;  %v16371_v19 = vld [vmem:[#allocation298_spill] sm:$0xff]  ;;  %v16390_v8 = vld [vmem:[#allocation432_spill] sm:$0xff]  ;;  %vm3621_vm2 = vcmp.lt.s32.totalorder %v11106_v55, 1200 }
 0x386   : > { %16281 = vst [vmem:[#allocation443_spill] sm:$0xff] %v11145_v32  ;;  %16282 = vst [vmem:[#allocation424_spill] sm:$0xff] %v11148_v44  ;;  %v11181_v21 = vadd.s32 %v11048_v59, %v3516_v63  ;;  %v11184_v12 = vadd.s32 %v11048_v59, %v3517_v34  ;;  %v11187_v42 = vadd.s32 %v11048_v59, %v3518_v29  ;;  %v16364_v44 = vld [vmem:[#allocation445_spill] sm:$0xff]  ;;  %v16366_v32 = vld [vmem:[#allocation312_spill] sm:$0xff]  ;;  %vm13873_vm11 = vcmp.lt.s32.totalorder %v11109_v41, 1200 }
 0x387   : > { %16283 = vst [vmem:[#allocation91_spill] sm:$0xff] %v11151_v5  ;;  %16284 = vst [vmem:[#allocation366_spill] sm:$0xff] %v11154_v46  ;;  %v11190_v51 = vadd.s32 %v11048_v59, %v3519_v52  ;;  %v11193_v57 = vadd.s32 %v11048_v59, %v3520_v39  ;;  %v11196_v25 = vadd.s32 %v11048_v59, %v3521_v9  ;;  %v16360_v46 = vld [vmem:[#allocation455_spill] sm:$0xff]  ;;  %v16373_v26 = vld [vmem:[#allocation190_spill] sm:$0xff]  ;;  %vm13867_vm13 = vcmp.lt.s32.totalorder %v11112_v58, 1200 }
 0x388   : > { %16285 = vst [vmem:[#allocation472_spill] sm:$0xff] %v11157_v48  ;;  %16286 = vst [vmem:[#allocation205_spill] sm:$0xff] %v11160_v3  ;;  %v11199_v10 = vadd.s32 %v11048_v59, %v3522_v56  ;;  %v11202_v63 = vadd.s32 %v11048_v59, %v3523_v1  ;;  %v11205_v34 = vadd.s32 %v11048_v59, %v3524_v53  ;;  %v16356_v3 = vld [vmem:[#allocation307_spill] sm:$0xff]  ;;  %v16358_v48 = vld [vmem:[#allocation354_spill] sm:$0xff]  ;;  %vm13853_vm14 = vcmp.lt.s32.totalorder %v11115_v14, 1200 }
 0x389   : > { %16287 = vst [vmem:[#allocation347_spill] sm:$0xff] %v11163_v28  ;;  %16288 = vst [vmem:[#allocation447_spill] sm:$0xff] %v11166_v37  ;;  %v11208_v29 = vadd.s32 %v11048_v59, %v3525_v18  ;;  %v11211_v52 = vadd.s32 %v11048_v59, %v3526_v0  ;;  %v11214_v39 = vadd.s32 %v11048_v59, %v3527_v2  ;;  %v16311_v2 = vld [vmem:[#allocation448_spill] sm:$0xff]  ;;  %v16352_v37 = vld [vmem:[#allocation454_spill] sm:$0xff] }
 0x38a   : > { %16289 = vst [vmem:[#allocation376_spill] sm:$0xff] %v11169_v11  ;;  %16290 = vst [vmem:[#allocation215_spill] sm:$0xff] %v11172_v43  ;;  %v11217_v9 = vadd.s32 %v11048_v59, %v3528_v62  ;;  %v11220_v56 = vadd.s32 %v11048_v59, %v3529_v38  ;;  %v11223_v1 = vadd.s32 %v11048_v59, %v3530_v47  ;;  %v16313_v62 = vld [vmem:[#allocation10_spill] sm:$0xff]  ;;  %v3338_v38 = vand.u32 127, %v16258_v24  ;;  %v16349_v43 = vld [vmem:[#allocation45_spill] sm:$0xff] }
 0x38b   : > { %16291 = vst [vmem:[#allocation451_spill] sm:$0xff] %v11175_v50  ;;  %16292 = vst [vmem:[#allocation435_spill] sm:$0xff] %v11178_v15  ;;  %v11226_v53 = vadd.s32 %v11048_v59, %v3531_v35  ;;  %v11229_v18 = vadd.s32 %v11048_v59, %v3532_v23  ;;  %v11232_v0 = vadd.s32 %v11048_v59, %v3533_v45  ;;  %v16317_v35 = vld [vmem:[#allocation47_spill] sm:$0xff]  ;;  %v16318_v23 = vld [vmem:[#allocation129_spill] sm:$0xff] }
 0x38c   : > { %16293 = vst [vmem:[#allocation121_spill] sm:$0xff] %v11181_v21  ;;  %16294 = vst [vmem:[#allocation369_spill] sm:$0xff] %v11184_v12  ;;  %v11240_v47 = vadd.s32 %v11048_v59, %v3534_v33  ;;  %v16319_v45 = vld [vmem:[#allocation133_spill] sm:$0xff]  ;;  %v16322_v24 = vld [vmem:[#allocation258_spill] sm:$0xff] }
 0x38d   : > { %16295 = vst [vmem:[#allocation440_spill] sm:$0xff] %v11187_v42  ;;  %16296 = vst [vmem:[#allocation223_spill] sm:$0xff] %v11190_v51  ;;  %v16323_v33 = vld [vmem:[#allocation264_spill] sm:$0xff]  ;;  %v16336_v51 = vld [vmem:[#allocation450_spill] sm:$0xff]  ;;  %v11272_v42 = vadd.s32 128, %v3338_v38 }
 0x38e   : > { %16297 = vst [vmem:[#allocation337_spill] sm:$0xff] %v11193_v57  ;;  %16298 = vst [vmem:[#allocation460_spill] sm:$0xff] %v11196_v25  ;;  %v16332_v25 = vld [vmem:[#allocation304_spill] sm:$0xff]  ;;  %v16341_v12 = vld [vmem:[#allocation315_spill] sm:$0xff] }
 0x38f   : > { %16299 = vst [vmem:[#allocation444_spill] sm:$0xff] %v11199_v10  ;;  %16300 = vst [vmem:[#allocation225_spill] sm:$0xff] %v11202_v63  ;;  %v16328_v63 = vld [vmem:[#allocation449_spill] sm:$0xff]  ;;  %v16330_v10 = vld [vmem:[#allocation11_spill] sm:$0xff]  ;;  %vm3341_vm7 = vcmp.lt.s32.totalorder %v11272_v42, 200 }
 0x390   : > { %16301 = vst [vmem:[#allocation428_spill] sm:$0xff] %v11205_v34  ;;  %16302 = vst [vmem:[#allocation429_spill] sm:$0xff] %v11208_v29  ;;  %v16326_v34 = vld [vmem:[#allocation346_spill] sm:$0xff]  ;;  %v16334_v57 = vld [vmem:[#allocation348_spill] sm:$0xff] }
 0x391   : > { %16303 = vst [vmem:[#allocation382_spill] sm:$0xff] %v11211_v52  ;;  %16304 = vst [vmem:[#allocation227_spill] sm:$0xff] %v11214_v39  ;;  %v16312_v39 = vld [vmem:[#allocation252_spill] sm:$0xff]  ;;  %v16345_v15 = vld [vmem:[#allocation323_spill] sm:$0xff] }
 0x392   : > { %16305 = vst [vmem:[#allocation473_spill] sm:$0xff] %v11217_v9  ;;  %16306 = vst [vmem:[#allocation471_spill] sm:$0xff] %v11220_v56  ;;  %v3266_v52 = vmul.f32 %v16312_v39, %v16311_v2  ;;  %v16314_v9 = vld [vmem:[#allocation128_spill] sm:$0xff]  ;;  %v16320_v56 = vld [vmem:[#allocation139_spill] sm:$0xff] }
 0x393   : > { %16307 = vst [vmem:[#allocation256_spill] sm:$0xff] %v11223_v1  ;;  %16308 = vst [vmem:[#allocation229_spill] sm:$0xff] %v11226_v53  ;;  %v3268_v29 = vmul.f32 %v16314_v9, %v16313_v62  ;;  %v16316_v1 = vld [vmem:[#allocation303_spill] sm:$0xff]  ;;  %v3276_v39 = vmul.f32 %v16320_v56, %v10900_v30  ;;  %v3280_v62 = vmul.f32 %v16322_v24, %v10906_v60  ;;  %v16329_v30 = vld [vmem:[#allocation288_spill] sm:$0xff] }
 0x394   : > { %16309 = vst [vmem:[#allocation475_spill] sm:$0xff] %v11229_v18  ;;  %16310 = vst [vmem:[#allocation474_spill] sm:$0xff] %v11232_v0  ;;  %v3270_v53 = vmul.f32 %v16317_v35, %v16316_v1  ;;  %v3272_v18 = vmul.f32 %v16318_v23, %v10894_v4  ;;  %v3274_v0 = vmul.f32 %v16319_v45, %v10897_v17  ;;  %v16321_v2 = vld [vmem:[#allocation147_spill] sm:$0xff]  ;;  %v16324_v1 = vld [vmem:[#allocation270_spill] sm:$0xff] }
 0x395   : > { %16315 = vst [vmem:[#allocation453_spill] sm:$0xff] %v11240_v47  ;;  %v3278_v9 = vmul.f32 %v16321_v2, %v10903_v40  ;;  %v3282_v47 = vmul.f32 %v16323_v33, %v10909_v13  ;;  %v3284_v35 = vmul.f32 %v16324_v1, %v10912_v22  ;;  %v16325_v4 = vld [vmem:[#allocation276_spill] sm:$0xff]  ;;  %v16327_v17 = vld [vmem:[#allocation282_spill] sm:$0xff]  ;;  %v3290_v56 = vmul.f32 %v16329_v30, %v16328_v63  ;;  %v16333_v60 = vld [vmem:[#allocation189_spill] sm:$0xff] }
 0x396   : > { %v3286_v23 = vmul.f32 %v16325_v4, %v10915_v61  ;;  %v3288_v45 = vmul.f32 %v16327_v17, %v16326_v34  ;;  %v16331_v40 = vld [vmem:[#allocation294_spill] sm:$0xff]  ;;  %v3294_v24 = vmul.f32 %v16333_v60, %v16332_v25  ;;  %v16335_v13 = vld [vmem:[#allocation299_spill] sm:$0xff]  ;;  %v16337_v22 = vld [vmem:[#allocation305_spill] sm:$0xff] }
 0x397   : > { %v3292_v2 = vmul.f32 %v16331_v40, %v16330_v10  ;;  %v3296_v33 = vmul.f32 %v16335_v13, %v16334_v57  ;;  %v3298_v1 = vmul.f32 %v16337_v22, %v16336_v51  ;;  %v16338_v61 = vld [vmem:[#allocation131_spill] sm:$0xff]  ;;  %v16340_v17 = vld [vmem:[#allocation192_spill] sm:$0xff]  ;;  %v16342_v30 = vld [vmem:[#allocation350_spill] sm:$0xff] }
 0x398   : > { %v16339_v4 = vld [vmem:[#allocation311_spill] sm:$0xff]  ;;  %v3302_v63 = vmul.f32 %v16341_v12, %v16340_v17  ;;  %v16343_v21 = vld [vmem:[#allocation320_spill] sm:$0xff]  ;;  %v16348_v13 = vld [vmem:[#allocation306_spill] sm:$0xff] }
 0x399   : > { %v3300_v34 = vmul.f32 %v16339_v4, %v16338_v61  ;;  %v3304_v10 = vmul.f32 %v16343_v21, %v16342_v30  ;;  %v16344_v40 = vld [vmem:[#allocation356_spill] sm:$0xff]  ;;  %v16347_v50 = vld [vmem:[#allocation327_spill] sm:$0xff]  ;;  %v3310_v51 = vmul.f32 %v16349_v43, %v16348_v13  ;;  %v16350_v38 = vld [vmem:[#allocation353_spill] sm:$0xff] }
 0x39a   : > { %v3306_v25 = vmul.f32 %v16345_v15, %v16344_v40  ;;  %v16346_v60 = vld [vmem:[#allocation132_spill] sm:$0xff]  ;;  %v16351_v22 = vld [vmem:[#allocation253_spill] sm:$0xff]  ;;  %v16353_v61 = vld [vmem:[#allocation211_spill] sm:$0xff] }
 0x39b   : > { %v3308_v57 = vmul.f32 %v16347_v50, %v16346_v60  ;;  %v3312_v11 = vmul.f32 %v16351_v22, %v16350_v38  ;;  %v3314_v4 = vmul.f32 %v16353_v61, %v16352_v37  ;;  %v16354_v28 = vld [vmem:[#allocation134_spill] sm:$0xff]  ;;  %v16355_v12 = vld [vmem:[#allocation217_spill] sm:$0xff]  ;;  %v16361_v50 = vld [vmem:[#allocation171_spill] sm:$0xff] }
 0x39c   : > { %v3316_v17 = vmul.f32 %v16355_v12, %v16354_v28  ;;  %v16357_v21 = vld [vmem:[#allocation142_spill] sm:$0xff]  ;;  %v3322_v60 = vmul.f32 %v16361_v50, %v16360_v46  ;;  %v16362_v5 = vld [vmem:[#allocation135_spill] sm:$0xff]  ;;  %v16363_v43 = vld [vmem:[#allocation328_spill] sm:$0xff] }
 0x39d   : > { %v3318_v30 = vmul.f32 %v16357_v21, %v16356_v3  ;;  %v16359_v15 = vld [vmem:[#allocation150_spill] sm:$0xff]  ;;  %v3324_v13 = vmul.f32 %v16363_v43, %v16362_v5  ;;  %v16367_v37 = vld [vmem:[#allocation331_spill] sm:$0xff]  ;;  %v16369_v12 = vld [vmem:[#allocation297_spill] sm:$0xff] }
 0x39e   : > { %v3320_v40 = vmul.f32 %v16359_v15, %v16358_v48  ;;  %v16365_v38 = vld [vmem:[#allocation330_spill] sm:$0xff]  ;;  %v3328_v61 = vmul.f32 %v16367_v37, %v16366_v32  ;;  %v16368_v28 = vld [vmem:[#allocation399_spill] sm:$0xff]  ;;  %v16370_v21 = vld [vmem:[#allocation137_spill] sm:$0xff] }
 0x39f   : > { %v3326_v22 = vmul.f32 %v16365_v38, %v16364_v44  ;;  %v3330_v3 = vmul.f32 %v16369_v12, %v16368_v28  ;;  %v3332_v48 = vmul.f32 %v16371_v19, %v16370_v21  ;;  %v16372_v15 = vld [vmem:[#allocation309_spill] sm:$0xff]  ;;  %v16376_v43 = vld [vmem:[#allocation184_spill] sm:$0xff]  ;;  %v16379_v37 = vld [vmem:[#allocation138_spill] sm:$0xff] }
 0x3a0   : > { %v3334_v46 = vmul.f32 %v16373_v26, %v16372_v15  ;;  %v16374_v50 = vld [vmem:[#allocation357_spill] sm:$0xff]  ;;  %v3472_v36 = vadd.s32 8, %v16376_v43  ;;  %v3473_v44 = vadd.s32 16, %v16376_v43  ;;  %v11316_v32 = vadd.s32 24, %v16376_v43  ;;  %v16381_v28 = vld [vmem:[#allocation359_spill] sm:$0xff]  ;;  %v16384_v21 = vld [vmem:[#allocation404_spill] sm:$0xff] }
 0x3a1   : > { %v3336_v5 = vmul.f32 %v16375_v16, %v16374_v50  ;;  %v11319_v38 = vadd.s32 32, %v16376_v43  ;;  %v11324_v19 = vsel %vm3341_vm7, %v16379_v37, 0.0  ;;  %v11329_v26 = vsel %vm3341_vm7, %v16381_v28, 0.0  ;;  %v16383_v16 = vld [vmem:[#allocation141_spill] sm:$0xff]  ;;  %v16385_v50 = vld [vmem:[#allocation178_spill] sm:$0xff] }
 0x3a2   : > { %16377 = vst [vmem:[#allocation231_spill] sm:$0xff] %v11316_v32  ;;  %16380 = vst [vmem:[#allocation476_spill] sm:$0xff] %v11324_v19  ;;  %v3377_v12 = vsel %vm3341_vm7, %v16383_v16, 0.0  ;;  %v3379_v15 = vsel %vm3341_vm7, %v16384_v21, 0.0  ;;  %v16386_v32 = vld [vmem:[#allocation180_spill] sm:$0xff]  ;;  %v16387_v19 = vld [vmem:[#allocation182_spill] sm:$0xff] }
 0x3a3   : > { %16378 = vst [vmem:[#allocation379_spill] sm:$0xff] %v11319_v38  ;;  %16382 = vst [vmem:[#allocation159_spill] sm:$0xff] %v11329_v26  ;;  %v3381_v38 = vsel %vm3341_vm7, %v16385_v50, 0.0  ;;  %v3383_v37 = vsel %vm3341_vm7, %v16386_v32, 0.0  ;;  %v3385_v28 = vsel %vm3341_vm7, %v16387_v19, 0.0  ;;  %v16388_v26 = vld [vmem:[#allocation186_spill] sm:$0xff] }
 0x3a4   : > { %v3387_v16 = vsel %vm3341_vm7, %v16388_v26, 0.0  ;;  %v3389_v21 = vsel %vm3341_vm7, %v16389_v31, 0.0  ;;  %v3391_v50 = vsel %vm3341_vm7, %v16390_v8, 0.0  ;;  %v11358_v32 = vsel %vm3341_vm7, %v16391_v7, 0.0 }
 0x3a5   : > { %v11363_v19 = vsel %vm3341_vm7, %v16392_v20, 0.0  ;;  %v11368_v26 = vsel %vm3341_vm7, %v16393_v6, 0.0  ;;  %v11372_v31 = vsel %vm3341_vm7, %v3266_v52, 0.0  ;;  %v11376_v8 = vsel %vm3341_vm7, %v3268_v29, 0.0 }
 0x3a6   : > { %v11380_v7 = vsel %vm3341_vm7, %v3270_v53, 0.0  ;;  %v11384_v20 = vsel %vm3341_vm7, %v3272_v18, 0.0  ;;  %v11388_v6 = vsel %vm3341_vm7, %v3274_v0, 0.0  ;;  %v11392_v52 = vsel %vm3341_vm7, %v3276_v39, 0.0 }
 0x3a7   : > { %v11396_v29 = vsel %vm3341_vm7, %v3278_v9, 0.0  ;;  %v11400_v53 = vsel %vm3341_vm7, %v3280_v62, 0.0  ;;  %v11404_v18 = vsel %vm3341_vm7, %v3282_v47, 0.0  ;;  %v11408_v0 = vsel %vm3341_vm7, %v3284_v35, 0.0 }
 0x3a8   : > { %v11412_v39 = vsel %vm3341_vm7, %v3286_v23, 0.0  ;;  %v11416_v9 = vsel %vm3341_vm7, %v3288_v45, 0.0  ;;  %v11420_v62 = vsel %vm3341_vm7, %v3290_v56, 0.0  ;;  %v11424_v47 = vsel %vm3341_vm7, %v3292_v2, 0.0 }
 0x3a9   : > { %v11428_v35 = vsel %vm3341_vm7, %v3294_v24, 0.0  ;;  %v11432_v23 = vsel %vm3341_vm7, %v3296_v33, 0.0  ;;  %v11436_v45 = vsel %vm3341_vm7, %v3298_v1, 0.0  ;;  %v11440_v56 = vsel %vm3341_vm7, %v3300_v34, 0.0 }
 0x3aa   : > { %v11444_v2 = vsel %vm3341_vm7, %v3302_v63, 0.0  ;;  %v11448_v24 = vsel %vm3341_vm7, %v3304_v10, 0.0  ;;  %v11452_v33 = vsel %vm3341_vm7, %v3306_v25, 0.0  ;;  %v11456_v1 = vsel %vm3341_vm7, %v3308_v57, 0.0 }
 0x3ab   : > { %v11460_v34 = vsel %vm3341_vm7, %v3310_v51, 0.0  ;;  %v11464_v63 = vsel %vm3341_vm7, %v3312_v11, 0.0  ;;  %v11468_v10 = vsel %vm3341_vm7, %v3314_v4, 0.0  ;;  %v11472_v25 = vsel %vm3341_vm7, %v3316_v17, 0.0 }
 0x3ac   : > { %v11476_v57 = vsel %vm3341_vm7, %v3318_v30, 0.0  ;;  %v11480_v51 = vsel %vm3341_vm7, %v3320_v40, 0.0  ;;  %v11484_v11 = vsel %vm3341_vm7, %v3322_v60, 0.0  ;;  %v11488_v4 = vsel %vm3341_vm7, %v3324_v13, 0.0 }
 0x3ad   : > { %v11492_v17 = vsel %vm3341_vm7, %v3326_v22, 0.0  ;;  %v11496_v30 = vsel %vm3341_vm7, %v3328_v61, 0.0  ;;  %v11500_v40 = vsel %vm3341_vm7, %v3330_v3, 0.0  ;;  %v11504_v60 = vsel %vm3341_vm7, %v3332_v48, 0.0 }
 0x3ae   : > { %16394 = vst [vmem:[#allocation233_spill] sm:$0xff] %v11496_v30  ;;  %v11508_v13 = vsel %vm3341_vm7, %v3334_v46, 0.0  ;;  %v11512_v22 = vsel %vm3341_vm7, %v3336_v5, 0.0  ;;  %v11516_v61 = vadd.s32 %v11048_v59, %v16376_v43  ;;  %v11519_v30 = vadd.s32 %v11048_v59, %v3472_v36  ;;  %v16397_v46 = vld [vmem:[#allocation289_spill] sm:$0xff]  ;;  %v16400_v43 = vld [vmem:[#allocation16_spill] sm:$0xff] }
 0x3af   : > { %v11522_v3 = vadd.s32 %v11048_v59, %v3473_v44  ;;  %v11532_v48 = vsel %vm3618_vm9, %v3377_v12, 0.0  ;;  %v11536_v36 = vsel %vm3619_vm10, %v3379_v15, 0.0  ;;  %vm13855_vm15 = vcmp.lt.s32.totalorder %v16397_v46, 1200  ;;  %v16401_v12 = vld [vmem:[#allocation372_spill] sm:$0xff] }
 0x3b0   : > { %16395 = vst [vmem:[#allocation477_spill] sm:$0xff] %v11532_v48  ;;  %16396 = vst [vmem:[#allocation478_spill] sm:$0xff] %v11536_v36  ;;  %v11542_v5 = vsel %vm3620_vm3, %v3381_v38, 0.0  ;;  %v11546_v44 = vsel %vm3621_vm2, %v3383_v37, 0.0  ;;  %vm13854_vm6 = vcmp.lt.s32.totalorder %v16400_v43, 1200  ;;  %vm13857_vm4 = vcmp.lt.s32.totalorder %v16401_v12, 1200 }
 0x3b1   : > { %16398 = vst [vmem:[#allocation479_spill] sm:$0xff] %v11542_v5  ;;  %16399 = vst [vmem:[#allocation235_spill] sm:$0xff] %v11546_v44  ;;  %v11552_v15 = vsel %vm13873_vm11, %v3385_v28, 0.0  ;;  %v11556_v36 = vsel %vm13867_vm13, %v3387_v16, 0.0  ;;  %v16403_v48 = vld [vmem:[#allocation18_spill] sm:$0xff]  ;;  %v16404_v38 = vld [vmem:[#allocation363_spill] sm:$0xff] }
 0x3b2   : > { %16402 = vst [vmem:[#allocation480_spill] sm:$0xff] %v11556_v36  ;;  %vm13856_vm12 = vcmp.lt.s32.totalorder %v16403_v48, 1200  ;;  %vm13859_vm0 = vcmp.lt.s32.totalorder %v16404_v38, 1200  ;;  %v11562_v37 = vsel %vm13853_vm14, %v3389_v21, 0.0  ;;  %v11566_v44 = vsel %vm13855_vm15, %v3391_v50, 0.0  ;;  %v16407_v5 = vld [vmem:[#allocation442_spill] sm:$0xff] }
 0x3b3   : > { %16405 = vst [vmem:[#allocation388_spill] sm:$0xff] %v11562_v37  ;;  %16406 = vst [vmem:[#allocation389_spill] sm:$0xff] %v11566_v44  ;;  %vm13858_vm8 = vcmp.lt.s32.totalorder %v16407_v5, 1200  ;;  %v16408_v28 = vld [vmem:[#allocation419_spill] sm:$0xff]  ;;  %v11573_v16 = vsel %vm13854_vm6, %v11358_v32, 0.0  ;;  %v11578_v36 = vsel %vm13857_vm4, %v11363_v19, 0.0 }
 0x3b4   : > { %vm13861_vm1 = vcmp.lt.s32.totalorder %v16408_v28, 1200  ;;  %16409 = vst [vmem:[#allocation237_spill] sm:$0xff] %v11573_v16  ;;  %16410 = vst [vmem:[#allocation481_spill] sm:$0xff] %v11578_v36  ;;  %v16411_v21 = vld [vmem:[#allocation20_spill] sm:$0xff]  ;;  %v16412_v37 = vld [vmem:[#allocation345_spill] sm:$0xff]  ;;  %v11585_v50 = vsel %vm13856_vm12, %v11368_v26, 0.0 }
 0x3b5   : > { %vm13860_vm5 = vcmp.lt.s32.totalorder %v16411_v21, 1200  ;;  %vm13862_vm14 = vcmp.lt.s32.totalorder %v16412_v37, 1200  ;;  %16413 = vst [vmem:[#allocation391_spill] sm:$0xff] %v11585_v50  ;;  %v11590_v44 = vsel %vm13859_vm0, %v11372_v31, 0.0  ;;  %v16415_v32 = vld [vmem:[#allocation443_spill] sm:$0xff]  ;;  %v16416_v16 = vld [vmem:[#allocation424_spill] sm:$0xff] }
 0x3b6   : > { %16414 = vst [vmem:[#allocation482_spill] sm:$0xff] %v11590_v44  ;;  %vm13863_vm6 = vcmp.lt.s32.totalorder %v16415_v32, 1200  ;;  %vm13864_vm15 = vcmp.lt.s32.totalorder %v16416_v16, 1200  ;;  %v11597_v19 = vsel %vm13858_vm8, %v11376_v8, 0.0  ;;  %v11602_v36 = vsel %vm13861_vm1, %v11380_v7, 0.0  ;;  %v16419_v26 = vld [vmem:[#allocation91_spill] sm:$0xff] }
 0x3b7   : > { %16417 = vst [vmem:[#allocation23_spill] sm:$0xff] %v11597_v19  ;;  %16418 = vst [vmem:[#allocation483_spill] sm:$0xff] %v11602_v36  ;;  %vm13866_vm12 = vcmp.lt.s32.totalorder %v16419_v26, 1200  ;;  %v16420_v50 = vld [vmem:[#allocation366_spill] sm:$0xff]  ;;  %v11609_v31 = vsel %vm13860_vm5, %v11384_v20, 0.0  ;;  %v11614_v44 = vsel %vm13862_vm14, %v11388_v6, 0.0 }
 0x3b8   : > { %vm13868_vm4 = vcmp.lt.s32.totalorder %v16420_v50, 1200  ;;  %16421 = vst [vmem:[#allocation393_spill] sm:$0xff] %v11614_v44  ;;  %v16422_v8 = vld [vmem:[#allocation472_spill] sm:$0xff]  ;;  %v16423_v19 = vld [vmem:[#allocation205_spill] sm:$0xff]  ;;  %v11621_v7 = vsel %vm13863_vm6, %v11392_v52, 0.0  ;;  %v11626_v36 = vsel %vm13864_vm15, %v11396_v29, 0.0 }
 0x3b9   : > { %vm13869_vm8 = vcmp.lt.s32.totalorder %v16422_v8, 1200  ;;  %vm13870_vm0 = vcmp.lt.s32.totalorder %v16423_v19, 1200  ;;  %16424 = vst [vmem:[#allocation484_spill] sm:$0xff] %v11621_v7  ;;  %16425 = vst [vmem:[#allocation24_spill] sm:$0xff] %v11626_v36  ;;  %vm3601_vm5 = vcmp.lt.s32.totalorder %v11516_v61, 1200  ;;  %v16426_v20 = vld [vmem:[#allocation347_spill] sm:$0xff] }
 0x3ba   : > { %vm13872_vm1 = vcmp.lt.s32.totalorder %v16426_v20, 1200  ;;  %v16427_v6 = vld [vmem:[#allocation447_spill] sm:$0xff]  ;;  %v11634_v44 = vsel %vm13866_vm12, %v11400_v53, 0.0  ;;  %v11639_v52 = vsel %vm13868_vm4, %v11404_v18, 0.0  ;;  %v16429_v7 = vld [vmem:[#allocation376_spill] sm:$0xff]  ;;  %v11646_v36 = vsel %vm13869_vm8, %v11408_v0, 0.0 }
 0x3bb   : > { %vm13875_vm14 = vcmp.lt.s32.totalorder %v16427_v6, 1200  ;;  %16428 = vst [vmem:[#allocation485_spill] sm:$0xff] %v11639_v52  ;;  %vm13874_vm6 = vcmp.lt.s32.totalorder %v16429_v7, 1200  ;;  %v16430_v29 = vld [vmem:[#allocation215_spill] sm:$0xff]  ;;  %16431 = vst [vmem:[#allocation268_spill] sm:$0xff] %v11646_v36  ;;  %v11651_v26 = vsel %vm13870_vm0, %v11412_v39, 0.0 }
 0x3bc   : > { %vm13877_vm15 = vcmp.lt.s32.totalorder %v16430_v29, 1200  ;;  %16432 = vst [vmem:[#allocation487_spill] sm:$0xff] %v11651_v26  ;;  %vm3602_vm12 = vcmp.lt.s32.totalorder %v11519_v30, 1200  ;;  %v16433_v53 = vld [vmem:[#allocation451_spill] sm:$0xff]  ;;  %v11659_v52 = vsel %vm13872_vm1, %v11416_v9, 0.0  ;;  %v11664_v0 = vsel %vm13875_vm14, %v11420_v62, 0.0 }
 0x3bd   : > { %vm13876_vm13 = vcmp.lt.s32.totalorder %v16433_v53, 1200  ;;  %v16434_v18 = vld [vmem:[#allocation435_spill] sm:$0xff]  ;;  %16435 = vst [vmem:[#allocation243_spill] sm:$0xff] %v11659_v52  ;;  %16436 = vst [vmem:[#allocation486_spill] sm:$0xff] %v11664_v0  ;;  %v16437_v36 = vld [vmem:[#allocation121_spill] sm:$0xff]  ;;  %v11671_v26 = vsel %vm13874_vm6, %v11424_v47, 0.0 }
 0x3be   : > { %vm13879_vm4 = vcmp.lt.s32.totalorder %v16434_v18, 1200  ;;  %vm13878_vm8 = vcmp.lt.s32.totalorder %v16437_v36, 1200  ;;  %v16438_v39 = vld [vmem:[#allocation369_spill] sm:$0xff]  ;;  %16439 = vst [vmem:[#allocation488_spill] sm:$0xff] %v11671_v26  ;;  %v11676_v20 = vsel %vm13877_vm15, %v11428_v35, 0.0  ;;  %v16441_v9 = vld [vmem:[#allocation440_spill] sm:$0xff] }
 0x3bf   : > { %vm13881_vm0 = vcmp.lt.s32.totalorder %v16438_v39, 1200  ;;  %16440 = vst [vmem:[#allocation397_spill] sm:$0xff] %v11676_v20  ;;  %vm13880_vm1 = vcmp.lt.s32.totalorder %v16441_v9, 1200  ;;  %v16442_v52 = vld [vmem:[#allocation223_spill] sm:$0xff]  ;;  %v11683_v62 = vsel %vm13876_vm13, %v11432_v23, 0.0  ;;  %v11688_v0 = vsel %vm13879_vm4, %v11436_v45, 0.0 }
 0x3c0   : > { %vm13883_vm11 = vcmp.lt.s32.totalorder %v16442_v52, 1200  ;;  %16443 = vst [vmem:[#allocation245_spill] sm:$0xff] %v11683_v62  ;;  %16444 = vst [vmem:[#allocation490_spill] sm:$0xff] %v11688_v0  ;;  %v16445_v47 = vld [vmem:[#allocation337_spill] sm:$0xff]  ;;  %v16446_v26 = vld [vmem:[#allocation460_spill] sm:$0xff]  ;;  %v11695_v35 = vsel %vm13878_vm8, %v11440_v56, 0.0 }
 0x3c1   : > { %vm13882_vm6 = vcmp.lt.s32.totalorder %v16445_v47, 1200  ;;  %vm13885_vm14 = vcmp.lt.s32.totalorder %v16446_v26, 1200  ;;  %16447 = vst [vmem:[#allocation489_spill] sm:$0xff] %v11695_v35  ;;  %v11700_v20 = vsel %vm13881_vm0, %v11444_v2, 0.0  ;;  %v16449_v23 = vld [vmem:[#allocation444_spill] sm:$0xff]  ;;  %v16450_v62 = vld [vmem:[#allocation225_spill] sm:$0xff] }
 0x3c2   : > { %16448 = vst [vmem:[#allocation491_spill] sm:$0xff] %v11700_v20  ;;  %vm13884_vm13 = vcmp.lt.s32.totalorder %v16449_v23, 1200  ;;  %vm3653_vm15 = vcmp.lt.s32.totalorder %v16450_v62, 1200  ;;  %v11707_v45 = vsel %vm13880_vm1, %v11448_v24, 0.0  ;;  %v11712_v0 = vsel %vm13883_vm11, %v11452_v33, 0.0  ;;  %v16453_v56 = vld [vmem:[#allocation428_spill] sm:$0xff] }
 0x3c3   : > { %16451 = vst [vmem:[#allocation247_spill] sm:$0xff] %v11707_v45  ;;  %16452 = vst [vmem:[#allocation400_spill] sm:$0xff] %v11712_v0  ;;  %vm3654_vm8 = vcmp.lt.s32.totalorder %v16453_v56, 1200  ;;  %v16454_v35 = vld [vmem:[#allocation429_spill] sm:$0xff]  ;;  %v11719_v2 = vsel %vm13882_vm6, %v11456_v1, 0.0  ;;  %v11724_v20 = vsel %vm13885_vm14, %v11460_v34, 0.0 }
 0x3c4   : > { %vm3655_vm4 = vcmp.lt.s32.totalorder %v16454_v35, 1200  ;;  %16455 = vst [vmem:[#allocation492_spill] sm:$0xff] %v11719_v2  ;;  %16456 = vst [vmem:[#allocation402_spill] sm:$0xff] %v11724_v20  ;;  %v16457_v24 = vld [vmem:[#allocation382_spill] sm:$0xff]  ;;  %v16458_v45 = vld [vmem:[#allocation227_spill] sm:$0xff]  ;;  %v11731_v33 = vsel %vm13884_vm13, %v11464_v63, 0.0 }
 0x3c5   : > { %vm13888_vm1 = vcmp.lt.s32.totalorder %v16457_v24, 1200  ;;  %vm13887_vm0 = vcmp.lt.s32.totalorder %v16458_v45, 1200  ;;  %16459 = vst [vmem:[#allocation50_spill] sm:$0xff] %v11731_v33  ;;  %v11736_v0 = vsel %vm3653_vm15, %v11468_v10, 0.0  ;;  %v16461_v1 = vld [vmem:[#allocation473_spill] sm:$0xff]  ;;  %v16462_v2 = vld [vmem:[#allocation471_spill] sm:$0xff] }
 0x3c6   : > { %16460 = vst [vmem:[#allocation493_spill] sm:$0xff] %v11736_v0  ;;  %vm3658_vm6 = vcmp.lt.s32.totalorder %v16461_v1, 1200  ;;  %vm3659_vm11 = vcmp.lt.s32.totalorder %v16462_v2, 1200  ;;  %v11743_v34 = vsel %vm3654_vm8, %v11472_v25, 0.0  ;;  %v11748_v20 = vsel %vm3655_vm4, %v11476_v57, 0.0  ;;  %v16465_v63 = vld [vmem:[#allocation256_spill] sm:$0xff] }
 0x3c7   : > { %16463 = vst [vmem:[#allocation494_spill] sm:$0xff] %v11743_v34  ;;  %16464 = vst [vmem:[#allocation495_spill] sm:$0xff] %v11748_v20  ;;  %vm13915_vm13 = vcmp.lt.s32.totalorder %v16465_v63, 1200  ;;  %v16466_v33 = vld [vmem:[#allocation229_spill] sm:$0xff]  ;;  %v11755_v10 = vsel %vm13888_vm1, %v11480_v51, 0.0  ;;  %v11760_v0 = vsel %vm13887_vm0, %v11484_v11, 0.0 }
 0x3c8   : > { %vm13889_vm14 = vcmp.lt.s32.totalorder %v16466_v33, 1200  ;;  %16467 = vst [vmem:[#allocation55_spill] sm:$0xff] %v11755_v10  ;;  %16468 = vst [vmem:[#allocation496_spill] sm:$0xff] %v11760_v0  ;;  %v16469_v25 = vld [vmem:[#allocation93_spill] sm:$0xff]  ;;  %v16470_v57 = vld [vmem:[#allocation476_spill] sm:$0xff]  ;;  %v11771_v35 = vsel %vm3658_vm6, %v11488_v4, 0.0 }
 0x3c9   : > { %v3665_v34 = vsel %vm3601_vm5, %v16469_v25, 0.0  ;;  %v3666_v20 = vsel %vm3601_vm5, %v16470_v57, 0.0  ;;  %16471 = vst [vmem:[#allocation277_spill] sm:$0xff] %v11771_v35  ;;  %v11776_v51 = vsel %vm3659_vm11, %v11492_v17, 0.0  ;;  %v16473_v11 = vld [vmem:[#allocation475_spill] sm:$0xff]  ;;  %v16474_v0 = vld [vmem:[#allocation474_spill] sm:$0xff] }
 0x3ca   : > { %16472 = vst [vmem:[#allocation497_spill] sm:$0xff] %v11776_v51  ;;  %vm13892_vm0 = vcmp.lt.s32.totalorder %v16473_v11, 1200  ;;  %vm13896_vm1 = vcmp.lt.s32.totalorder %v16474_v0, 1200  ;;  %v16475_v10 = vld [vmem:[#allocation233_spill] sm:$0xff]  ;;  %v11788_v61 = vsel %vm13889_vm14, %v11500_v40, 0.0  ;;  %v16479_v57 = vld [vmem:[#allocation310_spill] sm:$0xff] }
 0x3cb   : > { %v11783_v25 = vsel %vm13915_vm13, %v16475_v10, 0.0  ;;  %16477 = vst [vmem:[#allocation498_spill] sm:$0xff] %v11788_v61  ;;  %v16478_v4 = vld [vmem:[#allocation453_spill] sm:$0xff]  ;;  %v3667_v17 = vsel %vm3602_vm12, %v16479_v57, 0.0  ;;  %v11797_v51 = vsel %vm13892_vm0, %v11504_v60, 0.0  ;;  %v11802_v10 = vsel %vm13896_vm1, %v11508_v13, 0.0 }
 0x3cc   : > { %16476 = vst [vmem:[#allocation61_spill] sm:$0xff] %v11783_v25  ;;  %vm13913_vm5 = vcmp.lt.s32.totalorder %v16478_v4, 1200  ;;  %16480 = vst [vmem:[#allocation499_spill] sm:$0xff] %v11797_v51  ;;  %v16482_v25 = vld [vmem:[#allocation231_spill] sm:$0xff]  ;;  %vm3603_vm14 = vcmp.lt.s32.totalorder %v11522_v3, 1200  ;;  %v3793_v57 = vadd.f32 %v3666_v20, %v3665_v34  ;;  %v16484_v33 = vld [vmem:[#allocation144_spill] sm:$0xff] }
 0x3cd   : > { %16481 = vst [vmem:[#allocation406_spill] sm:$0xff] %v11802_v10  ;;  %v3540_v40 = vadd.s32 %v11048_v59, %v16482_v25  ;;  %v11810_v61 = vsel %vm13913_vm5, %v11512_v22, 0.0  ;;  %v16485_v11 = vmax.f32 %v16484_v33, 0.0  ;;  %v16486_v60 = vld [vmem:[#allocation313_spill] sm:$0xff]  ;;  %v16489_v63 = vld [vmem:[#allocation459_spill] sm:$0xff]  ;;  %v16493_v2 = vld [vmem:[#allocation452_spill] sm:$0xff] }
 0x3ce   : > { %16483 = vst [vmem:[#allocation67_spill] sm:$0xff] %v11810_v61  ;;  %vm16487_vm0 = vnez %v16486_v60  ;;  %v16488_v51 = vld [vmem:[#allocation365_spill] sm:$0xff]  ;;  %vm16494_vm1 = vnez %v16493_v2  ;;  %v16495_v25 = vld [vmem:[#allocation367_spill] sm:$0xff]  ;;  %v16498_v4 = vld [vmem:[#allocation342_spill] sm:$0xff] }
 0x3cf   : > { %v16490_v0 = vsel %vm16487_vm0, %v16488_v51, %v16489_v63  ;;  %v16491_v10 = vld [vmem:[#allocation145_spill] sm:$0xff]  ;;  %v2964_v22 = vmul.f32 0.75, %v16498_v4  ;;  %v16499_v61 = vld [vmem:[#allocation159_spill] sm:$0xff]  ;;  %v16504_v51 = vld [vmem:[#allocation140_spill] sm:$0xff] }
 0x3d0   : > { %v2837_v13 = vadd.f32 %v16490_v0, %v16485_v11  ;;  %v16492_v35 = vmax.f32 %v16491_v10, 0.0  ;;  %v16496_v1 = vld [vmem:[#allocation281_spill] sm:$0xff]  ;;  %v3668_v20 = vsel %vm3602_vm12, %v16499_v61, 0.0  ;;  %v16501_v34 = vld [vmem:[#allocation75_spill] sm:$0xff]  ;;  %v3347_v2 = vsel %vm3341_vm7, %v16504_v51, 0.0  ;;  %v16510_v61 = vld [vmem:[#allocation458_spill] sm:$0xff] }
 0x3d1   : > { %v16497_v45 = vsel %vm16494_vm1, %v16495_v25, %v16496_v1  ;;  %v16500_v33 = vld [vmem:[#allocation9_spill] sm:$0xff]  ;;  %v16502_v56 = vld [vmem:[#allocation343_spill] sm:$0xff]  ;;  %v3794_v11 = vadd.f32 %v3793_v57, %v3667_v17  ;;  %v16511_v23 = vld [vmem:[#allocation184_spill] sm:$0xff]  ;;  %vm3604_vm12 = vcmp.lt.s32.totalorder %v3540_v40, 1200 }
 0x3d2   : > { %v2838_v24 = vadd.f32 %v16497_v45, %v16492_v35  ;;  %v3090_v60 = vmul.f32 %v16501_v34, %v16500_v33  ;;  %v16503_v63 = vld [vmem:[#allocation71_spill] sm:$0xff]  ;;  %v16505_v10 = vld [vmem:[#allocation301_spill] sm:$0xff]  ;;  %v16506_v35 = vld [vmem:[#allocation446_spill] sm:$0xff]  ;;  %v3669_v33 = vsel %vm3603_vm14, %v16510_v61, 0.0  ;;  %v3476_v26 = vadd.s32 40, %v16511_v23 }
 0x3d3   : > { %v3216_v0 = vmul.f32 %v16503_v63, %v16502_v56  ;;  %v2963_v1 = vmul.f32 0.75, %v16505_v10  ;;  %v16507_v45 = vld [vmem:[#allocation72_spill] sm:$0xff]  ;;  %v16508_v25 = vld [vmem:[#allocation191_spill] sm:$0xff]  ;;  %v16509_v62 = vld [vmem:[#allocation69_spill] sm:$0xff]  ;;  %v3795_v51 = vadd.f32 %v3794_v11, %v3668_v20  ;;  %v3670_v20 = vsel %vm3603_vm14, %v3347_v2, 0.0 }
 0x3d4   : > { %v3089_v4 = vmul.f32 %v16507_v45, %v16506_v35  ;;  %v3215_v30 = vmul.f32 %v16509_v62, %v16508_v25  ;;  %v16512_v56 = vld [vmem:[#allocation379_spill] sm:$0xff]  ;;  %v16513_v17 = vld [vmem:[#allocation148_spill] sm:$0xff]  ;;  %v16517_v47 = vld [vmem:[#allocation370_spill] sm:$0xff]  ;;  %v2966_v29 = vmul.f32 0.75, %v2838_v24  ;;  %v3542_v3 = vadd.s32 %v11048_v59, %v3476_v26 }
 0x3d5   : > { %v3541_v63 = vadd.s32 %v11048_v59, %v16512_v56  ;;  %v16514_v57 = vmax.f32 %v16513_v17, 0.0  ;;  %v16515_v10 = vld [vmem:[#allocation456_spill] sm:$0xff]  ;;  %v16518_v35 = vld [vmem:[#allocation461_spill] sm:$0xff]  ;;  %v16525_v36 = vld [vmem:[#allocation410_spill] sm:$0xff]  ;;  %v3218_v17 = vmul.f32 %v16501_v34, %v3090_v60 }
 0x3d6   : > { %vm16516_vm0 = vnez %v16515_v10  ;;  %v16520_v62 = vld [vmem:[#allocation149_spill] sm:$0xff]  ;;  %v16527_v11 = vld [vmem:[#allocation79_spill] sm:$0xff]  ;;  %v16528_v10 = vld [vmem:[#allocation76_spill] sm:$0xff] }
 0x3d7   : > { %v16519_v52 = vsel %vm16516_vm0, %v16517_v47, %v16518_v35  ;;  %v16521_v25 = vmax.f32 %v16520_v62, 0.0  ;;  %v16522_v39 = vld [vmem:[#allocation457_spill] sm:$0xff]  ;;  %v3092_v56 = vmul.f32 %v16527_v11, %v2964_v22  ;;  %v3349_v47 = vsel %vm3341_vm7, %v3216_v0, 0.0  ;;  %v16529_v22 = vld [vmem:[#allocation152_spill] sm:$0xff]  ;;  %v16533_v60 = vld [vmem:[#allocation375_spill] sm:$0xff] }
 0x3d8   : > { %v2839_v9 = vadd.f32 %v16519_v52, %v16514_v57  ;;  %vm16523_vm1 = vnez %v16522_v39  ;;  %v16524_v61 = vld [vmem:[#allocation373_spill] sm:$0xff]  ;;  %v3796_v52 = vadd.f32 %v3795_v51, %v3669_v33  ;;  %v2965_v57 = vmul.f32 0.75, %v2837_v13  ;;  %v16534_v0 = vld [vmem:[#allocation462_spill] sm:$0xff] }
 0x3d9   : > { %v16526_v18 = vsel %vm16523_vm1, %v16524_v61, %v16525_v36  ;;  %v3091_v35 = vmul.f32 %v16528_v10, %v2963_v1  ;;  %v3217_v39 = vmul.f32 %v16507_v45, %v3089_v4  ;;  %v3671_v36 = vsel %vm3604_vm12, %v3215_v30, 0.0  ;;  %v16531_v34 = vld [vmem:[#allocation317_spill] sm:$0xff]  ;;  %v16538_v62 = vld [vmem:[#allocation198_spill] sm:$0xff]  ;;  %v16541_v4 = vld [vmem:[#allocation360_spill] sm:$0xff] }
 0x3da   : > { %v2840_v53 = vadd.f32 %v16526_v18, %v16521_v25  ;;  %v3477_v18 = vadd.s32 48, %v16511_v23  ;;  %vm3605_vm14 = vcmp.lt.s32.totalorder %v3541_v63, 1200  ;;  %v3797_v24 = vadd.f32 %v3796_v52, %v3670_v20  ;;  %v16536_v51 = vld [vmem:[#allocation153_spill] sm:$0xff]  ;;  %v16540_v45 = vld [vmem:[#allocation378_spill] sm:$0xff] }
 0x3db   : > { %v16530_v2 = vmax.f32 %v16529_v22, 0.0  ;;  %vm16532_vm0 = vnez %v16531_v34  ;;  %v16537_v1 = vmax.f32 %v16536_v51, 0.0  ;;  %vm16539_vm1 = vnez %v16538_v62  ;;  %v16543_v20 = vld [vmem:[#allocation85_spill] sm:$0xff] }
 0x3dc   : > { %v16535_v33 = vsel %vm16532_vm0, %v16533_v60, %v16534_v0  ;;  %v16542_v30 = vsel %vm16539_vm1, %v16540_v45, %v16541_v4  ;;  %v2968_v61 = vmul.f32 0.75, %v2840_v53  ;;  %v3672_v26 = vsel %vm3604_vm12, %v3349_v47, 0.0  ;;  %v16544_v0 = vld [vmem:[#allocation80_spill] sm:$0xff]  ;;  %v16554_v45 = vld [vmem:[#allocation201_spill] sm:$0xff] }
 0x3dd   : > { %v2841_v13 = vadd.f32 %v16535_v33, %v16530_v2  ;;  %v2842_v25 = vadd.f32 %v16542_v30, %v16537_v1  ;;  %v3094_v52 = vmul.f32 %v16543_v20, %v2966_v29  ;;  %v3220_v22 = vmul.f32 %v16527_v11, %v3092_v56  ;;  %v16545_v29 = vld [vmem:[#allocation156_spill] sm:$0xff]  ;;  %v16547_v11 = vld [vmem:[#allocation319_spill] sm:$0xff]  ;;  %v16549_v56 = vld [vmem:[#allocation381_spill] sm:$0xff] }
 0x3de   : > { %v3351_v34 = vsel %vm3341_vm7, %v3218_v17, 0.0  ;;  %v3798_v60 = vadd.f32 %v3797_v24, %v3671_v36  ;;  %v2967_v2 = vmul.f32 0.75, %v2839_v9  ;;  %v3093_v33 = vmul.f32 %v16544_v0, %v2965_v57  ;;  %v16550_v17 = vld [vmem:[#allocation362_spill] sm:$0xff]  ;;  %v16552_v24 = vld [vmem:[#allocation157_spill] sm:$0xff] }
 0x3df   : > { %v3219_v51 = vmul.f32 %v16528_v10, %v3091_v35  ;;  %v3673_v62 = vsel %vm3605_vm14, %v3217_v39, 0.0  ;;  %v3478_v1 = vadd.s32 56, %v16511_v23  ;;  %v3543_v53 = vadd.s32 %v11048_v59, %v3477_v18  ;;  %v16556_v10 = vld [vmem:[#allocation155_spill] sm:$0xff] }
 0x3e0   : > { %vm3606_vm12 = vcmp.lt.s32.totalorder %v3542_v3, 1200  ;;  %v3799_v40 = vadd.f32 %v3798_v60, %v3672_v26  ;;  %v16546_v47 = vmax.f32 %v16545_v29, 0.0  ;;  %vm16548_vm0 = vnez %v16547_v11  ;;  %v16557_v35 = vld [vmem:[#allocation43_spill] sm:$0xff] }
 0x3e1   : > { %v16551_v36 = vsel %vm16548_vm0, %v16549_v56, %v16550_v17  ;;  %v16553_v57 = vmax.f32 %v16552_v24, 0.0  ;;  %vm16555_vm1 = vnez %v16554_v45  ;;  %v2970_v30 = vmul.f32 0.75, %v2842_v25  ;;  %v16559_v26 = vld [vmem:[#allocation199_spill] sm:$0xff]  ;;  %v16560_v17 = vld [vmem:[#allocation197_spill] sm:$0xff] }
 0x3e2   : > { %v2843_v9 = vadd.f32 %v16551_v36, %v16546_v47  ;;  %v16558_v39 = vsel %vm16555_vm1, %v16556_v10, %v16557_v35  ;;  %v3674_v18 = vsel %vm3605_vm14, %v3351_v34, 0.0  ;;  %v3096_v60 = vmul.f32 %v16559_v26, %v2968_v61  ;;  %v16561_v61 = vld [vmem:[#allocation160_spill] sm:$0xff]  ;;  %v16570_v10 = vld [vmem:[#allocation322_spill] sm:$0xff] }
 0x3e3   : > { %v2844_v4 = vadd.f32 %v16558_v39, %v16553_v57  ;;  %v3222_v29 = vmul.f32 %v16543_v20, %v3094_v52  ;;  %v3353_v11 = vsel %vm3341_vm7, %v3220_v22, 0.0  ;;  %v3800_v56 = vadd.f32 %v3799_v40, %v3673_v62  ;;  %v16563_v20 = vld [vmem:[#allocation321_spill] sm:$0xff]  ;;  %v16565_v52 = vld [vmem:[#allocation384_spill] sm:$0xff]  ;;  %v16566_v22 = vld [vmem:[#allocation251_spill] sm:$0xff] }
 0x3e4   : > { %v2969_v47 = vmul.f32 0.75, %v2841_v13  ;;  %v3095_v36 = vmul.f32 %v16560_v17, %v2967_v2  ;;  %v3221_v24 = vmul.f32 %v16544_v0, %v3093_v33  ;;  %v3675_v45 = vsel %vm3606_vm12, %v3219_v51, 0.0  ;;  %v16568_v40 = vld [vmem:[#allocation161_spill] sm:$0xff]  ;;  %v16572_v0 = vld [vmem:[#allocation259_spill] sm:$0xff] }
 0x3e5   : > { %v3479_v57 = vadd.s32 64, %v16511_v23  ;;  %v3544_v63 = vadd.s32 %v11048_v59, %v3478_v1  ;;  %vm3607_vm14 = vcmp.lt.s32.totalorder %v3543_v53, 1200  ;;  %v3801_v25 = vadd.f32 %v3800_v56, %v3674_v18  ;;  %v16573_v33 = vld [vmem:[#allocation463_spill] sm:$0xff]  ;;  %v16575_v18 = vld [vmem:[#allocation97_spill] sm:$0xff] }
 0x3e6   : > { %v16562_v34 = vmax.f32 %v16561_v61, 0.0  ;;  %vm16564_vm0 = vnez %v16563_v20  ;;  %v16569_v2 = vmax.f32 %v16568_v40, 0.0  ;;  %vm16571_vm1 = vnez %v16570_v10 }
 0x3e7   : > { %v16567_v62 = vsel %vm16564_vm0, %v16565_v52, %v16566_v22  ;;  %v16574_v51 = vsel %vm16571_vm1, %v16572_v0, %v16573_v33  ;;  %v2972_v39 = vmul.f32 0.75, %v2844_v4  ;;  %v3676_v1 = vsel %vm3606_vm12, %v3353_v11, 0.0  ;;  %v16576_v22 = vld [vmem:[#allocation92_spill] sm:$0xff] }
 0x3e8   : > { %v2845_v13 = vadd.f32 %v16567_v62, %v16562_v34  ;;  %v2846_v35 = vadd.f32 %v16574_v51, %v16569_v2  ;;  %v3098_v56 = vmul.f32 %v16575_v18, %v2970_v30  ;;  %v3224_v61 = vmul.f32 %v16559_v26, %v3096_v60  ;;  %v16577_v30 = vld [vmem:[#allocation164_spill] sm:$0xff]  ;;  %v16579_v26 = vld [vmem:[#allocation202_spill] sm:$0xff]  ;;  %v16581_v60 = vld [vmem:[#allocation387_spill] sm:$0xff] }
 0x3e9   : > { %v3355_v20 = vsel %vm3341_vm7, %v3222_v29, 0.0  ;;  %v3802_v52 = vadd.f32 %v3801_v25, %v3675_v45  ;;  %v2971_v34 = vmul.f32 0.75, %v2843_v9  ;;  %v3097_v62 = vmul.f32 %v16576_v22, %v2969_v47  ;;  %v16582_v29 = vld [vmem:[#allocation464_spill] sm:$0xff]  ;;  %v16584_v25 = vld [vmem:[#allocation165_spill] sm:$0xff] }
 0x3ea   : > { %v3223_v40 = vmul.f32 %v16560_v17, %v3095_v36  ;;  %v3677_v10 = vsel %vm3607_vm14, %v3221_v24, 0.0  ;;  %v3480_v2 = vadd.s32 72, %v16511_v23  ;;  %v3545_v3 = vadd.s32 %v11048_v59, %v3479_v57  ;;  %v16586_v0 = vld [vmem:[#allocation324_spill] sm:$0xff]  ;;  %v16588_v17 = vld [vmem:[#allocation262_spill] sm:$0xff]  ;;  %v16589_v36 = vld [vmem:[#allocation465_spill] sm:$0xff] }
 0x3eb   : > { %vm3608_vm12 = vcmp.lt.s32.totalorder %v3544_v63, 1200  ;;  %v3803_v4 = vadd.f32 %v3802_v52, %v3676_v1  ;;  %v16578_v11 = vmax.f32 %v16577_v30, 0.0  ;;  %vm16580_vm0 = vnez %v16579_v26  ;;  %v16591_v1 = vld [vmem:[#allocation206_spill] sm:$0xff] }
 0x3ec   : > { %v16583_v45 = vsel %vm16580_vm0, %v16581_v60, %v16582_v29  ;;  %v16585_v47 = vmax.f32 %v16584_v25, 0.0  ;;  %vm16587_vm1 = vnez %v16586_v0  ;;  %v2974_v51 = vmul.f32 0.75, %v2846_v35  ;;  %v16592_v29 = vld [vmem:[#allocation203_spill] sm:$0xff] }
 0x3ed   : > { %v2847_v9 = vadd.f32 %v16583_v45, %v16578_v11  ;;  %v16590_v24 = vsel %vm16587_vm1, %v16588_v17, %v16589_v36  ;;  %v3678_v57 = vsel %vm3607_vm14, %v3355_v20, 0.0  ;;  %v3100_v52 = vmul.f32 %v16591_v1, %v2972_v39  ;;  %v16593_v39 = vld [vmem:[#allocation51_spill] sm:$0xff]  ;;  %v16602_v17 = vld [vmem:[#allocation292_spill] sm:$0xff] }
 0x3ee   : > { %v2848_v33 = vadd.f32 %v16590_v24, %v16585_v47  ;;  %v3226_v30 = vmul.f32 %v16575_v18, %v3098_v56  ;;  %v3357_v26 = vsel %vm3341_vm7, %v3224_v61, 0.0  ;;  %v3804_v60 = vadd.f32 %v3803_v4, %v3677_v10  ;;  %v16595_v18 = vld [vmem:[#allocation325_spill] sm:$0xff]  ;;  %v16597_v56 = vld [vmem:[#allocation167_spill] sm:$0xff]  ;;  %v16598_v61 = vld [vmem:[#allocation466_spill] sm:$0xff] }
 0x3ef   : > { %v2973_v11 = vmul.f32 0.75, %v2845_v13  ;;  %v3099_v45 = vmul.f32 %v16592_v29, %v2971_v34  ;;  %v3225_v25 = vmul.f32 %v16576_v22, %v3097_v62  ;;  %v3679_v0 = vsel %vm3608_vm12, %v3223_v40, 0.0  ;;  %v16600_v4 = vld [vmem:[#allocation168_spill] sm:$0xff]  ;;  %v16604_v22 = vld [vmem:[#allocation265_spill] sm:$0xff]  ;;  %v16605_v62 = vld [vmem:[#allocation467_spill] sm:$0xff] }
 0x3f0   : > { %v3481_v47 = vadd.s32 80, %v16511_v23  ;;  %v3546_v53 = vadd.s32 %v11048_v59, %v3480_v2  ;;  %vm3609_vm14 = vcmp.lt.s32.totalorder %v3545_v3, 1200  ;;  %v3805_v35 = vadd.f32 %v3804_v60, %v3678_v57  ;;  %v16607_v57 = vld [vmem:[#allocation210_spill] sm:$0xff] }
 0x3f1   : > { %v16594_v20 = vmax.f32 %v16593_v39, 0.0  ;;  %vm16596_vm0 = vnez %v16595_v18  ;;  %v16601_v34 = vmax.f32 %v16600_v4, 0.0  ;;  %vm16603_vm1 = vnez %v16602_v17 }
 0x3f2   : > { %v16599_v10 = vsel %vm16596_vm0, %v16597_v56, %v16598_v61  ;;  %v16606_v40 = vsel %vm16603_vm1, %v16604_v22, %v16605_v62  ;;  %v2976_v24 = vmul.f32 0.75, %v2848_v33  ;;  %v3680_v2 = vsel %vm3608_vm12, %v3357_v26, 0.0  ;;  %v16608_v61 = vld [vmem:[#allocation208_spill] sm:$0xff] }
 0x3f3   : > { %v2849_v13 = vadd.f32 %v16599_v10, %v16594_v20  ;;  %v2850_v36 = vadd.f32 %v16606_v40, %v16601_v34  ;;  %v3102_v60 = vmul.f32 %v16607_v57, %v2974_v51  ;;  %v3228_v39 = vmul.f32 %v16591_v1, %v3100_v52  ;;  %v16609_v51 = vld [vmem:[#allocation53_spill] sm:$0xff]  ;;  %v16611_v1 = vld [vmem:[#allocation358_spill] sm:$0xff]  ;;  %v16618_v22 = vld [vmem:[#allocation204_spill] sm:$0xff] }
 0x3f4   : > { %v3359_v18 = vsel %vm3341_vm7, %v3226_v30, 0.0  ;;  %v3806_v56 = vadd.f32 %v3805_v35, %v3679_v0  ;;  %v2975_v20 = vmul.f32 0.75, %v2847_v9  ;;  %v3101_v10 = vmul.f32 %v16608_v61, %v2973_v11  ;;  %v16613_v52 = vld [vmem:[#allocation81_spill] sm:$0xff]  ;;  %v16614_v30 = vld [vmem:[#allocation468_spill] sm:$0xff]  ;;  %v16616_v35 = vld [vmem:[#allocation170_spill] sm:$0xff] }
 0x3f5   : > { %v3227_v4 = vmul.f32 %v16592_v29, %v3099_v45  ;;  %v3681_v17 = vsel %vm3609_vm14, %v3225_v25, 0.0  ;;  %v3482_v34 = vadd.s32 88, %v16511_v23  ;;  %v3547_v63 = vadd.s32 %v11048_v59, %v3481_v47  ;;  %v16620_v29 = vld [vmem:[#allocation395_spill] sm:$0xff]  ;;  %v16621_v45 = vld [vmem:[#allocation469_spill] sm:$0xff] }
 0x3f6   : > { %vm3610_vm12 = vcmp.lt.s32.totalorder %v3546_v53, 1200  ;;  %v3807_v33 = vadd.f32 %v3806_v56, %v3680_v2  ;;  %v16610_v26 = vmax.f32 %v16609_v51, 0.0  ;;  %vm16612_vm0 = vnez %v16611_v1  ;;  %v16623_v2 = vld [vmem:[#allocation216_spill] sm:$0xff] }
 0x3f7   : > { %v16615_v0 = vsel %vm16612_vm0, %v16613_v52, %v16614_v30  ;;  %v16617_v11 = vmax.f32 %v16616_v35, 0.0  ;;  %vm16619_vm1 = vnez %v16618_v22  ;;  %v2978_v40 = vmul.f32 0.75, %v2850_v36  ;;  %v16624_v30 = vld [vmem:[#allocation213_spill] sm:$0xff] }
 0x3f8   : > { %v2851_v9 = vadd.f32 %v16615_v0, %v16610_v26  ;;  %v16622_v25 = vsel %vm16619_vm1, %v16620_v29, %v16621_v45  ;;  %v3682_v47 = vsel %vm3609_vm14, %v3359_v18, 0.0  ;;  %v3104_v56 = vmul.f32 %v16623_v2, %v2976_v24  ;;  %v16625_v24 = vld [vmem:[#allocation54_spill] sm:$0xff]  ;;  %v16634_v29 = vld [vmem:[#allocation207_spill] sm:$0xff] }
 0x3f9   : > { %v2852_v62 = vadd.f32 %v16622_v25, %v16617_v11  ;;  %v3230_v51 = vmul.f32 %v16607_v57, %v3102_v60  ;;  %v3361_v1 = vsel %vm3341_vm7, %v3228_v39, 0.0  ;;  %v3808_v52 = vadd.f32 %v3807_v33, %v3681_v17  ;;  %v16627_v57 = vld [vmem:[#allocation44_spill] sm:$0xff]  ;;  %v16629_v60 = vld [vmem:[#allocation87_spill] sm:$0xff]  ;;  %v16630_v39 = vld [vmem:[#allocation470_spill] sm:$0xff] }
 0x3fa   : > { %v2977_v26 = vmul.f32 0.75, %v2849_v13  ;;  %v3103_v0 = vmul.f32 %v16624_v30, %v2975_v20  ;;  %v3229_v35 = vmul.f32 %v16608_v61, %v3101_v10  ;;  %v3683_v22 = vsel %vm3610_vm12, %v3227_v4, 0.0  ;;  %v16632_v33 = vld [vmem:[#allocation172_spill] sm:$0xff]  ;;  %v16636_v61 = vld [vmem:[#allocation398_spill] sm:$0xff]  ;;  %v16637_v10 = vld [vmem:[#allocation263_spill] sm:$0xff] }
 0x3fb   : > { %v3483_v11 = vadd.s32 96, %v16511_v23  ;;  %v3548_v3 = vadd.s32 %v11048_v59, %v3482_v34  ;;  %vm3611_vm14 = vcmp.lt.s32.totalorder %v3547_v63, 1200  ;;  %v3809_v36 = vadd.f32 %v3808_v52, %v3682_v47  ;;  %v16639_v47 = vld [vmem:[#allocation220_spill] sm:$0xff] }
 0x3fc   : > { %v16626_v18 = vmax.f32 %v16625_v24, 0.0  ;;  %vm16628_vm0 = vnez %v16627_v57  ;;  %v16633_v20 = vmax.f32 %v16632_v33, 0.0  ;;  %vm16635_vm1 = vnez %v16634_v29 }
 0x3fd   : > { %v16631_v17 = vsel %vm16628_vm0, %v16629_v60, %v16630_v39  ;;  %v16638_v4 = vsel %vm16635_vm1, %v16636_v61, %v16637_v10  ;;  %v2980_v25 = vmul.f32 0.75, %v2852_v62  ;;  %v3684_v34 = vsel %vm3610_vm12, %v3361_v1, 0.0  ;;  %v16640_v39 = vld [vmem:[#allocation218_spill] sm:$0xff]  ;;  %v16650_v61 = vld [vmem:[#allocation333_spill] sm:$0xff] }
 0x3fe   : > { %v2853_v13 = vadd.f32 %v16631_v17, %v16626_v18  ;;  %v2854_v45 = vadd.f32 %v16638_v4, %v16633_v20  ;;  %v3106_v52 = vmul.f32 %v16639_v47, %v2978_v40  ;;  %v3232_v24 = vmul.f32 %v16623_v2, %v3104_v56  ;;  %v16641_v40 = vld [vmem:[#allocation56_spill] sm:$0xff]  ;;  %v16645_v56 = vld [vmem:[#allocation274_spill] sm:$0xff] }
 0x3ff   : > { %v3363_v57 = vsel %vm3341_vm7, %v3230_v51, 0.0  ;;  %v3810_v60 = vadd.f32 %v3809_v36, %v3683_v22  ;;  %v2979_v18 = vmul.f32 0.75, %v2851_v9  ;;  %v3105_v17 = vmul.f32 %v16640_v39, %v2977_v26  ;;  %v16643_v2 = vld [vmem:[#allocation332_spill] sm:$0xff]  ;;  %v16646_v51 = vld [vmem:[#allocation361_spill] sm:$0xff]  ;;  %v16648_v36 = vld [vmem:[#allocation174_spill] sm:$0xff] }
 0x400   : > { %v3231_v33 = vmul.f32 %v16624_v30, %v3103_v0  ;;  %v3685_v29 = vsel %vm3611_vm14, %v3229_v35, 0.0  ;;  %v3484_v20 = vadd.s32 104, %v16511_v23  ;;  %v3549_v53 = vadd.s32 %v11048_v59, %v3483_v11  ;;  %v16652_v30 = vld [vmem:[#allocation99_spill] sm:$0xff] }
 0x401   : > { %vm3612_vm12 = vcmp.lt.s32.totalorder %v3548_v3, 1200  ;;  %v3811_v62 = vadd.f32 %v3810_v60, %v3684_v34  ;;  %v16642_v1 = vmax.f32 %v16641_v40, 0.0  ;;  %vm16644_vm0 = vnez %v16643_v2  ;;  %v16653_v0 = vld [vmem:[#allocation439_spill] sm:$0xff]  ;;  %v16655_v34 = vld [vmem:[#allocation269_spill] sm:$0xff]  ;;  %v16659_v2 = vld [vmem:[#allocation222_spill] sm:$0xff] }
 0x402   : > { %v16647_v22 = vsel %vm16644_vm0, %v16645_v56, %v16646_v51  ;;  %v16649_v26 = vmax.f32 %v16648_v36, 0.0  ;;  %vm16651_vm1 = vnez %v16650_v61  ;;  %v2982_v4 = vmul.f32 0.75, %v2854_v45  ;;  %v16660_v61 = vld [vmem:[#allocation221_spill] sm:$0xff] }
 0x403   : > { %v2855_v9 = vadd.f32 %v16647_v22, %v16642_v1  ;;  %v16654_v35 = vsel %vm16651_vm1, %v16652_v30, %v16653_v0  ;;  %v3686_v11 = vsel %vm3611_vm14, %v3363_v57, 0.0  ;;  %v16656_v60 = vand.u32 2147483647, %v16655_v34  ;;  %v16670_v34 = vld [vmem:[#allocation175_spill] sm:$0xff] }
 0x404   : > { %v2856_v10 = vadd.f32 %v16654_v35, %v16649_v26  ;;  %v3108_v56 = vmul.f32 %v16659_v2, %v2980_v25  ;;  %v3234_v1 = vmul.f32 %v16639_v47, %v3106_v52  ;;  %v3365_v51 = vsel %vm3341_vm7, %v3232_v24, 0.0  ;;  %v16661_v25 = vld [vmem:[#allocation57_spill] sm:$0xff]  ;;  %v16663_v47 = vld [vmem:[#allocation166_spill] sm:$0xff] }
 0x405   : > { %vm12058_vm5 = vcmp.lt.f32.partialorder %v16656_v60, 0.0004427343  ;;  %v3812_v22 = vadd.f32 %v3811_v62, %v3685_v29  ;;  %v2981_v36 = vmul.f32 0.75, %v2853_v13  ;;  %v3107_v26 = vmul.f32 %v16660_v61, %v2979_v18  ;;  %v16665_v52 = vld [vmem:[#allocation278_spill] sm:$0xff]  ;;  %v16666_v24 = vld [vmem:[#allocation441_spill] sm:$0xff]  ;;  %v16668_v62 = vld [vmem:[#allocation176_spill] sm:$0xff] }
 0x406   : > { %v3233_v63 = vmul.f32 %v16640_v39, %v3105_v17  ;;  %v3687_v45 = vsel %vm3612_vm12, %v3231_v33, 0.0  ;;  %v3485_v57 = vadd.s32 112, %v16511_v23  ;;  %v3550_v30 = vadd.s32 %v11048_v59, %v3484_v20  ;;  %v16672_v39 = vld [vmem:[#allocation284_spill] sm:$0xff] }
 0x407   : > { %vm3613_vm14 = vcmp.lt.s32.totalorder %v3549_v53, 1200  ;;  %v3813_v0 = vadd.f32 %v3812_v22, %v3686_v11  ;;  %v16662_v35 = vmax.f32 %v16661_v25, 0.0  ;;  %vm16664_vm0 = vnez %v16663_v47  ;;  %v16673_v17 = vld [vmem:[#allocation272_spill] sm:$0xff]  ;;  %v16675_v11 = vld [vmem:[#allocation275_spill] sm:$0xff]  ;;  %v16679_v47 = vld [vmem:[#allocation226_spill] sm:$0xff] }
 0x408   : > { %v16667_v29 = vsel %vm16664_vm0, %v16665_v52, %v16666_v24  ;;  %v16669_v18 = vmax.f32 %v16668_v62, 0.0  ;;  %vm16671_vm1 = vnez %v16670_v34  ;;  %v2984_v7 = vmul.f32 0.75, %v2856_v10  ;;  %v16680_v34 = vld [vmem:[#allocation224_spill] sm:$0xff] }
 0x409   : > { %v2857_v13 = vadd.f32 %v16667_v29, %v16662_v35  ;;  %v16674_v33 = vsel %vm16671_vm1, %v16672_v39, %v16673_v17  ;;  %v3688_v20 = vsel %vm3612_vm12, %v3365_v51, 0.0  ;;  %v16676_v22 = vand.u32 2147483647, %v16675_v11  ;;  %v16684_v11 = vld [vmem:[#allocation257_spill] sm:$0xff] }
 0x40a   : > { %v2858_v60 = vadd.f32 %v16674_v33, %v16669_v18  ;;  %v3110_v52 = vmul.f32 %v16679_v47, %v2982_v4  ;;  %v3236_v35 = vmul.f32 %v16659_v2, %v3108_v56  ;;  %v3367_v24 = vsel %vm3341_vm7, %v3234_v1, 0.0  ;;  %v16681_v4 = vld [vmem:[#allocation431_spill] sm:$0xff]  ;;  %v16686_v1 = vld [vmem:[#allocation286_spill] sm:$0xff] }
 0x40b   : > { %vm12088_vm13 = vcmp.lt.f32.partialorder %v16676_v22, 0.0004427343  ;;  %v3814_v29 = vadd.f32 %v3813_v0, %v3687_v45  ;;  %v2983_v62 = vmul.f32 0.75, %v2855_v9  ;;  %v3109_v18 = vmul.f32 %v16680_v34, %v2981_v36  ;;  %v16682_v2 = vld [vmem:[#allocation59_spill] sm:$0xff]  ;;  %v16687_v9 = vld [vmem:[#allocation334_spill] sm:$0xff] }
 0x40c   : > { %v3235_v3 = vmul.f32 %v16660_v61, %v3107_v26  ;;  %v3689_v10 = vsel %vm3613_vm14, %v3233_v63, 0.0  ;;  %v3486_v51 = vadd.s32 120, %v16511_v23  ;;  %v3551_v39 = vadd.s32 %v11048_v59, %v3485_v57  ;;  %v16689_v26 = vld [vmem:[#allocation283_spill] sm:$0xff]  ;;  %v16693_v57 = vld [vmem:[#allocation230_spill] sm:$0xff] }
 0x40d   : > { %vm3614_vm12 = vcmp.lt.s32.totalorder %v3550_v30, 1200  ;;  %v3815_v17 = vadd.f32 %v3814_v29, %v3688_v20  ;;  %v2017_v33 = vmul.f32 0.6931472, %v16681_v4  ;;  %v16683_v56 = vmax.f32 %v16682_v2, 0.0 }
 0x40e   : > { %vm16685_vm0 = vnez %v16684_v11  ;;  %v2986_v0 = vmul.f32 0.75, %v2858_v60  ;;  %v3690_v61 = vsel %vm3613_vm14, %v3367_v24, 0.0  ;;  %v16690_v63 = vand.u32 2147483647, %v16689_v26  ;;  %v16704_v26 = vld [vmem:[#allocation234_spill] sm:$0xff] }
 0x40f   : > { %v16688_v45 = vsel %vm16685_vm0, %v16686_v1, %v16687_v9  ;;  %v3112_v20 = vmul.f32 %v16693_v57, %v2984_v7  ;;  %v3238_v29 = vmul.f32 %v16679_v47, %v3110_v52  ;;  %v3369_v4 = vsel %vm3341_vm7, %v3236_v35, 0.0  ;;  %v16694_v1 = vld [vmem:[#allocation228_spill] sm:$0xff]  ;;  %v16696_v52 = vld [vmem:[#allocation437_spill] sm:$0xff] }
 0x410   : > { %v2859_v36 = vadd.f32 %v16688_v45, %v16683_v56  ;;  %vm12112_vm1 = vcmp.lt.f32.partialorder %v16690_v63, 0.0004427343  ;;  %v3816_v2 = vadd.f32 %v3815_v17, %v3689_v10  ;;  %v2985_v11 = vmul.f32 0.75, %v2857_v13  ;;  %v16695_v7 = vld [vmem:[#allocation416_spill] sm:$0xff]  ;;  %v16705_v63 = vld [vmem:[#allocation335_spill] sm:$0xff] }
 0x411   : > { %v3111_v56 = vmul.f32 %v16694_v1, %v2983_v62  ;;  %v3237_v53 = vmul.f32 %v16680_v34, %v3109_v18  ;;  %v3691_v60 = vsel %vm3614_vm12, %v3235_v3, 0.0  ;;  %v3487_v24 = vadd.s32 128, %v16511_v23  ;;  %v16697_v10 = vld [vmem:[#allocation60_spill] sm:$0xff]  ;;  %v16701_v62 = vld [vmem:[#allocation413_spill] sm:$0xff]  ;;  %v16702_v34 = vld [vmem:[#allocation119_spill] sm:$0xff] }
 0x412   : > { %v3552_v9 = vadd.s32 %v11048_v59, %v3486_v51  ;;  %vm3615_vm14 = vcmp.lt.s32.totalorder %v3551_v39, 1200  ;;  %v3817_v45 = vadd.f32 %v3816_v2, %v3690_v61  ;;  %v2023_v47 = vsel %vm12058_vm5, %v16695_v7, %v2017_v33  ;;  %v16699_v17 = vld [vmem:[#allocation260_spill] sm:$0xff] }
 0x413   : > { %v2035_v35 = vmul.f32 0.6931472, %v16696_v52  ;;  %v16698_v13 = vmax.f32 %v16697_v10, 0.0  ;;  %vm16700_vm0 = vnez %v16699_v17  ;;  %v3692_v23 = vsel %vm3614_vm12, %v3369_v4, 0.0  ;;  %v16709_v10 = vld [vmem:[#allocation232_spill] sm:$0xff] }
 0x414   : > { %v16703_v18 = vsel %vm16700_vm0, %v16701_v62, %v16702_v34  ;;  %v3114_v51 = vmul.f32 %v16704_v26, %v2986_v0  ;;  %v3240_v61 = vmul.f32 %v16693_v57, %v3112_v20  ;;  %v3371_v40 = vsel %vm3341_vm7, %v3238_v29, 0.0  ;;  %v16710_v0 = vld [vmem:[#allocation280_spill] sm:$0xff]  ;;  %v16711_v29 = vld [vmem:[#allocation421_spill] sm:$0xff]  ;;  %v16713_v62 = vld [vmem:[#allocation434_spill] sm:$0xff] }
 0x415   : > { %v2861_v3 = vadd.f32 %v16703_v18, %v16698_v13  ;;  %v3818_v33 = vadd.f32 %v3817_v45, %v3691_v60  ;;  %v16706_v2 = vand.u32 2147483647, %v16705_v63  ;;  %v2987_v52 = vmul.f32 0.75, %v2859_v36  ;;  %v16712_v45 = vld [vmem:[#allocation266_spill] sm:$0xff]  ;;  %v16716_v34 = vld [vmem:[#allocation336_spill] sm:$0xff]  ;;  %v16723_v63 = vld [vmem:[#allocation427_spill] sm:$0xff] }
 0x416   : > { %v3113_v17 = vmul.f32 %v16709_v10, %v2985_v11  ;;  %v3239_v30 = vmul.f32 %v16694_v1, %v3111_v56  ;;  %v3693_v4 = vsel %vm3615_vm14, %v3237_v53, 0.0  ;;  %5130 = vpow2.f32 %v16710_v0  ;;  %v16714_v11 = vld [vmem:[#allocation62_spill] sm:$0xff]  ;;  %v16725_v0 = vld [vmem:[#allocation344_spill] sm:$0xff] }
 0x417   : > { %vm12143_vm5 = vcmp.lt.f32.partialorder %v16706_v2, 0.0004427343  ;;  %v3553_v57 = vadd.s32 %v11048_v59, %v3487_v24  ;;  %vm3616_vm12 = vcmp.lt.s32.totalorder %v3552_v9, 1200  ;;  %v3819_v20 = vadd.f32 %v3818_v33, %v3692_v23  ;;  %v16720_v23 = vld [vmem:[#allocation236_spill] sm:$0xff] }
 0x418   : > { %v2041_v60 = vsel %vm12088_vm13, %v16711_v29, %v2035_v35  ;;  %v2053_v13 = vmul.f32 0.6931472, %v16712_v45  ;;  %5132 = vlog2.f32 %v16713_v62  ;;  %v3694_v36 = vsel %vm3615_vm14, %v3371_v40, 0.0 }
 0x419   : > { %v16715_v1 = vmax.f32 %v16714_v11, 0.0  ;;  %v3242_v53 = vmul.f32 %v16704_v26, %v3114_v51  ;;  %v3373_v59 = vsel %vm3341_vm7, %v3240_v61, 0.0  ;;  %v3820_v24 = vadd.f32 %v3819_v20, %v3693_v4  ;;  %v16722_v26 = vld [vmem:[#allocation341_spill] sm:$0xff]  ;;  %v16724_v4 = vld [vmem:[#allocation438_spill] sm:$0xff]  ;;  %v16726_v20 = vld [vmem:[#allocation103_spill] sm:$0xff] }
 0x41a   : > { %v16717_v18 = vand.u32 2147483647, %v16716_v34  ;;  %v2989_v35 = vmul.f32 0.75, %v2861_v3  ;;  %v3115_v33 = vmul.f32 %v16720_v23, %v2987_v52  ;;  %v3241_v39 = vmul.f32 %v16709_v10, %v3113_v17  ;;  %v16727_v17 = vld [vmem:[#allocation63_spill] sm:$0xff] }
 0x41b   : > { %v2863_v56 = vadd.f32 %v2023_v47, %v16715_v1  ;;  %v3695_v40 = vsel %vm3616_vm12, %v3239_v30, 0.0  ;;  %v16721_v47 = vld [vmem:[#allocation107_spill] sm:$0xff]  ;;  %v2126_v51 = vmul.f32 -0.5, %v16722_v26  ;;  %vm3617_vm13 = vcmp.lt.s32.totalorder %v3553_v57, 1200  ;;  %v16733_v1 = vld [vmem:[#allocation241_spill] sm:$0xff] }
 0x41c   : > { %vm12165_vm0 = vcmp.lt.f32.partialorder %v16717_v18, 0.0004427343  ;;  %5134 = vpow2.f32 %v16721_v47  ;;  %v3821_v61 = vadd.f32 %v3820_v24, %v3694_v36  ;;  %v2059_v2 = vsel %vm12112_vm1, %v16723_v63, %v2053_v13  ;;  %v16729_v36 = vld [vmem:[#allocation338_spill] sm:$0xff]  ;;  %v16734_v34 = vld [vmem:[#allocation111_spill] sm:$0xff]  ;;  %v16736_v47 = vld [vmem:[#allocation193_spill] sm:$0xff] }
 0x41d   : > { %5136 = vlog2.f32 %v16724_v4  ;;  %v2141_v3 = vadd.f32 1.0, %v16725_v0  ;;  %v3696_v52 = vsel %vm3616_vm12, %v3373_v59, 0.0  ;;  %v2071_v10 = vmul.f32 0.6931472, %v16726_v20  ;;  %v16739_v4 = vld [vmem:[#allocation65_spill] sm:$0xff] }
 0x41e   : > { %v16728_v30 = vmax.f32 %v16727_v17, 0.0  ;;  %v3375_v45 = vsel %vm3341_vm7, %v3242_v53, 0.0  ;;  %v3822_v62 = vadd.f32 %v3821_v61, %v3695_v40  ;;  %v16730_v11 = vand.u32 2147483647, %v16729_v36 }
 0x41f   : > { %v2991_v13 = vmul.f32 0.75, %v2863_v56  ;;  %v3117_v24 = vmul.f32 %v16733_v1, %v2989_v35  ;;  %v3243_v9 = vmul.f32 %v16720_v23, %v3115_v33  ;;  %v3697_v59 = vsel %vm3617_vm13, %v3241_v39, 0.0  ;;  %v16737_v23 = vld [vmem:[#allocation430_spill] sm:$0xff]  ;;  %v16738_v39 = vld [vmem:[#allocation340_spill] sm:$0xff] }
 0x420   : > { %v2865_v29 = vadd.f32 %v2041_v60, %v16728_v30  ;;  %vm12187_vm14 = vcmp.lt.f32.partialorder %v16730_v11, 0.0004427343  ;;  %5138 = vpow2.f32 %v16734_v34  ;;  %v16735_v60 = vld [vmem:[#allocation436_spill] sm:$0xff]  ;;  %v2129_v53 = vand.u32 2147483647, %v16722_v26  ;;  %v12202_v35 = vpop.eup %5130 }
 0x421   : > { %v12197_v42 = vmul.f32 %v16729_v36, %v16735_v60  ;;  %v3823_v18 = vadd.f32 %v3822_v62, %v3696_v52  ;;  %v2127_v40 = vadd.f32 1.0, %v2126_v51  ;;  %5140 = vlog2.f32 %v2141_v3  ;;  %v16741_v51 = vld [vmem:[#allocation246_spill] sm:$0xff] }
 0x422   : > { %v2159_v61 = vadd.f32 1.0, %v16736_v47  ;;  %v3698_v56 = vsel %vm3617_vm13, %v3375_v45, 0.0  ;;  %v2077_v33 = vsel %vm12143_vm5, %v16737_v23, %v2071_v10  ;;  %v2089_v63 = vmul.f32 0.6931472, %v16738_v39  ;;  %v5133_v36 = vpop.eup %5132  ;;  %v16742_v45 = vld [vmem:[#allocation287_spill] sm:$0xff] }
 0x423   : > { %v16740_v20 = vmax.f32 %v16739_v4, 0.0  ;;  %v3824_v30 = vadd.f32 %v3823_v18, %v3697_v59  ;;  %v2993_v52 = vmul.f32 0.75, %v2865_v29  ;;  %v3119_v3 = vmul.f32 %v16741_v51, %v2991_v13  ;;  %v16745_v29 = vld [vmem:[#allocation349_spill] sm:$0xff]  ;;  %v16747_v59 = vld [vmem:[#allocation66_spill] sm:$0xff] }
 0x424   : > { %v3245_v62 = vmul.f32 %v16733_v1, %v3117_v24  ;;  %v3699_v57 = vsel %vm3618_vm9, %v3243_v9, 0.0  ;;  %5142 = vpow2.f32 %v16742_v45  ;;  %v2144_v7 = vmul.f32 -0.5, %v16725_v0  ;;  %v16750_v4 = vld [vmem:[#allocation114_spill] sm:$0xff] }
 0x425   : > { %v2867_v17 = vadd.f32 %v2059_v2, %v16740_v20  ;;  %v2147_v10 = vand.u32 2147483647, %v16725_v0  ;;  %v3825_v11 = vadd.f32 %v3824_v30, %v3698_v56  ;;  %v2128_v34 = vmul.f32 %v16722_v26, %v2127_v40 }
 0x426   : > { %vm12218_vm7 = vcmp.lt.f32.partialorder %v2129_v53, 0.0004427343  ;;  %5144 = vlog2.f32 %v2159_v61  ;;  %v2177_v13 = vadd.f32 1.0, %v16745_v29  ;;  %v12223_v1 = vpop.eup %5134  ;;  %v2095_v24 = vsel %vm12165_vm0, %v16746_v49, %v2089_v63  ;;  %v16749_v53 = vld [vmem:[#allocation27_spill] sm:$0xff]  ;;  %v16753_v63 = vld [vmem:[#allocation477_spill] sm:$0xff] }
 0x427   : > { %v2107_v9 = vmul.f32 0.6931472, %v5133_v36  ;;  %v16748_v60 = vmax.f32 %v16747_v59, 0.0  ;;  %v3826_v56 = vadd.f32 %v3825_v11, %v3699_v57  ;;  %v5137_v23 = vpop.eup %5136  ;;  %v2995_v26 = vmul.f32 0.75, %v2867_v17  ;;  %v16754_v36 = vld [vmem:[#allocation352_spill] sm:$0xff]  ;;  %v16757_v49 = vld [vmem:[#allocation29_spill] sm:$0xff] }
 0x428   : > { %v3121_v40 = vmul.f32 %v16749_v53, %v2993_v52  ;;  %v3247_v39 = vmul.f32 %v16741_v51, %v3119_v3  ;;  %v3701_v61 = vsel %vm3619_vm10, %v3245_v62, 0.0  ;;  %5146 = vpow2.f32 %v16750_v4  ;;  %v16755_v62 = vld [vmem:[#allocation13_spill] sm:$0xff] }
 0x429   : > { %v2869_v18 = vadd.f32 %v2077_v33, %v16748_v60  ;;  %v2145_v20 = vadd.f32 1.0, %v2144_v7  ;;  %vm12235_vm9 = vcmp.lt.f32.partialorder %v2147_v10, 0.0004427343  ;;  %v3827_v30 = vadd.f32 %v3826_v56, %v16753_v63  ;;  %v16758_v56 = vld [vmem:[#allocation116_spill] sm:$0xff] }
 0x42a   : > { %v2162_v33 = vmul.f32 -0.5, %v16736_v47  ;;  %v2165_v17 = vand.u32 2147483647, %v16736_v47  ;;  %5148 = vlog2.f32 %v2177_v13  ;;  %v2195_v52 = vadd.f32 1.0, %v16754_v36  ;;  %v12243_v51 = vpop.eup %5138 }
 0x42b   : > { %v2113_v27 = vsel %vm12187_vm14, %v12197_v42, %v2107_v9  ;;  %v2125_v3 = vmul.f32 0.6931472, %v5137_v23  ;;  %v16756_v57 = vmax.f32 %v16755_v62, 0.0  ;;  %v3828_v7 = vadd.f32 %v3827_v30, %v3701_v61  ;;  %v5141_v10 = vpop.eup %5140  ;;  %v16759_v42 = vld [vmem:[#allocation478_spill] sm:$0xff] }
 0x42c   : > { %v2997_v11 = vmul.f32 0.75, %v2869_v18  ;;  %v3123_v59 = vmul.f32 %v16757_v49, %v2995_v26  ;;  %v3249_v60 = vmul.f32 %v16749_v53, %v3121_v40  ;;  %v3703_v13 = vsel %vm3620_vm3, %v3247_v39, 0.0  ;;  %v16762_v18 = vld [vmem:[#allocation194_spill] sm:$0xff]  ;;  %v16763_v39 = vld [vmem:[#allocation15_spill] sm:$0xff] }
 0x42d   : > { %v2871_v45 = vadd.f32 %v2095_v24, %v16756_v57  ;;  %5150 = vpow2.f32 %v16758_v56  ;;  %v2146_v4 = vmul.f32 %v16725_v0, %v2145_v20  ;;  %v2180_v22 = vmul.f32 -0.5, %v16745_v29  ;;  %v16766_v57 = vld [vmem:[#allocation293_spill] sm:$0xff] }
 0x42e   : > { %v3829_v9 = vadd.f32 %v3828_v7, %v16759_v42  ;;  %v2163_v23 = vadd.f32 1.0, %v2162_v33  ;;  %vm12258_vm10 = vcmp.lt.f32.partialorder %v2165_v17, 0.0004427343  ;;  %5152 = vlog2.f32 %v2195_v52  ;;  %v12263_v53 = vpop.eup %5142  ;;  %v16765_v33 = vld [vmem:[#allocation31_spill] sm:$0xff] }
 0x42f   : > { %v2213_v26 = vadd.f32 1.0, %v16762_v18  ;;  %v2131_v54 = vsel %vm12218_vm7, %v2128_v34, %v2125_v3  ;;  %v2143_v40 = vmul.f32 0.6931472, %v5141_v10  ;;  %v16764_v0 = vmax.f32 %v16763_v39, 0.0  ;;  %v16767_v34 = vld [vmem:[#allocation479_spill] sm:$0xff]  ;;  %v16771_v39 = vld [vmem:[#allocation33_spill] sm:$0xff] }
 0x430   : > { %v3830_v20 = vadd.f32 %v3829_v9, %v3703_v13  ;;  %v5145_v63 = vpop.eup %5144  ;;  %v2999_v30 = vmul.f32 0.75, %v2871_v45  ;;  %v3125_v17 = vmul.f32 %v16765_v33, %v2997_v11  ;;  %v3251_v62 = vmul.f32 %v16757_v49, %v3123_v59  ;;  %v16768_v45 = vld [vmem:[#allocation355_spill] sm:$0xff]  ;;  %v16769_v59 = vld [vmem:[#allocation17_spill] sm:$0xff] }
 0x431   : > { %v2873_v61 = vadd.f32 %v2113_v27, %v16764_v0  ;;  %v3705_v52 = vsel %vm3621_vm2, %v3249_v60, 0.0  ;;  %5154 = vpow2.f32 %v16766_v57  ;;  %v2181_v7 = vadd.f32 1.0, %v2180_v22 }
 0x432   : > { %v2183_v2 = vand.u32 2147483647, %v16745_v29  ;;  %v3831_v3 = vadd.f32 %v3830_v20, %v16767_v34  ;;  %v2164_v10 = vmul.f32 %v16736_v47, %v2163_v23  ;;  %v2198_v27 = vmul.f32 -0.5, %v16754_v36  ;;  %v12279_v11 = vpop.eup %5146  ;;  %v16779_v34 = vld [vmem:[#allocation35_spill] sm:$0xff] }
 0x433   : > { %5156 = vlog2.f32 %v2213_v26  ;;  %v2231_v13 = vadd.f32 1.0, %v16768_v45  ;;  %v2149_v55 = vsel %vm12235_vm9, %v2146_v4, %v2143_v40  ;;  %v2161_v49 = vmul.f32 0.6931472, %v5145_v63  ;;  %v16775_v4 = vld [vmem:[#allocation235_spill] sm:$0xff] }
 0x434   : > { %v16770_v60 = vmax.f32 %v16769_v59, 0.0  ;;  %v3832_v22 = vadd.f32 %v3831_v3, %v3705_v52  ;;  %v5149_v42 = vpop.eup %5148  ;;  %v3001_v9 = vmul.f32 0.75, %v2873_v61  ;;  %v3127_v0 = vmul.f32 %v16771_v39, %v2999_v30  ;;  %v16776_v63 = vld [vmem:[#allocation195_spill] sm:$0xff] }
 0x435   : > { %v3253_v47 = vmul.f32 %v16765_v33, %v3125_v17  ;;  %vm16772_vm3 = vcmp.lt.s32.totalorder %v11109_v41, 1200  ;;  %v2182_v26 = vmul.f32 %v16745_v29, %v2181_v7  ;;  %vm12290_vm2 = vcmp.lt.f32.partialorder %v2183_v2, 0.0004427343  ;;  %v16777_v17 = vld [vmem:[#allocation19_spill] sm:$0xff] }
 0x436   : > { %v2875_v56 = vadd.f32 %v2131_v54, %v16770_v60  ;;  %v3707_v23 = vsel %vm16772_vm3, %v3251_v62, 0.0  ;;  %v2201_v25 = vand.u32 2147483647, %v16754_v36  ;;  %v3833_v54 = vadd.f32 %v3832_v22, %v16775_v4 }
 0x437   : > { %v2199_v40 = vadd.f32 1.0, %v2198_v27  ;;  %v2216_v61 = vmul.f32 -0.5, %v16762_v18  ;;  %5158 = vlog2.f32 %v2231_v13  ;;  %v2249_v30 = vadd.f32 1.0, %v16776_v63  ;;  %v12298_v33 = vpop.eup %5150 }
 0x438   : > { %v2167_v41 = vsel %vm12258_vm10, %v2164_v10, %v2161_v49  ;;  %v2179_v29 = vmul.f32 0.6931472, %v5149_v42  ;;  %v16778_v62 = vmax.f32 %v16777_v17, 0.0  ;;  %v3834_v57 = vadd.f32 %v3833_v54, %v3707_v23  ;;  %v5153_v7 = vpop.eup %5152  ;;  %v16786_v54 = vld [vmem:[#allocation37_spill] sm:$0xff] }
 0x439   : > { %v3003_v2 = vmul.f32 0.75, %v2875_v56  ;;  %v3129_v3 = vmul.f32 %v16779_v34, %v3001_v9  ;;  %v3255_v27 = vmul.f32 %v16771_v39, %v3127_v0  ;;  %vm16780_vm1 = vcmp.lt.s32.totalorder %v11112_v58, 1200  ;;  %v16783_v56 = vld [vmem:[#allocation196_spill] sm:$0xff]  ;;  %v16784_v39 = vld [vmem:[#allocation86_spill] sm:$0xff] }
 0x43a   : > { %v2877_v52 = vadd.f32 %v2149_v55, %v16778_v62  ;;  %v3709_v13 = vsel %vm16780_vm1, %v3253_v47, 0.0  ;;  %vm12308_vm5 = vcmp.lt.f32.partialorder %v2201_v25, 0.0004427343  ;;  %v2219_v24 = vand.u32 2147483647, %v16762_v18  ;;  %v16791_v62 = vld [vmem:[#allocation316_spill] sm:$0xff] }
 0x43b   : > { %v2234_v10 = vmul.f32 -0.5, %v16768_v45  ;;  %v3835_v55 = vadd.f32 %v3834_v57, %v11552_v15  ;;  %v2200_v49 = vmul.f32 %v16754_v36, %v2199_v40  ;;  %v2217_v60 = vadd.f32 1.0, %v2216_v61  ;;  %v12317_v42 = vpop.eup %5154 }
 0x43c   : > { %5160 = vlog2.f32 %v2249_v30  ;;  %v2267_v22 = vadd.f32 1.0, %v16783_v56  ;;  %v2185_v58 = vsel %vm12290_vm2, %v2182_v26, %v2179_v29  ;;  %v2197_v9 = vmul.f32 0.6931472, %v5153_v7  ;;  %v16790_v30 = vld [vmem:[#allocation480_spill] sm:$0xff]  ;;  %v16792_v7 = vld [vmem:[#allocation98_spill] sm:$0xff] }
 0x43d   : > { %v16785_v0 = vmax.f32 %v16784_v39, 0.0  ;;  %v3836_v23 = vadd.f32 %v3835_v55, %v3709_v13  ;;  %v5157_v25 = vpop.eup %5156  ;;  %v3005_v4 = vmul.f32 0.75, %v2877_v52  ;;  %v3131_v15 = vmul.f32 %v16786_v54, %v3003_v2 }
 0x43e   : > { %v3257_v36 = vmul.f32 %v16779_v34, %v3129_v3  ;;  %vm16787_vm12 = vcmp.lt.s32.totalorder %v11115_v14, 1200  ;;  %vm12327_vm0 = vcmp.lt.f32.partialorder %v2219_v24, 0.0004427343  ;;  %v2235_v20 = vadd.f32 1.0, %v2234_v10  ;;  %v16794_v24 = vld [vmem:[#allocation39_spill] sm:$0xff] }
 0x43f   : > { %v2879_v47 = vadd.f32 %v2167_v41, %v16785_v0  ;;  %v3711_v40 = vsel %vm16787_vm12, %v3255_v27, 0.0  ;;  %v2237_v26 = vand.u32 2147483647, %v16768_v45  ;;  %v3837_v29 = vadd.f32 %v3836_v23, %v16790_v30  ;;  %v16799_v0 = vld [vmem:[#allocation364_spill] sm:$0xff] }
 0x440   : > { %v2218_v41 = vmul.f32 %v16762_v18, %v2217_v60  ;;  %v2252_v17 = vmul.f32 -0.5, %v16776_v63  ;;  %5162 = vlog2.f32 %v2267_v22  ;;  %v2285_v52 = vadd.f32 1.0, %v16791_v62 }
 0x441   : > { %v2203_v14 = vsel %vm12308_vm5, %v2200_v49, %v2197_v9  ;;  %v2215_v57 = vmul.f32 0.6931472, %v5157_v25  ;;  %v16793_v2 = vmax.f32 %v16792_v7, 0.0  ;;  %v3838_v3 = vadd.f32 %v3837_v29, %v3711_v40  ;;  %v5159_v27 = vpop.eup %5158  ;;  %v16798_v49 = vld [vmem:[#allocation388_spill] sm:$0xff]  ;;  %v16802_v40 = vld [vmem:[#allocation41_spill] sm:$0xff] }
 0x442   : > { %v3007_v13 = vmul.f32 0.75, %v2879_v47  ;;  %v3133_v10 = vmul.f32 %v16794_v24, %v3005_v4  ;;  %v3259_v55 = vmul.f32 %v16786_v54, %v3131_v15  ;;  %vm16795_vm13 = vcmp.lt.s32.totalorder %v16397_v46, 1200  ;;  %v16800_v25 = vld [vmem:[#allocation212_spill] sm:$0xff] }
 0x443   : > { %v2881_v34 = vadd.f32 %v2185_v58, %v16793_v2  ;;  %v3713_v18 = vsel %vm16795_vm13, %v3257_v36, 0.0  ;;  %v2236_v60 = vmul.f32 %v16768_v45, %v2235_v20  ;;  %vm12345_vm14 = vcmp.lt.f32.partialorder %v2237_v26, 0.0004427343  ;;  %v16807_v7 = vld [vmem:[#allocation368_spill] sm:$0xff] }
 0x444   : > { %v2255_v59 = vand.u32 2147483647, %v16776_v63  ;;  %v3839_v58 = vadd.f32 %v3838_v3, %v16798_v49  ;;  %v2253_v9 = vadd.f32 1.0, %v2252_v17  ;;  %v2270_v39 = vmul.f32 -0.5, %v16783_v56  ;;  %v16806_v17 = vld [vmem:[#allocation389_spill] sm:$0xff]  ;;  %v16808_v3 = vld [vmem:[#allocation120_spill] sm:$0xff] }
 0x445   : > { %5164 = vlog2.f32 %v2285_v52  ;;  %v2303_v47 = vadd.f32 1.0, %v16799_v0  ;;  %v2221_v46 = vsel %vm12327_vm0, %v2218_v41, %v2215_v57  ;;  %v2233_v23 = vmul.f32 0.6931472, %v5159_v27 }
 0x446   : > { %v16801_v45 = vmax.f32 %v16800_v25, 0.0  ;;  %v3840_v54 = vadd.f32 %v3839_v58, %v3713_v18  ;;  %v5161_v15 = vpop.eup %5160  ;;  %v3009_v36 = vmul.f32 0.75, %v2881_v34  ;;  %v3135_v20 = vmul.f32 %v16802_v40, %v3007_v13  ;;  %v16810_v18 = vld [vmem:[#allocation249_spill] sm:$0xff] }
 0x447   : > { %v3261_v26 = vmul.f32 %v16794_v24, %v3133_v10  ;;  %vm16803_vm7 = vcmp.lt.s32.totalorder %v16400_v43, 1200  ;;  %vm12361_vm9 = vcmp.lt.f32.partialorder %v2255_v59, 0.0004427343  ;;  %v2273_v61 = vand.u32 2147483647, %v16783_v56 }
 0x448   : > { %v2883_v4 = vadd.f32 %v2203_v14, %v16801_v45  ;;  %v3715_v30 = vsel %vm16803_vm7, %v3259_v55, 0.0  ;;  %v2288_v41 = vmul.f32 -0.5, %v16791_v62  ;;  %v3841_v52 = vadd.f32 %v3840_v54, %v16806_v17 }
 0x449   : > { %v2254_v14 = vmul.f32 %v16776_v63, %v2253_v9  ;;  %v2271_v57 = vadd.f32 1.0, %v2270_v39  ;;  %5166 = vlog2.f32 %v2303_v47  ;;  %v2321_v2 = vadd.f32 1.0, %v16807_v7  ;;  %v16814_v9 = vld [vmem:[#allocation237_spill] sm:$0xff] }
 0x44a   : > { %v2239_v43 = vsel %vm12345_vm14, %v2236_v60, %v2233_v23  ;;  %v2251_v34 = vmul.f32 0.6931472, %v5161_v15  ;;  %v16809_v27 = vmax.f32 %v16808_v3, 0.0  ;;  %v3842_v24 = vadd.f32 %v3841_v52, %v3715_v30  ;;  %v5163_v10 = vpop.eup %5162  ;;  %v16815_v23 = vld [vmem:[#allocation371_spill] sm:$0xff]  ;;  %v16822_v52 = vld [vmem:[#allocation481_spill] sm:$0xff] }
 0x44b   : > { %v3011_v55 = vmul.f32 0.75, %v2883_v4  ;;  %v3137_v59 = vmul.f32 %v16810_v18, %v3009_v36  ;;  %v3263_v49 = vmul.f32 %v16802_v40, %v3135_v20  ;;  %vm16811_vm10 = vcmp.lt.s32.totalorder %v16401_v12, 1200  ;;  %v16816_v4 = vld [vmem:[#allocation122_spill] sm:$0xff] }
 0x44c   : > { %v2885_v13 = vadd.f32 %v2221_v46, %v16809_v27  ;;  %v3717_v63 = vsel %vm16811_vm10, %v3261_v26, 0.0  ;;  %vm12378_vm3 = vcmp.lt.f32.partialorder %v2273_v61, 0.0004427343  ;;  %v2289_v22 = vadd.f32 1.0, %v2288_v41  ;;  %v16818_v26 = vld [vmem:[#allocation255_spill] sm:$0xff] }
 0x44d   : > { %v2291_v60 = vand.u32 2147483647, %v16791_v62  ;;  %v3843_v39 = vadd.f32 %v3842_v24, %v16814_v9  ;;  %v2272_v47 = vmul.f32 %v16783_v56, %v2271_v57  ;;  %v2306_v46 = vmul.f32 -0.5, %v16799_v0  ;;  %v16824_v27 = vld [vmem:[#allocation123_spill] sm:$0xff] }
 0x44e   : > { %5168 = vlog2.f32 %v2321_v2  ;;  %v2339_v25 = vadd.f32 1.0, %v16815_v23  ;;  %v2257_v12 = vsel %vm12361_vm9, %v2254_v14, %v2251_v34  ;;  %v2269_v45 = vmul.f32 0.6931472, %v5163_v10  ;;  %v16830_v9 = vld [vmem:[#allocation391_spill] sm:$0xff] }
 0x44f   : > { %v16817_v54 = vmax.f32 %v16816_v4, 0.0  ;;  %v3844_v36 = vadd.f32 %v3843_v39, %v3717_v63  ;;  %v5165_v40 = vpop.eup %5164  ;;  %v3013_v20 = vmul.f32 0.75, %v2885_v13  ;;  %v3139_v30 = vmul.f32 %v16818_v26, %v3011_v55  ;;  %v16832_v4 = vld [vmem:[#allocation124_spill] sm:$0xff] }
 0x450   : > { %v3265_v61 = vmul.f32 %v16810_v18, %v3137_v59  ;;  %vm16819_vm2 = vcmp.lt.s32.totalorder %v16403_v48, 1200  ;;  %v2290_v41 = vmul.f32 %v16791_v62, %v2289_v22  ;;  %vm12396_vm1 = vcmp.lt.f32.partialorder %v2291_v60, 0.0004427343  ;;  %v16826_v18 = vld [vmem:[#allocation46_spill] sm:$0xff] }
 0x451   : > { %v2887_v15 = vadd.f32 %v2239_v43, %v16817_v54  ;;  %v3719_v56 = vsel %vm16819_vm2, %v3263_v49, 0.0  ;;  %v2309_v29 = vand.u32 2147483647, %v16799_v0  ;;  %v3845_v14 = vadd.f32 %v3844_v36, %v16822_v52  ;;  %v16823_v43 = vld [vmem:[#allocation374_spill] sm:$0xff] }
 0x452   : > { %v2307_v57 = vadd.f32 1.0, %v2306_v46  ;;  %v2324_v2 = vmul.f32 -0.5, %v16807_v7  ;;  %5170 = vlog2.f32 %v2339_v25  ;;  %v2357_v34 = vadd.f32 1.0, %v16823_v43  ;;  %v16831_v25 = vld [vmem:[#allocation377_spill] sm:$0xff] }
 0x453   : > { %v2275_v48 = vsel %vm12378_vm3, %v2272_v47, %v2269_v45  ;;  %v2287_v3 = vmul.f32 0.6931472, %v5165_v40  ;;  %v16825_v62 = vmax.f32 %v16824_v27, 0.0  ;;  %v3846_v24 = vadd.f32 %v3845_v14, %v3719_v56  ;;  %v5167_v10 = vpop.eup %5166  ;;  %v16854_v56 = vld [vmem:[#allocation483_spill] sm:$0xff] }
 0x454   : > { %v3015_v55 = vmul.f32 0.75, %v2887_v15  ;;  %v3141_v59 = vmul.f32 %v16826_v18, %v3013_v20  ;;  %v3267_v49 = vmul.f32 %v16818_v26, %v3139_v30  ;;  %vm16827_vm5 = vcmp.lt.s32.totalorder %v16404_v38, 1200  ;;  %v16834_v26 = vld [vmem:[#allocation48_spill] sm:$0xff] }
 0x455   : > { %v2889_v13 = vadd.f32 %v2257_v12, %v16825_v62  ;;  %v3721_v63 = vsel %vm16827_vm5, %v3265_v61, 0.0  ;;  %vm12412_vm12 = vcmp.lt.f32.partialorder %v2309_v29, 0.0004427343  ;;  %v2327_v58 = vand.u32 2147483647, %v16807_v7  ;;  %v16838_v29 = vld [vmem:[#allocation482_spill] sm:$0xff] }
 0x456   : > { %v2342_v60 = vmul.f32 -0.5, %v16815_v23  ;;  %v3847_v39 = vadd.f32 %v3846_v24, %v16830_v9  ;;  %v2308_v47 = vmul.f32 %v16799_v0, %v2307_v57  ;;  %v2325_v46 = vadd.f32 1.0, %v2324_v2  ;;  %v16839_v2 = vld [vmem:[#allocation380_spill] sm:$0xff] }
 0x457   : > { %5172 = vlog2.f32 %v2357_v34  ;;  %v2375_v12 = vadd.f32 1.0, %v16831_v25  ;;  %v2293_v38 = vsel %vm12396_vm1, %v2290_v41, %v2287_v3  ;;  %v2305_v45 = vmul.f32 0.6931472, %v5167_v10  ;;  %v16840_v3 = vld [vmem:[#allocation125_spill] sm:$0xff] }
 0x458   : > { %v16833_v54 = vmax.f32 %v16832_v4, 0.0  ;;  %v3848_v36 = vadd.f32 %v3847_v39, %v3721_v63  ;;  %v5169_v40 = vpop.eup %5168  ;;  %v3017_v20 = vmul.f32 0.75, %v2889_v13  ;;  %v3143_v30 = vmul.f32 %v16834_v26, %v3015_v55  ;;  %v16842_v55 = vld [vmem:[#allocation130_spill] sm:$0xff] }
 0x459   : > { %v3269_v61 = vmul.f32 %v16826_v18, %v3141_v59  ;;  %vm16835_vm0 = vcmp.lt.s32.totalorder %v16407_v5, 1200  ;;  %vm12429_vm13 = vcmp.lt.f32.partialorder %v2327_v58, 0.0004427343  ;;  %v2343_v17 = vadd.f32 1.0, %v2342_v60  ;;  %v16846_v58 = vld [vmem:[#allocation23_spill] sm:$0xff] }
 0x45a   : > { %v2891_v15 = vadd.f32 %v2275_v48, %v16833_v54  ;;  %v3723_v0 = vsel %vm16835_vm0, %v3267_v49, 0.0  ;;  %v2345_v41 = vand.u32 2147483647, %v16815_v23  ;;  %v3849_v52 = vadd.f32 %v3848_v36, %v16838_v29  ;;  %v16850_v36 = vld [vmem:[#allocation136_spill] sm:$0xff] }
 0x45b   : > { %v2326_v14 = vmul.f32 %v16807_v7, %v2325_v46  ;;  %v2360_v57 = vmul.f32 -0.5, %v16823_v43  ;;  %5174 = vlog2.f32 %v2375_v12  ;;  %v2393_v34 = vadd.f32 1.0, %v16839_v2 }
 0x45c   : > { %v2311_v5 = vsel %vm12412_vm12, %v2308_v47, %v2305_v45  ;;  %v2323_v48 = vmul.f32 0.6931472, %v5169_v40  ;;  %v16841_v27 = vmax.f32 %v16840_v3, 0.0  ;;  %v3850_v13 = vadd.f32 %v3849_v52, %v3723_v0  ;;  %v5171_v24 = vpop.eup %5170  ;;  %v16847_v47 = vld [vmem:[#allocation383_spill] sm:$0xff]  ;;  %v16855_v52 = vld [vmem:[#allocation385_spill] sm:$0xff] }
 0x45d   : > { %v3019_v10 = vmul.f32 0.75, %v2891_v15  ;;  %v3145_v18 = vmul.f32 %v16842_v55, %v3017_v20  ;;  %v3271_v59 = vmul.f32 %v16834_v26, %v3143_v30  ;;  %vm16843_vm14 = vcmp.lt.s32.totalorder %v16408_v28, 1200  ;;  %v16870_v30 = vld [vmem:[#allocation163_spill] sm:$0xff] }
 0x45e   : > { %v2893_v62 = vadd.f32 %v2293_v38, %v16841_v27  ;;  %v3725_v7 = vsel %vm16843_vm14, %v3269_v61, 0.0  ;;  %v2344_v49 = vmul.f32 %v16815_v23, %v2343_v17  ;;  %vm12447_vm7 = vcmp.lt.f32.partialorder %v2345_v41, 0.0004427343  ;;  %v16848_v38 = vld [vmem:[#allocation126_spill] sm:$0xff] }
 0x45f   : > { %v2363_v22 = vand.u32 2147483647, %v16823_v43  ;;  %v3851_v60 = vadd.f32 %v3850_v13, %v16846_v58  ;;  %v2361_v9 = vadd.f32 1.0, %v2360_v57  ;;  %v2378_v39 = vmul.f32 -0.5, %v16831_v25  ;;  %v16858_v13 = vld [vmem:[#allocation143_spill] sm:$0xff] }
 0x460   : > { %5176 = vlog2.f32 %v2393_v34  ;;  %v2411_v46 = vadd.f32 1.0, %v16847_v47  ;;  %v2329_v28 = vsel %vm12429_vm13, %v2326_v14, %v2323_v48  ;;  %v2341_v12 = vmul.f32 0.6931472, %v5171_v24  ;;  %v16856_v34 = vld [vmem:[#allocation127_spill] sm:$0xff] }
 0x461   : > { %v16849_v23 = vmax.f32 %v16848_v38, 0.0  ;;  %v3852_v4 = vadd.f32 %v3851_v60, %v3725_v7  ;;  %v5173_v54 = vpop.eup %5172  ;;  %v3021_v15 = vmul.f32 0.75, %v2893_v62  ;;  %v3147_v40 = vmul.f32 %v16850_v36, %v3019_v10 }
 0x462   : > { %v3273_v20 = vmul.f32 %v16842_v55, %v3145_v18  ;;  %vm16851_vm9 = vcmp.lt.s32.totalorder %v16411_v21, 1200  ;;  %vm12463_vm10 = vcmp.lt.f32.partialorder %v2363_v22, 0.0004427343  ;;  %v2381_v61 = vand.u32 2147483647, %v16831_v25  ;;  %v16862_v22 = vld [vmem:[#allocation386_spill] sm:$0xff] }
 0x463   : > { %v2895_v45 = vadd.f32 %v2311_v5, %v16849_v23  ;;  %v3727_v26 = vsel %vm16851_vm9, %v3271_v59, 0.0  ;;  %v2396_v0 = vmul.f32 -0.5, %v16839_v2  ;;  %v3853_v17 = vadd.f32 %v3852_v4, %v16854_v56  ;;  %v16865_v23 = vld [vmem:[#allocation151_spill] sm:$0xff]  ;;  %v16871_v56 = vld [vmem:[#allocation22_spill] sm:$0xff] }
 0x464   : > { %v2362_v41 = vmul.f32 %v16823_v43, %v2361_v9  ;;  %v2379_v29 = vadd.f32 1.0, %v2378_v39  ;;  %5178 = vlog2.f32 %v2411_v46  ;;  %v2429_v14 = vadd.f32 1.0, %v16855_v52  ;;  %v16863_v9 = vld [vmem:[#allocation21_spill] sm:$0xff] }
 0x465   : > { %v2347_v21 = vsel %vm12447_vm7, %v2344_v49, %v2341_v12  ;;  %v2359_v57 = vmul.f32 0.6931472, %v5173_v54  ;;  %v16857_v5 = vmax.f32 %v16856_v34, 0.0  ;;  %v3854_v3 = vadd.f32 %v3853_v17, %v3727_v26  ;;  %v5175_v27 = vpop.eup %5174 }
 0x466   : > { %v3023_v62 = vmul.f32 0.75, %v2895_v45  ;;  %v3149_v24 = vmul.f32 %v16858_v13, %v3021_v15  ;;  %v3275_v10 = vmul.f32 %v16850_v36, %v3147_v40  ;;  %vm16859_vm3 = vcmp.lt.s32.totalorder %v16412_v37, 1200  ;;  %v16869_v36 = vld [vmem:[#allocation393_spill] sm:$0xff] }
 0x467   : > { %v2897_v48 = vadd.f32 %v2329_v28, %v16857_v5  ;;  %v3729_v43 = vsel %vm16859_vm3, %v3273_v20, 0.0  ;;  %vm12480_vm2 = vcmp.lt.f32.partialorder %v2381_v61, 0.0004427343  ;;  %v2397_v18 = vadd.f32 1.0, %v2396_v0 }
 0x468   : > { %v2399_v59 = vand.u32 2147483647, %v16839_v2  ;;  %v3855_v7 = vadd.f32 %v3854_v3, %v11609_v31  ;;  %v2380_v49 = vmul.f32 %v16831_v25, %v2379_v29  ;;  %v2414_v63 = vmul.f32 -0.5, %v16847_v47 }
 0x469   : > { %5180 = vlog2.f32 %v2429_v14  ;;  %v2447_v58 = vadd.f32 1.0, %v16862_v22  ;;  %v2365_v37 = vsel %vm12463_vm10, %v2362_v41, %v2359_v57  ;;  %v2377_v60 = vmul.f32 0.6931472, %v5175_v27 }
 0x46a   : > { %v16864_v39 = vmax.f32 %v16863_v9, 0.0  ;;  %v3856_v28 = vadd.f32 %v3855_v7, %v3729_v43  ;;  %v5177_v12 = vpop.eup %5176  ;;  %v3025_v38 = vmul.f32 0.75, %v2897_v48  ;;  %v3151_v45 = vmul.f32 %v16865_v23, %v3023_v62  ;;  %v16877_v62 = vld [vmem:[#allocation484_spill] sm:$0xff]  ;;  %v16878_v43 = vld [vmem:[#allocation390_spill] sm:$0xff] }
 0x46b   : > { %v3277_v31 = vmul.f32 %v16858_v13, %v3149_v24  ;;  %vm16866_vm1 = vcmp.lt.s32.totalorder %v16415_v32, 1200  ;;  %v2398_v4 = vmul.f32 %v16839_v2, %v2397_v18  ;;  %vm12498_vm5 = vcmp.lt.f32.partialorder %v2399_v59, 0.0004427343  ;;  %v16879_v59 = vld [vmem:[#allocation238_spill] sm:$0xff] }
 0x46c   : > { %v2899_v46 = vadd.f32 %v2347_v21, %v16864_v39  ;;  %v3731_v25 = vsel %vm16866_vm1, %v3275_v10, 0.0  ;;  %v2417_v15 = vand.u32 2147483647, %v16847_v47  ;;  %v3857_v40 = vadd.f32 %v3856_v28, %v16869_v36  ;;  %v16873_v21 = vld [vmem:[#allocation261_spill] sm:$0xff] }
 0x46d   : > { %v2415_v20 = vadd.f32 1.0, %v2414_v63  ;;  %v2432_v26 = vmul.f32 -0.5, %v16855_v52  ;;  %5182 = vlog2.f32 %v2447_v58  ;;  %v2465_v61 = vadd.f32 1.0, %v16870_v30 }
 0x46e   : > { %v2383_v32 = vsel %vm12480_vm2, %v2380_v49, %v2377_v60  ;;  %v2395_v0 = vmul.f32 0.6931472, %v5177_v12  ;;  %v16872_v2 = vmax.f32 %v16871_v56, 0.0  ;;  %v3858_v41 = vadd.f32 %v3857_v40, %v3731_v25  ;;  %v5179_v29 = vpop.eup %5178  ;;  %v16881_v60 = vld [vmem:[#allocation267_spill] sm:$0xff]  ;;  %v16888_v40 = vld [vmem:[#allocation240_spill] sm:$0xff]  ;;  %v16890_v56 = vld [vmem:[#allocation273_spill] sm:$0xff] }
 0x46f   : > { %v3027_v14 = vmul.f32 0.75, %v2899_v46  ;;  %v3153_v57 = vmul.f32 %v16873_v21, %v3025_v38  ;;  %v3279_v34 = vmul.f32 %v16865_v23, %v3151_v45  ;;  %vm16874_vm12 = vcmp.lt.s32.totalorder %v16416_v16, 1200  ;;  %v16882_v46 = vld [vmem:[#allocation91_spill] sm:$0xff]  ;;  %v16886_v23 = vld [vmem:[#allocation24_spill] sm:$0xff] }
 0x470   : > { %v2901_v17 = vadd.f32 %v2365_v37, %v16872_v2  ;;  %v3733_v5 = vsel %vm16874_vm12, %v3277_v31, 0.0  ;;  %vm12514_vm0 = vcmp.lt.f32.partialorder %v2417_v15, 0.0004427343  ;;  %v2435_v3 = vand.u32 2147483647, %v16855_v52 }
 0x471   : > { %v2450_v27 = vmul.f32 -0.5, %v16862_v22  ;;  %v3859_v13 = vadd.f32 %v3858_v41, %v16877_v62  ;;  %v2416_v24 = vmul.f32 %v16847_v47, %v2415_v20  ;;  %v2433_v10 = vadd.f32 1.0, %v2432_v26 }
 0x472   : > { %5184 = vlog2.f32 %v2465_v61  ;;  %v2483_v55 = vadd.f32 1.0, %v16878_v43  ;;  %v2401_v16 = vsel %vm12498_vm5, %v2398_v4, %v2395_v0  ;;  %v2413_v18 = vmul.f32 0.6931472, %v5179_v29  ;;  %v16887_v4 = vld [vmem:[#allocation392_spill] sm:$0xff] }
 0x473   : > { %v16880_v7 = vmax.f32 %v16879_v59, 0.0  ;;  %v3860_v63 = vadd.f32 %v3859_v13, %v3733_v5  ;;  %v5181_v58 = vpop.eup %5180  ;;  %v3029_v37 = vmul.f32 0.75, %v2901_v17  ;;  %v3155_v9 = vmul.f32 %v16881_v60, %v3027_v14  ;;  %v16894_v5 = vld [vmem:[#allocation394_spill] sm:$0xff] }
 0x474   : > { %v3281_v39 = vmul.f32 %v16873_v21, %v3153_v57  ;;  %vm16883_vm13 = vcmp.lt.s32.totalorder %v16882_v46, 1200  ;;  %vm12531_vm14 = vcmp.lt.f32.partialorder %v2435_v3, 0.0004427343  ;;  %v2451_v12 = vadd.f32 1.0, %v2450_v27  ;;  %v16895_v27 = vld [vmem:[#allocation242_spill] sm:$0xff]  ;;  %v16913_v57 = vld [vmem:[#allocation291_spill] sm:$0xff] }
 0x475   : > { %v2903_v49 = vadd.f32 %v2383_v32, %v16880_v7  ;;  %v3735_v47 = vsel %vm16883_vm13, %v3279_v34, 0.0  ;;  %v2468_v38 = vmul.f32 -0.5, %v16870_v30  ;;  %v3861_v45 = vadd.f32 %v3860_v63, %v16886_v23  ;;  %v16901_v63 = vld [vmem:[#allocation485_spill] sm:$0xff] }
 0x476   : > { %v2434_v31 = vmul.f32 %v16855_v52, %v2433_v10  ;;  %v2453_v25 = vand.u32 2147483647, %v16862_v22  ;;  %5186 = vlog2.f32 %v2483_v55  ;;  %v2501_v54 = vadd.f32 1.0, %v16887_v4 }
 0x477   : > { %v2419_v15 = vsel %vm12514_vm0, %v2416_v24, %v2413_v18  ;;  %v2431_v36 = vmul.f32 0.6931472, %v5181_v58  ;;  %v16889_v20 = vmax.f32 %v16888_v40, 0.0  ;;  %v3862_v61 = vadd.f32 %v3861_v45, %v3735_v47  ;;  %v5183_v32 = vpop.eup %5182  ;;  %v16903_v47 = vld [vmem:[#allocation25_spill] sm:$0xff] }
 0x478   : > { %v3031_v0 = vmul.f32 0.75, %v2903_v49  ;;  %v3157_v2 = vmul.f32 %v16890_v56, %v3029_v37  ;;  %v3283_v17 = vmul.f32 %v16881_v60, %v3155_v9  ;;  %vm16891_vm7 = vcmp.lt.s32.totalorder %v16420_v50, 1200  ;;  %v16902_v9 = vld [vmem:[#allocation396_spill] sm:$0xff]  ;;  %v16905_v45 = vld [vmem:[#allocation285_spill] sm:$0xff] }
 0x479   : > { %v2905_v26 = vadd.f32 %v2401_v16, %v16889_v20  ;;  %v3737_v52 = vsel %vm16891_vm7, %v3281_v39, 0.0  ;;  %v2452_v41 = vmul.f32 %v16862_v22, %v2451_v12  ;;  %v2469_v29 = vadd.f32 1.0, %v2468_v38  ;;  %v16909_v20 = vld [vmem:[#allocation268_spill] sm:$0xff] }
 0x47a   : > { %v2471_v14 = vand.u32 2147483647, %v16870_v30  ;;  %v3863_v21 = vadd.f32 %v3862_v61, %v11634_v44  ;;  %vm12551_vm9 = vcmp.lt.f32.partialorder %v2453_v25, 0.0004427343  ;;  %v2486_v34 = vmul.f32 -0.5, %v16878_v43  ;;  %v16897_v44 = vld [vmem:[#allocation279_spill] sm:$0xff] }
 0x47b   : > { %5188 = vlog2.f32 %v2501_v54  ;;  %v2519_v48 = vadd.f32 1.0, %v16894_v5  ;;  %v2437_v50 = vsel %vm12531_vm14, %v2434_v31, %v2431_v36  ;;  %v2449_v3 = vmul.f32 0.6931472, %v5183_v32 }
 0x47c   : > { %v16896_v22 = vmax.f32 %v16895_v27, 0.0  ;;  %v3864_v13 = vadd.f32 %v3863_v21, %v3737_v52  ;;  %v5185_v24 = vpop.eup %5184  ;;  %v3033_v10 = vmul.f32 0.75, %v2905_v26  ;;  %v3159_v55 = vmul.f32 %v16897_v44, %v3031_v0  ;;  %v16910_v0 = vld [vmem:[#allocation271_spill] sm:$0xff] }
 0x47d   : > { %v3285_v16 = vmul.f32 %v16890_v56, %v3157_v2  ;;  %vm16898_vm10 = vcmp.lt.s32.totalorder %v16422_v8, 1200  ;;  %v2470_v59 = vmul.f32 %v16870_v30, %v2469_v29  ;;  %vm12566_vm3 = vcmp.lt.f32.partialorder %v2471_v14, 0.0004427343 }
 0x47e   : > { %v2907_v62 = vadd.f32 %v2419_v15, %v16896_v22  ;;  %v3739_v18 = vsel %vm16898_vm10, %v3283_v17, 0.0  ;;  %v2489_v49 = vand.u32 2147483647, %v16878_v43  ;;  %v3865_v58 = vadd.f32 %v3864_v13, %v16901_v63  ;;  %v16911_v17 = vld [vmem:[#allocation26_spill] sm:$0xff] }
 0x47f   : > { %v2487_v37 = vadd.f32 1.0, %v2486_v34  ;;  %v2504_v60 = vmul.f32 -0.5, %v16887_v4  ;;  %5190 = vlog2.f32 %v2519_v48  ;;  %v2537_v39 = vadd.f32 1.0, %v16902_v9 }
 0x480   : > { %v2455_v8 = vsel %vm12551_vm9, %v2452_v41, %v2449_v3  ;;  %v2467_v46 = vmul.f32 0.6931472, %v5185_v24  ;;  %v16904_v30 = vmax.f32 %v16903_v47, 0.0  ;;  %v3866_v12 = vadd.f32 %v3865_v58, %v3739_v18  ;;  %v5187_v38 = vpop.eup %5186 }
 0x481   : > { %v3035_v23 = vmul.f32 0.75, %v2907_v62  ;;  %v3161_v31 = vmul.f32 %v16905_v45, %v3033_v10  ;;  %v3287_v25 = vmul.f32 %v16897_v44, %v3159_v55  ;;  %vm16906_vm2 = vcmp.lt.s32.totalorder %v16423_v19, 1200  ;;  %v16918_v62 = vld [vmem:[#allocation487_spill] sm:$0xff]  ;;  %v16919_v44 = vld [vmem:[#allocation401_spill] sm:$0xff] }
 0x482   : > { %v2909_v28 = vadd.f32 %v2437_v50, %v16904_v30  ;;  %v3741_v54 = vsel %vm16906_vm2, %v3285_v16, 0.0  ;;  %vm12582_vm1 = vcmp.lt.f32.partialorder %v2489_v49, 0.0004427343  ;;  %v2507_v36 = vand.u32 2147483647, %v16887_v4  ;;  %v16914_v50 = vld [vmem:[#allocation347_spill] sm:$0xff] }
 0x483   : > { %v2522_v40 = vmul.f32 -0.5, %v16894_v5  ;;  %v3867_v26 = vadd.f32 %v3866_v12, %v16909_v20  ;;  %v2488_v61 = vmul.f32 %v16878_v43, %v2487_v37  ;;  %v2505_v32 = vadd.f32 1.0, %v2504_v60  ;;  %v16922_v60 = vld [vmem:[#allocation295_spill] sm:$0xff] }
 0x484   : > { %5192 = vlog2.f32 %v2537_v39  ;;  %v2555_v56 = vadd.f32 1.0, %v16910_v0  ;;  %v2473_v19 = vsel %vm12566_vm3, %v2470_v59, %v2467_v46  ;;  %v2485_v2 = vmul.f32 0.6931472, %v5187_v38  ;;  %v16920_v59 = vld [vmem:[#allocation49_spill] sm:$0xff] }
 0x485   : > { %v16912_v52 = vmax.f32 %v16911_v17, 0.0  ;;  %v3868_v29 = vadd.f32 %v3867_v26, %v3741_v54  ;;  %v5189_v14 = vpop.eup %5188  ;;  %v3037_v21 = vmul.f32 0.75, %v2909_v28  ;;  %v3163_v34 = vmul.f32 %v16913_v57, %v3035_v23  ;;  %v16926_v28 = vld [vmem:[#allocation243_spill] sm:$0xff]  ;;  %v16928_v54 = vld [vmem:[#allocation52_spill] sm:$0xff] }
 0x486   : > { %v3289_v48 = vmul.f32 %v16905_v45, %v3161_v31  ;;  %vm16915_vm5 = vcmp.lt.s32.totalorder %v16914_v50, 1200  ;;  %vm12599_vm12 = vcmp.lt.f32.partialorder %v2507_v36, 0.0004427343  ;;  %v2523_v27 = vadd.f32 1.0, %v2522_v40  ;;  %v16927_v45 = vld [vmem:[#allocation403_spill] sm:$0xff]  ;;  %v16930_v26 = vld [vmem:[#allocation296_spill] sm:$0xff] }
 0x487   : > { %v2911_v41 = vadd.f32 %v2455_v8, %v16912_v52  ;;  %v3743_v43 = vsel %vm16915_vm5, %v3287_v25, 0.0  ;;  %v2525_v22 = vand.u32 2147483647, %v16894_v5  ;;  %v3869_v13 = vadd.f32 %v3868_v29, %v16918_v62 }
 0x488   : > { %v2506_v24 = vmul.f32 %v16887_v4, %v2505_v32  ;;  %v2540_v10 = vmul.f32 -0.5, %v16902_v9  ;;  %5194 = vlog2.f32 %v2555_v56  ;;  %v2573_v55 = vadd.f32 1.0, %v16919_v44  ;;  %v16931_v56 = vld [vmem:[#allocation376_spill] sm:$0xff] }
 0x489   : > { %v2491_v16 = vsel %vm12582_vm1, %v2488_v61, %v2485_v2  ;;  %v2503_v18 = vmul.f32 0.6931472, %v5189_v14  ;;  %v16921_v7 = vmax.f32 %v16920_v59, 0.0  ;;  %v3870_v63 = vadd.f32 %v3869_v13, %v3743_v43  ;;  %v5191_v58 = vpop.eup %5190  ;;  %v16937_v43 = vld [vmem:[#allocation58_spill] sm:$0xff] }
 0x48a   : > { %v3039_v37 = vmul.f32 0.75, %v2911_v41  ;;  %v3165_v39 = vmul.f32 %v16922_v60, %v3037_v21  ;;  %v3291_v8 = vmul.f32 %v16913_v57, %v3163_v34  ;;  %vm16923_vm0 = vcmp.lt.s32.totalorder %v16427_v6, 1200  ;;  %v16935_v41 = vld [vmem:[#allocation486_spill] sm:$0xff]  ;;  %v16936_v57 = vld [vmem:[#allocation405_spill] sm:$0xff] }
 0x48b   : > { %v2913_v49 = vadd.f32 %v2473_v19, %v16921_v7  ;;  %v3745_v4 = vsel %vm16923_vm0, %v3289_v48, 0.0  ;;  %v2524_v46 = vmul.f32 %v16894_v5, %v2523_v27  ;;  %vm12617_vm13 = vcmp.lt.f32.partialorder %v2525_v22, 0.0004427343  ;;  %v16955_v2 = vld [vmem:[#allocation70_spill] sm:$0xff] }
 0x48c   : > { %v2543_v30 = vand.u32 2147483647, %v16902_v9  ;;  %v3871_v12 = vadd.f32 %v3870_v63, %v16926_v28  ;;  %v2541_v38 = vadd.f32 1.0, %v2540_v10  ;;  %v2558_v23 = vmul.f32 -0.5, %v16910_v0 }
 0x48d   : > { %5196 = vlog2.f32 %v2573_v55  ;;  %v2591_v31 = vadd.f32 1.0, %v16927_v45  ;;  %v2509_v6 = vsel %vm12599_vm12, %v2506_v24, %v2503_v18  ;;  %v2521_v25 = vmul.f32 0.6931472, %v5191_v58  ;;  %v16939_v24 = vld [vmem:[#allocation302_spill] sm:$0xff] }
 0x48e   : > { %v16929_v5 = vmax.f32 %v16928_v54, 0.0  ;;  %v3872_v36 = vadd.f32 %v3871_v12, %v3745_v4  ;;  %v5193_v40 = vpop.eup %5192  ;;  %v3041_v20 = vmul.f32 0.75, %v2913_v49  ;;  %v3167_v61 = vmul.f32 %v16930_v26, %v3039_v37  ;;  %v16944_v49 = vld [vmem:[#allocation488_spill] sm:$0xff]  ;;  %v16964_v18 = vld [vmem:[#allocation74_spill] sm:$0xff] }
 0x48f   : > { %v3293_v32 = vmul.f32 %v16922_v60, %v3165_v39  ;;  %vm16932_vm14 = vcmp.lt.s32.totalorder %v16931_v56, 1200  ;;  %vm12633_vm7 = vcmp.lt.f32.partialorder %v2543_v30, 0.0004427343  ;;  %v2561_v17 = vand.u32 2147483647, %v16910_v0  ;;  %v16945_v60 = vld [vmem:[#allocation407_spill] sm:$0xff] }
 0x490   : > { %v2915_v15 = vadd.f32 %v2491_v16, %v16929_v5  ;;  %v3747_v19 = vsel %vm16932_vm14, %v3291_v8, 0.0  ;;  %v2576_v52 = vmul.f32 -0.5, %v16919_v44  ;;  %v3873_v29 = vadd.f32 %v3872_v36, %v16935_v41  ;;  %v16940_v16 = vld [vmem:[#allocation215_spill] sm:$0xff]  ;;  %v16953_v36 = vld [vmem:[#allocation397_spill] sm:$0xff] }
 0x491   : > { %v2542_v14 = vmul.f32 %v16902_v9, %v2541_v38  ;;  %v2559_v21 = vadd.f32 1.0, %v2558_v23  ;;  %5198 = vlog2.f32 %v2591_v31  ;;  %v2609_v34 = vadd.f32 1.0, %v16936_v57  ;;  %v16948_v23 = vld [vmem:[#allocation308_spill] sm:$0xff] }
 0x492   : > { %v2527_v48 = vsel %vm12617_vm13, %v2524_v46, %v2521_v25  ;;  %v2539_v50 = vmul.f32 0.6931472, %v5193_v40  ;;  %v16938_v3 = vmax.f32 %v16937_v43, 0.0  ;;  %v3874_v22 = vadd.f32 %v3873_v29, %v3747_v19  ;;  %v5195_v62 = vpop.eup %5194  ;;  %v16946_v46 = vld [vmem:[#allocation64_spill] sm:$0xff] }
 0x493   : > { %v3043_v13 = vmul.f32 0.75, %v2915_v15  ;;  %v3169_v10 = vmul.f32 %v16939_v24, %v3041_v20  ;;  %v3295_v55 = vmul.f32 %v16930_v26, %v3167_v61  ;;  %vm16941_vm9 = vcmp.lt.s32.totalorder %v16940_v16, 1200  ;;  %v16954_v61 = vld [vmem:[#allocation409_spill] sm:$0xff] }
 0x494   : > { %v2917_v27 = vadd.f32 %v2509_v6, %v16938_v3  ;;  %v3749_v9 = vsel %vm16941_vm9, %v3293_v32, 0.0  ;;  %vm12650_vm10 = vcmp.lt.f32.partialorder %v2561_v17, 0.0004427343  ;;  %v2577_v59 = vadd.f32 1.0, %v2576_v52 }
 0x495   : > { %v2579_v7 = vand.u32 2147483647, %v16919_v44  ;;  %v3875_v63 = vadd.f32 %v3874_v22, %v16944_v49  ;;  %v2560_v58 = vmul.f32 %v16910_v0, %v2559_v21  ;;  %v2594_v37 = vmul.f32 -0.5, %v16927_v45  ;;  %v16949_v0 = vld [vmem:[#allocation451_spill] sm:$0xff]  ;;  %v16962_v22 = vld [vmem:[#allocation245_spill] sm:$0xff] }
 0x496   : > { %5200 = vlog2.f32 %v2609_v34  ;;  %v2627_v39 = vadd.f32 1.0, %v16945_v60  ;;  %v2545_v8 = vsel %vm12633_vm7, %v2542_v14, %v2539_v50  ;;  %v2557_v4 = vmul.f32 0.6931472, %v5195_v62  ;;  %v16957_v14 = vld [vmem:[#allocation314_spill] sm:$0xff] }
 0x497   : > { %v16947_v47 = vmax.f32 %v16946_v46, 0.0  ;;  %v3876_v28 = vadd.f32 %v3875_v63, %v3749_v9  ;;  %v5197_v12 = vpop.eup %5196  ;;  %v3045_v38 = vmul.f32 0.75, %v2917_v27  ;;  %v3171_v31 = vmul.f32 %v16948_v23, %v3043_v13 }
 0x498   : > { %v3297_v6 = vmul.f32 %v16939_v24, %v3169_v10  ;;  %vm16950_vm3 = vcmp.lt.s32.totalorder %v16949_v0, 1200  ;;  %v2578_v54 = vmul.f32 %v16919_v44, %v2577_v59  ;;  %vm12668_vm2 = vcmp.lt.f32.partialorder %v2579_v7, 0.0004427343  ;;  %v16963_v10 = vld [vmem:[#allocation412_spill] sm:$0xff] }
 0x499   : > { %v2919_v30 = vadd.f32 %v2527_v48, %v16947_v47  ;;  %v3751_v25 = vsel %vm16950_vm3, %v3295_v55, 0.0  ;;  %v2597_v15 = vand.u32 2147483647, %v16927_v45  ;;  %v3877_v40 = vadd.f32 %v3876_v28, %v16953_v36  ;;  %v16958_v48 = vld [vmem:[#allocation435_spill] sm:$0xff]  ;;  %v16971_v28 = vld [vmem:[#allocation490_spill] sm:$0xff] }
 0x49a   : > { %v2595_v20 = vadd.f32 1.0, %v2594_v37  ;;  %v2612_v26 = vmul.f32 -0.5, %v16936_v57  ;;  %5202 = vlog2.f32 %v2627_v39  ;;  %v2645_v32 = vadd.f32 1.0, %v16954_v61  ;;  %v16966_v37 = vld [vmem:[#allocation318_spill] sm:$0xff] }
 0x49b   : > { %v2563_v56 = vsel %vm12650_vm10, %v2560_v58, %v2557_v4  ;;  %v2575_v19 = vmul.f32 0.6931472, %v5197_v12  ;;  %v16956_v44 = vmax.f32 %v16955_v2, 0.0  ;;  %v3878_v52 = vadd.f32 %v3877_v40, %v3751_v25  ;;  %v5199_v41 = vpop.eup %5198  ;;  %v16967_v4 = vld [vmem:[#allocation121_spill] sm:$0xff] }
 0x49c   : > { %v3047_v29 = vmul.f32 0.75, %v2919_v30  ;;  %v3173_v21 = vmul.f32 %v16957_v14, %v3045_v38  ;;  %v3299_v34 = vmul.f32 %v16948_v23, %v3171_v31  ;;  %vm16959_vm1 = vcmp.lt.s32.totalorder %v16958_v48, 1200  ;;  %v16972_v31 = vld [vmem:[#allocation415_spill] sm:$0xff] }
 0x49d   : > { %v2921_v17 = vadd.f32 %v2545_v8, %v16956_v44  ;;  %v3753_v50 = vsel %vm16959_vm1, %v3297_v6, 0.0  ;;  %vm12684_vm5 = vcmp.lt.f32.partialorder %v2597_v15, 0.0004427343  ;;  %v2615_v3 = vand.u32 2147483647, %v16936_v57 }
 0x49e   : > { %v2630_v27 = vmul.f32 -0.5, %v16945_v60  ;;  %v3879_v62 = vadd.f32 %v3878_v52, %v16962_v22  ;;  %v2596_v13 = vmul.f32 %v16927_v45, %v2595_v20  ;;  %v2613_v24 = vadd.f32 1.0, %v2612_v26  ;;  %v16975_v26 = vld [vmem:[#allocation200_spill] sm:$0xff]  ;;  %v16980_v52 = vld [vmem:[#allocation489_spill] sm:$0xff] }
 0x49f   : > { %5204 = vlog2.f32 %v2645_v32  ;;  %v2663_v55 = vadd.f32 1.0, %v16963_v10  ;;  %v2581_v16 = vsel %vm12668_vm2, %v2578_v54, %v2575_v19  ;;  %v2593_v9 = vmul.f32 0.6931472, %v5199_v41  ;;  %v16973_v54 = vld [vmem:[#allocation78_spill] sm:$0xff] }
 0x4a0   : > { %v16965_v59 = vmax.f32 %v16964_v18, 0.0  ;;  %v3880_v49 = vadd.f32 %v3879_v62, %v3753_v50  ;;  %v5201_v63 = vpop.eup %5200  ;;  %v3049_v58 = vmul.f32 0.75, %v2921_v17  ;;  %v3175_v39 = vmul.f32 %v16966_v37, %v3047_v29  ;;  %v16981_v50 = vld [vmem:[#allocation83_spill] sm:$0xff]  ;;  %v16983_v62 = vld [vmem:[#allocation326_spill] sm:$0xff] }
 0x4a1   : > { %v3301_v8 = vmul.f32 %v16957_v14, %v3173_v21  ;;  %vm16968_vm12 = vcmp.lt.s32.totalorder %v16967_v4, 1200  ;;  %vm12701_vm0 = vcmp.lt.f32.partialorder %v2615_v3, 0.0004427343  ;;  %v2631_v47 = vadd.f32 1.0, %v2630_v27  ;;  %v16989_v4 = vld [vmem:[#allocation88_spill] sm:$0xff] }
 0x4a2   : > { %v2923_v7 = vadd.f32 %v2563_v56, %v16965_v59  ;;  %v3755_v45 = vsel %vm16968_vm12, %v3299_v34, 0.0  ;;  %v2633_v30 = vand.u32 2147483647, %v16945_v60  ;;  %v3881_v12 = vadd.f32 %v3880_v49, %v16971_v28 }
 0x4a3   : > { %v2614_v38 = vmul.f32 %v16936_v57, %v2613_v24  ;;  %v2648_v23 = vmul.f32 -0.5, %v16954_v61  ;;  %5206 = vlog2.f32 %v2663_v55  ;;  %v2681_v6 = vadd.f32 1.0, %v16972_v31  ;;  %v16976_v57 = vld [vmem:[#allocation369_spill] sm:$0xff]  ;;  %v16984_v55 = vld [vmem:[#allocation440_spill] sm:$0xff] }
 0x4a4   : > { %v2599_v0 = vsel %vm12684_vm5, %v2596_v13, %v2593_v9  ;;  %v2611_v25 = vmul.f32 0.6931472, %v5201_v63  ;;  %v16974_v5 = vmax.f32 %v16973_v54, 0.0  ;;  %v3882_v36 = vadd.f32 %v3881_v12, %v3755_v45  ;;  %v5203_v40 = vpop.eup %5202  ;;  %v16991_v12 = vld [vmem:[#allocation250_spill] sm:$0xff] }
 0x4a5   : > { %v3051_v20 = vmul.f32 0.75, %v2923_v7  ;;  %v3177_v32 = vmul.f32 %v16975_v26, %v3049_v58  ;;  %v3303_v56 = vmul.f32 %v16966_v37, %v3175_v39  ;;  %vm16977_vm13 = vcmp.lt.s32.totalorder %v16976_v57, 1200  ;;  %v16988_v7 = vld [vmem:[#allocation491_spill] sm:$0xff] }
 0x4a6   : > { %v2925_v15 = vadd.f32 %v2581_v16, %v16974_v5  ;;  %v3757_v19 = vsel %vm16977_vm13, %v3301_v8, 0.0  ;;  %v2632_v2 = vmul.f32 %v16945_v60, %v2631_v47  ;;  %vm12719_vm14 = vcmp.lt.f32.partialorder %v2633_v30, 0.0004427343  ;;  %v16996_v5 = vld [vmem:[#allocation247_spill] sm:$0xff] }
 0x4a7   : > { %v2651_v17 = vand.u32 2147483647, %v16954_v61  ;;  %v3883_v41 = vadd.f32 %v3882_v36, %v16980_v52  ;;  %v2649_v29 = vadd.f32 1.0, %v2648_v23  ;;  %v2666_v14 = vmul.f32 -0.5, %v16963_v10  ;;  %v16999_v52 = vld [vmem:[#allocation209_spill] sm:$0xff] }
 0x4a8   : > { %5208 = vlog2.f32 %v2681_v6  ;;  %v2699_v21 = vadd.f32 1.0, %v12202_v35  ;;  %v2617_v34 = vsel %vm12701_vm0, %v2614_v38, %v2611_v25  ;;  %v2629_v48 = vmul.f32 0.6931472, %v5203_v40  ;;  %v16992_v6 = vld [vmem:[#allocation223_spill] sm:$0xff] }
 0x4a9   : > { %v16982_v60 = vmax.f32 %v16981_v50, 0.0  ;;  %v3884_v3 = vadd.f32 %v3883_v41, %v3757_v19  ;;  %v5205_v27 = vpop.eup %5204  ;;  %v3053_v22 = vmul.f32 0.75, %v2925_v15  ;;  %v3179_v13 = vmul.f32 %v16983_v62, %v3051_v20  ;;  %v17004_v50 = vld [vmem:[#allocation400_spill] sm:$0xff] }
 0x4aa   : > { %v3305_v24 = vmul.f32 %v16975_v26, %v3177_v32  ;;  %vm16985_vm7 = vcmp.lt.s32.totalorder %v16984_v55, 1200  ;;  %vm12735_vm9 = vcmp.lt.f32.partialorder %v2651_v17, 0.0004427343  ;;  %v2669_v18 = vand.u32 2147483647, %v16963_v10 }
 0x4ab   : > { %v2927_v43 = vadd.f32 %v2599_v0, %v16982_v60  ;;  %v3759_v16 = vsel %vm16985_vm7, %v3303_v56, 0.0  ;;  %v2684_v59 = vmul.f32 -0.5, %v16972_v31  ;;  %v3885_v49 = vadd.f32 %v3884_v3, %v16988_v7  ;;  %v16997_v56 = vld [vmem:[#allocation90_spill] sm:$0xff] }
 0x4ac   : > { %v2650_v63 = vmul.f32 %v16954_v61, %v2649_v29  ;;  %v2667_v58 = vadd.f32 1.0, %v2666_v14  ;;  %5210 = vlog2.f32 %v2699_v21  ;;  %v2717_v37 = vadd.f32 1.0, %v12223_v1 }
 0x4ad   : > { %v2635_v39 = vsel %vm12719_vm14, %v2632_v2, %v2629_v48  ;;  %v2647_v8 = vmul.f32 0.6931472, %v5205_v27  ;;  %v16990_v45 = vmax.f32 %v16989_v4, 0.0  ;;  %v3886_v47 = vadd.f32 %v3885_v49, %v3759_v16  ;;  %v5207_v30 = vpop.eup %5206  ;;  %v17008_v49 = vld [vmem:[#allocation460_spill] sm:$0xff] }
 0x4ae   : > { %v3055_v28 = vmul.f32 0.75, %v2927_v43  ;;  %v3181_v38 = vmul.f32 %v16991_v12, %v3053_v22  ;;  %v3307_v23 = vmul.f32 %v16983_v62, %v3179_v13  ;;  %vm16993_vm10 = vcmp.lt.s32.totalorder %v16992_v6, 1200  ;;  %v17005_v13 = vld [vmem:[#allocation95_spill] sm:$0xff] }
 0x4af   : > { %v2929_v46 = vadd.f32 %v2617_v34, %v16990_v45  ;;  %v3761_v61 = vsel %vm16993_vm10, %v3305_v24, 0.0  ;;  %vm12752_vm3 = vcmp.lt.f32.partialorder %v2669_v18, 0.0004427343  ;;  %v2685_v25 = vadd.f32 1.0, %v2684_v59  ;;  %v17007_v18 = vld [vmem:[#allocation254_spill] sm:$0xff] }
 0x4b0   : > { %v2687_v54 = vand.u32 2147483647, %v16972_v31  ;;  %v3887_v15 = vadd.f32 %v3886_v47, %v16996_v5  ;;  %v2668_v36 = vmul.f32 %v16963_v10, %v2667_v58  ;;  %v2702_v40 = vmul.f32 -0.5, %v12202_v35  ;;  %v17000_v10 = vld [vmem:[#allocation337_spill] sm:$0xff] }
 0x4b1   : > { %5212 = vlog2.f32 %v2717_v37  ;;  %v2735_v20 = vadd.f32 1.0, %v12243_v51  ;;  %v2653_v26 = vsel %vm12735_vm9, %v2650_v63, %v2647_v8  ;;  %v2665_v32 = vmul.f32 0.6931472, %v5207_v30  ;;  %v17012_v8 = vld [vmem:[#allocation492_spill] sm:$0xff] }
 0x4b2   : > { %v16998_v57 = vmax.f32 %v16997_v56, 0.0  ;;  %v3888_v2 = vadd.f32 %v3887_v15, %v3761_v61  ;;  %v5209_v44 = vpop.eup %5208  ;;  %v3057_v17 = vmul.f32 0.75, %v2929_v46  ;;  %v3183_v41 = vmul.f32 %v16999_v52, %v3055_v28  ;;  %v17016_v15 = vld [vmem:[#allocation444_spill] sm:$0xff] }
 0x4b3   : > { %v3309_v29 = vmul.f32 %v16991_v12, %v3181_v38  ;;  %vm17001_vm2 = vcmp.lt.s32.totalorder %v17000_v10, 1200  ;;  %v2686_v21 = vmul.f32 %v16972_v31, %v2685_v25  ;;  %vm12770_vm1 = vcmp.lt.f32.partialorder %v2687_v54, 0.0004427343  ;;  %v17013_v12 = vld [vmem:[#allocation100_spill] sm:$0xff]  ;;  %v17015_v25 = vld [vmem:[#allocation214_spill] sm:$0xff] }
 0x4b4   : > { %v2931_v19 = vadd.f32 %v2635_v39, %v16998_v57  ;;  %v3763_v14 = vsel %vm17001_vm2, %v3307_v23, 0.0  ;;  %v2705_v48 = vand.u32 2147483647, %v12202_v35  ;;  %v3889_v60 = vadd.f32 %v3888_v2, %v17004_v50 }
 0x4b5   : > { %v2703_v43 = vadd.f32 1.0, %v2702_v40  ;;  %v2720_v3 = vmul.f32 -0.5, %v12223_v1  ;;  %5214 = vlog2.f32 %v2735_v20  ;;  %v2753_v27 = vadd.f32 1.0, %v12263_v53 }
 0x4b6   : > { %v2671_v22 = vsel %vm12752_vm3, %v2668_v36, %v2665_v32  ;;  %v2683_v62 = vmul.f32 0.6931472, %v5209_v44  ;;  %v17006_v31 = vmax.f32 %v17005_v13, 0.0  ;;  %v3890_v55 = vadd.f32 %v3889_v60, %v3763_v14  ;;  %v5211_v16 = vpop.eup %5210 }
 0x4b7   : > { %v3059_v9 = vmul.f32 0.75, %v2931_v19  ;;  %v3185_v59 = vmul.f32 %v17007_v18, %v3057_v17  ;;  %v3311_v7 = vmul.f32 %v16999_v52, %v3183_v41  ;;  %vm17009_vm5 = vcmp.lt.s32.totalorder %v17008_v49, 1200  ;;  %v17021_v17 = vld [vmem:[#allocation102_spill] sm:$0xff] }
 0x4b8   : > { %v2933_v24 = vadd.f32 %v2653_v26, %v17006_v31  ;;  %v3765_v63 = vsel %vm17009_vm5, %v3309_v29, 0.0  ;;  %vm12786_vm12 = vcmp.lt.f32.partialorder %v2705_v48, 0.0004427343  ;;  %v2723_v37 = vand.u32 2147483647, %v12223_v1  ;;  %v17020_v26 = vld [vmem:[#allocation402_spill] sm:$0xff] }
 0x4b9   : > { %v2738_v39 = vmul.f32 -0.5, %v12243_v51  ;;  %v3891_v4 = vadd.f32 %v3890_v55, %v17012_v8  ;;  %v2704_v45 = vmul.f32 %v12202_v35, %v2703_v43  ;;  %v2721_v46 = vadd.f32 1.0, %v2720_v3  ;;  %v17030_v49 = vld [vmem:[#allocation146_spill] sm:$0xff] }
 0x4ba   : > { %5216 = vlog2.f32 %v2753_v27  ;;  %v2771_v47 = vadd.f32 1.0, %v12279_v11  ;;  %v2689_v30 = vsel %vm12770_vm1, %v2686_v21, %v2683_v62  ;;  %v2701_v28 = vmul.f32 0.6931472, %v5211_v16  ;;  %v17023_v21 = vld [vmem:[#allocation219_spill] sm:$0xff]  ;;  %v17027_v27 = vld [vmem:[#allocation50_spill] sm:$0xff]  ;;  %v17028_v16 = vld [vmem:[#allocation105_spill] sm:$0xff] }
 0x4bb   : > { %v17014_v38 = vmax.f32 %v17013_v12, 0.0  ;;  %v3892_v6 = vadd.f32 %v3891_v4, %v3765_v63  ;;  %v5213_v61 = vpop.eup %5212  ;;  %v3061_v0 = vmul.f32 0.75, %v2933_v24  ;;  %v3187_v54 = vmul.f32 %v17015_v25, %v3059_v9  ;;  %v17032_v8 = vld [vmem:[#allocation154_spill] sm:$0xff] }
 0x4bc   : > { %v3313_v5 = vmul.f32 %v17007_v18, %v3185_v59  ;;  %vm17017_vm0 = vcmp.lt.s32.totalorder %v17016_v15, 1200  ;;  %vm12803_vm13 = vcmp.lt.f32.partialorder %v2723_v37, 0.0004427343  ;;  %v2739_v40 = vadd.f32 1.0, %v2738_v39  ;;  %v17038_v15 = vld [vmem:[#allocation158_spill] sm:$0xff] }
 0x4bd   : > { %v2935_v23 = vadd.f32 %v2671_v22, %v17014_v38  ;;  %v3767_v35 = vsel %vm17017_vm0, %v3311_v7, 0.0  ;;  %v2741_v20 = vand.u32 2147483647, %v12243_v51  ;;  %v3893_v32 = vadd.f32 %v3892_v6, %v17020_v26  ;;  %v17036_v6 = vld [vmem:[#allocation108_spill] sm:$0xff]  ;;  %v5362_v26 = vld [vmem:[%s5585_s30 + $0x3c0] sm:$0xff] }
 0x4be   : > { %v2722_v56 = vmul.f32 %v12223_v1, %v2721_v46  ;;  %v2756_v57 = vmul.f32 -0.5, %v12263_v53  ;;  %5218 = vlog2.f32 %v2771_v47  ;;  %v2789_v19 = vadd.f32 1.0, %v12298_v33  ;;  %v17035_v46 = vld [vmem:[#allocation493_spill] sm:$0xff] }
 0x4bf   : > { %v2707_v2 = vsel %vm12786_vm12, %v2704_v45, %v2701_v28  ;;  %v2719_v44 = vmul.f32 0.6931472, %v5213_v61  ;;  %v17022_v52 = vmax.f32 %v17021_v17, 0.0  ;;  %v3894_v29 = vadd.f32 %v3893_v32, %v3767_v35  ;;  %v5215_v10 = vpop.eup %5214 }
 0x4c0   : > { %v3063_v14 = vmul.f32 0.75, %v2935_v23  ;;  %v3189_v34 = vmul.f32 %v17023_v21, %v3061_v0  ;;  %v3315_v48 = vmul.f32 %v17015_v25, %v3187_v54  ;;  %v3769_v50 = vsel %vm3653_vm15, %v3313_v5, 0.0 }
 0x4c1   : > { %v2937_v41 = vadd.f32 %v2689_v30, %v17022_v52  ;;  %v2740_v60 = vmul.f32 %v12243_v51, %v2739_v40  ;;  %vm12821_vm14 = vcmp.lt.f32.partialorder %v2741_v20, 0.0004427343  ;;  %v2759_v3 = vand.u32 2147483647, %v12263_v53  ;;  %v17040_v20 = vld [vmem:[#allocation162_spill] sm:$0xff] }
 0x4c2   : > { %v3895_v22 = vadd.f32 %v3894_v29, %v17027_v27  ;;  %v2757_v62 = vadd.f32 1.0, %v2756_v57  ;;  %v2774_v13 = vmul.f32 -0.5, %v12279_v11  ;;  %5220 = vlog2.f32 %v2789_v19  ;;  %v17043_v57 = vld [vmem:[#allocation494_spill] sm:$0xff]  ;;  %v17049_v27 = vld [vmem:[#allocation173_spill] sm:$0xff] }
 0x4c3   : > { %v2807_v31 = vadd.f32 1.0, %v12317_v42  ;;  %v2725_v24 = vsel %vm12803_vm13, %v2722_v56, %v2719_v44  ;;  %v2737_v55 = vmul.f32 0.6931472, %v5215_v10  ;;  %v17029_v51 = vmax.f32 %v17028_v16, 0.0  ;;  %v17044_v10 = vld [vmem:[#allocation110_spill] sm:$0xff] }
 0x4c4   : > { %v3896_v18 = vadd.f32 %v3895_v22, %v3769_v50  ;;  %v5217_v59 = vpop.eup %5216  ;;  %v3065_v7 = vmul.f32 0.75, %v2937_v41  ;;  %v3191_v63 = vmul.f32 %v17030_v49, %v3063_v14  ;;  %v3317_v58 = vmul.f32 %v17023_v21, %v3189_v34  ;;  %v17046_v50 = vld [vmem:[#allocation179_spill] sm:$0xff] }
 0x4c5   : > { %v2939_v9 = vadd.f32 %v2707_v2, %v17029_v51  ;;  %v3771_v39 = vsel %vm3654_vm8, %v3315_v48, 0.0  ;;  %5222 = vrcp.f32 %v17032_v8  ;;  %vm12838_vm15 = vcmp.lt.f32.partialorder %v2759_v3, 0.0004427343  ;;  %v17054_v8 = vld [vmem:[#allocation329_spill] sm:$0xff] }
 0x4c6   : > { %v2777_v45 = vand.u32 2147483647, %v12279_v11  ;;  %v3897_v47 = vadd.f32 %v3896_v18, %v17035_v46  ;;  %v2758_v30 = vmul.f32 %v12263_v53, %v2757_v62  ;;  %v2775_v28 = vadd.f32 1.0, %v2774_v13  ;;  %v17050_v62 = vld [vmem:[#allocation169_spill] sm:$0xff]  ;;  %v5363_v13 = vld [vmem:[%s5585_s30 + $0x3d0] sm:$0xff] }
 0x4c7   : > { %v2792_v12 = vmul.f32 -0.5, %v12298_v33  ;;  %5224 = vlog2.f32 %v2807_v31  ;;  %v2743_v38 = vsel %vm12821_vm14, %v2740_v60, %v2737_v55  ;;  %v2755_v23 = vmul.f32 0.6931472, %v5217_v59 }
 0x4c8   : > { %v17037_v61 = vmax.f32 %v17036_v6, 0.0  ;;  %v3898_v25 = vadd.f32 %v3897_v47, %v3771_v39  ;;  %v5219_v54 = vpop.eup %5218  ;;  %v3067_v5 = vmul.f32 0.75, %v2939_v9  ;;  %v3193_v35 = vmul.f32 %v17038_v15, %v3065_v7  ;;  %v17057_v47 = vld [vmem:[#allocation177_spill] sm:$0xff] }
 0x4c9   : > { %v3319_v36 = vmul.f32 %v17030_v49, %v3191_v63  ;;  %v3773_v53 = vsel %vm3655_vm4, %v3317_v58, 0.0  ;;  %5226 = vrcp.f32 %v17040_v20  ;;  %v1153_v32 = vmax.f32 %v5362_v26, 0.0  ;;  %v17062_v26 = vld [vmem:[#allocation496_spill] sm:$0xff] }
 0x4ca   : > { %v2941_v0 = vadd.f32 %v2725_v24, %v17037_v61  ;;  %vm12856_vm8 = vcmp.lt.f32.partialorder %v2777_v45, 0.0004427343  ;;  %v3899_v19 = vadd.f32 %v3898_v25, %v17043_v57  ;;  %v2776_v2 = vmul.f32 %v12279_v11, %v2775_v28  ;;  %v17047_v11 = vld [vmem:[#allocation382_spill] sm:$0xff]  ;;  %v17051_v24 = vld [vmem:[#allocation495_spill] sm:$0xff] }
 0x4cb   : > { %v2793_v44 = vadd.f32 1.0, %v2792_v12  ;;  %v2795_v17 = vand.u32 2147483647, %v12298_v33  ;;  %v2810_v52 = vmul.f32 -0.5, %v12317_v42  ;;  %v2761_v41 = vsel %vm12838_vm15, %v2758_v30, %v2755_v23  ;;  %v17055_v45 = vld [vmem:[#allocation227_spill] sm:$0xff] }
 0x4cc   : > { %v2773_v29 = vmul.f32 0.6931472, %v5219_v54  ;;  %v17045_v14 = vmax.f32 %v17044_v10, 0.0  ;;  %v3900_v34 = vadd.f32 %v3899_v19, %v3773_v53  ;;  %v5221_v48 = vpop.eup %5220  ;;  %v3069_v1 = vmul.f32 0.75, %v2941_v0  ;;  %v17058_v28 = vld [vmem:[#allocation55_spill] sm:$0xff] }
 0x4cd   : > { %v3195_v60 = vmul.f32 %v17046_v50, %v3067_v5  ;;  %v3321_v43 = vmul.f32 %v17038_v15, %v3193_v35  ;;  %vm17048_vm4 = vcmp.lt.s32.totalorder %v17047_v11, 1200  ;;  %v773_v22 = vadd.f32 1.0, %v17049_v27  ;;  %v17065_v11 = vld [vmem:[#allocation256_spill] sm:$0xff]  ;;  %v17067_v27 = vld [vmem:[#allocation497_spill] sm:$0xff]  ;;  %v17080_v61 = vld [vmem:[#allocation67_spill] sm:$0xff] }
 0x4ce   : > { %v2943_v21 = vadd.f32 %v2743_v38, %v17045_v14  ;;  %v3775_v3 = vsel %vm17048_vm4, %v3319_v36, 0.0  ;;  %5228 = vrcp.f32 %v17050_v62  ;;  %v1155_v31 = vmax.f32 %v5363_v13, 0.0  ;;  %v5364_v38 = vld [vmem:[%s5585_s30 + $0x3e0] sm:$0xff]  ;;  %v17064_v14 = vld [vmem:[#allocation277_spill] sm:$0xff] }
 0x4cf   : > { %v3901_v55 = vadd.f32 %v3900_v34, %v17051_v24  ;;  %v2794_v16 = vmul.f32 %v12298_v33, %v2793_v44  ;;  %vm12877_vm7 = vcmp.lt.f32.partialorder %v2795_v17, 0.0004427343  ;;  %v2811_v9 = vadd.f32 1.0, %v2810_v52  ;;  %v5223_v59 = vpop.eup %5222 }
 0x4d0   : > { %v2813_v18 = vand.u32 2147483647, %v12317_v42  ;;  %v2779_v7 = vsel %vm12856_vm8, %v2776_v2, %v2773_v29  ;;  %v2791_v49 = vmul.f32 0.6931472, %v5221_v48  ;;  %v2945_v63 = vadd.f32 %v2761_v41, %v1153_v32  ;;  %v5365_v32 = vld [vmem:[%s5585_s30 + $0x3f0] sm:$0xff] }
 0x4d1   : > { %v3902_v58 = vadd.f32 %v3901_v55, %v3775_v3  ;;  %v5225_v37 = vpop.eup %5224  ;;  %v3071_v39 = vmul.f32 0.75, %v2943_v21  ;;  %v3197_v4 = vmul.f32 %v17054_v8, %v3069_v1  ;;  %v3323_v33 = vmul.f32 %v17046_v50, %v3195_v60  ;;  %v17068_v55 = vld [vmem:[#allocation229_spill] sm:$0xff] }
 0x4d2   : > { %vm17056_vm9 = vcmp.lt.s32.totalorder %v17055_v45, 1200  ;;  %v775_v30 = vadd.f32 1.0, %v17057_v47  ;;  %5230 = vrcp.f32 %v773_v22  ;;  %v1157_v23 = vmax.f32 %v5364_v38, 0.0  ;;  %v17079_v38 = vld [vmem:[#allocation406_spill] sm:$0xff] }
 0x4d3   : > { %v3777_v46 = vsel %vm17056_vm9, %v3321_v43, 0.0  ;;  %v3903_v12 = vadd.f32 %v3902_v58, %v17058_v28  ;;  %v2812_v6 = vmul.f32 %v12317_v42, %v2811_v9  ;;  %vm12892_vm10 = vcmp.lt.f32.partialorder %v2813_v18, 0.0004427343  ;;  %v5227_v0 = vpop.eup %5226  ;;  %v17070_v9 = vld [vmem:[#allocation61_spill] sm:$0xff] }
 0x4d4   : > { %v2797_v25 = vsel %vm12877_vm7, %v2794_v16, %v2791_v49  ;;  %v2809_v54 = vmul.f32 0.6931472, %v5225_v37  ;;  %v2947_v5 = vadd.f32 %v2779_v7, %v1155_v31  ;;  %v3073_v35 = vmul.f32 0.75, %v2945_v63  ;;  %v17071_v63 = vld [vmem:[#allocation475_spill] sm:$0xff]  ;;  %v17073_v37 = vld [vmem:[#allocation498_spill] sm:$0xff]  ;;  %v17077_v28 = vld [vmem:[#allocation453_spill] sm:$0xff] }
 0x4d5   : > { %v3904_v15 = vadd.f32 %v3903_v12, %v3777_v46  ;;  %v3199_v36 = vmul.f32 %v5223_v59, %v3071_v39  ;;  %v3325_v40 = vmul.f32 %v17054_v8, %v3197_v4  ;;  %v3779_v20 = vsel %vm3658_vm6, %v3323_v33, 0.0  ;;  %v17074_v33 = vld [vmem:[#allocation474_spill] sm:$0xff]  ;;  %v17076_v46 = vld [vmem:[#allocation499_spill] sm:$0xff] }
 0x4d6   : > { %v1159_v56 = vmax.f32 %v5365_v32, 0.0  ;;  %5232 = vrcp.f32 %v775_v30  ;;  %v2815_v19 = vsel %vm12892_vm10, %v2812_v6, %v2809_v54  ;;  %v2949_v2 = vadd.f32 %v2797_v25, %v1157_v23 }
 0x4d7   : > { %v3905_v42 = vadd.f32 %v3904_v15, %v17062_v26  ;;  %v3075_v17 = vmul.f32 0.75, %v2947_v5  ;;  %v3201_v52 = vmul.f32 %v5227_v0, %v3073_v35  ;;  %v3327_v41 = vmul.f32 %v5223_v59, %v3199_v36 }
 0x4d8   : > { %v5229_v57 = vpop.eup %5228  ;;  %v3781_v10 = vsel %vm3659_vm11, %v3325_v40, 0.0  ;;  %v2951_v34 = vadd.f32 %v2815_v19, %v1159_v56  ;;  %v3077_v50 = vmul.f32 0.75, %v2949_v2  ;;  %vm17066_vm6 = vcmp.lt.s32.totalorder %v17065_v11, 1200 }
 0x4d9   : > { %v3906_v44 = vadd.f32 %v3905_v42, %v3779_v20  ;;  %v3203_v60 = vmul.f32 %v5229_v57, %v3075_v17  ;;  %v3329_v43 = vmul.f32 %v5227_v0, %v3201_v52  ;;  %v3783_v3 = vsel %vm17066_vm6, %v3327_v41, 0.0 }
 0x4da   : > { %v3079_v13 = vmul.f32 0.75, %v2951_v34  ;;  %vm17069_vm3 = vcmp.lt.s32.totalorder %v17068_v55, 1200  ;;  %vm17072_vm11 = vcmp.lt.s32.totalorder %v17071_v63, 1200  ;;  %vm17075_vm2 = vcmp.lt.s32.totalorder %v17074_v33, 1200 }
 0x4db   : > { %v3907_v21 = vadd.f32 %v3906_v44, %v17064_v14  ;;  %v3331_v24 = vmul.f32 %v5229_v57, %v3203_v60  ;;  %v3785_v16 = vsel %vm17069_vm3, %v3329_v43, 0.0  ;;  %vm17078_vm1 = vcmp.lt.s32.totalorder %v17077_v28, 1200 }
 0x4dc   : > { %v5231_v1 = vpop.eup %5230 }
 0x4dd   : > { %v3908_v48 = vadd.f32 %v3907_v21, %v3781_v10  ;;  %v3205_v31 = vmul.f32 %v5231_v1, %v3077_v50  ;;  %v3787_v58 = vsel %vm17072_vm11, %v3331_v24, 0.0 }
 0x4df   : > { %v3909_v22 = vadd.f32 %v3908_v48, %v17067_v27  ;;  %v3333_v49 = vmul.f32 %v5231_v1, %v3205_v31 }
 0x4e0   : > { %v5233_v51 = vpop.eup %5232 }
 0x4e1   : > { %v3910_v62 = vadd.f32 %v3909_v22, %v3783_v3  ;;  %v3207_v7 = vmul.f32 %v5233_v51, %v3079_v13  ;;  %v3789_v45 = vsel %vm17075_vm2, %v3333_v49, 0.0 }
 0x4e3   : > { %v3911_v18 = vadd.f32 %v3910_v62, %v17070_v9  ;;  %v3335_v4 = vmul.f32 %v5233_v51, %v3207_v7 }
 0x4e5   : > { %v3912_v59 = vadd.f32 %v3911_v18, %v3785_v16  ;;  %v3791_v12 = vsel %vm17078_vm1, %v3335_v4, 0.0 }
 0x4e7   : > { %v3913_v39 = vadd.f32 %v3912_v59, %v17073_v37 }
 0x4e9   : > { %v3914_v8 = vadd.f32 %v3913_v39, %v3787_v58 }
 0x4eb   : > { %v3915_v47 = vadd.f32 %v3914_v8, %v17076_v46 }
 0x4ed   : > { %v3916_v30 = vadd.f32 %v3915_v47, %v3789_v45 }
 0x4ef   : > { %v3917_v23 = vadd.f32 %v3916_v30, %v17079_v38 }
 0x4f1   : > { %v3918_v6 = vadd.f32 %v3917_v23, %v3791_v12 }
 0x4f3   : > { %v3919_v0 = vadd.f32 %v3918_v6, %v17080_v61 }
 0x4f5   : > { %3920 = vadd.xlane.f32.xlu0 %v3919_v0 }
 0x582   : > { %v3921_v25 = vpop.xlane.xlu0 %3920 }
 0x583   : > { %v3922_v54 = vrot.slane %v3921_v25, 4 }
 0x585   : > { %v3923_v5 = vadd.f32 %v3922_v54, %v3921_v25 }
 0x587   : > { %v3924_v15 = vrot.slane %v3923_v5, 2 }
 0x589   : > { %v3925_v35 = vadd.f32 %v3924_v15, %v3923_v5 }
 0x58b   : > { %v3926_v36 = vrot.slane %v3925_v35, 1 }
 0x58d   : > { %v3927_v40 = vadd.f32 %v3926_v36, %v3925_v35 }
 0x58f   : > { %4160 = vpush %v3927_v40 }
 0x5c0   : > { %s4161_s5 = spop %4160 }
 0x5c1   : > { %v3929_v53 = vstv %s4161_s5 }
 0x5c2   : > { %3930 = vst [vmem:[%s135_s28] sm:$0xff] %v3929_v53 }
 0x5c3   : > { %5409 = shalt.err (!%p5406_p1)
}
 0x5c4   : > { %s5410_s20 = scalar_lea.hbm %s12929_s4, 128  ;;  %s5414_s23 = scalar_lea.hbm %s12973_s1, 384 }
 0x5c5   : > { %p5411_p3 = scmp.ne.s32.totalorder %s12929_s4, %s5410_s20  ;;  %p5415_p0 = scmp.lt.u32.totalorder %s12929_s4, %s12973_s1 }
 0x5c6   : > { %p5416_p2 = scmp.lt.u32.totalorder %s5414_s23, %s5410_s20  ;;  %p5418_p6 = scmp.lt.u32.totalorder %s5410_s20, %s12929_s4 }
 0x5c7   : > { %p5412_p4 = pnand %p5411_p3, %p17081_p10 }
 0x5c8   : > { %p5417_p7 = por %p5416_p2, %p5415_p0 }
 0x5c9   : > { %p5413_p5 = pneg %p5412_p4 }
 0x5ca   : > { %p5419_p11 = por %p5418_p6, %p5417_p7 }
 0x5cc   : > { %p5420_p12 = pnand %p5419_p11, %p5413_p5 }
 0x5ce   : > { %5423 = shalt.err (!%p5420_p12)
}
 0x5cf   : > { %4164 = dma.vmem_to_hbm [thread:$0]  (%p17081_p10), %s12931_s29, 128, %s12929_s4, %s3932_s11  }
 0x5d0 PF: > { %p4175_p8 = scmp.ge.s32.totalorder %s5462_s9, 2  ;;  %s3957_s30 = sand.u32 1, %s5450_s6  }
 0x5d1   : > { %p17082_p9 = scmp.ne.s32.totalorder %s13919_s19, 0  ;;  %s3958_s17 = scalar_lea.sflag [#allocation4], %s3957_s30 }
 0x5d3   : > { %p4171_p13 = pnand %p4175_p8, %p17082_p9 }
 0x5d5   : > { %5445 = dma.done.wait (!%p4171_p13), %s3958_s17, 128  }
 0x5d6   : > { %5447 = vsyncadd (!%p4171_p13), %s3958_s17, 4294967168  ;;  %p14_p1 = scmp.ge.s32.totalorder %s5503_s12, 5   ;;  %s17083_s6 = smov %s5454_s7 }
 0x5d7   : > { %s17084_s7 = smov %s5458_s8  ;;  %s17085_s8 = smov %s5515_s15 }
 0x5d8   : > { %s17086_s9 = smov %s5503_s12  ;;  %16 = sbr.rel (!%p14_p1) target bundleno = 5 (0x5), region = 69 }
 0x5df   :  { %3963 = vsyncpa [#allocation3], 1 }
 0x5e0   :  { %3965 = vsyncpa [#allocation3 + $0x1], 1 }
 0x5e1   :  { %3966 = vsyncpa [#allocation4], 1 }
 0x5e2   :  { %3968 = vsyncpa [#allocation4 + $0x1], 1 }

</bundles_post_ra>
